<compile_context>
chip_gen: v5e
topology: v5e:2x2
jax: 0.10.0
libtpu: 0.0.40
codegen_flags: <defaults>
</compile_context>

<pallas_src>
import jax
import jax.numpy as jnp
from jax.experimental import pallas as pl
from jax.experimental.pallas import tpu as pltpu

_EPS = 1e-5
C1P = 128   # conv1 out channels, padded (real 20) - lane dim for pooling/taps
C2P = 64    # conv2 out channels, padded (real 50) - y2 lane dim
FP = 512    # fc1 features, padded (real 500)
OP = 128    # logits, padded (real 10)
_NEG = -1e9  # baked class mask for padded logit lanes


# ----------------------------------------------------------------------------
# Kernel 1: conv1 + ReLU + maxpool(2,2) + conv2 (+bias) + BN2 partial stats,
#           one batch block per grid step.
# ----------------------------------------------------------------------------
def _conv_kernel(pat_ref, w1_ref, b1_ref, w2_ref, b2_ref,
                 y2_ref, st_ref, c1_s, p1_s, q_s):
    bb = pat_ref.shape[0]

    # conv1 for the whole batch block as ONE MXU matmul (M = bb*576).
    y1 = jnp.dot(pat_ref[...].reshape(bb * 576, 32), w1_ref[...],
                 preferred_element_type=jnp.float32)
    y1 = jnp.maximum(y1 + b1_ref[...], 0.0)
    c1_s[...] = y1.reshape(bb, 24, 24, C1P)

    # 2x2 max-pool: wo (sublane dim) via strided reads, ho via split + max.
    m = jnp.maximum(c1_s[:, :, pl.ds(0, 12, 2), :],
                    c1_s[:, :, pl.ds(1, 12, 2), :])            # (bb,24,12,C1P)
    mr = m.reshape(bb, 12, 2, 12, C1P)
    p1_s[...] = jnp.maximum(mr[:, :, 0], mr[:, :, 1])          # (bb,12,12,C1P)

    # Hoist the 5 kj sublane shifts out of the 25-tap loop so that every tap
    # read below is an aligned 8-row window (was 25 unaligned slices).
    for kj in range(5):
        q_s[kj] = p1_s[:, :, kj:kj + 8, :]

    # conv2 (20->50, 5x5) as 25 shifted-tap matmuls (M = bb*64), f32 acc
    # seeded with the broadcast bias.
    acc = jnp.broadcast_to(b2_ref[...], (bb * 64, C2P))
    for ki in range(5):
        for kj in range(5):
            patch = q_s[kj, :, ki:ki + 8, :, :].reshape(bb * 64, C1P)
            acc = acc + jnp.dot(patch.astype(jnp.bfloat16),
                                w2_ref[ki * 5 + kj],
                                preferred_element_type=jnp.float32)

    y2_ref[...] = acc.reshape(bb, 64, C2P).astype(jnp.bfloat16)

    # Per-block partial sums / sums-of-squares for the global BN2 statistics.
    s1 = jnp.sum(acc, axis=0, keepdims=True)
    s2 = jnp.sum(acc * acc, axis=0, keepdims=True)
    st_ref[...] = jnp.concatenate([s1, s2], axis=0).reshape(1, 2, C2P)


# ----------------------------------------------------------------------------
# Kernel 2: BN2-apply -> maxpool(2) -> ReLU -> fc1 (+bias) + BN1 partial
#           stats, one batch block per grid step.
# ----------------------------------------------------------------------------
def _mid_kernel(y2_ref, sc2_ref, sh2_ref, wf1_ref, bf1_ref,
                h_ref, st_ref, pm_s):
    hb = y2_ref.shape[0]

    # Upcast and apply BN2 exactly once to the whole tile.
    ybn = (y2_ref[...].astype(jnp.float32).reshape(hb, 8, 8, C2P)
           * sc2_ref[...] + sh2_ref[...])

    # 2x2 max-pool (ho via split + max, wo via strided reads), then ReLU.
    yr = ybn.reshape(hb, 4, 2, 8, C2P)
    pm_s[...] = jnp.maximum(yr[:, :, 0], yr[:, :, 1])           # (hb,4,8,C2P)
    pooled = jnp.maximum(
        jnp.maximum(pm_s[:, :, pl.ds(0, 4, 2), :],
                    pm_s[:, :, pl.ds(1, 4, 2), :]), 0.0)        # (hb,4,4,C2P)

    # fc1 as 16 per-position matmuls (weights pre-permuted: no NHWC->NCHW
    # transpose needed); accumulator seeded with the bias.
    hacc = jnp.broadcast_to(bf1_ref[...], (hb, FP))
    for hh in range(4):
        for ww in range(4):
            q = pooled[:, hh, ww, :].astype(jnp.bfloat16)        # (hb, C2P)
            hacc = hacc + jnp.dot(q, wf1_ref[hh * 4 + ww],
                                  preferred_element_type=jnp.float32)
    h_ref[...] = hacc

    # Per-block partial sums / sums-of-squares for the global BN1 statistics.
    s1 = jnp.sum(hacc, axis=0, keepdims=True)
    s2 = jnp.sum(hacc * hacc, axis=0, keepdims=True)
    st_ref[...] = jnp.concatenate([s1, s2], axis=0).reshape(1, 2, FP)


# ----------------------------------------------------------------------------
# Kernel 3: BN1-apply -> ReLU -> fc2 -> log_softmax (class mask baked into
#           the fc2 bias), one batch block per grid step.
# ----------------------------------------------------------------------------
def _out_kernel(h_ref, sc1_ref, sh1_ref, wf2_ref, bf2_ref, o_ref):
    h = jnp.maximum(h_ref[...] * sc1_ref[...] + sh1_ref[...], 0.0)
    logits = jnp.dot(h.astype(jnp.bfloat16), wf2_ref[...],
                     preferred_element_type=jnp.float32) + bf2_ref[...]
    mx = jnp.max(logits, axis=1, keepdims=True)
    sh = logits - mx
    lse = jnp.log(jnp.sum(jnp.exp(sh), axis=1, keepdims=True))
    o_ref[...] = sh - lse


# ----------------------------------------------------------------------------
# One-time weight preparation: transpose / pad / cast to bf16.
# ----------------------------------------------------------------------------
def prepare_params(params):
    f32, bf16 = jnp.float32, jnp.bfloat16
    # conv1 (20,1,5,5) -> (taps=32, 128); tap order t = ki*5+kj
    w1 = params["conv1_w"].reshape(20, 25).T
    w1 = jnp.pad(w1, ((0, 7), (0, C1P - 20)))
    b1 = jnp.pad(params["conv1_b"], (0, C1P - 20)).reshape(1, C1P)
    # conv2 (50,20,5,5) -> (25, 128, 64)
    w2 = jnp.transpose(params["conv2_w"], (2, 3, 1, 0)).reshape(25, 20, 50)
    w2 = jnp.pad(w2, ((0, 0), (0, C1P - 20), (0, C2P - 50)))
    b2 = jnp.pad(params["conv2_b"], (0, C2P - 50)).reshape(1, C2P)
    g2 = jnp.pad(params["bn2_g"], (0, C2P - 50))
    bb2 = jnp.pad(params["bn2_b"], (0, C2P - 50))
    # fc1 (500, 800=c*16+h*4+w) -> (16=h*4+w, 64, 512)
    wf1 = params["fc1_w"].reshape(500, 50, 4, 4)
    wf1 = jnp.transpose(wf1, (2, 3, 1, 0)).reshape(16, 50, 500)
    wf1 = jnp.pad(wf1, ((0, 0), (0, C2P - 50), (0, FP - 500)))
    bf1 = jnp.pad(params["fc1_b"], (0, FP - 500)).reshape(1, FP)
    g1 = jnp.pad(params["bn1_g"], (0, FP - 500))
    bb1 = jnp.pad(params["bn1_b"], (0, FP - 500))
    # fc2 (10,500) -> (512, 128); padded bias lanes act as the class mask.
    wf2 = jnp.pad(params["fc2_w"].T, ((0, FP - 500), (0, OP - 10)))
    bf2 = jnp.concatenate(
        [params["fc2_b"], jnp.full((OP - 10,), _NEG, f32)]).reshape(1, OP)
    return {
        "w1": w1.astype(bf16), "b1": b1.astype(f32),
        "w2": w2.astype(bf16), "b2": b2.astype(f32),
        "g2": g2.astype(f32), "bb2": bb2.astype(f32),
        "wf1": wf1.astype(bf16), "bf1": bf1.astype(f32),
        "g1": g1.astype(f32), "bb1": bb1.astype(f32),
        "wf2": wf2.astype(bf16), "bf2": bf2.astype(f32),
    }


def _block_batch(n):
    # Multiple of 8 keeps the (8,128) tiling rule happy for the (n, F)-shaped
    # intermediates; otherwise fall back to the whole batch in one block.
    return 8 if n % 8 == 0 else n


# ----------------------------------------------------------------------------
# Forward pass (matches cnn_batch.forward, train-mode BN).
# ----------------------------------------------------------------------------
@jax.jit
def cnn_batch_forward(x, prep):
    n = x.shape[0]
    bb = _block_batch(n)
    nb = n // bb

    # conv1 im2col on the tiny 28x28 single-channel input (XLA layout glue).
    x2 = x[:, 0].astype(jnp.float32)                          # (n, 28, 28)
    cols = [x2[:, ki:ki + 24, kj:kj + 24]
            for ki in range(5) for kj in range(5)]
    patches = jnp.stack(cols, axis=-1).reshape(n, 576, 25)
    patches = jnp.pad(patches, ((0, 0), (0, 0), (0, 7))).astype(jnp.bfloat16)

    cparams = pltpu.CompilerParams(
        dimension_semantics=("parallel",),
        vmem_limit_bytes=32 * 1024 * 1024)

    conv_cost = pl.CostEstimate(
        flops=n * (2 * 576 * 32 * C1P + 25 * 2 * 64 * C1P * C2P),
        transcendentals=0,
        bytes_accessed=n * (576 * 32 * 2 + 64 * C2P * 2)
        + (32 * C1P + 25 * C1P * C2P) * 2)

    y2, st2 = pl.pallas_call(
        _conv_kernel,
        out_shape=(jax.ShapeDtypeStruct((n, 64, C2P), jnp.bfloat16),
                   jax.ShapeDtypeStruct((nb, 2, C2P), jnp.float32)),
        grid=(nb,),
        in_specs=[
            pl.BlockSpec((bb, 576, 32), lambda i: (i, 0, 0)),
            pl.BlockSpec((32, C1P), lambda i: (0, 0)),
            pl.BlockSpec((1, C1P), lambda i: (0, 0)),
            pl.BlockSpec((25, C1P, C2P), lambda i: (0, 0, 0)),
            pl.BlockSpec((1, C2P), lambda i: (0, 0)),
        ],
        out_specs=(pl.BlockSpec((bb, 64, C2P), lambda i: (i, 0, 0)),
                   pl.BlockSpec((1, 2, C2P), lambda i: (i, 0, 0))),
        scratch_shapes=[
            pltpu.VMEM((bb, 24, 24, C1P), jnp.float32),    # conv1 output
            pltpu.VMEM((bb, 12, 12, C1P), jnp.float32),    # pooled conv1
            pltpu.VMEM((5, bb, 12, 8, C1P), jnp.float32),  # kj-shifted taps
        ],
        compiler_params=cparams,
        cost_estimate=conv_cost,
    )(patches, prep["w1"], prep["b1"], prep["w2"], prep["b2"])

    # BatchNorm2d(50): finish the (tiny) global reduction in XLA.
    inv2 = 1.0 / float(n * 64)
    s2 = jnp.sum(st2, axis=0)
    mean2 = s2[0] * inv2
    var2 = jnp.maximum(s2[1] * inv2 - mean2 * mean2, 0.0)
    scale2 = prep["g2"] * jax.lax.rsqrt(var2 + _EPS)
    shift2 = prep["bb2"] - scale2 * mean2

    mid_cost = pl.CostEstimate(
        flops=n * 16 * 2 * C2P * FP,
        transcendentals=0,
        bytes_accessed=n * (64 * C2P * 2 + FP * 4) + 16 * C2P * FP * 2)

    h_pre, st1 = pl.pallas_call(
        _mid_kernel,
        out_shape=(jax.ShapeDtypeStruct((n, FP), jnp.float32),
                   jax.ShapeDtypeStruct((nb, 2, FP), jnp.float32)),
        grid=(nb,),
        in_specs=[
            pl.BlockSpec((bb, 64, C2P), lambda i: (i, 0, 0)),
            pl.BlockSpec((1, C2P), lambda i: (0, 0)),
            pl.BlockSpec((1, C2P), lambda i: (0, 0)),
            pl.BlockSpec((16, C2P, FP), lambda i: (0, 0, 0)),
            pl.BlockSpec((1, FP), lambda i: (0, 0)),
        ],
        out_specs=(pl.BlockSpec((bb, FP), lambda i: (i, 0)),
                   pl.BlockSpec((1, 2, FP), lambda i: (i, 0, 0))),
        scratch_shapes=[pltpu.VMEM((bb, 4, 8, C2P), jnp.float32)],
        compiler_params=cparams,
        cost_estimate=mid_cost,
    )(y2, scale2.reshape(1, C2P), shift2.reshape(1, C2P),
      prep["wf1"], prep["bf1"])

    # BatchNorm1d(500): finish the (tiny) global reduction in XLA.
    inv1 = 1.0 / float(n)
    s1 = jnp.sum(st1, axis=0)
    mean1 = s1[0] * inv1
    var1 = jnp.maximum(s1[1] * inv1 - mean1 * mean1, 0.0)
    scale1 = prep["g1"] * jax.lax.rsqrt(var1 + _EPS)
    shift1 = prep["bb1"] - scale1 * mean1

    out_cost = pl.CostEstimate(
        flops=n * 2 * FP * OP,
        transcendentals=n * (OP + 2),
        bytes_accessed=n * (FP * 4 + OP * 4) + FP * OP * 2)

    out = pl.pallas_call(
        _out_kernel,
        out_shape=jax.ShapeDtypeStruct((n, OP), jnp.float32),
        grid=(nb,),
        in_specs=[
            pl.BlockSpec((bb, FP), lambda i: (i, 0)),
            pl.BlockSpec((1, FP), lambda i: (0, 0)),
            pl.BlockSpec((1, FP), lambda i: (0, 0)),
            pl.BlockSpec((FP, OP), lambda i: (0, 0)),
            pl.BlockSpec((1, OP), lambda i: (0, 0)),
        ],
        out_specs=pl.BlockSpec((bb, OP), lambda i: (i, 0)),
        compiler_params=cparams,
        cost_estimate=out_cost,
    )(h_pre, scale1.reshape(1, FP), shift1.reshape(1, FP),
      prep["wf2"], prep["bf2"])

    return out[:, :10]


# ----------------------------------------------------------------------------
# Deterministic parameter init (shapes from cnn_batch.__init__).
# ----------------------------------------------------------------------------
def init_params(key):
    ks = jax.random.split(key, 8)
    s = 0.05
    return {
        "conv1_w": s * jax.random.normal(ks[0], (20, 1, 5, 5), jnp.float32),
        "conv1_b": s * jax.random.normal(ks[1], (20,), jnp.float32),
        "conv2_w": s * jax.random.normal(ks[2], (50, 20, 5, 5), jnp.float32),
        "conv2_b": s * jax.random.normal(ks[3], (50,), jnp.float32),
        "bn2_g": jnp.ones((50,), jnp.float32),
        "bn2_b": jnp.zeros((50,), jnp.float32),
        "fc1_w": s * jax.random.normal(ks[4], (500, 800), jnp.float32),
        "fc1_b": s * jax.random.normal(ks[5], (500,), jnp.float32),
        "bn1_g": jnp.ones((500,), jnp.float32),
        "bn1_b": jnp.zeros((500,), jnp.float32),
        "fc2_w": s * jax.random.normal(ks[6], (10, 500), jnp.float32),
        "fc2_b": s * jax.random.normal(ks[7], (10,), jnp.float32),
    }


if __name__ == "__main__":
    key = jax.random.PRNGKey(0)
    pkey, xkey = jax.random.split(key)
    params = init_params(pkey)
    prep = prepare_params(params)

    # MNIST geometry is required by fc1 = Linear(4*4*50, 500); batch kept small.
    x = jax.random.normal(xkey, (2, 1, 28, 28), jnp.float32)

    out = cnn_batch_forward(x, prep)
    out = jax.block_until_ready(out)

    assert out.shape == (2, 10)
    assert bool(jnp.all(jnp.isfinite(out)))
    # log_softmax rows should exponentiate-and-sum to ~1
    assert bool(jnp.allclose(jnp.sum(jnp.exp(out), axis=1), 1.0, atol=1e-3))
    print("KERNEL_OK")
</pallas_src>

<mosaic_0001>
module attributes {stable_mosaic.version = 11 : i64} {
  func.func @_conv_kernel(%arg0: i32, %arg1: memref<2x576x32xbf16, #tpu.memory_space<vmem>>, %arg2: memref<32x128xbf16, #tpu.memory_space<vmem>>, %arg3: memref<1x128xf32, #tpu.memory_space<vmem>>, %arg4: memref<25x128x64xbf16, #tpu.memory_space<vmem>>, %arg5: memref<1x64xf32, #tpu.memory_space<vmem>>, %arg6: memref<2x64x64xbf16, #tpu.memory_space<vmem>>, %arg7: memref<1x2x64xf32, #tpu.memory_space<vmem>>, %arg8: memref<2x24x24x128xf32, #tpu.memory_space<vmem>>, %arg9: memref<2x12x12x128xf32, #tpu.memory_space<vmem>>, %arg10: memref<5x2x12x8x128xf32, #tpu.memory_space<vmem>>) attributes {dimension_semantics = [#tpu.dimension_semantics<parallel>], iteration_bounds = array<i64: 1>, scalar_prefetch = 0 : i64, scratch_operands = 3 : i64, tpu.core_type = #tpu.core_type<tc>, window_params = [{transform_indices = @transform_0, window_bounds = array<i64: 2, 576, 32>}, {pipeline_mode = #tpu.pipeline_mode<synchronous>, transform_indices = @transform_1, window_bounds = array<i64: 32, 128>}, {pipeline_mode = #tpu.pipeline_mode<synchronous>, transform_indices = @transform_2, window_bounds = array<i64: 1, 128>}, {pipeline_mode = #tpu.pipeline_mode<synchronous>, transform_indices = @transform_3, window_bounds = array<i64: 25, 128, 64>}, {pipeline_mode = #tpu.pipeline_mode<synchronous>, transform_indices = @transform_4, window_bounds = array<i64: 1, 64>}, {transform_indices = @transform_5, window_bounds = array<i64: 2, 64, 64>}, {transform_indices = @transform_6, window_bounds = array<i64: 1, 2, 64>}]} {
    %c0 = arith.constant 0 : index
    %c0_0 = arith.constant 0 : index
    %c0_1 = arith.constant 0 : index
    %0 = vector.load %arg1[%c0, %c0_0, %c0_1] : memref<2x576x32xbf16, #tpu.memory_space<vmem>>, vector<2x576x32xbf16>
    %1 = vector.shape_cast %0 : vector<2x576x32xbf16> to vector<1152x32xbf16>
    %c0_2 = arith.constant 0 : index
    %c0_3 = arith.constant 0 : index
    %2 = vector.load %arg2[%c0_2, %c0_3] : memref<32x128xbf16, #tpu.memory_space<vmem>>, vector<32x128xbf16>
    %cst = arith.constant dense<0.000000e+00> : vector<1152x128xf32>
    %3 = tpu.matmul %1, %2, %cst {dimension_numbers = #tpu.dot_dimension_numbers<[1], [0], [0], [1], [0, 0, 1, 1], [], []>} : vector<1152x32xbf16>, vector<32x128xbf16>, vector<1152x128xf32> -> vector<1152x128xf32>
    %c0_4 = arith.constant 0 : index
    %c0_5 = arith.constant 0 : index
    %4 = vector.load %arg3[%c0_4, %c0_5] : memref<1x128xf32, #tpu.memory_space<vmem>>, vector<1x128xf32>
    %5 = vector.broadcast %4 : vector<1x128xf32> to vector<1152x128xf32>
    %6 = arith.addf %3, %5 : vector<1152x128xf32>
    %cst_6 = arith.constant 0.000000e+00 : f32
    %7 = vector.broadcast %cst_6 : f32 to vector<1152x128xf32>
    %8 = arith.maximumf %6, %7 : vector<1152x128xf32>
    %9 = vector.shape_cast %8 : vector<1152x128xf32> to vector<2x24x24x128xf32>
    %c0_7 = arith.constant 0 : index
    %c0_8 = arith.constant 0 : index
    %c0_9 = arith.constant 0 : index
    %c0_10 = arith.constant 0 : index
    %10 = vector.load %arg8[%c0_7, %c0_8, %c0_9, %c0_10] : memref<2x24x24x128xf32, #tpu.memory_space<vmem>>, vector<2x24x24x128xf32>
    tpu.vector_store %arg8[%c0_7, %c0_8, %c0_9, %c0_10], %9 {strides = array<i32>} : memref<2x24x24x128xf32, #tpu.memory_space<vmem>>, vector<2x24x24x128xf32>,
    %c0_11 = arith.constant 0 : index
    %c0_12 = arith.constant 0 : index
    %c0_13 = arith.constant 0 : index
    %c0_14 = arith.constant 0 : index
    %11 = tpu.strided_load %arg8[%c0_11, %c0_12, %c0_13, %c0_14] {strides = array<i32: 1, 1, 2, 1>} : memref<2x24x24x128xf32, #tpu.memory_space<vmem>>, vector<2x24x12x128xf32>
    %c0_15 = arith.constant 0 : index
    %c0_16 = arith.constant 0 : index
    %c1 = arith.constant 1 : index
    %c0_17 = arith.constant 0 : index
    %12 = tpu.strided_load %arg8[%c0_15, %c0_16, %c1, %c0_17] {strides = array<i32: 1, 1, 2, 1>} : memref<2x24x24x128xf32, #tpu.memory_space<vmem>>, vector<2x24x12x128xf32>
    %13 = arith.maximumf %11, %12 : vector<2x24x12x128xf32>
    %14 = vector.shape_cast %13 : vector<2x24x12x128xf32> to vector<2x12x2x12x128xf32>
    %15 = vector.extract_strided_slice %14 {offsets = [0, 0, 0, 0, 0], sizes = [2, 12, 1, 12, 128], strides = [1, 1, 1, 1, 1]} : vector<2x12x2x12x128xf32> to vector<2x12x1x12x128xf32>
    %16 = vector.shape_cast %15 : vector<2x12x1x12x128xf32> to vector<2x12x12x128xf32>
    %17 = vector.extract_strided_slice %14 {offsets = [0, 0, 1, 0, 0], sizes = [2, 12, 1, 12, 128], strides = [1, 1, 1, 1, 1]} : vector<2x12x2x12x128xf32> to vector<2x12x1x12x128xf32>
    %18 = vector.shape_cast %17 : vector<2x12x1x12x128xf32> to vector<2x12x12x128xf32>
    %19 = arith.maximumf %16, %18 : vector<2x12x12x128xf32>
    %c0_18 = arith.constant 0 : index
    %c0_19 = arith.constant 0 : index
    %c0_20 = arith.constant 0 : index
    %c0_21 = arith.constant 0 : index
    %20 = vector.load %arg9[%c0_18, %c0_19, %c0_20, %c0_21] : memref<2x12x12x128xf32, #tpu.memory_space<vmem>>, vector<2x12x12x128xf32>
    tpu.vector_store %arg9[%c0_18, %c0_19, %c0_20, %c0_21], %19 {strides = array<i32>} : memref<2x12x12x128xf32, #tpu.memory_space<vmem>>, vector<2x12x12x128xf32>,
    %c0_22 = arith.constant 0 : index
    %c0_23 = arith.constant 0 : index
    %c0_24 = arith.constant 0 : index
    %c0_25 = arith.constant 0 : index
    %21 = vector.load %arg9[%c0_22, %c0_23, %c0_24, %c0_25] : memref<2x12x12x128xf32, #tpu.memory_space<vmem>>, vector<2x12x8x128xf32>
    %c0_26 = arith.constant 0 : index
    %c0_27 = arith.constant 0 : index
    %c0_28 = arith.constant 0 : index
    %c0_29 = arith.constant 0 : index
    %c0_30 = arith.constant 0 : index
    %22 = vector.load %arg10[%c0_26, %c0_27, %c0_28, %c0_29, %c0_30] : memref<5x2x12x8x128xf32, #tpu.memory_space<vmem>>, vector<1x2x12x8x128xf32>
    %23 = vector.shape_cast %22 : vector<1x2x12x8x128xf32> to vector<2x12x8x128xf32>
    %24 = vector.shape_cast %21 : vector<2x12x8x128xf32> to vector<1x2x12x8x128xf32>
    tpu.vector_store %arg10[%c0_26, %c0_27, %c0_28, %c0_29, %c0_30], %24 {strides = array<i32>} : memref<5x2x12x8x128xf32, #tpu.memory_space<vmem>>, vector<1x2x12x8x128xf32>,
    %c0_31 = arith.constant 0 : index
    %c0_32 = arith.constant 0 : index
    %c1_33 = arith.constant 1 : index
    %c0_34 = arith.constant 0 : index
    %25 = vector.load %arg9[%c0_31, %c0_32, %c1_33, %c0_34] : memref<2x12x12x128xf32, #tpu.memory_space<vmem>>, vector<2x12x8x128xf32>
    %c1_35 = arith.constant 1 : index
    %c0_36 = arith.constant 0 : index
    %c0_37 = arith.constant 0 : index
    %c0_38 = arith.constant 0 : index
    %c0_39 = arith.constant 0 : index
    %26 = vector.load %arg10[%c1_35, %c0_36, %c0_37, %c0_38, %c0_39] : memref<5x2x12x8x128xf32, #tpu.memory_space<vmem>>, vector<1x2x12x8x128xf32>
    %27 = vector.shape_cast %26 : vector<1x2x12x8x128xf32> to vector<2x12x8x128xf32>
    %28 = vector.shape_cast %25 : vector<2x12x8x128xf32> to vector<1x2x12x8x128xf32>
    tpu.vector_store %arg10[%c1_35, %c0_36, %c0_37, %c0_38, %c0_39], %28 {strides = array<i32>} : memref<5x2x12x8x128xf32, #tpu.memory_space<vmem>>, vector<1x2x12x8x128xf32>,
    %c0_40 = arith.constant 0 : index
    %c0_41 = arith.constant 0 : index
    %c2 = arith.constant 2 : index
    %c0_42 = arith.constant 0 : index
    %29 = vector.load %arg9[%c0_40, %c0_41, %c2, %c0_42] : memref<2x12x12x128xf32, #tpu.memory_space<vmem>>, vector<2x12x8x128xf32>
    %c2_43 = arith.constant 2 : index
    %c0_44 = arith.constant 0 : index
    %c0_45 = arith.constant 0 : index
    %c0_46 = arith.constant 0 : index
    %c0_47 = arith.constant 0 : index
    %30 = vector.load %arg10[%c2_43, %c0_44, %c0_45, %c0_46, %c0_47] : memref<5x2x12x8x128xf32, #tpu.memory_space<vmem>>, vector<1x2x12x8x128xf32>
    %31 = vector.shape_cast %30 : vector<1x2x12x8x128xf32> to vector<2x12x8x128xf32>
    %32 = vector.shape_cast %29 : vector<2x12x8x128xf32> to vector<1x2x12x8x128xf32>
    tpu.vector_store %arg10[%c2_43, %c0_44, %c0_45, %c0_46, %c0_47], %32 {strides = array<i32>} : memref<5x2x12x8x128xf32, #tpu.memory_space<vmem>>, vector<1x2x12x8x128xf32>,
    %c0_48 = arith.constant 0 : index
    %c0_49 = arith.constant 0 : index
    %c3 = arith.constant 3 : index
    %c0_50 = arith.constant 0 : index
    %33 = vector.load %arg9[%c0_48, %c0_49, %c3, %c0_50] : memref<2x12x12x128xf32, #tpu.memory_space<vmem>>, vector<2x12x8x128xf32>
    %c3_51 = arith.constant 3 : index
    %c0_52 = arith.constant 0 : index
    %c0_53 = arith.constant 0 : index
    %c0_54 = arith.constant 0 : index
    %c0_55 = arith.constant 0 : index
    %34 = vector.load %arg10[%c3_51, %c0_52, %c0_53, %c0_54, %c0_55] : memref<5x2x12x8x128xf32, #tpu.memory_space<vmem>>, vector<1x2x12x8x128xf32>
    %35 = vector.shape_cast %34 : vector<1x2x12x8x128xf32> to vector<2x12x8x128xf32>
    %36 = vector.shape_cast %33 : vector<2x12x8x128xf32> to vector<1x2x12x8x128xf32>
    tpu.vector_store %arg10[%c3_51, %c0_52, %c0_53, %c0_54, %c0_55], %36 {strides = array<i32>} : memref<5x2x12x8x128xf32, #tpu.memory_space<vmem>>, vector<1x2x12x8x128xf32>,
    %c0_56 = arith.constant 0 : index
    %c0_57 = arith.constant 0 : index
    %c4 = arith.constant 4 : index
    %c0_58 = arith.constant 0 : index
    %37 = vector.load %arg9[%c0_56, %c0_57, %c4, %c0_58] : memref<2x12x12x128xf32, #tpu.memory_space<vmem>>, vector<2x12x8x128xf32>
    %c4_59 = arith.constant 4 : index
    %c0_60 = arith.constant 0 : index
    %c0_61 = arith.constant 0 : index
    %c0_62 = arith.constant 0 : index
    %c0_63 = arith.constant 0 : index
    %38 = vector.load %arg10[%c4_59, %c0_60, %c0_61, %c0_62, %c0_63] : memref<5x2x12x8x128xf32, #tpu.memory_space<vmem>>, vector<1x2x12x8x128xf32>
    %39 = vector.shape_cast %38 : vector<1x2x12x8x128xf32> to vector<2x12x8x128xf32>
    %40 = vector.shape_cast %37 : vector<2x12x8x128xf32> to vector<1x2x12x8x128xf32>
    tpu.vector_store %arg10[%c4_59, %c0_60, %c0_61, %c0_62, %c0_63], %40 {strides = array<i32>} : memref<5x2x12x8x128xf32, #tpu.memory_space<vmem>>, vector<1x2x12x8x128xf32>,
    %c0_64 = arith.constant 0 : index
    %c0_65 = arith.constant 0 : index
    %41 = vector.load %arg5[%c0_64, %c0_65] : memref<1x64xf32, #tpu.memory_space<vmem>>, vector<1x64xf32>
    %42 = vector.shape_cast %41 : vector<1x64xf32> to vector<1x64xf32>
    %43 = vector.broadcast %42 : vector<1x64xf32> to vector<128x64xf32>
    %c0_66 = arith.constant 0 : index
    %c0_67 = arith.constant 0 : index
    %c0_68 = arith.constant 0 : index
    %c0_69 = arith.constant 0 : index
    %c0_70 = arith.constant 0 : index
    %44 = vector.load %arg10[%c0_66, %c0_67, %c0_68, %c0_69, %c0_70] : memref<5x2x12x8x128xf32, #tpu.memory_space<vmem>>, vector<1x2x8x8x128xf32>
    %45 = vector.shape_cast %44 : vector<1x2x8x8x128xf32> to vector<2x8x8x128xf32>
    %46 = vector.shape_cast %45 : vector<2x8x8x128xf32> to vector<128x128xf32>
    %47 = arith.truncf %46 : vector<128x128xf32> to vector<128x128xbf16>
    %c0_71 = arith.constant 0 : index
    %c0_72 = arith.constant 0 : index
    %c0_73 = arith.constant 0 : index
    %48 = vector.load %arg4[%c0_71, %c0_72, %c0_73] : memref<25x128x64xbf16, #tpu.memory_space<vmem>>, vector<1x128x64xbf16>
    %49 = vector.shape_cast %48 : vector<1x128x64xbf16> to vector<128x64xbf16>
    %cst_74 = arith.constant dense<0.000000e+00> : vector<128x64xf32>
    %50 = tpu.matmul %47, %49, %cst_74 {dimension_numbers = #tpu.dot_dimension_numbers<[1], [0], [0], [1], [0, 0, 1, 1], [], []>} : vector<128x128xbf16>, vector<128x64xbf16>, vector<128x64xf32> -> vector<128x64xf32>
    %51 = arith.addf %43, %50 : vector<128x64xf32>
    %c1_75 = arith.constant 1 : index
    %c0_76 = arith.constant 0 : index
    %c0_77 = arith.constant 0 : index
    %c0_78 = arith.constant 0 : index
    %c0_79 = arith.constant 0 : index
    %52 = vector.load %arg10[%c1_75, %c0_76, %c0_77, %c0_78, %c0_79] : memref<5x2x12x8x128xf32, #tpu.memory_space<vmem>>, vector<1x2x8x8x128xf32>
    %53 = vector.shape_cast %52 : vector<1x2x8x8x128xf32> to vector<2x8x8x128xf32>
    %54 = vector.shape_cast %53 : vector<2x8x8x128xf32> to vector<128x128xf32>
    %55 = arith.truncf %54 : vector<128x128xf32> to vector<128x128xbf16>
    %c1_80 = arith.constant 1 : index
    %c0_81 = arith.constant 0 : index
    %c0_82 = arith.constant 0 : index
    %56 = vector.load %arg4[%c1_80, %c0_81, %c0_82] : memref<25x128x64xbf16, #tpu.memory_space<vmem>>, vector<1x128x64xbf16>
    %57 = vector.shape_cast %56 : vector<1x128x64xbf16> to vector<128x64xbf16>
    %cst_83 = arith.constant dense<0.000000e+00> : vector<128x64xf32>
    %58 = tpu.matmul %55, %57, %cst_83 {dimension_numbers = #tpu.dot_dimension_numbers<[1], [0], [0], [1], [0, 0, 1, 1], [], []>} : vector<128x128xbf16>, vector<128x64xbf16>, vector<128x64xf32> -> vector<128x64xf32>
    %59 = arith.addf %51, %58 : vector<128x64xf32>
    %c2_84 = arith.constant 2 : index
    %c0_85 = arith.constant 0 : index
    %c0_86 = arith.constant 0 : index
    %c0_87 = arith.constant 0 : index
    %c0_88 = arith.constant 0 : index
    %60 = vector.load %arg10[%c2_84, %c0_85, %c0_86, %c0_87, %c0_88] : memref<5x2x12x8x128xf32, #tpu.memory_space<vmem>>, vector<1x2x8x8x128xf32>
    %61 = vector.shape_cast %60 : vector<1x2x8x8x128xf32> to vector<2x8x8x128xf32>
    %62 = vector.shape_cast %61 : vector<2x8x8x128xf32> to vector<128x128xf32>
    %63 = arith.truncf %62 : vector<128x128xf32> to vector<128x128xbf16>
    %c2_89 = arith.constant 2 : index
    %c0_90 = arith.constant 0 : index
    %c0_91 = arith.constant 0 : index
    %64 = vector.load %arg4[%c2_89, %c0_90, %c0_91] : memref<25x128x64xbf16, #tpu.memory_space<vmem>>, vector<1x128x64xbf16>
    %65 = vector.shape_cast %64 : vector<1x128x64xbf16> to vector<128x64xbf16>
    %cst_92 = arith.constant dense<0.000000e+00> : vector<128x64xf32>
    %66 = tpu.matmul %63, %65, %cst_92 {dimension_numbers = #tpu.dot_dimension_numbers<[1], [0], [0], [1], [0, 0, 1, 1], [], []>} : vector<128x128xbf16>, vector<128x64xbf16>, vector<128x64xf32> -> vector<128x64xf32>
    %67 = arith.addf %59, %66 : vector<128x64xf32>
    %c3_93 = arith.constant 3 : index
    %c0_94 = arith.constant 0 : index
    %c0_95 = arith.constant 0 : index
    %c0_96 = arith.constant 0 : index
    %c0_97 = arith.constant 0 : index
    %68 = vector.load %arg10[%c3_93, %c0_94, %c0_95, %c0_96, %c0_97] : memref<5x2x12x8x128xf32, #tpu.memory_space<vmem>>, vector<1x2x8x8x128xf32>
    %69 = vector.shape_cast %68 : vector<1x2x8x8x128xf32> to vector<2x8x8x128xf32>
    %70 = vector.shape_cast %69 : vector<2x8x8x128xf32> to vector<128x128xf32>
    %71 = arith.truncf %70 : vector<128x128xf32> to vector<128x128xbf16>
    %c3_98 = arith.constant 3 : index
    %c0_99 = arith.constant 0 : index
    %c0_100 = arith.constant 0 : index
    %72 = vector.load %arg4[%c3_98, %c0_99, %c0_100] : memref<25x128x64xbf16, #tpu.memory_space<vmem>>, vector<1x128x64xbf16>
    %73 = vector.shape_cast %72 : vector<1x128x64xbf16> to vector<128x64xbf16>
    %cst_101 = arith.constant dense<0.000000e+00> : vector<128x64xf32>
    %74 = tpu.matmul %71, %73, %cst_101 {dimension_numbers = #tpu.dot_dimension_numbers<[1], [0], [0], [1], [0, 0, 1, 1], [], []>} : vector<128x128xbf16>, vector<128x64xbf16>, vector<128x64xf32> -> vector<128x64xf32>
    %75 = arith.addf %67, %74 : vector<128x64xf32>
    %c4_102 = arith.constant 4 : index
    %c0_103 = arith.constant 0 : index
    %c0_104 = arith.constant 0 : index
    %c0_105 = arith.constant 0 : index
    %c0_106 = arith.constant 0 : index
    %76 = vector.load %arg10[%c4_102, %c0_103, %c0_104, %c0_105, %c0_106] : memref<5x2x12x8x128xf32, #tpu.memory_space<vmem>>, vector<1x2x8x8x128xf32>
    %77 = vector.shape_cast %76 : vector<1x2x8x8x128xf32> to vector<2x8x8x128xf32>
    %78 = vector.shape_cast %77 : vector<2x8x8x128xf32> to vector<128x128xf32>
    %79 = arith.truncf %78 : vector<128x128xf32> to vector<128x128xbf16>
    %c4_107 = arith.constant 4 : index
    %c0_108 = arith.constant 0 : index
    %c0_109 = arith.constant 0 : index
    %80 = vector.load %arg4[%c4_107, %c0_108, %c0_109] : memref<25x128x64xbf16, #tpu.memory_space<vmem>>, vector<1x128x64xbf16>
    %81 = vector.shape_cast %80 : vector<1x128x64xbf16> to vector<128x64xbf16>
    %cst_110 = arith.constant dense<0.000000e+00> : vector<128x64xf32>
    %82 = tpu.matmul %79, %81, %cst_110 {dimension_numbers = #tpu.dot_dimension_numbers<[1], [0], [0], [1], [0, 0, 1, 1], [], []>} : vector<128x128xbf16>, vector<128x64xbf16>, vector<128x64xf32> -> vector<128x64xf32>
    %83 = arith.addf %75, %82 : vector<128x64xf32>
    %c0_111 = arith.constant 0 : index
    %c0_112 = arith.constant 0 : index
    %c1_113 = arith.constant 1 : index
    %c0_114 = arith.constant 0 : index
    %c0_115 = arith.constant 0 : index
    %84 = vector.load %arg10[%c0_111, %c0_112, %c1_113, %c0_114, %c0_115] : memref<5x2x12x8x128xf32, #tpu.memory_space<vmem>>, vector<1x2x8x8x128xf32>
    %85 = vector.shape_cast %84 : vector<1x2x8x8x128xf32> to vector<2x8x8x128xf32>
    %86 = vector.shape_cast %85 : vector<2x8x8x128xf32> to vector<128x128xf32>
    %87 = arith.truncf %86 : vector<128x128xf32> to vector<128x128xbf16>
    %c5 = arith.constant 5 : index
    %c0_116 = arith.constant 0 : index
    %c0_117 = arith.constant 0 : index
    %88 = vector.load %arg4[%c5, %c0_116, %c0_117] : memref<25x128x64xbf16, #tpu.memory_space<vmem>>, vector<1x128x64xbf16>
    %89 = vector.shape_cast %88 : vector<1x128x64xbf16> to vector<128x64xbf16>
    %cst_118 = arith.constant dense<0.000000e+00> : vector<128x64xf32>
    %90 = tpu.matmul %87, %89, %cst_118 {dimension_numbers = #tpu.dot_dimension_numbers<[1], [0], [0], [1], [0, 0, 1, 1], [], []>} : vector<128x128xbf16>, vector<128x64xbf16>, vector<128x64xf32> -> vector<128x64xf32>
    %91 = arith.addf %83, %90 : vector<128x64xf32>
    %c1_119 = arith.constant 1 : index
    %c0_120 = arith.constant 0 : index
    %c1_121 = arith.constant 1 : index
    %c0_122 = arith.constant 0 : index
    %c0_123 = arith.constant 0 : index
    %92 = vector.load %arg10[%c1_119, %c0_120, %c1_121, %c0_122, %c0_123] : memref<5x2x12x8x128xf32, #tpu.memory_space<vmem>>, vector<1x2x8x8x128xf32>
    %93 = vector.shape_cast %92 : vector<1x2x8x8x128xf32> to vector<2x8x8x128xf32>
    %94 = vector.shape_cast %93 : vector<2x8x8x128xf32> to vector<128x128xf32>
    %95 = arith.truncf %94 : vector<128x128xf32> to vector<128x128xbf16>
    %c6 = arith.constant 6 : index
    %c0_124 = arith.constant 0 : index
    %c0_125 = arith.constant 0 : index
    %96 = vector.load %arg4[%c6, %c0_124, %c0_125] : memref<25x128x64xbf16, #tpu.memory_space<vmem>>, vector<1x128x64xbf16>
    %97 = vector.shape_cast %96 : vector<1x128x64xbf16> to vector<128x64xbf16>
    %cst_126 = arith.constant dense<0.000000e+00> : vector<128x64xf32>
    %98 = tpu.matmul %95, %97, %cst_126 {dimension_numbers = #tpu.dot_dimension_numbers<[1], [0], [0], [1], [0, 0, 1, 1], [], []>} : vector<128x128xbf16>, vector<128x64xbf16>, vector<128x64xf32> -> vector<128x64xf32>
    %99 = arith.addf %91, %98 : vector<128x64xf32>
    %c2_127 = arith.constant 2 : index
    %c0_128 = arith.constant 0 : index
    %c1_129 = arith.constant 1 : index
    %c0_130 = arith.constant 0 : index
    %c0_131 = arith.constant 0 : index
    %100 = vector.load %arg10[%c2_127, %c0_128, %c1_129, %c0_130, %c0_131] : memref<5x2x12x8x128xf32, #tpu.memory_space<vmem>>, vector<1x2x8x8x128xf32>
    %101 = vector.shape_cast %100 : vector<1x2x8x8x128xf32> to vector<2x8x8x128xf32>
    %102 = vector.shape_cast %101 : vector<2x8x8x128xf32> to vector<128x128xf32>
    %103 = arith.truncf %102 : vector<128x128xf32> to vector<128x128xbf16>
    %c7 = arith.constant 7 : index
    %c0_132 = arith.constant 0 : index
    %c0_133 = arith.constant 0 : index
    %104 = vector.load %arg4[%c7, %c0_132, %c0_133] : memref<25x128x64xbf16, #tpu.memory_space<vmem>>, vector<1x128x64xbf16>
    %105 = vector.shape_cast %104 : vector<1x128x64xbf16> to vector<128x64xbf16>
    %cst_134 = arith.constant dense<0.000000e+00> : vector<128x64xf32>
    %106 = tpu.matmul %103, %105, %cst_134 {dimension_numbers = #tpu.dot_dimension_numbers<[1], [0], [0], [1], [0, 0, 1, 1], [], []>} : vector<128x128xbf16>, vector<128x64xbf16>, vector<128x64xf32> -> vector<128x64xf32>
    %107 = arith.addf %99, %106 : vector<128x64xf32>
    %c3_135 = arith.constant 3 : index
    %c0_136 = arith.constant 0 : index
    %c1_137 = arith.constant 1 : index
    %c0_138 = arith.constant 0 : index
    %c0_139 = arith.constant 0 : index
    %108 = vector.load %arg10[%c3_135, %c0_136, %c1_137, %c0_138, %c0_139] : memref<5x2x12x8x128xf32, #tpu.memory_space<vmem>>, vector<1x2x8x8x128xf32>
    %109 = vector.shape_cast %108 : vector<1x2x8x8x128xf32> to vector<2x8x8x128xf32>
    %110 = vector.shape_cast %109 : vector<2x8x8x128xf32> to vector<128x128xf32>
    %111 = arith.truncf %110 : vector<128x128xf32> to vector<128x128xbf16>
    %c8 = arith.constant 8 : index
    %c0_140 = arith.constant 0 : index
    %c0_141 = arith.constant 0 : index
    %112 = vector.load %arg4[%c8, %c0_140, %c0_141] : memref<25x128x64xbf16, #tpu.memory_space<vmem>>, vector<1x128x64xbf16>
    %113 = vector.shape_cast %112 : vector<1x128x64xbf16> to vector<128x64xbf16>
    %cst_142 = arith.constant dense<0.000000e+00> : vector<128x64xf32>
    %114 = tpu.matmul %111, %113, %cst_142 {dimension_numbers = #tpu.dot_dimension_numbers<[1], [0], [0], [1], [0, 0, 1, 1], [], []>} : vector<128x128xbf16>, vector<128x64xbf16>, vector<128x64xf32> -> vector<128x64xf32>
    %115 = arith.addf %107, %114 : vector<128x64xf32>
    %c4_143 = arith.constant 4 : index
    %c0_144 = arith.constant 0 : index
    %c1_145 = arith.constant 1 : index
    %c0_146 = arith.constant 0 : index
    %c0_147 = arith.constant 0 : index
    %116 = vector.load %arg10[%c4_143, %c0_144, %c1_145, %c0_146, %c0_147] : memref<5x2x12x8x128xf32, #tpu.memory_space<vmem>>, vector<1x2x8x8x128xf32>
    %117 = vector.shape_cast %116 : vector<1x2x8x8x128xf32> to vector<2x8x8x128xf32>
    %118 = vector.shape_cast %117 : vector<2x8x8x128xf32> to vector<128x128xf32>
    %119 = arith.truncf %118 : vector<128x128xf32> to vector<128x128xbf16>
    %c9 = arith.constant 9 : index
    %c0_148 = arith.constant 0 : index
    %c0_149 = arith.constant 0 : index
    %120 = vector.load %arg4[%c9, %c0_148, %c0_149] : memref<25x128x64xbf16, #tpu.memory_space<vmem>>, vector<1x128x64xbf16>
    %121 = vector.shape_cast %120 : vector<1x128x64xbf16> to vector<128x64xbf16>
    %cst_150 = arith.constant dense<0.000000e+00> : vector<128x64xf32>
    %122 = tpu.matmul %119, %121, %cst_150 {dimension_numbers = #tpu.dot_dimension_numbers<[1], [0], [0], [1], [0, 0, 1, 1], [], []>} : vector<128x128xbf16>, vector<128x64xbf16>, vector<128x64xf32> -> vector<128x64xf32>
    %123 = arith.addf %115, %122 : vector<128x64xf32>
    %c0_151 = arith.constant 0 : index
    %c0_152 = arith.constant 0 : index
    %c2_153 = arith.constant 2 : index
    %c0_154 = arith.constant 0 : index
    %c0_155 = arith.constant 0 : index
    %124 = vector.load %arg10[%c0_151, %c0_152, %c2_153, %c0_154, %c0_155] : memref<5x2x12x8x128xf32, #tpu.memory_space<vmem>>, vector<1x2x8x8x128xf32>
    %125 = vector.shape_cast %124 : vector<1x2x8x8x128xf32> to vector<2x8x8x128xf32>
    %126 = vector.shape_cast %125 : vector<2x8x8x128xf32> to vector<128x128xf32>
    %127 = arith.truncf %126 : vector<128x128xf32> to vector<128x128xbf16>
    %c10 = arith.constant 10 : index
    %c0_156 = arith.constant 0 : index
    %c0_157 = arith.constant 0 : index
    %128 = vector.load %arg4[%c10, %c0_156, %c0_157] : memref<25x128x64xbf16, #tpu.memory_space<vmem>>, vector<1x128x64xbf16>
    %129 = vector.shape_cast %128 : vector<1x128x64xbf16> to vector<128x64xbf16>
    %cst_158 = arith.constant dense<0.000000e+00> : vector<128x64xf32>
    %130 = tpu.matmul %127, %129, %cst_158 {dimension_numbers = #tpu.dot_dimension_numbers<[1], [0], [0], [1], [0, 0, 1, 1], [], []>} : vector<128x128xbf16>, vector<128x64xbf16>, vector<128x64xf32> -> vector<128x64xf32>
    %131 = arith.addf %123, %130 : vector<128x64xf32>
    %c1_159 = arith.constant 1 : index
    %c0_160 = arith.constant 0 : index
    %c2_161 = arith.constant 2 : index
    %c0_162 = arith.constant 0 : index
    %c0_163 = arith.constant 0 : index
    %132 = vector.load %arg10[%c1_159, %c0_160, %c2_161, %c0_162, %c0_163] : memref<5x2x12x8x128xf32, #tpu.memory_space<vmem>>, vector<1x2x8x8x128xf32>
    %133 = vector.shape_cast %132 : vector<1x2x8x8x128xf32> to vector<2x8x8x128xf32>
    %134 = vector.shape_cast %133 : vector<2x8x8x128xf32> to vector<128x128xf32>
    %135 = arith.truncf %134 : vector<128x128xf32> to vector<128x128xbf16>
    %c11 = arith.constant 11 : index
    %c0_164 = arith.constant 0 : index
    %c0_165 = arith.constant 0 : index
    %136 = vector.load %arg4[%c11, %c0_164, %c0_165] : memref<25x128x64xbf16, #tpu.memory_space<vmem>>, vector<1x128x64xbf16>
    %137 = vector.shape_cast %136 : vector<1x128x64xbf16> to vector<128x64xbf16>
    %cst_166 = arith.constant dense<0.000000e+00> : vector<128x64xf32>
    %138 = tpu.matmul %135, %137, %cst_166 {dimension_numbers = #tpu.dot_dimension_numbers<[1], [0], [0], [1], [0, 0, 1, 1], [], []>} : vector<128x128xbf16>, vector<128x64xbf16>, vector<128x64xf32> -> vector<128x64xf32>
    %139 = arith.addf %131, %138 : vector<128x64xf32>
    %c2_167 = arith.constant 2 : index
    %c0_168 = arith.constant 0 : index
    %c2_169 = arith.constant 2 : index
    %c0_170 = arith.constant 0 : index
    %c0_171 = arith.constant 0 : index
    %140 = vector.load %arg10[%c2_167, %c0_168, %c2_169, %c0_170, %c0_171] : memref<5x2x12x8x128xf32, #tpu.memory_space<vmem>>, vector<1x2x8x8x128xf32>
    %141 = vector.shape_cast %140 : vector<1x2x8x8x128xf32> to vector<2x8x8x128xf32>
    %142 = vector.shape_cast %141 : vector<2x8x8x128xf32> to vector<128x128xf32>
    %143 = arith.truncf %142 : vector<128x128xf32> to vector<128x128xbf16>
    %c12 = arith.constant 12 : index
    %c0_172 = arith.constant 0 : index
    %c0_173 = arith.constant 0 : index
    %144 = vector.load %arg4[%c12, %c0_172, %c0_173] : memref<25x128x64xbf16, #tpu.memory_space<vmem>>, vector<1x128x64xbf16>
    %145 = vector.shape_cast %144 : vector<1x128x64xbf16> to vector<128x64xbf16>
    %cst_174 = arith.constant dense<0.000000e+00> : vector<128x64xf32>
    %146 = tpu.matmul %143, %145, %cst_174 {dimension_numbers = #tpu.dot_dimension_numbers<[1], [0], [0], [1], [0, 0, 1, 1], [], []>} : vector<128x128xbf16>, vector<128x64xbf16>, vector<128x64xf32> -> vector<128x64xf32>
    %147 = arith.addf %139, %146 : vector<128x64xf32>
    %c3_175 = arith.constant 3 : index
    %c0_176 = arith.constant 0 : index
    %c2_177 = arith.constant 2 : index
    %c0_178 = arith.constant 0 : index
    %c0_179 = arith.constant 0 : index
    %148 = vector.load %arg10[%c3_175, %c0_176, %c2_177, %c0_178, %c0_179] : memref<5x2x12x8x128xf32, #tpu.memory_space<vmem>>, vector<1x2x8x8x128xf32>
    %149 = vector.shape_cast %148 : vector<1x2x8x8x128xf32> to vector<2x8x8x128xf32>
    %150 = vector.shape_cast %149 : vector<2x8x8x128xf32> to vector<128x128xf32>
    %151 = arith.truncf %150 : vector<128x128xf32> to vector<128x128xbf16>
    %c13 = arith.constant 13 : index
    %c0_180 = arith.constant 0 : index
    %c0_181 = arith.constant 0 : index
    %152 = vector.load %arg4[%c13, %c0_180, %c0_181] : memref<25x128x64xbf16, #tpu.memory_space<vmem>>, vector<1x128x64xbf16>
    %153 = vector.shape_cast %152 : vector<1x128x64xbf16> to vector<128x64xbf16>
    %cst_182 = arith.constant dense<0.000000e+00> : vector<128x64xf32>
    %154 = tpu.matmul %151, %153, %cst_182 {dimension_numbers = #tpu.dot_dimension_numbers<[1], [0], [0], [1], [0, 0, 1, 1], [], []>} : vector<128x128xbf16>, vector<128x64xbf16>, vector<128x64xf32> -> vector<128x64xf32>
    %155 = arith.addf %147, %154 : vector<128x64xf32>
    %c4_183 = arith.constant 4 : index
    %c0_184 = arith.constant 0 : index
    %c2_185 = arith.constant 2 : index
    %c0_186 = arith.constant 0 : index
    %c0_187 = arith.constant 0 : index
    %156 = vector.load %arg10[%c4_183, %c0_184, %c2_185, %c0_186, %c0_187] : memref<5x2x12x8x128xf32, #tpu.memory_space<vmem>>, vector<1x2x8x8x128xf32>
    %157 = vector.shape_cast %156 : vector<1x2x8x8x128xf32> to vector<2x8x8x128xf32>
    %158 = vector.shape_cast %157 : vector<2x8x8x128xf32> to vector<128x128xf32>
    %159 = arith.truncf %158 : vector<128x128xf32> to vector<128x128xbf16>
    %c14 = arith.constant 14 : index
    %c0_188 = arith.constant 0 : index
    %c0_189 = arith.constant 0 : index
    %160 = vector.load %arg4[%c14, %c0_188, %c0_189] : memref<25x128x64xbf16, #tpu.memory_space<vmem>>, vector<1x128x64xbf16>
    %161 = vector.shape_cast %160 : vector<1x128x64xbf16> to vector<128x64xbf16>
    %cst_190 = arith.constant dense<0.000000e+00> : vector<128x64xf32>
    %162 = tpu.matmul %159, %161, %cst_190 {dimension_numbers = #tpu.dot_dimension_numbers<[1], [0], [0], [1], [0, 0, 1, 1], [], []>} : vector<128x128xbf16>, vector<128x64xbf16>, vector<128x64xf32> -> vector<128x64xf32>
    %163 = arith.addf %155, %162 : vector<128x64xf32>
    %c0_191 = arith.constant 0 : index
    %c0_192 = arith.constant 0 : index
    %c3_193 = arith.constant 3 : index
    %c0_194 = arith.constant 0 : index
    %c0_195 = arith.constant 0 : index
    %164 = vector.load %arg10[%c0_191, %c0_192, %c3_193, %c0_194, %c0_195] : memref<5x2x12x8x128xf32, #tpu.memory_space<vmem>>, vector<1x2x8x8x128xf32>
    %165 = vector.shape_cast %164 : vector<1x2x8x8x128xf32> to vector<2x8x8x128xf32>
    %166 = vector.shape_cast %165 : vector<2x8x8x128xf32> to vector<128x128xf32>
    %167 = arith.truncf %166 : vector<128x128xf32> to vector<128x128xbf16>
    %c15 = arith.constant 15 : index
    %c0_196 = arith.constant 0 : index
    %c0_197 = arith.constant 0 : index
    %168 = vector.load %arg4[%c15, %c0_196, %c0_197] : memref<25x128x64xbf16, #tpu.memory_space<vmem>>, vector<1x128x64xbf16>
    %169 = vector.shape_cast %168 : vector<1x128x64xbf16> to vector<128x64xbf16>
    %cst_198 = arith.constant dense<0.000000e+00> : vector<128x64xf32>
    %170 = tpu.matmul %167, %169, %cst_198 {dimension_numbers = #tpu.dot_dimension_numbers<[1], [0], [0], [1], [0, 0, 1, 1], [], []>} : vector<128x128xbf16>, vector<128x64xbf16>, vector<128x64xf32> -> vector<128x64xf32>
    %171 = arith.addf %163, %170 : vector<128x64xf32>
    %c1_199 = arith.constant 1 : index
    %c0_200 = arith.constant 0 : index
    %c3_201 = arith.constant 3 : index
    %c0_202 = arith.constant 0 : index
    %c0_203 = arith.constant 0 : index
    %172 = vector.load %arg10[%c1_199, %c0_200, %c3_201, %c0_202, %c0_203] : memref<5x2x12x8x128xf32, #tpu.memory_space<vmem>>, vector<1x2x8x8x128xf32>
    %173 = vector.shape_cast %172 : vector<1x2x8x8x128xf32> to vector<2x8x8x128xf32>
    %174 = vector.shape_cast %173 : vector<2x8x8x128xf32> to vector<128x128xf32>
    %175 = arith.truncf %174 : vector<128x128xf32> to vector<128x128xbf16>
    %c16 = arith.constant 16 : index
    %c0_204 = arith.constant 0 : index
    %c0_205 = arith.constant 0 : index
    %176 = vector.load %arg4[%c16, %c0_204, %c0_205] : memref<25x128x64xbf16, #tpu.memory_space<vmem>>, vector<1x128x64xbf16>
    %177 = vector.shape_cast %176 : vector<1x128x64xbf16> to vector<128x64xbf16>
    %cst_206 = arith.constant dense<0.000000e+00> : vector<128x64xf32>
    %178 = tpu.matmul %175, %177, %cst_206 {dimension_numbers = #tpu.dot_dimension_numbers<[1], [0], [0], [1], [0, 0, 1, 1], [], []>} : vector<128x128xbf16>, vector<128x64xbf16>, vector<128x64xf32> -> vector<128x64xf32>
    %179 = arith.addf %171, %178 : vector<128x64xf32>
    %c2_207 = arith.constant 2 : index
    %c0_208 = arith.constant 0 : index
    %c3_209 = arith.constant 3 : index
    %c0_210 = arith.constant 0 : index
    %c0_211 = arith.constant 0 : index
    %180 = vector.load %arg10[%c2_207, %c0_208, %c3_209, %c0_210, %c0_211] : memref<5x2x12x8x128xf32, #tpu.memory_space<vmem>>, vector<1x2x8x8x128xf32>
    %181 = vector.shape_cast %180 : vector<1x2x8x8x128xf32> to vector<2x8x8x128xf32>
    %182 = vector.shape_cast %181 : vector<2x8x8x128xf32> to vector<128x128xf32>
    %183 = arith.truncf %182 : vector<128x128xf32> to vector<128x128xbf16>
    %c17 = arith.constant 17 : index
    %c0_212 = arith.constant 0 : index
    %c0_213 = arith.constant 0 : index
    %184 = vector.load %arg4[%c17, %c0_212, %c0_213] : memref<25x128x64xbf16, #tpu.memory_space<vmem>>, vector<1x128x64xbf16>
    %185 = vector.shape_cast %184 : vector<1x128x64xbf16> to vector<128x64xbf16>
    %cst_214 = arith.constant dense<0.000000e+00> : vector<128x64xf32>
    %186 = tpu.matmul %183, %185, %cst_214 {dimension_numbers = #tpu.dot_dimension_numbers<[1], [0], [0], [1], [0, 0, 1, 1], [], []>} : vector<128x128xbf16>, vector<128x64xbf16>, vector<128x64xf32> -> vector<128x64xf32>
    %187 = arith.addf %179, %186 : vector<128x64xf32>
    %c3_215 = arith.constant 3 : index
    %c0_216 = arith.constant 0 : index
    %c3_217 = arith.constant 3 : index
    %c0_218 = arith.constant 0 : index
    %c0_219 = arith.constant 0 : index
    %188 = vector.load %arg10[%c3_215, %c0_216, %c3_217, %c0_218, %c0_219] : memref<5x2x12x8x128xf32, #tpu.memory_space<vmem>>, vector<1x2x8x8x128xf32>
    %189 = vector.shape_cast %188 : vector<1x2x8x8x128xf32> to vector<2x8x8x128xf32>
    %190 = vector.shape_cast %189 : vector<2x8x8x128xf32> to vector<128x128xf32>
    %191 = arith.truncf %190 : vector<128x128xf32> to vector<128x128xbf16>
    %c18 = arith.constant 18 : index
    %c0_220 = arith.constant 0 : index
    %c0_221 = arith.constant 0 : index
    %192 = vector.load %arg4[%c18, %c0_220, %c0_221] : memref<25x128x64xbf16, #tpu.memory_space<vmem>>, vector<1x128x64xbf16>
    %193 = vector.shape_cast %192 : vector<1x128x64xbf16> to vector<128x64xbf16>
    %cst_222 = arith.constant dense<0.000000e+00> : vector<128x64xf32>
    %194 = tpu.matmul %191, %193, %cst_222 {dimension_numbers = #tpu.dot_dimension_numbers<[1], [0], [0], [1], [0, 0, 1, 1], [], []>} : vector<128x128xbf16>, vector<128x64xbf16>, vector<128x64xf32> -> vector<128x64xf32>
    %195 = arith.addf %187, %194 : vector<128x64xf32>
    %c4_223 = arith.constant 4 : index
    %c0_224 = arith.constant 0 : index
    %c3_225 = arith.constant 3 : index
    %c0_226 = arith.constant 0 : index
    %c0_227 = arith.constant 0 : index
    %196 = vector.load %arg10[%c4_223, %c0_224, %c3_225, %c0_226, %c0_227] : memref<5x2x12x8x128xf32, #tpu.memory_space<vmem>>, vector<1x2x8x8x128xf32>
    %197 = vector.shape_cast %196 : vector<1x2x8x8x128xf32> to vector<2x8x8x128xf32>
    %198 = vector.shape_cast %197 : vector<2x8x8x128xf32> to vector<128x128xf32>
    %199 = arith.truncf %198 : vector<128x128xf32> to vector<128x128xbf16>
    %c19 = arith.constant 19 : index
    %c0_228 = arith.constant 0 : index
    %c0_229 = arith.constant 0 : index
    %200 = vector.load %arg4[%c19, %c0_228, %c0_229] : memref<25x128x64xbf16, #tpu.memory_space<vmem>>, vector<1x128x64xbf16>
    %201 = vector.shape_cast %200 : vector<1x128x64xbf16> to vector<128x64xbf16>
    %cst_230 = arith.constant dense<0.000000e+00> : vector<128x64xf32>
    %202 = tpu.matmul %199, %201, %cst_230 {dimension_numbers = #tpu.dot_dimension_numbers<[1], [0], [0], [1], [0, 0, 1, 1], [], []>} : vector<128x128xbf16>, vector<128x64xbf16>, vector<128x64xf32> -> vector<128x64xf32>
    %203 = arith.addf %195, %202 : vector<128x64xf32>
    %c0_231 = arith.constant 0 : index
    %c0_232 = arith.constant 0 : index
    %c4_233 = arith.constant 4 : index
    %c0_234 = arith.constant 0 : index
    %c0_235 = arith.constant 0 : index
    %204 = vector.load %arg10[%c0_231, %c0_232, %c4_233, %c0_234, %c0_235] : memref<5x2x12x8x128xf32, #tpu.memory_space<vmem>>, vector<1x2x8x8x128xf32>
    %205 = vector.shape_cast %204 : vector<1x2x8x8x128xf32> to vector<2x8x8x128xf32>
    %206 = vector.shape_cast %205 : vector<2x8x8x128xf32> to vector<128x128xf32>
    %207 = arith.truncf %206 : vector<128x128xf32> to vector<128x128xbf16>
    %c20 = arith.constant 20 : index
    %c0_236 = arith.constant 0 : index
    %c0_237 = arith.constant 0 : index
    %208 = vector.load %arg4[%c20, %c0_236, %c0_237] : memref<25x128x64xbf16, #tpu.memory_space<vmem>>, vector<1x128x64xbf16>
    %209 = vector.shape_cast %208 : vector<1x128x64xbf16> to vector<128x64xbf16>
    %cst_238 = arith.constant dense<0.000000e+00> : vector<128x64xf32>
    %210 = tpu.matmul %207, %209, %cst_238 {dimension_numbers = #tpu.dot_dimension_numbers<[1], [0], [0], [1], [0, 0, 1, 1], [], []>} : vector<128x128xbf16>, vector<128x64xbf16>, vector<128x64xf32> -> vector<128x64xf32>
    %211 = arith.addf %203, %210 : vector<128x64xf32>
    %c1_239 = arith.constant 1 : index
    %c0_240 = arith.constant 0 : index
    %c4_241 = arith.constant 4 : index
    %c0_242 = arith.constant 0 : index
    %c0_243 = arith.constant 0 : index
    %212 = vector.load %arg10[%c1_239, %c0_240, %c4_241, %c0_242, %c0_243] : memref<5x2x12x8x128xf32, #tpu.memory_space<vmem>>, vector<1x2x8x8x128xf32>
    %213 = vector.shape_cast %212 : vector<1x2x8x8x128xf32> to vector<2x8x8x128xf32>
    %214 = vector.shape_cast %213 : vector<2x8x8x128xf32> to vector<128x128xf32>
    %215 = arith.truncf %214 : vector<128x128xf32> to vector<128x128xbf16>
    %c21 = arith.constant 21 : index
    %c0_244 = arith.constant 0 : index
    %c0_245 = arith.constant 0 : index
    %216 = vector.load %arg4[%c21, %c0_244, %c0_245] : memref<25x128x64xbf16, #tpu.memory_space<vmem>>, vector<1x128x64xbf16>
    %217 = vector.shape_cast %216 : vector<1x128x64xbf16> to vector<128x64xbf16>
    %cst_246 = arith.constant dense<0.000000e+00> : vector<128x64xf32>
    %218 = tpu.matmul %215, %217, %cst_246 {dimension_numbers = #tpu.dot_dimension_numbers<[1], [0], [0], [1], [0, 0, 1, 1], [], []>} : vector<128x128xbf16>, vector<128x64xbf16>, vector<128x64xf32> -> vector<128x64xf32>
    %219 = arith.addf %211, %218 : vector<128x64xf32>
    %c2_247 = arith.constant 2 : index
    %c0_248 = arith.constant 0 : index
    %c4_249 = arith.constant 4 : index
    %c0_250 = arith.constant 0 : index
    %c0_251 = arith.constant 0 : index
    %220 = vector.load %arg10[%c2_247, %c0_248, %c4_249, %c0_250, %c0_251] : memref<5x2x12x8x128xf32, #tpu.memory_space<vmem>>, vector<1x2x8x8x128xf32>
    %221 = vector.shape_cast %220 : vector<1x2x8x8x128xf32> to vector<2x8x8x128xf32>
    %222 = vector.shape_cast %221 : vector<2x8x8x128xf32> to vector<128x128xf32>
    %223 = arith.truncf %222 : vector<128x128xf32> to vector<128x128xbf16>
    %c22 = arith.constant 22 : index
    %c0_252 = arith.constant 0 : index
    %c0_253 = arith.constant 0 : index
    %224 = vector.load %arg4[%c22, %c0_252, %c0_253] : memref<25x128x64xbf16, #tpu.memory_space<vmem>>, vector<1x128x64xbf16>
    %225 = vector.shape_cast %224 : vector<1x128x64xbf16> to vector<128x64xbf16>
    %cst_254 = arith.constant dense<0.000000e+00> : vector<128x64xf32>
    %226 = tpu.matmul %223, %225, %cst_254 {dimension_numbers = #tpu.dot_dimension_numbers<[1], [0], [0], [1], [0, 0, 1, 1], [], []>} : vector<128x128xbf16>, vector<128x64xbf16>, vector<128x64xf32> -> vector<128x64xf32>
    %227 = arith.addf %219, %226 : vector<128x64xf32>
    %c3_255 = arith.constant 3 : index
    %c0_256 = arith.constant 0 : index
    %c4_257 = arith.constant 4 : index
    %c0_258 = arith.constant 0 : index
    %c0_259 = arith.constant 0 : index
    %228 = vector.load %arg10[%c3_255, %c0_256, %c4_257, %c0_258, %c0_259] : memref<5x2x12x8x128xf32, #tpu.memory_space<vmem>>, vector<1x2x8x8x128xf32>
    %229 = vector.shape_cast %228 : vector<1x2x8x8x128xf32> to vector<2x8x8x128xf32>
    %230 = vector.shape_cast %229 : vector<2x8x8x128xf32> to vector<128x128xf32>
    %231 = arith.truncf %230 : vector<128x128xf32> to vector<128x128xbf16>
    %c23 = arith.constant 23 : index
    %c0_260 = arith.constant 0 : index
    %c0_261 = arith.constant 0 : index
    %232 = vector.load %arg4[%c23, %c0_260, %c0_261] : memref<25x128x64xbf16, #tpu.memory_space<vmem>>, vector<1x128x64xbf16>
    %233 = vector.shape_cast %232 : vector<1x128x64xbf16> to vector<128x64xbf16>
    %cst_262 = arith.constant dense<0.000000e+00> : vector<128x64xf32>
    %234 = tpu.matmul %231, %233, %cst_262 {dimension_numbers = #tpu.dot_dimension_numbers<[1], [0], [0], [1], [0, 0, 1, 1], [], []>} : vector<128x128xbf16>, vector<128x64xbf16>, vector<128x64xf32> -> vector<128x64xf32>
    %235 = arith.addf %227, %234 : vector<128x64xf32>
    %c4_263 = arith.constant 4 : index
    %c0_264 = arith.constant 0 : index
    %c4_265 = arith.constant 4 : index
    %c0_266 = arith.constant 0 : index
    %c0_267 = arith.constant 0 : index
    %236 = vector.load %arg10[%c4_263, %c0_264, %c4_265, %c0_266, %c0_267] : memref<5x2x12x8x128xf32, #tpu.memory_space<vmem>>, vector<1x2x8x8x128xf32>
    %237 = vector.shape_cast %236 : vector<1x2x8x8x128xf32> to vector<2x8x8x128xf32>
    %238 = vector.shape_cast %237 : vector<2x8x8x128xf32> to vector<128x128xf32>
    %239 = arith.truncf %238 : vector<128x128xf32> to vector<128x128xbf16>
    %c24 = arith.constant 24 : index
    %c0_268 = arith.constant 0 : index
    %c0_269 = arith.constant 0 : index
    %240 = vector.load %arg4[%c24, %c0_268, %c0_269] : memref<25x128x64xbf16, #tpu.memory_space<vmem>>, vector<1x128x64xbf16>
    %241 = vector.shape_cast %240 : vector<1x128x64xbf16> to vector<128x64xbf16>
    %cst_270 = arith.constant dense<0.000000e+00> : vector<128x64xf32>
    %242 = tpu.matmul %239, %241, %cst_270 {dimension_numbers = #tpu.dot_dimension_numbers<[1], [0], [0], [1], [0, 0, 1, 1], [], []>} : vector<128x128xbf16>, vector<128x64xbf16>, vector<128x64xf32> -> vector<128x64xf32>
    %243 = arith.addf %235, %242 : vector<128x64xf32>
    %244 = vector.shape_cast %243 : vector<128x64xf32> to vector<2x64x64xf32>
    %245 = arith.truncf %244 : vector<2x64x64xf32> to vector<2x64x64xbf16>
    %c0_271 = arith.constant 0 : index
    %c0_272 = arith.constant 0 : index
    %c0_273 = arith.constant 0 : index
    %246 = vector.load %arg6[%c0_271, %c0_272, %c0_273] : memref<2x64x64xbf16, #tpu.memory_space<vmem>>, vector<2x64x64xbf16>
    tpu.vector_store %arg6[%c0_271, %c0_272, %c0_273], %245 {strides = array<i32>} : memref<2x64x64xbf16, #tpu.memory_space<vmem>>, vector<2x64x64xbf16>,
    %cst_274 = arith.constant dense<0.000000e+00> : vector<64xf32>
    %247 = vector.multi_reduction <add>, %243, %cst_274 [0] : vector<128x64xf32> to vector<64xf32>
    %248 = vector.shape_cast %247 : vector<64xf32> to vector<1x64xf32>
    %249 = arith.mulf %243, %243 : vector<128x64xf32>
    %cst_275 = arith.constant dense<0.000000e+00> : vector<64xf32>
    %250 = vector.multi_reduction <add>, %249, %cst_275 [0] : vector<128x64xf32> to vector<64xf32>
    %251 = vector.shape_cast %250 : vector<64xf32> to vector<1x64xf32>
    %252 = tpu.concatenate %248, %251 in 0 : vector<1x64xf32>, vector<1x64xf32> -> vector<2x64xf32>
    %253 = vector.shape_cast %252 : vector<2x64xf32> to vector<1x2x64xf32>
    %c0_276 = arith.constant 0 : index
    %c0_277 = arith.constant 0 : index
    %c0_278 = arith.constant 0 : index
    %254 = vector.load %arg7[%c0_276, %c0_277, %c0_278] : memref<1x2x64xf32, #tpu.memory_space<vmem>>, vector<1x2x64xf32>
    tpu.vector_store %arg7[%c0_276, %c0_277, %c0_278], %253 {strides = array<i32>} : memref<1x2x64xf32, #tpu.memory_space<vmem>>, vector<1x2x64xf32>,
    return
  }
  func.func @transform_0(%arg0: i32) -> (i32, i32, i32) {
    %c0_i32 = arith.constant 0 : i32
    %c0_i32_0 = arith.constant 0 : i32
    %c0_i32_1 = arith.constant 0 : i32
    return %arg0, %c0_i32, %c0_i32_0 : i32, i32, i32
  }
  func.func @transform_1(%arg0: i32) -> (i32, i32) {
    %c0_i32 = arith.constant 0 : i32
    %c0_i32_0 = arith.constant 0 : i32
    %c0_i32_1 = arith.constant 0 : i32
    return %c0_i32, %c0_i32_0 : i32, i32
  }
  func.func @transform_2(%arg0: i32) -> (i32, i32) {
    %c0_i32 = arith.constant 0 : i32
    %c0_i32_0 = arith.constant 0 : i32
    %c0_i32_1 = arith.constant 0 : i32
    return %c0_i32, %c0_i32_0 : i32, i32
  }
  func.func @transform_3(%arg0: i32) -> (i32, i32, i32) {
    %c0_i32 = arith.constant 0 : i32
    %c0_i32_0 = arith.constant 0 : i32
    %c0_i32_1 = arith.constant 0 : i32
    %c0_i32_2 = arith.constant 0 : i32
    return %c0_i32, %c0_i32_0, %c0_i32_1 : i32, i32, i32
  }
  func.func @transform_4(%arg0: i32) -> (i32, i32) {
    %c0_i32 = arith.constant 0 : i32
    %c0_i32_0 = arith.constant 0 : i32
    %c0_i32_1 = arith.constant 0 : i32
    return %c0_i32, %c0_i32_0 : i32, i32
  }
  func.func @transform_5(%arg0: i32) -> (i32, i32, i32) {
    %c0_i32 = arith.constant 0 : i32
    %c0_i32_0 = arith.constant 0 : i32
    %c0_i32_1 = arith.constant 0 : i32
    return %arg0, %c0_i32, %c0_i32_0 : i32, i32, i32
  }
  func.func @transform_6(%arg0: i32) -> (i32, i32, i32) {
    %c0_i32 = arith.constant 0 : i32
    %c0_i32_0 = arith.constant 0 : i32
    %c0_i32_1 = arith.constant 0 : i32
    return %arg0, %c0_i32, %c0_i32_0 : i32, i32, i32
  }
}

module attributes {stable_mosaic.version = 11 : i64} {
  func.func @_mid_kernel(%arg0: i32, %arg1: memref<2x64x64xbf16, #tpu.memory_space<vmem>>, %arg2: memref<1x64xf32, #tpu.memory_space<vmem>>, %arg3: memref<1x64xf32, #tpu.memory_space<vmem>>, %arg4: memref<16x64x512xbf16, #tpu.memory_space<vmem>>, %arg5: memref<1x512xf32, #tpu.memory_space<vmem>>, %arg6: memref<2x512xf32, #tpu.memory_space<vmem>>, %arg7: memref<1x2x512xf32, #tpu.memory_space<vmem>>, %arg8: memref<2x4x8x64xf32, #tpu.memory_space<vmem>>) attributes {dimension_semantics = [#tpu.dimension_semantics<parallel>], iteration_bounds = array<i64: 1>, scalar_prefetch = 0 : i64, scratch_operands = 1 : i64, tpu.core_type = #tpu.core_type<tc>, window_params = [{transform_indices = @transform_0, window_bounds = array<i64: 2, 64, 64>}, {pipeline_mode = #tpu.pipeline_mode<synchronous>, transform_indices = @transform_1, window_bounds = array<i64: 1, 64>}, {pipeline_mode = #tpu.pipeline_mode<synchronous>, transform_indices = @transform_2, window_bounds = array<i64: 1, 64>}, {pipeline_mode = #tpu.pipeline_mode<synchronous>, transform_indices = @transform_3, window_bounds = array<i64: 16, 64, 512>}, {pipeline_mode = #tpu.pipeline_mode<synchronous>, transform_indices = @transform_4, window_bounds = array<i64: 1, 512>}, {transform_indices = @transform_5, window_bounds = array<i64: 2, 512>}, {transform_indices = @transform_6, window_bounds = array<i64: 1, 2, 512>}]} {
    %c0 = arith.constant 0 : index
    %c0_0 = arith.constant 0 : index
    %c0_1 = arith.constant 0 : index
    %0 = vector.load %arg1[%c0, %c0_0, %c0_1] : memref<2x64x64xbf16, #tpu.memory_space<vmem>>, vector<2x64x64xbf16>
    %1 = arith.extf %0 : vector<2x64x64xbf16> to vector<2x64x64xf32>
    %2 = vector.shape_cast %1 : vector<2x64x64xf32> to vector<2x8x8x64xf32>
    %c0_2 = arith.constant 0 : index
    %c0_3 = arith.constant 0 : index
    %3 = vector.load %arg2[%c0_2, %c0_3] : memref<1x64xf32, #tpu.memory_space<vmem>>, vector<1x64xf32>
    %4 = vector.shape_cast %3 : vector<1x64xf32> to vector<1x1x1x64xf32>
    %5 = vector.broadcast %4 : vector<1x1x1x64xf32> to vector<2x8x8x64xf32>
    %6 = arith.mulf %2, %5 : vector<2x8x8x64xf32>
    %c0_4 = arith.constant 0 : index
    %c0_5 = arith.constant 0 : index
    %7 = vector.load %arg3[%c0_4, %c0_5] : memref<1x64xf32, #tpu.memory_space<vmem>>, vector<1x64xf32>
    %8 = vector.shape_cast %7 : vector<1x64xf32> to vector<1x1x1x64xf32>
    %9 = vector.broadcast %8 : vector<1x1x1x64xf32> to vector<2x8x8x64xf32>
    %10 = arith.addf %6, %9 : vector<2x8x8x64xf32>
    %11 = vector.shape_cast %10 : vector<2x8x8x64xf32> to vector<2x4x2x8x64xf32>
    %12 = vector.extract_strided_slice %11 {offsets = [0, 0, 0, 0, 0], sizes = [2, 4, 1, 8, 64], strides = [1, 1, 1, 1, 1]} : vector<2x4x2x8x64xf32> to vector<2x4x1x8x64xf32>
    %13 = vector.shape_cast %12 : vector<2x4x1x8x64xf32> to vector<2x4x8x64xf32>
    %14 = vector.extract_strided_slice %11 {offsets = [0, 0, 1, 0, 0], sizes = [2, 4, 1, 8, 64], strides = [1, 1, 1, 1, 1]} : vector<2x4x2x8x64xf32> to vector<2x4x1x8x64xf32>
    %15 = vector.shape_cast %14 : vector<2x4x1x8x64xf32> to vector<2x4x8x64xf32>
    %16 = arith.maximumf %13, %15 : vector<2x4x8x64xf32>
    %c0_6 = arith.constant 0 : index
    %c0_7 = arith.constant 0 : index
    %c0_8 = arith.constant 0 : index
    %c0_9 = arith.constant 0 : index
    %17 = vector.load %arg8[%c0_6, %c0_7, %c0_8, %c0_9] : memref<2x4x8x64xf32, #tpu.memory_space<vmem>>, vector<2x4x8x64xf32>
    tpu.vector_store %arg8[%c0_6, %c0_7, %c0_8, %c0_9], %16 {strides = array<i32>} : memref<2x4x8x64xf32, #tpu.memory_space<vmem>>, vector<2x4x8x64xf32>,
    %c0_10 = arith.constant 0 : index
    %c0_11 = arith.constant 0 : index
    %c0_12 = arith.constant 0 : index
    %c0_13 = arith.constant 0 : index
    %18 = tpu.strided_load %arg8[%c0_10, %c0_11, %c0_12, %c0_13] {strides = array<i32: 1, 1, 2, 1>} : memref<2x4x8x64xf32, #tpu.memory_space<vmem>>, vector<2x4x4x64xf32>
    %c0_14 = arith.constant 0 : index
    %c0_15 = arith.constant 0 : index
    %c1 = arith.constant 1 : index
    %c0_16 = arith.constant 0 : index
    %19 = tpu.strided_load %arg8[%c0_14, %c0_15, %c1, %c0_16] {strides = array<i32: 1, 1, 2, 1>} : memref<2x4x8x64xf32, #tpu.memory_space<vmem>>, vector<2x4x4x64xf32>
    %20 = arith.maximumf %18, %19 : vector<2x4x4x64xf32>
    %cst = arith.constant 0.000000e+00 : f32
    %21 = vector.broadcast %cst : f32 to vector<2x4x4x64xf32>
    %22 = arith.maximumf %20, %21 : vector<2x4x4x64xf32>
    %c0_17 = arith.constant 0 : index
    %c0_18 = arith.constant 0 : index
    %23 = vector.load %arg5[%c0_17, %c0_18] : memref<1x512xf32, #tpu.memory_space<vmem>>, vector<1x512xf32>
    %24 = vector.shape_cast %23 : vector<1x512xf32> to vector<1x512xf32>
    %25 = vector.broadcast %24 : vector<1x512xf32> to vector<2x512xf32>
    %26 = vector.extract_strided_slice %22 {offsets = [0, 0, 0, 0], sizes = [2, 1, 1, 64], strides = [1, 1, 1, 1]} : vector<2x4x4x64xf32> to vector<2x1x1x64xf32>
    %27 = vector.shape_cast %26 : vector<2x1x1x64xf32> to vector<2x64xf32>
    %28 = arith.truncf %27 : vector<2x64xf32> to vector<2x64xbf16>
    %c0_19 = arith.constant 0 : index
    %c0_20 = arith.constant 0 : index
    %c0_21 = arith.constant 0 : index
    %29 = vector.load %arg4[%c0_19, %c0_20, %c0_21] : memref<16x64x512xbf16, #tpu.memory_space<vmem>>, vector<1x64x512xbf16>
    %30 = vector.shape_cast %29 : vector<1x64x512xbf16> to vector<64x512xbf16>
    %cst_22 = arith.constant dense<0.000000e+00> : vector<2x512xf32>
    %31 = tpu.matmul %28, %30, %cst_22 {dimension_numbers = #tpu.dot_dimension_numbers<[1], [0], [0], [1], [0, 0, 1, 1], [], []>} : vector<2x64xbf16>, vector<64x512xbf16>, vector<2x512xf32> -> vector<2x512xf32>
    %32 = arith.addf %25, %31 : vector<2x512xf32>
    %33 = vector.extract_strided_slice %22 {offsets = [0, 0, 1, 0], sizes = [2, 1, 1, 64], strides = [1, 1, 1, 1]} : vector<2x4x4x64xf32> to vector<2x1x1x64xf32>
    %34 = vector.shape_cast %33 : vector<2x1x1x64xf32> to vector<2x64xf32>
    %35 = arith.truncf %34 : vector<2x64xf32> to vector<2x64xbf16>
    %c1_23 = arith.constant 1 : index
    %c0_24 = arith.constant 0 : index
    %c0_25 = arith.constant 0 : index
    %36 = vector.load %arg4[%c1_23, %c0_24, %c0_25] : memref<16x64x512xbf16, #tpu.memory_space<vmem>>, vector<1x64x512xbf16>
    %37 = vector.shape_cast %36 : vector<1x64x512xbf16> to vector<64x512xbf16>
    %cst_26 = arith.constant dense<0.000000e+00> : vector<2x512xf32>
    %38 = tpu.matmul %35, %37, %cst_26 {dimension_numbers = #tpu.dot_dimension_numbers<[1], [0], [0], [1], [0, 0, 1, 1], [], []>} : vector<2x64xbf16>, vector<64x512xbf16>, vector<2x512xf32> -> vector<2x512xf32>
    %39 = arith.addf %32, %38 : vector<2x512xf32>
    %40 = vector.extract_strided_slice %22 {offsets = [0, 0, 2, 0], sizes = [2, 1, 1, 64], strides = [1, 1, 1, 1]} : vector<2x4x4x64xf32> to vector<2x1x1x64xf32>
    %41 = vector.shape_cast %40 : vector<2x1x1x64xf32> to vector<2x64xf32>
    %42 = arith.truncf %41 : vector<2x64xf32> to vector<2x64xbf16>
    %c2 = arith.constant 2 : index
    %c0_27 = arith.constant 0 : index
    %c0_28 = arith.constant 0 : index
    %43 = vector.load %arg4[%c2, %c0_27, %c0_28] : memref<16x64x512xbf16, #tpu.memory_space<vmem>>, vector<1x64x512xbf16>
    %44 = vector.shape_cast %43 : vector<1x64x512xbf16> to vector<64x512xbf16>
    %cst_29 = arith.constant dense<0.000000e+00> : vector<2x512xf32>
    %45 = tpu.matmul %42, %44, %cst_29 {dimension_numbers = #tpu.dot_dimension_numbers<[1], [0], [0], [1], [0, 0, 1, 1], [], []>} : vector<2x64xbf16>, vector<64x512xbf16>, vector<2x512xf32> -> vector<2x512xf32>
    %46 = arith.addf %39, %45 : vector<2x512xf32>
    %47 = vector.extract_strided_slice %22 {offsets = [0, 0, 3, 0], sizes = [2, 1, 1, 64], strides = [1, 1, 1, 1]} : vector<2x4x4x64xf32> to vector<2x1x1x64xf32>
    %48 = vector.shape_cast %47 : vector<2x1x1x64xf32> to vector<2x64xf32>
    %49 = arith.truncf %48 : vector<2x64xf32> to vector<2x64xbf16>
    %c3 = arith.constant 3 : index
    %c0_30 = arith.constant 0 : index
    %c0_31 = arith.constant 0 : index
    %50 = vector.load %arg4[%c3, %c0_30, %c0_31] : memref<16x64x512xbf16, #tpu.memory_space<vmem>>, vector<1x64x512xbf16>
    %51 = vector.shape_cast %50 : vector<1x64x512xbf16> to vector<64x512xbf16>
    %cst_32 = arith.constant dense<0.000000e+00> : vector<2x512xf32>
    %52 = tpu.matmul %49, %51, %cst_32 {dimension_numbers = #tpu.dot_dimension_numbers<[1], [0], [0], [1], [0, 0, 1, 1], [], []>} : vector<2x64xbf16>, vector<64x512xbf16>, vector<2x512xf32> -> vector<2x512xf32>
    %53 = arith.addf %46, %52 : vector<2x512xf32>
    %54 = vector.extract_strided_slice %22 {offsets = [0, 1, 0, 0], sizes = [2, 1, 1, 64], strides = [1, 1, 1, 1]} : vector<2x4x4x64xf32> to vector<2x1x1x64xf32>
    %55 = vector.shape_cast %54 : vector<2x1x1x64xf32> to vector<2x64xf32>
    %56 = arith.truncf %55 : vector<2x64xf32> to vector<2x64xbf16>
    %c4 = arith.constant 4 : index
    %c0_33 = arith.constant 0 : index
    %c0_34 = arith.constant 0 : index
    %57 = vector.load %arg4[%c4, %c0_33, %c0_34] : memref<16x64x512xbf16, #tpu.memory_space<vmem>>, vector<1x64x512xbf16>
    %58 = vector.shape_cast %57 : vector<1x64x512xbf16> to vector<64x512xbf16>
    %cst_35 = arith.constant dense<0.000000e+00> : vector<2x512xf32>
    %59 = tpu.matmul %56, %58, %cst_35 {dimension_numbers = #tpu.dot_dimension_numbers<[1], [0], [0], [1], [0, 0, 1, 1], [], []>} : vector<2x64xbf16>, vector<64x512xbf16>, vector<2x512xf32> -> vector<2x512xf32>
    %60 = arith.addf %53, %59 : vector<2x512xf32>
    %61 = vector.extract_strided_slice %22 {offsets = [0, 1, 1, 0], sizes = [2, 1, 1, 64], strides = [1, 1, 1, 1]} : vector<2x4x4x64xf32> to vector<2x1x1x64xf32>
    %62 = vector.shape_cast %61 : vector<2x1x1x64xf32> to vector<2x64xf32>
    %63 = arith.truncf %62 : vector<2x64xf32> to vector<2x64xbf16>
    %c5 = arith.constant 5 : index
    %c0_36 = arith.constant 0 : index
    %c0_37 = arith.constant 0 : index
    %64 = vector.load %arg4[%c5, %c0_36, %c0_37] : memref<16x64x512xbf16, #tpu.memory_space<vmem>>, vector<1x64x512xbf16>
    %65 = vector.shape_cast %64 : vector<1x64x512xbf16> to vector<64x512xbf16>
    %cst_38 = arith.constant dense<0.000000e+00> : vector<2x512xf32>
    %66 = tpu.matmul %63, %65, %cst_38 {dimension_numbers = #tpu.dot_dimension_numbers<[1], [0], [0], [1], [0, 0, 1, 1], [], []>} : vector<2x64xbf16>, vector<64x512xbf16>, vector<2x512xf32> -> vector<2x512xf32>
    %67 = arith.addf %60, %66 : vector<2x512xf32>
    %68 = vector.extract_strided_slice %22 {offsets = [0, 1, 2, 0], sizes = [2, 1, 1, 64], strides = [1, 1, 1, 1]} : vector<2x4x4x64xf32> to vector<2x1x1x64xf32>
    %69 = vector.shape_cast %68 : vector<2x1x1x64xf32> to vector<2x64xf32>
    %70 = arith.truncf %69 : vector<2x64xf32> to vector<2x64xbf16>
    %c6 = arith.constant 6 : index
    %c0_39 = arith.constant 0 : index
    %c0_40 = arith.constant 0 : index
    %71 = vector.load %arg4[%c6, %c0_39, %c0_40] : memref<16x64x512xbf16, #tpu.memory_space<vmem>>, vector<1x64x512xbf16>
    %72 = vector.shape_cast %71 : vector<1x64x512xbf16> to vector<64x512xbf16>
    %cst_41 = arith.constant dense<0.000000e+00> : vector<2x512xf32>
    %73 = tpu.matmul %70, %72, %cst_41 {dimension_numbers = #tpu.dot_dimension_numbers<[1], [0], [0], [1], [0, 0, 1, 1], [], []>} : vector<2x64xbf16>, vector<64x512xbf16>, vector<2x512xf32> -> vector<2x512xf32>
    %74 = arith.addf %67, %73 : vector<2x512xf32>
    %75 = vector.extract_strided_slice %22 {offsets = [0, 1, 3, 0], sizes = [2, 1, 1, 64], strides = [1, 1, 1, 1]} : vector<2x4x4x64xf32> to vector<2x1x1x64xf32>
    %76 = vector.shape_cast %75 : vector<2x1x1x64xf32> to vector<2x64xf32>
    %77 = arith.truncf %76 : vector<2x64xf32> to vector<2x64xbf16>
    %c7 = arith.constant 7 : index
    %c0_42 = arith.constant 0 : index
    %c0_43 = arith.constant 0 : index
    %78 = vector.load %arg4[%c7, %c0_42, %c0_43] : memref<16x64x512xbf16, #tpu.memory_space<vmem>>, vector<1x64x512xbf16>
    %79 = vector.shape_cast %78 : vector<1x64x512xbf16> to vector<64x512xbf16>
    %cst_44 = arith.constant dense<0.000000e+00> : vector<2x512xf32>
    %80 = tpu.matmul %77, %79, %cst_44 {dimension_numbers = #tpu.dot_dimension_numbers<[1], [0], [0], [1], [0, 0, 1, 1], [], []>} : vector<2x64xbf16>, vector<64x512xbf16>, vector<2x512xf32> -> vector<2x512xf32>
    %81 = arith.addf %74, %80 : vector<2x512xf32>
    %82 = vector.extract_strided_slice %22 {offsets = [0, 2, 0, 0], sizes = [2, 1, 1, 64], strides = [1, 1, 1, 1]} : vector<2x4x4x64xf32> to vector<2x1x1x64xf32>
    %83 = vector.shape_cast %82 : vector<2x1x1x64xf32> to vector<2x64xf32>
    %84 = arith.truncf %83 : vector<2x64xf32> to vector<2x64xbf16>
    %c8 = arith.constant 8 : index
    %c0_45 = arith.constant 0 : index
    %c0_46 = arith.constant 0 : index
    %85 = vector.load %arg4[%c8, %c0_45, %c0_46] : memref<16x64x512xbf16, #tpu.memory_space<vmem>>, vector<1x64x512xbf16>
    %86 = vector.shape_cast %85 : vector<1x64x512xbf16> to vector<64x512xbf16>
    %cst_47 = arith.constant dense<0.000000e+00> : vector<2x512xf32>
    %87 = tpu.matmul %84, %86, %cst_47 {dimension_numbers = #tpu.dot_dimension_numbers<[1], [0], [0], [1], [0, 0, 1, 1], [], []>} : vector<2x64xbf16>, vector<64x512xbf16>, vector<2x512xf32> -> vector<2x512xf32>
    %88 = arith.addf %81, %87 : vector<2x512xf32>
    %89 = vector.extract_strided_slice %22 {offsets = [0, 2, 1, 0], sizes = [2, 1, 1, 64], strides = [1, 1, 1, 1]} : vector<2x4x4x64xf32> to vector<2x1x1x64xf32>
    %90 = vector.shape_cast %89 : vector<2x1x1x64xf32> to vector<2x64xf32>
    %91 = arith.truncf %90 : vector<2x64xf32> to vector<2x64xbf16>
    %c9 = arith.constant 9 : index
    %c0_48 = arith.constant 0 : index
    %c0_49 = arith.constant 0 : index
    %92 = vector.load %arg4[%c9, %c0_48, %c0_49] : memref<16x64x512xbf16, #tpu.memory_space<vmem>>, vector<1x64x512xbf16>
    %93 = vector.shape_cast %92 : vector<1x64x512xbf16> to vector<64x512xbf16>
    %cst_50 = arith.constant dense<0.000000e+00> : vector<2x512xf32>
    %94 = tpu.matmul %91, %93, %cst_50 {dimension_numbers = #tpu.dot_dimension_numbers<[1], [0], [0], [1], [0, 0, 1, 1], [], []>} : vector<2x64xbf16>, vector<64x512xbf16>, vector<2x512xf32> -> vector<2x512xf32>
    %95 = arith.addf %88, %94 : vector<2x512xf32>
    %96 = vector.extract_strided_slice %22 {offsets = [0, 2, 2, 0], sizes = [2, 1, 1, 64], strides = [1, 1, 1, 1]} : vector<2x4x4x64xf32> to vector<2x1x1x64xf32>
    %97 = vector.shape_cast %96 : vector<2x1x1x64xf32> to vector<2x64xf32>
    %98 = arith.truncf %97 : vector<2x64xf32> to vector<2x64xbf16>
    %c10 = arith.constant 10 : index
    %c0_51 = arith.constant 0 : index
    %c0_52 = arith.constant 0 : index
    %99 = vector.load %arg4[%c10, %c0_51, %c0_52] : memref<16x64x512xbf16, #tpu.memory_space<vmem>>, vector<1x64x512xbf16>
    %100 = vector.shape_cast %99 : vector<1x64x512xbf16> to vector<64x512xbf16>
    %cst_53 = arith.constant dense<0.000000e+00> : vector<2x512xf32>
    %101 = tpu.matmul %98, %100, %cst_53 {dimension_numbers = #tpu.dot_dimension_numbers<[1], [0], [0], [1], [0, 0, 1, 1], [], []>} : vector<2x64xbf16>, vector<64x512xbf16>, vector<2x512xf32> -> vector<2x512xf32>
    %102 = arith.addf %95, %101 : vector<2x512xf32>
    %103 = vector.extract_strided_slice %22 {offsets = [0, 2, 3, 0], sizes = [2, 1, 1, 64], strides = [1, 1, 1, 1]} : vector<2x4x4x64xf32> to vector<2x1x1x64xf32>
    %104 = vector.shape_cast %103 : vector<2x1x1x64xf32> to vector<2x64xf32>
    %105 = arith.truncf %104 : vector<2x64xf32> to vector<2x64xbf16>
    %c11 = arith.constant 11 : index
    %c0_54 = arith.constant 0 : index
    %c0_55 = arith.constant 0 : index
    %106 = vector.load %arg4[%c11, %c0_54, %c0_55] : memref<16x64x512xbf16, #tpu.memory_space<vmem>>, vector<1x64x512xbf16>
    %107 = vector.shape_cast %106 : vector<1x64x512xbf16> to vector<64x512xbf16>
    %cst_56 = arith.constant dense<0.000000e+00> : vector<2x512xf32>
    %108 = tpu.matmul %105, %107, %cst_56 {dimension_numbers = #tpu.dot_dimension_numbers<[1], [0], [0], [1], [0, 0, 1, 1], [], []>} : vector<2x64xbf16>, vector<64x512xbf16>, vector<2x512xf32> -> vector<2x512xf32>
    %109 = arith.addf %102, %108 : vector<2x512xf32>
    %110 = vector.extract_strided_slice %22 {offsets = [0, 3, 0, 0], sizes = [2, 1, 1, 64], strides = [1, 1, 1, 1]} : vector<2x4x4x64xf32> to vector<2x1x1x64xf32>
    %111 = vector.shape_cast %110 : vector<2x1x1x64xf32> to vector<2x64xf32>
    %112 = arith.truncf %111 : vector<2x64xf32> to vector<2x64xbf16>
    %c12 = arith.constant 12 : index
    %c0_57 = arith.constant 0 : index
    %c0_58 = arith.constant 0 : index
    %113 = vector.load %arg4[%c12, %c0_57, %c0_58] : memref<16x64x512xbf16, #tpu.memory_space<vmem>>, vector<1x64x512xbf16>
    %114 = vector.shape_cast %113 : vector<1x64x512xbf16> to vector<64x512xbf16>
    %cst_59 = arith.constant dense<0.000000e+00> : vector<2x512xf32>
    %115 = tpu.matmul %112, %114, %cst_59 {dimension_numbers = #tpu.dot_dimension_numbers<[1], [0], [0], [1], [0, 0, 1, 1], [], []>} : vector<2x64xbf16>, vector<64x512xbf16>, vector<2x512xf32> -> vector<2x512xf32>
    %116 = arith.addf %109, %115 : vector<2x512xf32>
    %117 = vector.extract_strided_slice %22 {offsets = [0, 3, 1, 0], sizes = [2, 1, 1, 64], strides = [1, 1, 1, 1]} : vector<2x4x4x64xf32> to vector<2x1x1x64xf32>
    %118 = vector.shape_cast %117 : vector<2x1x1x64xf32> to vector<2x64xf32>
    %119 = arith.truncf %118 : vector<2x64xf32> to vector<2x64xbf16>
    %c13 = arith.constant 13 : index
    %c0_60 = arith.constant 0 : index
    %c0_61 = arith.constant 0 : index
    %120 = vector.load %arg4[%c13, %c0_60, %c0_61] : memref<16x64x512xbf16, #tpu.memory_space<vmem>>, vector<1x64x512xbf16>
    %121 = vector.shape_cast %120 : vector<1x64x512xbf16> to vector<64x512xbf16>
    %cst_62 = arith.constant dense<0.000000e+00> : vector<2x512xf32>
    %122 = tpu.matmul %119, %121, %cst_62 {dimension_numbers = #tpu.dot_dimension_numbers<[1], [0], [0], [1], [0, 0, 1, 1], [], []>} : vector<2x64xbf16>, vector<64x512xbf16>, vector<2x512xf32> -> vector<2x512xf32>
    %123 = arith.addf %116, %122 : vector<2x512xf32>
    %124 = vector.extract_strided_slice %22 {offsets = [0, 3, 2, 0], sizes = [2, 1, 1, 64], strides = [1, 1, 1, 1]} : vector<2x4x4x64xf32> to vector<2x1x1x64xf32>
    %125 = vector.shape_cast %124 : vector<2x1x1x64xf32> to vector<2x64xf32>
    %126 = arith.truncf %125 : vector<2x64xf32> to vector<2x64xbf16>
    %c14 = arith.constant 14 : index
    %c0_63 = arith.constant 0 : index
    %c0_64 = arith.constant 0 : index
    %127 = vector.load %arg4[%c14, %c0_63, %c0_64] : memref<16x64x512xbf16, #tpu.memory_space<vmem>>, vector<1x64x512xbf16>
    %128 = vector.shape_cast %127 : vector<1x64x512xbf16> to vector<64x512xbf16>
    %cst_65 = arith.constant dense<0.000000e+00> : vector<2x512xf32>
    %129 = tpu.matmul %126, %128, %cst_65 {dimension_numbers = #tpu.dot_dimension_numbers<[1], [0], [0], [1], [0, 0, 1, 1], [], []>} : vector<2x64xbf16>, vector<64x512xbf16>, vector<2x512xf32> -> vector<2x512xf32>
    %130 = arith.addf %123, %129 : vector<2x512xf32>
    %131 = vector.extract_strided_slice %22 {offsets = [0, 3, 3, 0], sizes = [2, 1, 1, 64], strides = [1, 1, 1, 1]} : vector<2x4x4x64xf32> to vector<2x1x1x64xf32>
    %132 = vector.shape_cast %131 : vector<2x1x1x64xf32> to vector<2x64xf32>
    %133 = arith.truncf %132 : vector<2x64xf32> to vector<2x64xbf16>
    %c15 = arith.constant 15 : index
    %c0_66 = arith.constant 0 : index
    %c0_67 = arith.constant 0 : index
    %134 = vector.load %arg4[%c15, %c0_66, %c0_67] : memref<16x64x512xbf16, #tpu.memory_space<vmem>>, vector<1x64x512xbf16>
    %135 = vector.shape_cast %134 : vector<1x64x512xbf16> to vector<64x512xbf16>
    %cst_68 = arith.constant dense<0.000000e+00> : vector<2x512xf32>
    %136 = tpu.matmul %133, %135, %cst_68 {dimension_numbers = #tpu.dot_dimension_numbers<[1], [0], [0], [1], [0, 0, 1, 1], [], []>} : vector<2x64xbf16>, vector<64x512xbf16>, vector<2x512xf32> -> vector<2x512xf32>
    %137 = arith.addf %130, %136 : vector<2x512xf32>
    %c0_69 = arith.constant 0 : index
    %c0_70 = arith.constant 0 : index
    %138 = vector.load %arg6[%c0_69, %c0_70] : memref<2x512xf32, #tpu.memory_space<vmem>>, vector<2x512xf32>
    tpu.vector_store %arg6[%c0_69, %c0_70], %137 {strides = array<i32>} : memref<2x512xf32, #tpu.memory_space<vmem>>, vector<2x512xf32>,
    %cst_71 = arith.constant dense<0.000000e+00> : vector<512xf32>
    %139 = vector.multi_reduction <add>, %137, %cst_71 [0] : vector<2x512xf32> to vector<512xf32>
    %140 = vector.shape_cast %139 : vector<512xf32> to vector<1x512xf32>
    %141 = arith.mulf %137, %137 : vector<2x512xf32>
    %cst_72 = arith.constant dense<0.000000e+00> : vector<512xf32>
    %142 = vector.multi_reduction <add>, %141, %cst_72 [0] : vector<2x512xf32> to vector<512xf32>
    %143 = vector.shape_cast %142 : vector<512xf32> to vector<1x512xf32>
    %144 = tpu.concatenate %140, %143 in 0 : vector<1x512xf32>, vector<1x512xf32> -> vector<2x512xf32>
    %145 = vector.shape_cast %144 : vector<2x512xf32> to vector<1x2x512xf32>
    %c0_73 = arith.constant 0 : index
    %c0_74 = arith.constant 0 : index
    %c0_75 = arith.constant 0 : index
    %146 = vector.load %arg7[%c0_73, %c0_74, %c0_75] : memref<1x2x512xf32, #tpu.memory_space<vmem>>, vector<1x2x512xf32>
    tpu.vector_store %arg7[%c0_73, %c0_74, %c0_75], %145 {strides = array<i32>} : memref<1x2x512xf32, #tpu.memory_space<vmem>>, vector<1x2x512xf32>,
    return
  }
  func.func @transform_0(%arg0: i32) -> (i32, i32, i32) {
    %c0_i32 = arith.constant 0 : i32
    %c0_i32_0 = arith.constant 0 : i32
    %c0_i32_1 = arith.constant 0 : i32
    return %arg0, %c0_i32, %c0_i32_0 : i32, i32, i32
  }
  func.func @transform_1(%arg0: i32) -> (i32, i32) {
    %c0_i32 = arith.constant 0 : i32
    %c0_i32_0 = arith.constant 0 : i32
    %c0_i32_1 = arith.constant 0 : i32
    return %c0_i32, %c0_i32_0 : i32, i32
  }
  func.func @transform_2(%arg0: i32) -> (i32, i32) {
    %c0_i32 = arith.constant 0 : i32
    %c0_i32_0 = arith.constant 0 : i32
    %c0_i32_1 = arith.constant 0 : i32
    return %c0_i32, %c0_i32_0 : i32, i32
  }
  func.func @transform_3(%arg0: i32) -> (i32, i32, i32) {
    %c0_i32 = arith.constant 0 : i32
    %c0_i32_0 = arith.constant 0 : i32
    %c0_i32_1 = arith.constant 0 : i32
    %c0_i32_2 = arith.constant 0 : i32
    return %c0_i32, %c0_i32_0, %c0_i32_1 : i32, i32, i32
  }
  func.func @transform_4(%arg0: i32) -> (i32, i32) {
    %c0_i32 = arith.constant 0 : i32
    %c0_i32_0 = arith.constant 0 : i32
    %c0_i32_1 = arith.constant 0 : i32
    return %c0_i32, %c0_i32_0 : i32, i32
  }
  func.func @transform_5(%arg0: i32) -> (i32, i32) {
    %c0_i32 = arith.constant 0 : i32
    %c0_i32_0 = arith.constant 0 : i32
    return %arg0, %c0_i32 : i32, i32
  }
  func.func @transform_6(%arg0: i32) -> (i32, i32, i32) {
    %c0_i32 = arith.constant 0 : i32
    %c0_i32_0 = arith.constant 0 : i32
    %c0_i32_1 = arith.constant 0 : i32
    return %arg0, %c0_i32, %c0_i32_0 : i32, i32, i32
  }
}

module attributes {stable_mosaic.version = 11 : i64} {
  func.func @_out_kernel(%arg0: i32, %arg1: memref<2x512xf32, #tpu.memory_space<vmem>>, %arg2: memref<1x512xf32, #tpu.memory_space<vmem>>, %arg3: memref<1x512xf32, #tpu.memory_space<vmem>>, %arg4: memref<512x128xbf16, #tpu.memory_space<vmem>>, %arg5: memref<1x128xf32, #tpu.memory_space<vmem>>, %arg6: memref<2x128xf32, #tpu.memory_space<vmem>>) attributes {dimension_semantics = [#tpu.dimension_semantics<parallel>], iteration_bounds = array<i64: 1>, scalar_prefetch = 0 : i64, scratch_operands = 0 : i64, tpu.core_type = #tpu.core_type<tc>, window_params = [{transform_indices = @transform_0, window_bounds = array<i64: 2, 512>}, {pipeline_mode = #tpu.pipeline_mode<synchronous>, transform_indices = @transform_1, window_bounds = array<i64: 1, 512>}, {pipeline_mode = #tpu.pipeline_mode<synchronous>, transform_indices = @transform_2, window_bounds = array<i64: 1, 512>}, {pipeline_mode = #tpu.pipeline_mode<synchronous>, transform_indices = @transform_3, window_bounds = array<i64: 512, 128>}, {pipeline_mode = #tpu.pipeline_mode<synchronous>, transform_indices = @transform_4, window_bounds = array<i64: 1, 128>}, {transform_indices = @transform_5, window_bounds = array<i64: 2, 128>}]} {
    %c0 = arith.constant 0 : index
    %c0_0 = arith.constant 0 : index
    %0 = vector.load %arg1[%c0, %c0_0] : memref<2x512xf32, #tpu.memory_space<vmem>>, vector<2x512xf32>
    %c0_1 = arith.constant 0 : index
    %c0_2 = arith.constant 0 : index
    %1 = vector.load %arg2[%c0_1, %c0_2] : memref<1x512xf32, #tpu.memory_space<vmem>>, vector<1x512xf32>
    %2 = vector.broadcast %1 : vector<1x512xf32> to vector<2x512xf32>
    %3 = arith.mulf %0, %2 : vector<2x512xf32>
    %c0_3 = arith.constant 0 : index
    %c0_4 = arith.constant 0 : index
    %4 = vector.load %arg3[%c0_3, %c0_4] : memref<1x512xf32, #tpu.memory_space<vmem>>, vector<1x512xf32>
    %5 = vector.broadcast %4 : vector<1x512xf32> to vector<2x512xf32>
    %6 = arith.addf %3, %5 : vector<2x512xf32>
    %cst = arith.constant 0.000000e+00 : f32
    %7 = vector.broadcast %cst : f32 to vector<2x512xf32>
    %8 = arith.maximumf %6, %7 : vector<2x512xf32>
    %9 = arith.truncf %8 : vector<2x512xf32> to vector<2x512xbf16>
    %c0_5 = arith.constant 0 : index
    %c0_6 = arith.constant 0 : index
    %10 = vector.load %arg4[%c0_5, %c0_6] : memref<512x128xbf16, #tpu.memory_space<vmem>>, vector<512x128xbf16>
    %cst_7 = arith.constant dense<0.000000e+00> : vector<2x128xf32>
    %11 = tpu.matmul %9, %10, %cst_7 {dimension_numbers = #tpu.dot_dimension_numbers<[1], [0], [0], [1], [0, 0, 1, 1], [], []>} : vector<2x512xbf16>, vector<512x128xbf16>, vector<2x128xf32> -> vector<2x128xf32>
    %c0_8 = arith.constant 0 : index
    %c0_9 = arith.constant 0 : index
    %12 = vector.load %arg5[%c0_8, %c0_9] : memref<1x128xf32, #tpu.memory_space<vmem>>, vector<1x128xf32>
    %13 = vector.broadcast %12 : vector<1x128xf32> to vector<2x128xf32>
    %14 = arith.addf %11, %13 : vector<2x128xf32>
    %cst_10 = arith.constant dense<0xFF800000> : vector<2xf32>
    %15 = vector.multi_reduction <maximumf>, %14, %cst_10 [1] : vector<2x128xf32> to vector<2xf32>
    %16 = vector.shape_cast %15 : vector<2xf32> to vector<2x1xf32>
    %17 = vector.broadcast %16 : vector<2x1xf32> to vector<2x128xf32>
    %18 = arith.subf %14, %17 : vector<2x128xf32>
    %19 = math.exp %18 : vector<2x128xf32>
    %cst_11 = arith.constant dense<0.000000e+00> : vector<2xf32>
    %20 = vector.multi_reduction <add>, %19, %cst_11 [1] : vector<2x128xf32> to vector<2xf32>
    %21 = vector.shape_cast %20 : vector<2xf32> to vector<2x1xf32>
    %22 = math.log %21 : vector<2x1xf32>
    %23 = vector.broadcast %22 : vector<2x1xf32> to vector<2x128xf32>
    %24 = arith.subf %18, %23 : vector<2x128xf32>
    %c0_12 = arith.constant 0 : index
    %c0_13 = arith.constant 0 : index
    %25 = vector.load %arg6[%c0_12, %c0_13] : memref<2x128xf32, #tpu.memory_space<vmem>>, vector<2x128xf32>
    tpu.vector_store %arg6[%c0_12, %c0_13], %24 {strides = array<i32>} : memref<2x128xf32, #tpu.memory_space<vmem>>, vector<2x128xf32>,
    return
  }
  func.func @transform_0(%arg0: i32) -> (i32, i32) {
    %c0_i32 = arith.constant 0 : i32
    %c0_i32_0 = arith.constant 0 : i32
    return %arg0, %c0_i32 : i32, i32
  }
  func.func @transform_1(%arg0: i32) -> (i32, i32) {
    %c0_i32 = arith.constant 0 : i32
    %c0_i32_0 = arith.constant 0 : i32
    %c0_i32_1 = arith.constant 0 : i32
    return %c0_i32, %c0_i32_0 : i32, i32
  }
  func.func @transform_2(%arg0: i32) -> (i32, i32) {
    %c0_i32 = arith.constant 0 : i32
    %c0_i32_0 = arith.constant 0 : i32
    %c0_i32_1 = arith.constant 0 : i32
    return %c0_i32, %c0_i32_0 : i32, i32
  }
  func.func @transform_3(%arg0: i32) -> (i32, i32) {
    %c0_i32 = arith.constant 0 : i32
    %c0_i32_0 = arith.constant 0 : i32
    %c0_i32_1 = arith.constant 0 : i32
    return %c0_i32, %c0_i32_0 : i32, i32
  }
  func.func @transform_4(%arg0: i32) -> (i32, i32) {
    %c0_i32 = arith.constant 0 : i32
    %c0_i32_0 = arith.constant 0 : i32
    %c0_i32_1 = arith.constant 0 : i32
    return %c0_i32, %c0_i32_0 : i32, i32
  }
  func.func @transform_5(%arg0: i32) -> (i32, i32) {
    %c0_i32 = arith.constant 0 : i32
    %c0_i32_0 = arith.constant 0 : i32
    return %arg0, %c0_i32 : i32, i32
  }
}

</mosaic_0001>

<bundles_post_ra>
// kernel: cnn_batch_forward.5
= control target key start
LH: loop header
LB: loop body
LE: loop exit
PB: predicated region body
PF: predicated region fallthrough
CT: control target
= control target key end

     0   :  { %vm31_vm0 = vcmask 1041408   ;;  %vm33_vm1 = vcmask 1045508   ;;  %s751_s0 = inlined_call_operand.vmem [shape: f32[2,512], index: 0, kind: input, shape index: {}]   ;;  %s752_s1 = inlined_call_operand.vmem [shape: f32[1,512], index: 1, kind: input, shape index: {}]   ;;  %s753_s2 = inlined_call_operand.vmem [shape: f32[1,512], index: 2, kind: input, shape index: {}]   ;;  %s754_s3 = inlined_call_operand.vmem [shape: bf16[512,128], index: 3, kind: input, shape index: {}]   ;;  %s755_s4 = inlined_call_operand.vmem [shape: f32[1,128], index: 4, kind: input, shape index: {}]   ;;  %s756_s5 = inlined_call_operand.hbm [shape: f32[2,128], index: 5, kind: output, shape index: {}]  }
   0x1   :  { %v544_v0 = vld [vmem:[%s754_s3 + $0x38] sm:$0xff]  ;;  %v543_v4 = vld [vmem:[%s754_s3 + $0x30] sm:$0xff]  ;;  %v542_v8 = vld [vmem:[%s754_s3 + $0x28] sm:$0xff] }
   0x2   :  { %v552_v1 = vld [vmem:[%s754_s3 + $0x78] sm:$0xff]  ;;  %328 = vmatpush.bf16.msra.mxu0 %v544_v0  ;;  %v551_v5 = vld [vmem:[%s754_s3 + $0x70] sm:$0xff]  ;;  %v550_v9 = vld [vmem:[%s754_s3 + $0x68] sm:$0xff] }
   0x3   :  { %v560_v2 = vld [vmem:[%s754_s3 + $0xb8] sm:$0xff]  ;;  %341 = vmatpush.bf16.msra.mxu1 %v552_v1  ;;  %v559_v6 = vld [vmem:[%s754_s3 + $0xb0] sm:$0xff]  ;;  %v558_v10 = vld [vmem:[%s754_s3 + $0xa8] sm:$0xff] }
   0x4   :  { %v568_v3 = vld [vmem:[%s754_s3 + $0xf8] sm:$0xff]  ;;  %354 = vmatpush.bf16.msra.mxu2 %v560_v2  ;;  %v567_v7 = vld [vmem:[%s754_s3 + $0xf0] sm:$0xff]  ;;  %v566_v11 = vld [vmem:[%s754_s3 + $0xe8] sm:$0xff] }
   0x5   :  { %367 = vmatpush.bf16.msra.mxu3 %v568_v3  ;;  %v541_v12 = vld [vmem:[%s754_s3 + $0x20] sm:$0xff] }
   0x6   :  { %329 = vmatpush.bf16.msra.mxu0 %v543_v4  ;;  %v549_v13 = vld [vmem:[%s754_s3 + $0x60] sm:$0xff] }
   0x7   :  { %342 = vmatpush.bf16.msra.mxu1 %v551_v5  ;;  %v557_v14 = vld [vmem:[%s754_s3 + $0xa0] sm:$0xff] }
   0x8   :  { %355 = vmatpush.bf16.msra.mxu2 %v559_v6  ;;  %v565_v15 = vld [vmem:[%s754_s3 + $0xe0] sm:$0xff] }
   0x9   :  { %368 = vmatpush.bf16.msra.mxu3 %v567_v7  ;;  %v22_v16 = vld [vmem:[%s752_s1] sm:$0xf] }
   0xa   :  { %330 = vmatpush.bf16.msra.mxu0 %v542_v8  ;;  %v39_v17 = vld [vmem:[%s753_s2] sm:$0xf]  ;;  %v24_v18 = vperm.slane %v22_v16, 0  ;;  %v25_v19 = vperm.slane %v22_v16, 1  ;;  %v26_v20 = vperm.slane %v22_v16, 2  ;;  %v27_v21 = vperm.slane %v22_v16, 3 }
   0xb   :  { %343 = vmatpush.bf16.msra.mxu1 %v550_v9  ;;  %v41_v22 = vperm.slane %v39_v17, 0  ;;  %v42_v23 = vperm.slane %v39_v17, 1  ;;  %v43_v24 = vperm.slane %v39_v17, 2  ;;  %v44_v25 = vperm.slane %v39_v17, 3 }
   0xc   :  { %356 = vmatpush.bf16.msra.mxu2 %v558_v10 }
   0xd   :  { %369 = vmatpush.bf16.msra.mxu3 %v566_v11 }
   0xe   :  { %10 = vsyncpa [#allocation3], 0  ;;  %331 = vmatpush.bf16.msra.mxu0 %v541_v12  ;;  %v540_v26 = vld [vmem:[%s754_s3 + $0x18] sm:$0xff]  ;;  %v28_v28 = vrot.slane %v25_v19, 6  ;;  %v29_v29 = vrot.slane %v26_v20, 4  ;;  %v30_v30 = vrot.slane %v27_v21, 2 }
   0xf   :  { %344 = vmatpush.bf16.msra.mxu1 %v549_v13  ;;  %v548_v27 = vld [vmem:[%s754_s3 + $0x58] sm:$0xff]  ;;  %vm35_vm2 = vcmask 1043456   ;;  %v21_v33 = vld [vmem:[%s751_s0] sm:$0xff]  ;;  %v45_v34 = vrot.slane %v42_v23, 6  ;;  %v46_v35 = vrot.slane %v43_v24, 4  ;;  %v47_v36 = vrot.slane %v44_v25, 2 }
  0x10   :  { %357 = vmatpush.bf16.msra.mxu2 %v557_v14  ;;  %v556_v31 = vld [vmem:[%s754_s3 + $0x98] sm:$0xff]  ;;  %v32_v37 = vsel %vm31_vm0, %v24_v18, %v28_v28  ;;  %v34_v38 = vsel %vm33_vm1, %v29_v29, %v30_v30  ;;  %v539_v42 = vld [vmem:[%s754_s3 + $0x10] sm:$0xff]  ;;  %v538_v49 = vld [vmem:[%s754_s3 + $0x8] sm:$0xff]  ;;  %s400_s12 = sshll.u32 %s756_s5, 4  ;;  %s401_s12 = int_to_ptr.hbm [resolvable:$true] %s400_s12 }
  0x11   :  { %370 = vmatpush.bf16.msra.mxu3 %v565_v15  ;;  %v564_v32 = vld [vmem:[%s754_s3 + $0xd8] sm:$0xff]  ;;  %v36_v39 = vsel %vm35_vm2, %v32_v37, %v34_v38  ;;  %v48_v40 = vsel %vm31_vm0, %v41_v22, %v45_v34  ;;  %v49_v41 = vsel %vm33_vm1, %v46_v35, %v47_v36  ;;  %v547_v43 = vld [vmem:[%s754_s3 + $0x50] sm:$0xff]  ;;  %v546_v50 = vld [vmem:[%s754_s3 + $0x48] sm:$0xff] }
  0x12   :  { %332 = vmatpush.bf16.msra.mxu0 %v540_v26  ;;  %v38_v44 = vmul.f32 %v36_v39, %v21_v33  ;;  %v50_v45 = vsel %vm35_vm2, %v48_v40, %v49_v41  ;;  %v555_v46 = vld [vmem:[%s754_s3 + $0x90] sm:$0xff]  ;;  %v554_v52 = vld [vmem:[%s754_s3 + $0x88] sm:$0xff]  ;;  %v537_v54 = vld [vmem:[%s754_s3] sm:$0xff] }
  0x13   :  { %345 = vmatpush.bf16.msra.mxu1 %v548_v27  ;;  %v563_v47 = vld [vmem:[%s754_s3 + $0xd0] sm:$0xff]  ;;  %v562_v53 = vld [vmem:[%s754_s3 + $0xc8] sm:$0xff]  ;;  %v545_v55 = vld [vmem:[%s754_s3 + $0x40] sm:$0xff] }
  0x14   :  { %358 = vmatpush.bf16.msra.mxu2 %v556_v31  ;;  %v52_v48 = vadd.f32 %v50_v45, %v38_v44  ;;  %v553_v56 = vld [vmem:[%s754_s3 + $0x80] sm:$0xff] }
  0x15   :  { %371 = vmatpush.bf16.msra.mxu3 %v564_v32  ;;  %v561_v57 = vld [vmem:[%s754_s3 + $0xc0] sm:$0xff]  ;;  %s601_s3 = smov [#allocation2]  }
  0x16   :  { %333 = vmatpush.bf16.msra.mxu0 %v539_v42  ;;  %v53_v51 = vmax.f32 %v52_v48, 0.0  ;;  %v570_v2 = vld [vmem:[%s755_s4] ss:$0 sm:$0xff]  ;;  %s398_s4 = sshll.u32 %s601_s3, 4  ;;  %s399_s4 = int_to_ptr.vmem [resolvable:$true] %s398_s4 }
  0x17   :  { %346 = vmatpush.bf16.msra.mxu1 %v547_v43 }
  0x18   :  { %359 = vmatpush.bf16.msra.mxu2 %v555_v46  ;;  %55 = vst [vmem:[#allocation1] ss:$4 sm:$0xff] %v53_v51 }
  0x19   :  { %372 = vmatpush.bf16.msra.mxu3 %v563_v47 }
  0x1a   :  { %334 = vmatpush.bf16.msra.mxu0 %v538_v49 }
  0x1b   :  { %347 = vmatpush.bf16.msra.mxu1 %v546_v50 }
  0x1c   :  { %360 = vmatpush.bf16.msra.mxu2 %v554_v52 }
  0x1d   :  { %373 = vmatpush.bf16.msra.mxu3 %v562_v53 }
  0x1e   :  { %335 = vmatpush.bf16.msra.mxu0 %v537_v54 }
  0x1f   :  { %348 = vmatpush.bf16.msra.mxu1 %v545_v55  ;;  %v56_v58 = vld.sshfl [vmem:[#allocation1] sm:$0xff pattern:$0x73625140]  ;;  %v57_v59 = vld.sshfl [vmem:[#allocation1 + $0x8] sm:$0xff pattern:$0x73625140] }
  0x20   :  { %361 = vmatpush.bf16.msra.mxu2 %v553_v56  ;;  %v64_v60 = vpack.c.bf16 %v56_v58, %v56_v58  ;;  %v65_v61 = vpack.c.bf16 %v57_v59, %v57_v59  ;;  %v58_v62 = vld.sshfl [vmem:[#allocation1 + $0x10] sm:$0xff pattern:$0x73625140]  ;;  %v59_v63 = vld.sshfl [vmem:[#allocation1 + $0x18] sm:$0xff pattern:$0x73625140] }
  0x21   :  { %374 = vmatpush.bf16.msra.mxu3 %v561_v57  ;;  %v66_v0 = vpack.c.bf16 %v58_v62, %v58_v62  ;;  %v67_v1 = vpack.c.bf16 %v59_v63, %v59_v63 }
  0x22   :  { %336 = vmatmul.bf16.vlgmr.msra.gmra.mxu0 %v64_v60  ;;  %349 = vmatmul.bf16.vlgmr.msra.gmra.mxu1 %v65_v61 }
  0x23   :  { %362 = vmatmul.bf16.vlgmr.msra.gmra.mxu2 %v66_v0 }
  0x24   :  { %375 = vmatmul.bf16.vlgmr.msra.gmra.mxu3 %v67_v1 }
  0x9f   :  { %v337_v3 = vpop.f32.mrf.mxu0  ;;  %v350_v4 = vpop.f32.mrf.mxu1 }
  0xa0   :  { %v338_v5 = vadd.f32 %v570_v2, %v337_v3 }
  0xa2   :  { %v351_v6 = vadd.f32 %v350_v4, %v338_v5 }
  0xa6   :  { %v363_v7 = vpop.f32.mrf.mxu2 }
  0xa7   :  { %v376_v8 = vpop.f32.mrf.mxu3  ;;  %v364_v9 = vadd.f32 %v363_v7, %v351_v6  ;;  %v339_v10 = vpop.f32.mrf.mxu0 }
  0xa8   :  { %v352_v11 = vpop.f32.mrf.mxu1 }
  0xa9   :  { %v377_v12 = vadd.f32 %v376_v8, %v364_v9 }
  0xab   :  { %v380_v13 = vsel %vm31_vm0, %v377_v12, -inf }
  0xac   :  { %381 = vmax.xlane.f32.xlu0 %v380_v13 }
  0xae   :  { %v365_v14 = vpop.f32.mrf.mxu2 }
  0xaf   :  { %v378_v15 = vpop.f32.mrf.mxu3 }
 0x11f   :  { %v382_v16 = vpop.xlane.xlu0 %381 }
 0x120   :  { %v383_v17 = vsub.f32 %v377_v12, %v382_v16 }
 0x122   :  { %v384_v18 = vmul.f32 1.442695, %v383_v17 }
 0x124   :  { %571 = vpow2.f32 %v384_v18 }
 0x12a   :  { %v572_v19 = vpop.eup %571 }
 0x12b   :  { %v386_v20 = vsel %vm31_vm0, %v572_v19, 0.0 }
 0x12c   :  { %387 = vadd.xlane.f32.xlu0 %v386_v20 }
 0x19f   :  { %v388_v21 = vpop.xlane.xlu0 %387 }
 0x1a0   :  { %573 = vlog2.f32 %v388_v21 }
 0x1a6   :  { %v574_v22 = vpop.eup %573 }
 0x1a7   :  { %v390_v23 = vmul.f32 0.6931472, %v574_v22 }
 0x1a9   :  { %v391_v24 = vsub.f32 %v383_v17, %v390_v23 }
 0x1ab   :  { %392 = vst [vmem:[#allocation2] sm:$0x3] %v391_v24 }
 0x1ac   :  { %403 = dma.vmem_to_hbm [thread:$0]  %s399_s4, 32, %s401_s12, [#allocation3]  }
 0x1ad   :  { %599 = dma.done.wait [#allocation3], 32  }
 0x1ae   :  { %600 = vsyncadd [#allocation3], 4294967264 }
 0x1af   :  { %408 = vsyncpa [#allocation3], 1 }

// kernel: cnn_batch_forward.4
= control target key start
LH: loop header
LB: loop body
LE: loop exit
PB: predicated region body
PF: predicated region fallthrough
CT: control target
= control target key end

     0   :  { %vm103_vm0 = vcmask 523264   ;;  %vm192_vm1 = vcmask 1041409   ;;  %vm2752_vm2 = vcmask 1041408   ;;  %vm2754_vm3 = vcmask 1045508   ;;  %s6354_s3 = inlined_call_operand.vmem [shape: bf16[16,64,512], index: 3, kind: input, shape index: {}]   ;;  %s6355_s0 = inlined_call_operand.vmem [shape: bf16[2,64,64], index: 0, kind: input, shape index: {}]   ;;  %s6356_s1 = inlined_call_operand.vmem [shape: f32[1,64], index: 1, kind: input, shape index: {}]   ;;  %s6357_s2 = inlined_call_operand.vmem [shape: f32[1,64], index: 2, kind: input, shape index: {}]   ;;  %s6358_s4 = inlined_call_operand.vmem [shape: f32[1,512], index: 4, kind: input, shape index: {}]   ;;  %s6359_s5 = inlined_call_operand.vmem [shape: f32[2,512], index: 5, kind: output, shape index: {0}]   ;;  %s6360_s6 = inlined_call_operand.vmem [shape: f32[1,2,512], index: 6, kind: output, shape index: {1}]  }
   0x1   :  { %v2895_v0 = vld [vmem:[%s6354_s3 + $0x60] sm:$0xf]  ;;  %v4187_v1 = vld [vmem:[%s6354_s3 + $0x6c] sm:$0xf0]  ;;  %v4185_v2 = vld [vmem:[%s6354_s3 + $0x64] sm:$0xf] }
   0x2   :  { %v2896_v3 = vor.u32 %v4187_v1, %v2895_v0  ;;  %v2897_v4 = vld [vmem:[%s6354_s3 + $0x70] sm:$0xf0]  ;;  %v2903_v5 = vld [vmem:[%s6354_s3 + $0x68] sm:$0xf]  ;;  %v4188_v6 = vld [vmem:[%s6354_s3 + $0x74] sm:$0xf0] }
   0x3   :  { %v2900_v7 = vor.u32 %v4185_v2, %v2897_v4  ;;  %v2904_v8 = vor.u32 %v4188_v6, %v2903_v5  ;;  %v4186_v9 = vld [vmem:[%s6354_s3 + $0x6c] sm:$0xf]  ;;  %v2905_v10 = vld [vmem:[%s6354_s3 + $0x78] sm:$0xf0]  ;;  %v2879_v11 = vld [vmem:[%s6354_s3 + $0x40] sm:$0xf] }
   0x4   :  { %282 = vmatpush.bf16.msra.mxu0 %v2896_v3  ;;  %v2908_v12 = vor.u32 %v4186_v9, %v2905_v10  ;;  %v4183_v13 = vld [vmem:[%s6354_s3 + $0x4c] sm:$0xf0]  ;;  %v4181_v14 = vld [vmem:[%s6354_s3 + $0x44] sm:$0xf]  ;;  %v2881_v15 = vld [vmem:[%s6354_s3 + $0x50] sm:$0xf0] }
   0x5   :  { %295 = vmatpush.bf16.msra.mxu1 %v2900_v7  ;;  %308 = vmatpush.bf16.msra.mxu2 %v2904_v8  ;;  %v2880_v16 = vor.u32 %v4183_v13, %v2879_v11  ;;  %v2884_v17 = vor.u32 %v4181_v14, %v2881_v15  ;;  %v2887_v18 = vld [vmem:[%s6354_s3 + $0x48] sm:$0xf]  ;;  %v4184_v19 = vld [vmem:[%s6354_s3 + $0x54] sm:$0xf0]  ;;  %v4182_v20 = vld [vmem:[%s6354_s3 + $0x4c] sm:$0xf] }
   0x6   :  { %321 = vmatpush.bf16.msra.mxu3 %v2908_v12  ;;  %v2888_v21 = vor.u32 %v4184_v19, %v2887_v18  ;;  %v2889_v22 = vld [vmem:[%s6354_s3 + $0x58] sm:$0xf0]  ;;  %v2863_v23 = vld [vmem:[%s6354_s3 + $0x20] sm:$0xf]  ;;  %v4179_v24 = vld [vmem:[%s6354_s3 + $0x2c] sm:$0xf0] }
   0x7   :  { %v2892_v25 = vor.u32 %v4182_v20, %v2889_v22  ;;  %v4177_v26 = vld [vmem:[%s6354_s3 + $0x24] sm:$0xf]  ;;  %v2865_v27 = vld [vmem:[%s6354_s3 + $0x30] sm:$0xf0]  ;;  %v2871_v28 = vld [vmem:[%s6354_s3 + $0x28] sm:$0xf]  ;;  %v2864_v29 = vor.u32 %v4179_v24, %v2863_v23 }
   0x8   :  { %283 = vmatpush.bf16.msra.mxu0 %v2880_v16  ;;  %v4180_v30 = vld [vmem:[%s6354_s3 + $0x34] sm:$0xf0]  ;;  %v4178_v31 = vld [vmem:[%s6354_s3 + $0x2c] sm:$0xf]  ;;  %v2873_v32 = vld [vmem:[%s6354_s3 + $0x38] sm:$0xf0]  ;;  %v2868_v33 = vor.u32 %v4177_v26, %v2865_v27 }
   0x9   :  { %296 = vmatpush.bf16.msra.mxu1 %v2884_v17  ;;  %309 = vmatpush.bf16.msra.mxu2 %v2888_v21  ;;  %v2872_v34 = vor.u32 %v4180_v30, %v2871_v28  ;;  %v2847_v35 = vld [vmem:[%s6354_s3] sm:$0xf]  ;;  %v4175_v36 = vld [vmem:[%s6354_s3 + $0xc] sm:$0xf0]  ;;  %v4173_v37 = vld [vmem:[%s6354_s3 + $0x4] sm:$0xf]  ;;  %v2876_v38 = vor.u32 %v4178_v31, %v2873_v32 }
   0xa   :  { %322 = vmatpush.bf16.msra.mxu3 %v2892_v25  ;;  %v2849_v39 = vld [vmem:[%s6354_s3 + $0x10] sm:$0xf0]  ;;  %v2855_v40 = vld [vmem:[%s6354_s3 + $0x8] sm:$0xf]  ;;  %v4176_v41 = vld [vmem:[%s6354_s3 + $0x14] sm:$0xf0]  ;;  %v2848_v45 = vor.u32 %v4175_v36, %v2847_v35 }
   0xb   :  { %v4174_v42 = vld [vmem:[%s6354_s3 + $0xc] sm:$0xf]  ;;  %v2857_v43 = vld [vmem:[%s6354_s3 + $0x18] sm:$0xf0]  ;;  %v4430_v44 = vld [vmem:[%s6355_s0] sm:$0xff]   ;;  %v2852_v50 = vor.u32 %v4173_v37, %v2849_v39  ;;  %v2856_v51 = vor.u32 %v4176_v41, %v2855_v40  ;;  %vm2756_vm4 = vcmask 1043456  }
   0xc   :  { %284 = vmatpush.bf16.msra.mxu0 %v2864_v29  ;;  %v4431_v46 = vunpack.c.l.bf16 %v4430_v44  ;;  %v4432_v47 = vunpack.c.h.bf16 %v4430_v44  ;;  %v4464_v48 = vld [vmem:[%s6355_s0 + $0x20] sm:$0xff]   ;;  %v2987_v55 = vld [vmem:[%s6354_s3 + $0xe8] sm:$0xf]  ;;  %v2860_v56 = vor.u32 %v4174_v42, %v2857_v43  ;;  %v4204_v59 = vld [vmem:[%s6354_s3 + $0xf4] sm:$0xf0]  ;;  %vm2820_vm5 = vcmask 1040384  }
   0xd   :  { %v4612_v49 = vld [vmem:[%s6356_s1] ss:$0 sm:$0xff]  ;;  %297 = vmatpush.bf16.msra.mxu1 %v2868_v33  ;;  %310 = vmatpush.bf16.msra.mxu2 %v2872_v34  ;;  %v4447_v52 = vunpack.c.l.bf16 %v4464_v48  ;;  %v4448_v53 = vunpack.c.h.bf16 %v4464_v48  ;;  %v4202_v60 = vld [vmem:[%s6354_s3 + $0xec] sm:$0xf]  ;;  %v2989_v61 = vld [vmem:[%s6354_s3 + $0xf8] sm:$0xf0]  ;;  %v2988_v0 = vor.u32 %v4204_v59, %v2987_v55 }
   0xe   :  { %v4617_v54 = vld [vmem:[%s6357_s2] ss:$0 sm:$0xff]  ;;  %323 = vmatpush.bf16.msra.mxu3 %v2876_v38  ;;  %v59_v57 = vmul.f32 %v4612_v49, %v4431_v46  ;;  %v60_v58 = vmul.f32 %v4612_v49, %v4432_v47  ;;  %v2992_v1 = vor.u32 %v4202_v60, %v2989_v61  ;;  %v4203_v3 = vld [vmem:[%s6354_s3 + $0xec] sm:$0xf0]  ;;  %v4201_v4 = vld [vmem:[%s6354_s3 + $0xe4] sm:$0xf] }
   0xf   :  { %v67_v62 = vmul.f32 %v4612_v49, %v4447_v52  ;;  %v68_v63 = vmul.f32 %v4612_v49, %v4448_v53  ;;  %v2979_v2 = vld [vmem:[%s6354_s3 + $0xe0] sm:$0xf]  ;;  %v2981_v8 = vld [vmem:[%s6354_s3 + $0xf0] sm:$0xf0]  ;;  %v2971_v9 = vld [vmem:[%s6354_s3 + $0xc8] sm:$0xf] }
  0x10   :  { %285 = vmatpush.bf16.msra.mxu0 %v2848_v45  ;;  %v79_v5 = vadd.f32 %v4617_v54, %v59_v57  ;;  %v80_v6 = vadd.f32 %v4617_v54, %v60_v58  ;;  %v2980_v7 = vor.u32 %v4203_v3, %v2979_v2  ;;  %v4200_v10 = vld [vmem:[%s6354_s3 + $0xd4] sm:$0xf0]  ;;  %v2984_v13 = vor.u32 %v4201_v4, %v2981_v8  ;;  %v4198_v14 = vld [vmem:[%s6354_s3 + $0xcc] sm:$0xf]  ;;  %v2973_v15 = vld [vmem:[%s6354_s3 + $0xd8] sm:$0xf0] }
  0x11   :  { %298 = vmatpush.bf16.msra.mxu1 %v2852_v50  ;;  %311 = vmatpush.bf16.msra.mxu2 %v2856_v51  ;;  %v87_v11 = vadd.f32 %v4617_v54, %v67_v62  ;;  %v88_v12 = vadd.f32 %v4617_v54, %v68_v63  ;;  %v2963_v16 = vld [vmem:[%s6354_s3 + $0xc0] sm:$0xf]  ;;  %v2972_v18 = vor.u32 %v4200_v10, %v2971_v9  ;;  %v4199_v19 = vld [vmem:[%s6354_s3 + $0xcc] sm:$0xf0]  ;;  %v4197_v20 = vld [vmem:[%s6354_s3 + $0xc4] sm:$0xf] }
  0x12   :  { %324 = vmatpush.bf16.msra.mxu3 %v2860_v56  ;;  %v95_v17 = vmax.f32 %v79_v5, %v80_v6  ;;  %v2965_v21 = vld [vmem:[%s6354_s3 + $0xd0] sm:$0xf0]  ;;  %v2976_v23 = vor.u32 %v4198_v14, %v2973_v15  ;;  %v2964_v24 = vor.u32 %v4199_v19, %v2963_v16  ;;  %v2955_v25 = vld [vmem:[%s6354_s3 + $0xa8] sm:$0xf]  ;;  %v4196_v26 = vld [vmem:[%s6354_s3 + $0xb4] sm:$0xf0] }
  0x13   :  { %v99_v22 = vmax.f32 %v87_v11, %v88_v12  ;;  %v4194_v27 = vld [vmem:[%s6354_s3 + $0xac] sm:$0xf]  ;;  %v2968_v28 = vor.u32 %v4197_v20, %v2965_v21  ;;  %v2957_v29 = vld [vmem:[%s6354_s3 + $0xb8] sm:$0xf0]  ;;  %v2947_v30 = vld [vmem:[%s6354_s3 + $0xa0] sm:$0xf]  ;;  %v2956_v33 = vor.u32 %v4196_v26, %v2955_v25 }
  0x14   :  { %441 = vmatpush.bf16.msrb.mxu0 %v2980_v7  ;;  %104 = vst.msk [vmem:[#allocation2] sm:$0xff] %vm103_vm0, %v95_v17  ;;  %v4195_v31 = vld [vmem:[%s6354_s3 + $0xac] sm:$0xf0]  ;;  %v4193_v32 = vld [vmem:[%s6354_s3 + $0xa4] sm:$0xf]  ;;  %v2960_v35 = vor.u32 %v4194_v27, %v2957_v29 }
  0x15   :  { %467 = vmatpush.bf16.msrb.mxu2 %v2988_v0  ;;  %454 = vmatpush.bf16.msrb.mxu1 %v2984_v13  ;;  %108 = vst.msk [vmem:[#allocation2 + $0x20] sm:$0xff] %vm103_vm0, %v99_v22  ;;  %v2949_v34 = vld [vmem:[%s6354_s3 + $0xb0] sm:$0xf0]  ;;  %v2948_v36 = vor.u32 %v4195_v31, %v2947_v30  ;;  %v2939_v37 = vld [vmem:[%s6354_s3 + $0x88] sm:$0xf] }
  0x16   :  { %480 = vmatpush.bf16.msrb.mxu3 %v2992_v1  ;;  %v4192_v38 = vld [vmem:[%s6354_s3 + $0x94] sm:$0xf0]  ;;  %v4190_v39 = vld [vmem:[%s6354_s3 + $0x8c] sm:$0xf]  ;;  %v2952_v40 = vor.u32 %v4193_v32, %v2949_v34  ;;  %v2941_v41 = vld [vmem:[%s6354_s3 + $0x98] sm:$0xf0] }
  0x17   :  { %v2931_v42 = vld [vmem:[%s6354_s3 + $0x80] sm:$0xf]  ;;  %v4191_v43 = vld [vmem:[%s6354_s3 + $0x8c] sm:$0xf0]  ;;  %v4189_v44 = vld [vmem:[%s6354_s3 + $0x84] sm:$0xf]  ;;  %v2940_v46 = vor.u32 %v4192_v38, %v2939_v37  ;;  %v2944_v50 = vor.u32 %v4190_v39, %v2941_v41 }
  0x18   :  { %442 = vmatpush.bf16.msrb.mxu0 %v2964_v24  ;;  %v2933_v45 = vld [vmem:[%s6354_s3 + $0x90] sm:$0xf0]  ;;  %v2932_v51 = vor.u32 %v4191_v43, %v2931_v42  ;;  %v3071_v0 = vld [vmem:[%s6354_s3 + $0x168] sm:$0xf]  ;;  %v4220_v1 = vld [vmem:[%s6354_s3 + $0x174] sm:$0xf0] }
  0x19   :  { %468 = vmatpush.bf16.msrb.mxu2 %v2972_v18  ;;  %455 = vmatpush.bf16.msrb.mxu1 %v2968_v28  ;;  %v2936_v56 = vor.u32 %v4189_v44, %v2933_v45  ;;  %v4218_v2 = vld [vmem:[%s6354_s3 + $0x16c] sm:$0xf]  ;;  %v3073_v4 = vld [vmem:[%s6354_s3 + $0x178] sm:$0xf0]  ;;  %v3063_v5 = vld [vmem:[%s6354_s3 + $0x160] sm:$0xf]  ;;  %v3072_v11 = vor.u32 %v4220_v1, %v3071_v0 }
  0x1a   :  { %481 = vmatpush.bf16.msrb.mxu3 %v2976_v23  ;;  %v4219_v6 = vld [vmem:[%s6354_s3 + $0x16c] sm:$0xf0]  ;;  %v4217_v7 = vld [vmem:[%s6354_s3 + $0x164] sm:$0xf]  ;;  %v3065_v8 = vld [vmem:[%s6354_s3 + $0x170] sm:$0xf0]  ;;  %v3076_v12 = vor.u32 %v4218_v2, %v3073_v4 }
  0x1b   :  { %v112_v47 = vld [vmem:[#allocation2] ss:$2 sm:$0xf]  ;;  %v128_v48 = vld [vmem:[#allocation2 + $0x1] ss:$2 sm:$0xf]  ;;  %v3064_v15 = vor.u32 %v4219_v6, %v3063_v5  ;;  %v3068_v16 = vor.u32 %v4217_v7, %v3065_v8 }
  0x1c   :  { %443 = vmatpush.bf16.msrb.mxu0 %v2948_v36  ;;  %v120_v52 = vld [vmem:[#allocation2 + $0x20] ss:$2 sm:$0xf]  ;;  %v136_v53 = vld [vmem:[#allocation2 + $0x21] ss:$2 sm:$0xf]  ;;  %v143_v55 = vmax.f32 %v112_v47, %v128_v48 }
  0x1d   :  { %469 = vmatpush.bf16.msrb.mxu2 %v2956_v33  ;;  %456 = vmatpush.bf16.msrb.mxu1 %v2952_v40  ;;  %v147_v57 = vmax.f32 %v120_v52, %v136_v53  ;;  %v3055_v13 = vld [vmem:[%s6354_s3 + $0x148] sm:$0xf]  ;;  %v4216_v14 = vld [vmem:[%s6354_s3 + $0x154] sm:$0xf0]  ;;  %v4214_v17 = vld [vmem:[%s6354_s3 + $0x14c] sm:$0xf] }
  0x1e   :  { %482 = vmatpush.bf16.msrb.mxu3 %v2960_v35  ;;  %v151_v58 = vmax.f32 %v143_v55, 0.0  ;;  %v3057_v18 = vld [vmem:[%s6354_s3 + $0x158] sm:$0xf0]  ;;  %v3047_v19 = vld [vmem:[%s6354_s3 + $0x140] sm:$0xf]  ;;  %v3056_v23 = vor.u32 %v4216_v14, %v3055_v13 }
  0x1f   :  { %v155_v59 = vmax.f32 %v147_v57, 0.0  ;;  %v4215_v20 = vld [vmem:[%s6354_s3 + $0x14c] sm:$0xf0]  ;;  %v4213_v21 = vld [vmem:[%s6354_s3 + $0x144] sm:$0xf]  ;;  %v3060_v24 = vor.u32 %v4214_v17, %v3057_v18  ;;  %v4465_v57 = vld [vmem:[%s6355_s0 + $0x28] sm:$0xff]  }
  0x20   :  { %444 = vmatpush.bf16.msrb.mxu0 %v2932_v51  ;;  %v169_v60 = vpack.c.bf16 %v151_v58, %v151_v58  ;;  %v3049_v22 = vld [vmem:[%s6354_s3 + $0x150] sm:$0xf0]  ;;  %v3039_v25 = vld [vmem:[%s6354_s3 + $0x128] sm:$0xf]  ;;  %v4212_v26 = vld [vmem:[%s6354_s3 + $0x134] sm:$0xf0]  ;;  %v3048_v27 = vor.u32 %v4215_v20, %v3047_v19  ;;  %v4451_v2 = vunpack.c.l.bf16 %v4465_v57  ;;  %v4452_v7 = vunpack.c.h.bf16 %v4465_v57 }
  0x21   :  { %470 = vmatpush.bf16.msrb.mxu2 %v2940_v46  ;;  %457 = vmatpush.bf16.msrb.mxu1 %v2936_v56  ;;  %v170_v61 = vpack.c.bf16 %v155_v59, %v155_v59  ;;  %v3052_v28 = vor.u32 %v4213_v21, %v3049_v22  ;;  %v4210_v29 = vld [vmem:[%s6354_s3 + $0x12c] sm:$0xf]  ;;  %v3041_v30 = vld [vmem:[%s6354_s3 + $0x138] sm:$0xf0]  ;;  %v3031_v31 = vld [vmem:[%s6354_s3 + $0x120] sm:$0xf]  ;;  %v3040_v36 = vor.u32 %v4212_v26, %v3039_v25 }
  0x22   :  { %483 = vmatpush.bf16.msrb.mxu3 %v2944_v50  ;;  %v4725_v62 = vunpack.c.l.b16 %v169_v60  ;;  %v4211_v32 = vld [vmem:[%s6354_s3 + $0x12c] sm:$0xf0]  ;;  %v4209_v33 = vld [vmem:[%s6354_s3 + $0x124] sm:$0xf]  ;;  %v3033_v34 = vld [vmem:[%s6354_s3 + $0x130] sm:$0xf0]  ;;  %v3044_v37 = vor.u32 %v4210_v29, %v3041_v30  ;;  %v69_v14 = vmul.f32 %v4612_v49, %v4451_v2 }
  0x23   :  { %v4727_v63 = vunpack.c.l.b16 %v170_v61  ;;  %v3023_v38 = vld [vmem:[%s6354_s3 + $0x108] sm:$0xf]  ;;  %v4208_v39 = vld [vmem:[%s6354_s3 + $0x114] sm:$0xf0]  ;;  %v4206_v40 = vld [vmem:[%s6354_s3 + $0x10c] sm:$0xf]  ;;  %v3032_v41 = vor.u32 %v4211_v32, %v3031_v31  ;;  %v3036_v42 = vor.u32 %v4209_v33, %v3033_v34 }
  0x24   :  { %v351_v35 = vrot.slane %v4725_v62, 1  ;;  %v3025_v43 = vld [vmem:[%s6354_s3 + $0x118] sm:$0xf0]  ;;  %v3015_v44 = vld [vmem:[%s6354_s3 + $0x100] sm:$0xf]  ;;  %v3024_v51 = vor.u32 %v4208_v39, %v3023_v38  ;;  %v4461_v56 = vld [vmem:[%s6355_s0 + $0x8] sm:$0xff]   ;;  %v89_v30 = vadd.f32 %v4617_v54, %v69_v14 }
  0x25   :  { %v191_v3 = vrot.slane %v4727_v63, 7  ;;  %v4207_v45 = vld [vmem:[%s6354_s3 + $0x10c] sm:$0xf0]  ;;  %v4205_v46 = vld [vmem:[%s6354_s3 + $0x104] sm:$0xf]  ;;  %v3028_v52 = vor.u32 %v4206_v40, %v3025_v43  ;;  %v4435_v0 = vunpack.c.l.bf16 %v4461_v56  ;;  %v4436_v1 = vunpack.c.h.bf16 %v4461_v56 }
  0x26   :  { %v3017_v47 = vld [vmem:[%s6354_s3 + $0x110] sm:$0xf0]  ;;  %v352_v48 = vsel %vm192_vm1, %v4727_v63, %v351_v35  ;;  %v3155_v50 = vld [vmem:[%s6354_s3 + $0x1e8] sm:$0xf]  ;;  %v3016_v53 = vor.u32 %v4207_v45, %v3015_v44  ;;  %v4236_v55 = vld [vmem:[%s6354_s3 + $0x1f4] sm:$0xf0] }
  0x27   :  { %v193_v9 = vsel %vm192_vm1, %v191_v3, %v4725_v62  ;;  %v3020_v58 = vor.u32 %v4205_v46, %v3017_v47  ;;  %v4234_v59 = vld [vmem:[%s6354_s3 + $0x1ec] sm:$0xf]  ;;  %v3157_v60 = vld [vmem:[%s6354_s3 + $0x1f8] sm:$0xf0]  ;;  %v3147_v61 = vld [vmem:[%s6354_s3 + $0x1e0] sm:$0xf]  ;;  %v353_v3 = vpack.c.b16 %v352_v48, %v352_v48  ;;  %v3156_v8 = vor.u32 %v4236_v55, %v3155_v50 }
  0x28   :  { %v194_v10 = vpack.c.b16 %v193_v9, %v193_v9  ;;  %v4235_v4 = vld [vmem:[%s6354_s3 + $0x1ec] sm:$0xf0]  ;;  %v4233_v5 = vld [vmem:[%s6354_s3 + $0x1e4] sm:$0xf]  ;;  %v3149_v6 = vld [vmem:[%s6354_s3 + $0x1f0] sm:$0xf0]  ;;  %v61_v9 = vmul.f32 %v4612_v49, %v4435_v0 }
  0x29   :  { %v4232_v13 = vld [vmem:[%s6354_s3 + $0x1d4] sm:$0xf0]  ;;  %v3152_v17 = vor.u32 %v4233_v5, %v3149_v6  ;;  %v4230_v18 = vld [vmem:[%s6354_s3 + $0x1cc] sm:$0xf]  ;;  %v3141_v19 = vld [vmem:[%s6354_s3 + $0x1d8] sm:$0xf0] }
  0x2a   :  { %2909 = vmatmul.msk.bf16.vlgmr.msra.gmra.mxu0 %vm103_vm0, %v194_v10  ;;  %2910 = vmatmul.msk.bf16.vlgmr.msra.gmra.mxu1 %vm103_vm0, %v194_v10  ;;  %v3131_v20 = vld [vmem:[%s6354_s3 + $0x1c0] sm:$0xf]  ;;  %v4231_v21 = vld [vmem:[%s6354_s3 + $0x1cc] sm:$0xf0]  ;;  %v4229_v22 = vld [vmem:[%s6354_s3 + $0x1c4] sm:$0xf]  ;;  %v81_v25 = vadd.f32 %v4617_v54, %v61_v9 }
  0x2b   :  { %2911 = vmatmul.msk.bf16.vlgmr.msra.gmra.mxu2 %vm103_vm0, %v194_v10  ;;  %2912 = vmatmul.msk.bf16.vlgmr.msra.gmra.mxu3 %vm103_vm0, %v194_v10  ;;  %v62_v10 = vmul.f32 %v4612_v49, %v4436_v1  ;;  %v4228_v29 = vld [vmem:[%s6354_s3 + $0x1b4] sm:$0xf0]  ;;  %v3132_v32 = vor.u32 %v4231_v21, %v3131_v20  ;;  %v4226_v34 = vld [vmem:[%s6354_s3 + $0x1ac] sm:$0xf]  ;;  %v3125_v35 = vld [vmem:[%s6354_s3 + $0x1b8] sm:$0xf0] }
  0x2c   :  { %627 = vmatpush.bf16.msra.mxu2 %v3072_v11  ;;  %640 = vmatpush.bf16.msra.mxu3 %v3076_v12  ;;  %v3160_v11 = vor.u32 %v4234_v59, %v3157_v60  ;;  %v3139_v12 = vld [vmem:[%s6354_s3 + $0x1c8] sm:$0xf]  ;;  %v3117_v38 = vld [vmem:[%s6354_s3 + $0x1b0] sm:$0xf0]  ;;  %v510_v39 = vrot.slane %v4725_v62, 2  ;;  %v511_v40 = vrot.slane %v4727_v63, 1  ;;  %v3128_v43 = vor.u32 %v4226_v34, %v3125_v35 }
  0x2d   :  { %601 = vmatpush.bf16.msra.mxu0 %v3064_v15  ;;  %614 = vmatpush.bf16.msra.mxu1 %v3068_v16  ;;  %v70_v15 = vmul.f32 %v4612_v49, %v4452_v7  ;;  %v3148_v16 = vor.u32 %v4235_v4, %v3147_v61  ;;  %v82_v26 = vadd.f32 %v4617_v54, %v62_v10  ;;  %v3107_v44 = vld [vmem:[%s6354_s3 + $0x188] sm:$0xf]  ;;  %v4224_v45 = vld [vmem:[%s6354_s3 + $0x194] sm:$0xf0]  ;;  %v4222_v50 = vld [vmem:[%s6354_s3 + $0x18c] sm:$0xf] }
  0x2e   :  { %v4221_v55 = vld [vmem:[%s6354_s3 + $0x184] sm:$0xf]  ;;  %v3101_v56 = vld [vmem:[%s6354_s3 + $0x190] sm:$0xf0]  ;;  %v512_v57 = vsel %vm192_vm1, %v511_v40, %v510_v39  ;;  %v3239_v60 = vld [vmem:[%s6354_s3 + $0x268] sm:$0xf] }
  0x2f   :  { %v90_v31 = vadd.f32 %v4617_v54, %v70_v15  ;;  %v4227_v54 = vld [vmem:[%s6354_s3 + $0x1ac] sm:$0xf0]  ;;  %v4252_v61 = vld [vmem:[%s6354_s3 + $0x274] sm:$0xf0]  ;;  %v3104_v1 = vor.u32 %v4221_v55, %v3101_v56  ;;  %v4250_v2 = vld [vmem:[%s6354_s3 + $0x26c] sm:$0xf]  ;;  %v513_v5 = vpack.c.b16 %v512_v57, %v512_v57 }
  0x30   :  { %628 = vmatpush.bf16.msra.mxu2 %v3056_v23  ;;  %641 = vmatpush.bf16.msra.mxu3 %v3060_v24  ;;  %v3133_v23 = vld [vmem:[%s6354_s3 + $0x1d0] sm:$0xf0]  ;;  %v3140_v24 = vor.u32 %v4232_v13, %v3139_v12  ;;  %v3231_v4 = vld [vmem:[%s6354_s3 + $0x260] sm:$0xf]  ;;  %v4251_v6 = vld [vmem:[%s6354_s3 + $0x26c] sm:$0xf0]  ;;  %v3240_v9 = vor.u32 %v4252_v61, %v3239_v60 }
  0x31   :  { %602 = vmatpush.bf16.msra.mxu0 %v3048_v27  ;;  %615 = vmatpush.bf16.msra.mxu1 %v3052_v28  ;;  %v3144_v27 = vor.u32 %v4230_v18, %v3141_v19  ;;  %v3123_v28 = vld [vmem:[%s6354_s3 + $0x1a8] sm:$0xf]  ;;  %v3136_v33 = vor.u32 %v4229_v22, %v3133_v23  ;;  %v100_v46 = vmax.f32 %v89_v30, %v90_v31  ;;  %v4249_v7 = vld [vmem:[%s6354_s3 + $0x264] sm:$0xf]  ;;  %v4248_v12 = vld [vmem:[%s6354_s3 + $0x254] sm:$0xf0] }
  0x32   :  { %v3232_v13 = vor.u32 %v4251_v6, %v3231_v4  ;;  %v4246_v15 = vld [vmem:[%s6354_s3 + $0x24c] sm:$0xf]  ;;  %v4247_v18 = vld [vmem:[%s6354_s3 + $0x24c] sm:$0xf0]  ;;  %v4245_v19 = vld [vmem:[%s6354_s3 + $0x244] sm:$0xf] }
  0x33   :  { %109 = vst.msk [vmem:[#allocation2 + $0x28] sm:$0xff] %vm103_vm0, %v100_v46  ;;  %v3217_v20 = vld [vmem:[%s6354_s3 + $0x250] sm:$0xf0]  ;;  %v3207_v21 = vld [vmem:[%s6354_s3 + $0x228] sm:$0xf]  ;;  %v670_v35 = vrot.slane %v4725_v62, 3 }
  0x34   :  { %629 = vmatpush.bf16.msra.mxu2 %v3040_v36  ;;  %642 = vmatpush.bf16.msra.mxu3 %v3044_v37  ;;  %v3115_v36 = vld [vmem:[%s6354_s3 + $0x1a0] sm:$0xf]  ;;  %v4225_v37 = vld [vmem:[%s6354_s3 + $0x1a4] sm:$0xf]  ;;  %v4244_v22 = vld [vmem:[%s6354_s3 + $0x234] sm:$0xf0] }
  0x35   :  { %603 = vmatpush.bf16.msra.mxu0 %v3032_v41  ;;  %616 = vmatpush.bf16.msra.mxu1 %v3036_v42  ;;  %v96_v41 = vmax.f32 %v81_v25, %v82_v26  ;;  %v3124_v42 = vor.u32 %v4228_v29, %v3123_v28  ;;  %v3116_v47 = vor.u32 %v4227_v54, %v3115_v36  ;;  %v4242_v29 = vld [vmem:[%s6354_s3 + $0x22c] sm:$0xf]  ;;  %v3209_v30 = vld [vmem:[%s6354_s3 + $0x238] sm:$0xf0]  ;;  %v3199_v31 = vld [vmem:[%s6354_s3 + $0x220] sm:$0xf] }
  0x36   :  { %v3120_v48 = vor.u32 %v4225_v37, %v3117_v38  ;;  %v3220_v28 = vor.u32 %v4245_v19, %v3217_v20  ;;  %v3201_v34 = vld [vmem:[%s6354_s3 + $0x230] sm:$0xf0]  ;;  %v671_v36 = vrot.slane %v4727_v63, 2  ;;  %v3191_v54 = vld [vmem:[%s6354_s3 + $0x208] sm:$0xf]  ;;  %v3208_v39 = vor.u32 %v4244_v22, %v3207_v21 }
  0x37   :  { %105 = vst.msk [vmem:[#allocation2 + $0x8] sm:$0xff] %vm103_vm0, %v96_v41  ;;  %v4240_v37 = vld [vmem:[%s6354_s3 + $0x214] sm:$0xf0]  ;;  %v3212_v40 = vor.u32 %v4242_v29, %v3209_v30  ;;  %v4238_v63 = vld [vmem:[%s6354_s3 + $0x20c] sm:$0xf] }
  0x38   :  { %630 = vmatpush.bf16.msra.mxu2 %v3024_v51  ;;  %643 = vmatpush.bf16.msra.mxu3 %v3028_v52  ;;  %v3109_v51 = vld [vmem:[%s6354_s3 + $0x198] sm:$0xf0]  ;;  %v3099_v52 = vld [vmem:[%s6354_s3 + $0x180] sm:$0xf]  ;;  %v4239_v46 = vld [vmem:[%s6354_s3 + $0x20c] sm:$0xf0] }
  0x39   :  { %604 = vmatpush.bf16.msra.mxu0 %v3016_v53  ;;  %617 = vmatpush.bf16.msra.mxu1 %v3020_v58  ;;  %v4223_v53 = vld [vmem:[%s6354_s3 + $0x18c] sm:$0xf0]  ;;  %v3108_v58 = vor.u32 %v4224_v45, %v3107_v44  ;;  %v3112_v59 = vor.u32 %v4222_v50, %v3109_v51  ;;  %v3193_v44 = vld [vmem:[%s6354_s3 + $0x218] sm:$0xf0]  ;;  %v3183_v45 = vld [vmem:[%s6354_s3 + $0x200] sm:$0xf]  ;;  %v672_v50 = vsel %vm192_vm1, %v671_v36, %v670_v35 }
  0x3a   :  { %2993 = vmatmul.msk.bf16.vlgmr.msrb.gmra.mxu0 %vm103_vm0, %v353_v3  ;;  %2994 = vmatmul.msk.bf16.vlgmr.msrb.gmra.mxu1 %vm103_vm0, %v353_v3  ;;  %v3100_v0 = vor.u32 %v4223_v53, %v3099_v52  ;;  %v122_v25 = vld [vmem:[#allocation2 + $0x28] ss:$2 sm:$0xf]  ;;  %v138_v26 = vld [vmem:[#allocation2 + $0x29] ss:$2 sm:$0xf]  ;;  %v3192_v53 = vor.u32 %v4240_v37, %v3191_v54  ;;  %v3196_v55 = vor.u32 %v4238_v63, %v3193_v44 }
  0x3b   :  { %2995 = vmatmul.msk.bf16.vlgmr.msrb.gmra.mxu2 %vm103_vm0, %v353_v3  ;;  %2996 = vmatmul.msk.bf16.vlgmr.msrb.gmra.mxu3 %vm103_vm0, %v353_v3  ;;  %v3241_v3 = vld [vmem:[%s6354_s3 + $0x278] sm:$0xf0]  ;;  %v148_v38 = vmax.f32 %v122_v25, %v138_v26  ;;  %v3323_v56 = vld [vmem:[%s6354_s3 + $0x2e8] sm:$0xf]  ;;  %v4268_v57 = vld [vmem:[%s6354_s3 + $0x2f4] sm:$0xf0] }
  0x3c   :  { %787 = vmatpush.bf16.msrb.mxu2 %v3156_v8  ;;  %800 = vmatpush.bf16.msrb.mxu3 %v3160_v11  ;;  %v3233_v8 = vld [vmem:[%s6354_s3 + $0x270] sm:$0xf0]  ;;  %v3244_v10 = vor.u32 %v4250_v2, %v3241_v3  ;;  %v3223_v11 = vld [vmem:[%s6354_s3 + $0x248] sm:$0xf]  ;;  %v4266_v60 = vld [vmem:[%s6354_s3 + $0x2ec] sm:$0xf] }
  0x3d   :  { %761 = vmatpush.bf16.msrb.mxu0 %v3148_v16  ;;  %774 = vmatpush.bf16.msrb.mxu1 %v3152_v17  ;;  %v3236_v14 = vor.u32 %v4249_v7, %v3233_v8  ;;  %v3225_v16 = vld [vmem:[%s6354_s3 + $0x258] sm:$0xf0]  ;;  %v3215_v17 = vld [vmem:[%s6354_s3 + $0x240] sm:$0xf]  ;;  %v3224_v23 = vor.u32 %v4248_v12, %v3223_v11  ;;  %v156_v52 = vmax.f32 %v148_v38, 0.0  ;;  %v3324_v7 = vor.u32 %v4268_v57, %v3323_v56 }
  0x3e   :  { %v114_v41 = vld [vmem:[#allocation2 + $0x8] ss:$2 sm:$0xf]  ;;  %v3325_v61 = vld [vmem:[%s6354_s3 + $0x2f8] sm:$0xf0] }
  0x3f   :  { %v4267_v2 = vld [vmem:[%s6354_s3 + $0x2ec] sm:$0xf0]  ;;  %v4265_v3 = vld [vmem:[%s6354_s3 + $0x2e4] sm:$0xf]  ;;  %v3317_v4 = vld [vmem:[%s6354_s3 + $0x2f0] sm:$0xf0]  ;;  %v814_v6 = vpack.c.bf16 %v156_v52, %v156_v52  ;;  %v3328_v8 = vor.u32 %v4266_v60, %v3325_v61 }
  0x40   :  { %788 = vmatpush.bf16.msrb.mxu2 %v3140_v24  ;;  %801 = vmatpush.bf16.msrb.mxu3 %v3144_v27  ;;  %v3228_v24 = vor.u32 %v4246_v15, %v3225_v16  ;;  %v3216_v27 = vor.u32 %v4247_v18, %v3215_v17  ;;  %v3320_v12 = vor.u32 %v4265_v3, %v3317_v4  ;;  %v3299_v15 = vld [vmem:[%s6354_s3 + $0x2c0] sm:$0xf]  ;;  %v4263_v16 = vld [vmem:[%s6354_s3 + $0x2cc] sm:$0xf0]  ;;  %v4261_v17 = vld [vmem:[%s6354_s3 + $0x2c4] sm:$0xf] }
  0x41   :  { %762 = vmatpush.bf16.msrb.mxu0 %v3132_v32  ;;  %775 = vmatpush.bf16.msrb.mxu1 %v3136_v33  ;;  %v4243_v32 = vld [vmem:[%s6354_s3 + $0x22c] sm:$0xf0]  ;;  %v4241_v33 = vld [vmem:[%s6354_s3 + $0x224] sm:$0xf]  ;;  %v3301_v18 = vld [vmem:[%s6354_s3 + $0x2d0] sm:$0xf0]  ;;  %v5109_v20 = vunpack.c.l.b16 %v814_v6  ;;  %v3300_v25 = vor.u32 %v4263_v16, %v3299_v15 }
  0x42   :  { %v3200_v62 = vor.u32 %v4243_v32, %v3199_v31  ;;  %v3304_v26 = vor.u32 %v4261_v17, %v3301_v18  ;;  %v3283_v29 = vld [vmem:[%s6354_s3 + $0x2a0] sm:$0xf]  ;;  %v4259_v30 = vld [vmem:[%s6354_s3 + $0x2ac] sm:$0xf0]  ;;  %v4257_v31 = vld [vmem:[%s6354_s3 + $0x2a4] sm:$0xf] }
  0x43   :  { %v3285_v32 = vld [vmem:[%s6354_s3 + $0x2b0] sm:$0xf0]  ;;  %v3275_v54 = vld [vmem:[%s6354_s3 + $0x288] sm:$0xf]  ;;  %v4256_v37 = vld [vmem:[%s6354_s3 + $0x294] sm:$0xf0]  ;;  %v3284_v38 = vor.u32 %v4259_v30, %v3283_v29 }
  0x44   :  { %789 = vmatpush.bf16.msrb.mxu2 %v3124_v42  ;;  %802 = vmatpush.bf16.msrb.mxu3 %v3128_v43  ;;  %v130_v42 = vld [vmem:[#allocation2 + $0x9] ss:$2 sm:$0xf]  ;;  %v3204_v43 = vor.u32 %v4241_v33, %v3201_v34  ;;  %v836_v34 = vrot.slane %v5109_v20, 7  ;;  %v3269_v63 = vld [vmem:[%s6354_s3 + $0x290] sm:$0xf0] }
  0x45   :  { %763 = vmatpush.bf16.msrb.mxu0 %v3116_v47  ;;  %776 = vmatpush.bf16.msrb.mxu1 %v3120_v48  ;;  %v4237_v47 = vld [vmem:[%s6354_s3 + $0x204] sm:$0xf]  ;;  %v3185_v48 = vld [vmem:[%s6354_s3 + $0x210] sm:$0xf0]  ;;  %v144_v51 = vmax.f32 %v114_v41, %v130_v42  ;;  %v3277_v41 = vld [vmem:[%s6354_s3 + $0x298] sm:$0xf0] }
  0x46   :  { %v3267_v42 = vld [vmem:[%s6354_s3 + $0x280] sm:$0xf]  ;;  %v4282_v52 = vld [vmem:[%s6354_s3 + $0x36c] sm:$0xf]  ;;  %v4283_v57 = vld [vmem:[%s6354_s3 + $0x36c] sm:$0xf0] }
  0x47   :  { %v4278_v4 = vld [vmem:[%s6354_s3 + $0x34c] sm:$0xf]  ;;  %v3383_v6 = vld [vmem:[%s6354_s3 + $0x340] sm:$0xf]  ;;  %v3377_v17 = vld [vmem:[%s6354_s3 + $0x338] sm:$0xf0] }
  0x48   :  { %790 = vmatpush.bf16.msrb.mxu2 %v3108_v58  ;;  %803 = vmatpush.bf16.msrb.mxu3 %v3112_v59  ;;  %v3184_v58 = vor.u32 %v4239_v46, %v3183_v45  ;;  %v3188_v59 = vor.u32 %v4237_v47, %v3185_v48  ;;  %v3276_v45 = vor.u32 %v4256_v37, %v3275_v54  ;;  %v3407_v47 = vld [vmem:[%s6354_s3 + $0x368] sm:$0xf]  ;;  %v4284_v48 = vld [vmem:[%s6354_s3 + $0x374] sm:$0xf0]  ;;  %v4274_v16 = vld [vmem:[%s6354_s3 + $0x32c] sm:$0xf] }
  0x49   :  { %764 = vmatpush.bf16.msrb.mxu0 %v3100_v0  ;;  %777 = vmatpush.bf16.msrb.mxu1 %v3104_v1  ;;  %v3315_v0 = vld [vmem:[%s6354_s3 + $0x2e0] sm:$0xf]  ;;  %v673_v1 = vpack.c.b16 %v672_v50, %v672_v50  ;;  %v3408_v60 = vor.u32 %v4284_v48, %v3407_v47  ;;  %v3491_v37 = vld [vmem:[%s6354_s3 + $0x3e8] sm:$0xf] }
  0x4a   :  { %3077 = vmatmul.msk.bf16.vlgmr.msra.gmra.mxu0 %vm103_vm0, %v513_v5  ;;  %3078 = vmatmul.msk.bf16.vlgmr.msra.gmra.mxu1 %vm103_vm0, %v513_v5  ;;  %v3316_v11 = vor.u32 %v4267_v2, %v3315_v0  ;;  %v3391_v0 = vld [vmem:[%s6354_s3 + $0x348] sm:$0xf]  ;;  %v3367_v18 = vld [vmem:[%s6354_s3 + $0x320] sm:$0xf] }
  0x4b   :  { %3079 = vmatmul.msk.bf16.vlgmr.msra.gmra.mxu2 %vm103_vm0, %v513_v5  ;;  %3080 = vmatmul.msk.bf16.vlgmr.msra.gmra.mxu3 %vm103_vm0, %v513_v5  ;;  %v152_v5 = vmax.f32 %v144_v51, 0.0 }
  0x4c   :  { %952 = vmatpush.bf16.msra.mxu2 %v3240_v9  ;;  %965 = vmatpush.bf16.msra.mxu3 %v3244_v10  ;;  %v3307_v9 = vld [vmem:[%s6354_s3 + $0x2c8] sm:$0xf]  ;;  %v4264_v10 = vld [vmem:[%s6354_s3 + $0x2d4] sm:$0xf0] }
  0x4d   :  { %926 = vmatpush.bf16.msra.mxu0 %v3232_v13  ;;  %939 = vmatpush.bf16.msra.mxu1 %v3236_v14  ;;  %v4262_v13 = vld [vmem:[%s6354_s3 + $0x2cc] sm:$0xf]  ;;  %v3309_v14 = vld [vmem:[%s6354_s3 + $0x2d8] sm:$0xf0]  ;;  %v813_v19 = vpack.c.bf16 %v152_v5, %v152_v5  ;;  %v3308_v21 = vor.u32 %v4264_v10, %v3307_v9  ;;  %v3385_v9 = vld [vmem:[%s6354_s3 + $0x350] sm:$0xf0] }
  0x4e   :  { %v3312_v22 = vor.u32 %v4262_v13, %v3309_v14  ;;  %v3393_v5 = vld [vmem:[%s6354_s3 + $0x358] sm:$0xf0]  ;;  %v4276_v13 = vld [vmem:[%s6354_s3 + $0x334] sm:$0xf0] }
  0x4f   :  { %v5135_v33 = vunpack.c.l.b16 %v813_v19  ;;  %v4275_v19 = vld [vmem:[%s6354_s3 + $0x32c] sm:$0xf0] }
  0x50   :  { %953 = vmatpush.bf16.msra.mxu2 %v3224_v23  ;;  %966 = vmatpush.bf16.msra.mxu3 %v3228_v24  ;;  %v3291_v23 = vld [vmem:[%s6354_s3 + $0x2a8] sm:$0xf]  ;;  %v4260_v24 = vld [vmem:[%s6354_s3 + $0x2b4] sm:$0xf0]  ;;  %v3368_v29 = vor.u32 %v4275_v19, %v3367_v18 }
  0x51   :  { %927 = vmatpush.bf16.msra.mxu0 %v3216_v27  ;;  %940 = vmatpush.bf16.msra.mxu1 %v3220_v28  ;;  %v4258_v27 = vld [vmem:[%s6354_s3 + $0x2ac] sm:$0xf]  ;;  %v3293_v28 = vld [vmem:[%s6354_s3 + $0x2b8] sm:$0xf0]  ;;  %v3292_v35 = vor.u32 %v4260_v24, %v3291_v23  ;;  %v837_v44 = vsel %vm192_vm1, %v836_v34, %v5135_v33  ;;  %v995_v23 = vrot.slane %v5135_v33, 1 }
  0x52   :  { %v3296_v36 = vor.u32 %v4258_v27, %v3293_v28  ;;  %v838_v56 = vpack.c.b16 %v837_v44, %v837_v44  ;;  %v4272_v27 = vld [vmem:[%s6354_s3 + $0x314] sm:$0xf0]  ;;  %v4270_v28 = vld [vmem:[%s6354_s3 + $0x30c] sm:$0xf]  ;;  %v4271_v34 = vld [vmem:[%s6354_s3 + $0x30c] sm:$0xf0] }
  0x53   :  { %v996_v54 = vsel %vm192_vm1, %v5109_v20, %v995_v23  ;;  %v3493_v44 = vld [vmem:[%s6354_s3 + $0x3f8] sm:$0xf0]  ;;  %v4292_v18 = vld [vmem:[%s6354_s3 + $0x3b4] sm:$0xf0] }
  0x54   :  { %954 = vmatpush.bf16.msra.mxu2 %v3208_v39  ;;  %967 = vmatpush.bf16.msra.mxu3 %v3212_v40  ;;  %v3288_v39 = vor.u32 %v4257_v31, %v3285_v32  ;;  %v4254_v40 = vld [vmem:[%s6354_s3 + $0x28c] sm:$0xf]  ;;  %v3361_v31 = vld [vmem:[%s6354_s3 + $0x318] sm:$0xf0]  ;;  %v3351_v32 = vld [vmem:[%s6354_s3 + $0x300] sm:$0xf] }
  0x55   :  { %928 = vmatpush.bf16.msra.mxu0 %v3200_v62  ;;  %941 = vmatpush.bf16.msra.mxu1 %v3204_v43  ;;  %v4255_v62 = vld [vmem:[%s6354_s3 + $0x28c] sm:$0xf0]  ;;  %v4253_v43 = vld [vmem:[%s6354_s3 + $0x284] sm:$0xf]  ;;  %v3280_v46 = vor.u32 %v4254_v40, %v3277_v41  ;;  %v3352_v40 = vor.u32 %v4271_v34, %v3351_v32  ;;  %v4300_v41 = vld [vmem:[%s6354_s3 + $0x3f4] sm:$0xf0] }
  0x56   :  { %v3268_v50 = vor.u32 %v4255_v62, %v3267_v42  ;;  %v3272_v51 = vor.u32 %v4253_v43, %v3269_v63  ;;  %v4462_v42 = vld [vmem:[%s6355_s0 + $0x10] sm:$0xff]   ;;  %v4298_v63 = vld [vmem:[%s6354_s3 + $0x3ec] sm:$0xf]  ;;  %v3461_v23 = vld [vmem:[%s6354_s3 + $0x3b8] sm:$0xf0] }
  0x57   :  { %v4466_v62 = vld [vmem:[%s6355_s0 + $0x30] sm:$0xff]   ;;  %v4440_v47 = vunpack.c.h.bf16 %v4462_v42 }
  0x58   :  { %955 = vmatpush.bf16.msra.mxu2 %v3192_v53  ;;  %968 = vmatpush.bf16.msra.mxu3 %v3196_v55  ;;  %v3409_v53 = vld [vmem:[%s6354_s3 + $0x378] sm:$0xf0]  ;;  %v3399_v55 = vld [vmem:[%s6354_s3 + $0x360] sm:$0xf]  ;;  %v4455_v48 = vunpack.c.l.bf16 %v4466_v62 }
  0x59   :  { %929 = vmatpush.bf16.msra.mxu0 %v3184_v58  ;;  %942 = vmatpush.bf16.msra.mxu1 %v3188_v59  ;;  %v4281_v58 = vld [vmem:[%s6354_s3 + $0x364] sm:$0xf]  ;;  %v3401_v59 = vld [vmem:[%s6354_s3 + $0x370] sm:$0xf0]  ;;  %v3412_v61 = vor.u32 %v4282_v52, %v3409_v53  ;;  %v3400_v2 = vor.u32 %v4283_v57, %v3399_v55  ;;  %v4456_v55 = vunpack.c.h.bf16 %v4466_v62  ;;  %v64_v57 = vmul.f32 %v4612_v49, %v4440_v47 }
  0x5a   :  { %3161 = vmatmul.msk.bf16.vlgmr.msrb.gmra.mxu0 %vm103_vm0, %v673_v1  ;;  %3162 = vmatmul.msk.bf16.vlgmr.msrb.gmra.mxu1 %vm103_vm0, %v673_v1  ;;  %v3404_v3 = vor.u32 %v4281_v58, %v3401_v59  ;;  %v4297_v52 = vld [vmem:[%s6354_s3 + $0x3e4] sm:$0xf]  ;;  %v3485_v53 = vld [vmem:[%s6354_s3 + $0x3f0] sm:$0xf0]  ;;  %v71_v58 = vmul.f32 %v4612_v49, %v4455_v48  ;;  %v3492_v59 = vor.u32 %v4300_v41, %v3491_v37  ;;  %v4287_v41 = vld [vmem:[%s6354_s3 + $0x38c] sm:$0xf0] }
  0x5b   :  { %3163 = vmatmul.msk.bf16.vlgmr.msrb.gmra.mxu2 %vm103_vm0, %v673_v1  ;;  %3164 = vmatmul.msk.bf16.vlgmr.msrb.gmra.mxu3 %vm103_vm0, %v673_v1  ;;  %v4280_v1 = vld [vmem:[%s6354_s3 + $0x354] sm:$0xf0]  ;;  %v3437_v62 = vld [vmem:[%s6354_s3 + $0x390] sm:$0xf0] }
  0x5c   :  { %1111 = vmatpush.bf16.msrb.mxu2 %v3324_v7  ;;  %1124 = vmatpush.bf16.msrb.mxu3 %v3328_v8  ;;  %v4279_v7 = vld [vmem:[%s6354_s3 + $0x34c] sm:$0xf0]  ;;  %v4277_v8 = vld [vmem:[%s6354_s3 + $0x344] sm:$0xf]  ;;  %v3392_v10 = vor.u32 %v4280_v1, %v3391_v0  ;;  %v4296_v0 = vld [vmem:[%s6354_s3 + $0x3d4] sm:$0xf0] }
  0x5d   :  { %1085 = vmatpush.bf16.msrb.mxu0 %v3316_v11  ;;  %1098 = vmatpush.bf16.msrb.mxu1 %v3320_v12  ;;  %v3396_v11 = vor.u32 %v4278_v4, %v3393_v5  ;;  %v3375_v12 = vld [vmem:[%s6354_s3 + $0x328] sm:$0xf]  ;;  %v3384_v14 = vor.u32 %v4279_v7, %v3383_v6  ;;  %v3388_v15 = vor.u32 %v4277_v8, %v3385_v9  ;;  %v5309_v1 = vld [vmem:[%s6356_s1] ss:$0 sm:$0xff]  ;;  %v4294_v4 = vld [vmem:[%s6354_s3 + $0x3cc] sm:$0xf] }
  0x5e   :  { %v3376_v24 = vor.u32 %v4276_v13, %v3375_v12  ;;  %v3477_v5 = vld [vmem:[%s6354_s3 + $0x3d8] sm:$0xf0]  ;;  %v3467_v6 = vld [vmem:[%s6354_s3 + $0x3c0] sm:$0xf]  ;;  %v4295_v7 = vld [vmem:[%s6354_s3 + $0x3cc] sm:$0xf0] }
  0x5f   :  { %v4293_v8 = vld [vmem:[%s6354_s3 + $0x3c4] sm:$0xf]  ;;  %v3469_v9 = vld [vmem:[%s6354_s3 + $0x3d0] sm:$0xf0]  ;;  %v3468_v19 = vor.u32 %v4295_v7, %v3467_v6 }
  0x60   :  { %1112 = vmatpush.bf16.msrb.mxu2 %v3308_v21  ;;  %1125 = vmatpush.bf16.msrb.mxu3 %v3312_v22  ;;  %v4273_v21 = vld [vmem:[%s6354_s3 + $0x324] sm:$0xf]  ;;  %v3369_v22 = vld [vmem:[%s6354_s3 + $0x330] sm:$0xf0] }
  0x61   :  { %1086 = vmatpush.bf16.msrb.mxu0 %v3300_v25  ;;  %1099 = vmatpush.bf16.msrb.mxu1 %v3304_v26  ;;  %v3380_v25 = vor.u32 %v4274_v16, %v3377_v17  ;;  %v3359_v26 = vld [vmem:[%s6354_s3 + $0x308] sm:$0xf]  ;;  %v3372_v30 = vor.u32 %v4273_v21, %v3369_v22  ;;  %v3480_v16 = vor.u32 %v4294_v4, %v3477_v5  ;;  %v4290_v22 = vld [vmem:[%s6354_s3 + $0x3ac] sm:$0xf]  ;;  %v3551_v4 = vld [vmem:[%s6354_s3 + $0x440] sm:$0xf] }
  0x62   :  { %v3459_v17 = vld [vmem:[%s6354_s3 + $0x3a8] sm:$0xf]  ;;  %v3472_v21 = vor.u32 %v4293_v8, %v3469_v9  ;;  %v3464_v34 = vor.u32 %v4290_v22, %v3461_v23  ;;  %v4311_v5 = vld [vmem:[%s6354_s3 + $0x44c] sm:$0xf0]  ;;  %v4309_v6 = vld [vmem:[%s6354_s3 + $0x444] sm:$0xf] }
  0x63   :  { %v3460_v32 = vor.u32 %v4292_v18, %v3459_v17  ;;  %v3553_v7 = vld [vmem:[%s6354_s3 + $0x450] sm:$0xf0]  ;;  %v3543_v8 = vld [vmem:[%s6354_s3 + $0x428] sm:$0xf]  ;;  %v4308_v9 = vld [vmem:[%s6354_s3 + $0x434] sm:$0xf0] }
  0x64   :  { %1113 = vmatpush.bf16.msrb.mxu2 %v3292_v35  ;;  %1126 = vmatpush.bf16.msrb.mxu3 %v3296_v36  ;;  %v4269_v35 = vld [vmem:[%s6354_s3 + $0x304] sm:$0xf]  ;;  %v3353_v36 = vld [vmem:[%s6354_s3 + $0x310] sm:$0xf0]  ;;  %v4306_v17 = vld [vmem:[%s6354_s3 + $0x42c] sm:$0xf] }
  0x65   :  { %1087 = vmatpush.bf16.msrb.mxu0 %v3284_v38  ;;  %1100 = vmatpush.bf16.msrb.mxu1 %v3288_v39  ;;  %v3360_v38 = vor.u32 %v4272_v27, %v3359_v26  ;;  %v3364_v39 = vor.u32 %v4270_v28, %v3361_v31  ;;  %v3356_v43 = vor.u32 %v4269_v35, %v3353_v36  ;;  %v4289_v26 = vld [vmem:[%s6354_s3 + $0x3a4] sm:$0xf]  ;;  %v3453_v27 = vld [vmem:[%s6354_s3 + $0x3b0] sm:$0xf0]  ;;  %v3443_v35 = vld [vmem:[%s6354_s3 + $0x388] sm:$0xf] }
  0x66   :  { %v4288_v36 = vld [vmem:[%s6354_s3 + $0x394] sm:$0xf0]  ;;  %v3545_v18 = vld [vmem:[%s6354_s3 + $0x438] sm:$0xf0]  ;;  %v4305_v22 = vld [vmem:[%s6354_s3 + $0x424] sm:$0xf] }
  0x67   :  { %v3537_v23 = vld [vmem:[%s6354_s3 + $0x430] sm:$0xf0] }
  0x68   :  { %1114 = vmatpush.bf16.msrb.mxu2 %v3276_v45  ;;  %1127 = vmatpush.bf16.msrb.mxu3 %v3280_v46  ;;  %v3483_v45 = vld [vmem:[%s6354_s3 + $0x3e0] sm:$0xf]  ;;  %v4439_v46 = vunpack.c.l.bf16 %v4462_v42  ;;  %v4285_v42 = vld [vmem:[%s6354_s3 + $0x384] sm:$0xf] }
  0x69   :  { %1088 = vmatpush.bf16.msrb.mxu0 %v3268_v50  ;;  %1101 = vmatpush.bf16.msrb.mxu1 %v3272_v51  ;;  %v997_v50 = vpack.c.b16 %v996_v54, %v996_v54  ;;  %v4299_v51 = vld [vmem:[%s6354_s3 + $0x3ec] sm:$0xf0]  ;;  %v4286_v54 = vld [vmem:[%s6354_s3 + $0x38c] sm:$0xf]  ;;  %v3440_v48 = vor.u32 %v4285_v42, %v3437_v62 }
  0x6a   :  { %3245 = vmatmul.msk.bf16.vlgmr.msra.gmra.mxu0 %vm103_vm0, %v838_v56  ;;  %3246 = vmatmul.msk.bf16.vlgmr.msra.gmra.mxu1 %vm103_vm0, %v838_v56 }
  0x6b   :  { %3247 = vmatmul.msk.bf16.vlgmr.msra.gmra.mxu2 %vm103_vm0, %v838_v56  ;;  %3248 = vmatmul.msk.bf16.vlgmr.msra.gmra.mxu3 %vm103_vm0, %v838_v56  ;;  %v63_v56 = vmul.f32 %v4612_v49, %v4439_v46  ;;  %v3484_v49 = vor.u32 %v4299_v51, %v3483_v45  ;;  %v3575_v45 = vld [vmem:[%s6354_s3 + $0x468] sm:$0xf]  ;;  %v4316_v46 = vld [vmem:[%s6354_s3 + $0x474] sm:$0xf0]  ;;  %v3577_v51 = vld [vmem:[%s6354_s3 + $0x478] sm:$0xf0] }
  0x6c   :  { %1271 = vmatpush.bf16.msra.mxu2 %v3408_v60  ;;  %1284 = vmatpush.bf16.msra.mxu3 %v3412_v61  ;;  %v3496_v60 = vor.u32 %v4298_v63, %v3493_v44  ;;  %v3475_v61 = vld [vmem:[%s6354_s3 + $0x3c8] sm:$0xf]  ;;  %v3444_v63 = vor.u32 %v4288_v36, %v3443_v35  ;;  %v3529_v35 = vld [vmem:[%s6354_s3 + $0x418] sm:$0xf0]  ;;  %v3519_v36 = vld [vmem:[%s6354_s3 + $0x400] sm:$0xf] }
  0x6d   :  { %1245 = vmatpush.bf16.msra.mxu0 %v3400_v2  ;;  %1258 = vmatpush.bf16.msra.mxu1 %v3404_v3  ;;  %v72_v2 = vmul.f32 %v5309_v1, %v4456_v55  ;;  %v3488_v3 = vor.u32 %v4297_v52, %v3485_v53  ;;  %v3567_v52 = vld [vmem:[%s6354_s3 + $0x460] sm:$0xf]  ;;  %v4315_v55 = vld [vmem:[%s6354_s3 + $0x46c] sm:$0xf0] }
  0x70   :  { %1272 = vmatpush.bf16.msra.mxu2 %v3392_v10  ;;  %1285 = vmatpush.bf16.msra.mxu3 %v3396_v11  ;;  %v5335_v10 = vld [vmem:[%s6357_s2] ss:$0 sm:$0xff] }
  0x71   :  { %1246 = vmatpush.bf16.msra.mxu0 %v3384_v14  ;;  %1259 = vmatpush.bf16.msra.mxu1 %v3388_v15  ;;  %v83_v11 = vadd.f32 %v5335_v10, %v63_v56  ;;  %v84_v12 = vadd.f32 %v5335_v10, %v64_v57  ;;  %v91_v13 = vadd.f32 %v5335_v10, %v71_v58  ;;  %v4313_v56 = vld [vmem:[%s6354_s3 + $0x464] sm:$0xf]  ;;  %v3569_v57 = vld [vmem:[%s6354_s3 + $0x470] sm:$0xf0] }
  0x72   :  { %v92_v14 = vadd.f32 %v5335_v10, %v72_v2  ;;  %v3476_v15 = vor.u32 %v4296_v0, %v3475_v61  ;;  %v3576_v58 = vor.u32 %v4316_v46, %v3575_v45  ;;  %v4312_v61 = vld [vmem:[%s6354_s3 + $0x454] sm:$0xf0]  ;;  %v3568_v0 = vor.u32 %v4315_v55, %v3567_v52  ;;  %v4330_v46 = vld [vmem:[%s6354_s3 + $0x4ec] sm:$0xf]  ;;  %v4329_v52 = vld [vmem:[%s6354_s3 + $0x4e4] sm:$0xf] }
  0x73   :  { %v97_v28 = vmax.f32 %v83_v11, %v84_v12  ;;  %v3572_v2 = vor.u32 %v4313_v56, %v3569_v57 }
  0x74   :  { %1273 = vmatpush.bf16.msra.mxu2 %v3376_v24  ;;  %1286 = vmatpush.bf16.msra.mxu3 %v3380_v25  ;;  %v3451_v24 = vld [vmem:[%s6354_s3 + $0x3a0] sm:$0xf]  ;;  %v4291_v25 = vld [vmem:[%s6354_s3 + $0x3ac] sm:$0xf0]  ;;  %v101_v31 = vmax.f32 %v91_v13, %v92_v14 }
  0x75   :  { %1247 = vmatpush.bf16.msra.mxu0 %v3368_v29  ;;  %1260 = vmatpush.bf16.msra.mxu1 %v3372_v30  ;;  %v1154_v29 = vrot.slane %v5135_v33, 2  ;;  %v1155_v30 = vrot.slane %v5109_v20, 1  ;;  %v3452_v37 = vor.u32 %v4291_v25, %v3451_v24  ;;  %106 = vst.msk [vmem:[#allocation2 + $0x10] sm:$0xff] %vm103_vm0, %v97_v28  ;;  %v1314_v24 = vrot.slane %v5135_v33, 3 }
  0x76   :  { %110 = vst.msk [vmem:[#allocation2 + $0x30] sm:$0xff] %vm103_vm0, %v101_v31  ;;  %v1315_v25 = vrot.slane %v5109_v20, 2  ;;  %v4302_v20 = vld [vmem:[%s6354_s3 + $0x40c] sm:$0xf] }
  0x77   :  { %v3532_v62 = vor.u32 %v4302_v20, %v3529_v35  ;;  %v4317_v20 = vld [vmem:[%s6354_s3 + $0x484] sm:$0xf]  ;;  %v3605_v35 = vld [vmem:[%s6354_s3 + $0x490] sm:$0xf0] }
  0x78   :  { %1274 = vmatpush.bf16.msra.mxu2 %v3360_v38  ;;  %1287 = vmatpush.bf16.msra.mxu3 %v3364_v39  ;;  %v3456_v38 = vor.u32 %v4289_v26, %v3453_v27  ;;  %v3445_v39 = vld [vmem:[%s6354_s3 + $0x398] sm:$0xf0]  ;;  %v3527_v26 = vld [vmem:[%s6354_s3 + $0x408] sm:$0xf]  ;;  %v4304_v27 = vld [vmem:[%s6354_s3 + $0x414] sm:$0xf0] }
  0x79   :  { %1248 = vmatpush.bf16.msra.mxu0 %v3352_v40  ;;  %1261 = vmatpush.bf16.msra.mxu1 %v3356_v43  ;;  %v3435_v40 = vld [vmem:[%s6354_s3 + $0x380] sm:$0xf]  ;;  %v1156_v43 = vsel %vm192_vm1, %v1155_v30, %v1154_v29  ;;  %v3448_v44 = vor.u32 %v4286_v54, %v3445_v39  ;;  %v3544_v29 = vor.u32 %v4308_v9, %v3543_v8  ;;  %v4303_v54 = vld [vmem:[%s6354_s3 + $0x40c] sm:$0xf0] }
  0x7a   :  { %3329 = vmatmul.msk.bf16.vlgmr.msrb.gmra.mxu0 %vm103_vm0, %v997_v50  ;;  %3330 = vmatmul.msk.bf16.vlgmr.msrb.gmra.mxu1 %vm103_vm0, %v997_v50  ;;  %v3436_v47 = vor.u32 %v4287_v41, %v3435_v40  ;;  %v1157_v53 = vpack.c.b16 %v1156_v43, %v1156_v43  ;;  %v3548_v30 = vor.u32 %v4306_v17, %v3545_v18  ;;  %v3659_v43 = vld [vmem:[%s6354_s3 + $0x4e8] sm:$0xf]  ;;  %v3629_v17 = vld [vmem:[%s6354_s3 + $0x4b8] sm:$0xf0]  ;;  %v3619_v18 = vld [vmem:[%s6354_s3 + $0x4a0] sm:$0xf] }
  0x7b   :  { %3331 = vmatmul.msk.bf16.vlgmr.msrb.gmra.mxu2 %vm103_vm0, %v997_v50  ;;  %3332 = vmatmul.msk.bf16.vlgmr.msrb.gmra.mxu3 %vm103_vm0, %v997_v50  ;;  %v4314_v50 = vld [vmem:[%s6354_s3 + $0x46c] sm:$0xf]  ;;  %v1316_v39 = vsel %vm192_vm1, %v1315_v25, %v1314_v24  ;;  %v3528_v42 = vor.u32 %v4304_v27, %v3527_v26  ;;  %v3611_v27 = vld [vmem:[%s6354_s3 + $0x488] sm:$0xf] }
  0x7c   :  { %1431 = vmatpush.bf16.msrb.mxu2 %v3492_v59  ;;  %1444 = vmatpush.bf16.msrb.mxu3 %v3496_v60  ;;  %v3580_v59 = vor.u32 %v4314_v50, %v3577_v51  ;;  %v3559_v60 = vld [vmem:[%s6354_s3 + $0x448] sm:$0xf]  ;;  %v116_v31 = vld [vmem:[#allocation2 + $0x10] ss:$2 sm:$0xf]  ;;  %v1317_v50 = vpack.c.b16 %v1316_v39, %v1316_v39 }
  0x7d   :  { %1405 = vmatpush.bf16.msrb.mxu0 %v3484_v49  ;;  %1418 = vmatpush.bf16.msrb.mxu1 %v3488_v3  ;;  %v4310_v49 = vld [vmem:[%s6354_s3 + $0x44c] sm:$0xf]  ;;  %v3561_v3 = vld [vmem:[%s6354_s3 + $0x458] sm:$0xf0]  ;;  %v3560_v11 = vor.u32 %v4312_v61, %v3559_v60  ;;  %v4331_v51 = vld [vmem:[%s6354_s3 + $0x4ec] sm:$0xf0] }
  0x7e   :  { %v3564_v12 = vor.u32 %v4310_v49, %v3561_v3  ;;  %v124_v13 = vld [vmem:[#allocation2 + $0x30] ss:$2 sm:$0xf]  ;;  %v140_v14 = vld [vmem:[#allocation2 + $0x31] ss:$2 sm:$0xf] }
  0x7f   :  { %v149_v28 = vmax.f32 %v124_v13, %v140_v14  ;;  %v4328_v60 = vld [vmem:[%s6354_s3 + $0x4d4] sm:$0xf0]  ;;  %v3645_v49 = vld [vmem:[%s6354_s3 + $0x4d8] sm:$0xf0]  ;;  %v3635_v3 = vld [vmem:[%s6354_s3 + $0x4c0] sm:$0xf] }
  0x80   :  { %1432 = vmatpush.bf16.msrb.mxu2 %v3476_v15  ;;  %1445 = vmatpush.bf16.msrb.mxu3 %v3480_v16  ;;  %v3552_v15 = vor.u32 %v4311_v5, %v3551_v4  ;;  %v3556_v16 = vor.u32 %v4309_v6, %v3553_v7  ;;  %v4327_v4 = vld [vmem:[%s6354_s3 + $0x4cc] sm:$0xf0]  ;;  %v4325_v5 = vld [vmem:[%s6354_s3 + $0x4c4] sm:$0xf]  ;;  %v3637_v6 = vld [vmem:[%s6354_s3 + $0x4d0] sm:$0xf0] }
  0x81   :  { %1406 = vmatpush.bf16.msrb.mxu0 %v3468_v19  ;;  %1419 = vmatpush.bf16.msrb.mxu1 %v3472_v21  ;;  %v3535_v19 = vld [vmem:[%s6354_s3 + $0x420] sm:$0xf]  ;;  %v4307_v21 = vld [vmem:[%s6354_s3 + $0x42c] sm:$0xf0]  ;;  %v157_v41 = vmax.f32 %v149_v28, 0.0  ;;  %v3636_v14 = vor.u32 %v4327_v4, %v3635_v3 }
  0x82   :  { %v3536_v33 = vor.u32 %v4307_v21, %v3535_v19  ;;  %v4324_v13 = vld [vmem:[%s6354_s3 + $0x4b4] sm:$0xf0]  ;;  %v4323_v19 = vld [vmem:[%s6354_s3 + $0x4ac] sm:$0xf0]  ;;  %v4321_v21 = vld [vmem:[%s6354_s3 + $0x4a4] sm:$0xf] }
  0x83   :  { %v1458_v56 = vpack.c.bf16 %v157_v41, %v157_v41  ;;  %v4320_v28 = vld [vmem:[%s6354_s3 + $0x494] sm:$0xf0]  ;;  %v3608_v41 = vor.u32 %v4317_v20, %v3605_v35  ;;  %v3711_v4 = vld [vmem:[%s6354_s3 + $0x528] sm:$0xf] }
  0x84   :  { %1433 = vmatpush.bf16.msrb.mxu2 %v3460_v32  ;;  %1446 = vmatpush.bf16.msrb.mxu3 %v3464_v34  ;;  %v132_v32 = vld [vmem:[#allocation2 + $0x11] ss:$2 sm:$0xf]  ;;  %v3540_v34 = vor.u32 %v4305_v22, %v3537_v23  ;;  %v4348_v39 = vld [vmem:[%s6354_s3 + $0x574] sm:$0xf0] }
  0x85   :  { %1407 = vmatpush.bf16.msrb.mxu0 %v3452_v37  ;;  %1420 = vmatpush.bf16.msrb.mxu1 %v3456_v38  ;;  %v4301_v37 = vld [vmem:[%s6354_s3 + $0x404] sm:$0xf]  ;;  %v3521_v38 = vld [vmem:[%s6354_s3 + $0x410] sm:$0xf0]  ;;  %v145_v40 = vmax.f32 %v116_v31, %v132_v32  ;;  %v5551_v8 = vunpack.c.l.b16 %v1458_v56  ;;  %v4318_v31 = vld [vmem:[%s6354_s3 + $0x48c] sm:$0xf] }
  0x86   :  { %v3524_v45 = vor.u32 %v4301_v37, %v3521_v38  ;;  %v3621_v22 = vld [vmem:[%s6354_s3 + $0x4b0] sm:$0xf0]  ;;  %v3613_v32 = vld [vmem:[%s6354_s3 + $0x498] sm:$0xf0]  ;;  %v3743_v38 = vld [vmem:[%s6354_s3 + $0x568] sm:$0xf] }
  0x87   :  { %v153_v55 = vmax.f32 %v145_v40, 0.0  ;;  %v1480_v24 = vrot.slane %v5551_v8, 7  ;;  %v3616_v37 = vor.u32 %v4318_v31, %v3613_v32  ;;  %v3687_v31 = vld [vmem:[%s6354_s3 + $0x500] sm:$0xf]  ;;  %v4335_v32 = vld [vmem:[%s6354_s3 + $0x50c] sm:$0xf0] }
  0x88   :  { %1434 = vmatpush.bf16.msrb.mxu2 %v3444_v63  ;;  %1447 = vmatpush.bf16.msrb.mxu3 %v3448_v44  ;;  %v4332_v63 = vld [vmem:[%s6354_s3 + $0x4f4] sm:$0xf0]  ;;  %v3520_v44 = vor.u32 %v4303_v54, %v3519_v36  ;;  %v3612_v54 = vor.u32 %v4320_v28, %v3611_v27  ;;  %v4334_v27 = vld [vmem:[%s6354_s3 + $0x50c] sm:$0xf]  ;;  %v3697_v28 = vld [vmem:[%s6354_s3 + $0x518] sm:$0xf0] }
  0x89   :  { %1408 = vmatpush.bf16.msrb.mxu0 %v3436_v47  ;;  %1421 = vmatpush.bf16.msrb.mxu1 %v3440_v48  ;;  %v3661_v47 = vld [vmem:[%s6354_s3 + $0x4f8] sm:$0xf0]  ;;  %v3651_v48 = vld [vmem:[%s6354_s3 + $0x4e0] sm:$0xf]  ;;  %v3660_v57 = vor.u32 %v4332_v63, %v3659_v43  ;;  %v1457_v7 = vpack.c.bf16 %v153_v55, %v153_v55 }
  0x8a   :  { %3413 = vmatmul.msk.bf16.vlgmr.msra.gmra.mxu0 %vm103_vm0, %v1157_v53  ;;  %3414 = vmatmul.msk.bf16.vlgmr.msra.gmra.mxu1 %vm103_vm0, %v1157_v53  ;;  %v3652_v61 = vor.u32 %v4331_v51, %v3651_v48  ;;  %v3735_v43 = vld [vmem:[%s6354_s3 + $0x560] sm:$0xf] }
  0x8b   :  { %3415 = vmatmul.msk.bf16.vlgmr.msra.gmra.mxu2 %vm103_vm0, %v1157_v53  ;;  %3416 = vmatmul.msk.bf16.vlgmr.msra.gmra.mxu3 %vm103_vm0, %v1157_v53  ;;  %v3653_v53 = vld [vmem:[%s6354_s3 + $0x4f0] sm:$0xf0]  ;;  %v5577_v23 = vunpack.c.l.b16 %v1457_v7 }
  0x8c   :  { %1596 = vmatpush.bf16.msra.mxu2 %v3576_v58  ;;  %1609 = vmatpush.bf16.msra.mxu3 %v3580_v59  ;;  %v3664_v58 = vor.u32 %v4330_v46, %v3661_v47  ;;  %v3643_v59 = vld [vmem:[%s6354_s3 + $0x4c8] sm:$0xf]  ;;  %v3737_v46 = vld [vmem:[%s6354_s3 + $0x570] sm:$0xf0] }
  0x8d   :  { %1570 = vmatpush.bf16.msra.mxu0 %v3568_v0  ;;  %1583 = vmatpush.bf16.msra.mxu1 %v3572_v2  ;;  %v3656_v0 = vor.u32 %v4329_v52, %v3653_v53  ;;  %v4326_v2 = vld [vmem:[%s6354_s3 + $0x4cc] sm:$0xf]  ;;  %v3644_v9 = vor.u32 %v4328_v60, %v3643_v59  ;;  %v1481_v36 = vsel %vm192_vm1, %v1480_v24, %v5577_v23  ;;  %v3727_v52 = vld [vmem:[%s6354_s3 + $0x548] sm:$0xf]  ;;  %v4344_v53 = vld [vmem:[%s6354_s3 + $0x554] sm:$0xf0] }
  0x8e   :  { %v1482_v63 = vpack.c.b16 %v1481_v36, %v1481_v36  ;;  %v3719_v59 = vld [vmem:[%s6354_s3 + $0x540] sm:$0xf]  ;;  %v4343_v60 = vld [vmem:[%s6354_s3 + $0x54c] sm:$0xf0]  ;;  %v3689_v36 = vld [vmem:[%s6354_s3 + $0x510] sm:$0xf0] }
  0x90   :  { %1597 = vmatpush.bf16.msra.mxu2 %v3560_v11  ;;  %1610 = vmatpush.bf16.msra.mxu3 %v3564_v12  ;;  %v3648_v11 = vor.u32 %v4326_v2, %v3645_v49  ;;  %v3627_v12 = vld [vmem:[%s6354_s3 + $0x4a8] sm:$0xf]  ;;  %v1639_v2 = vrot.slane %v5577_v23, 1  ;;  %v3728_v49 = vor.u32 %v4344_v53, %v3727_v52  ;;  %v3819_v52 = vld [vmem:[%s6354_s3 + $0x5e0] sm:$0xf] }
  0x91   :  { %1571 = vmatpush.bf16.msra.mxu0 %v3552_v15  ;;  %1584 = vmatpush.bf16.msra.mxu1 %v3556_v16  ;;  %v3640_v15 = vor.u32 %v4325_v5, %v3637_v6  ;;  %v4322_v16 = vld [vmem:[%s6354_s3 + $0x4ac] sm:$0xf]  ;;  %v3628_v25 = vor.u32 %v4324_v13, %v3627_v12  ;;  %v4340_v5 = vld [vmem:[%s6354_s3 + $0x534] sm:$0xf0]  ;;  %v3720_v6 = vor.u32 %v4343_v60, %v3719_v59  ;;  %v3703_v12 = vld [vmem:[%s6354_s3 + $0x520] sm:$0xf] }
  0x92   :  { %v3632_v26 = vor.u32 %v4322_v16, %v3629_v17  ;;  %v4337_v16 = vld [vmem:[%s6354_s3 + $0x524] sm:$0xf]  ;;  %v3705_v17 = vld [vmem:[%s6354_s3 + $0x530] sm:$0xf0]  ;;  %v3712_v24 = vor.u32 %v4340_v5, %v3711_v4  ;;  %v1640_v35 = vsel %vm192_vm1, %v5551_v8, %v1639_v2 }
  0x93   :  { %v4361_v59 = vld [vmem:[%s6354_s3 + $0x5e4] sm:$0xf]  ;;  %v3821_v60 = vld [vmem:[%s6354_s3 + $0x5f0] sm:$0xf0] }
  0x94   :  { %1598 = vmatpush.bf16.msra.mxu2 %v3544_v29  ;;  %1611 = vmatpush.bf16.msra.mxu3 %v3548_v30  ;;  %v3620_v29 = vor.u32 %v4323_v19, %v3619_v18  ;;  %v3624_v30 = vor.u32 %v4321_v21, %v3621_v22  ;;  %v5694_v18 = vld [vmem:[%s6358_s4] sm:$0xf]  ;;  %v3695_v22 = vld [vmem:[%s6354_s3 + $0x508] sm:$0xf] }
  0x95   :  { %1572 = vmatpush.bf16.msra.mxu0 %v3536_v33  ;;  %1585 = vmatpush.bf16.msra.mxu1 %v3540_v34  ;;  %v3603_v33 = vld [vmem:[%s6354_s3 + $0x480] sm:$0xf]  ;;  %v4319_v34 = vld [vmem:[%s6354_s3 + $0x48c] sm:$0xf0]  ;;  %v162_v20 = vperm.slane %v5694_v18, 1  ;;  %v164_v5 = vperm.slane %v5694_v18, 3 }
  0x96   :  { %v3604_v40 = vor.u32 %v4319_v34, %v3603_v33  ;;  %v4333_v33 = vld [vmem:[%s6354_s3 + $0x504] sm:$0xf]  ;;  %v161_v34 = vperm.slane %v5694_v18, 0 }
  0x98   :  { %1599 = vmatpush.bf16.msra.mxu2 %v3528_v42  ;;  %1612 = vmatpush.bf16.msra.mxu3 %v3532_v62  ;;  %v4346_v42 = vld [vmem:[%s6354_s3 + $0x56c] sm:$0xf]  ;;  %v3745_v62 = vld [vmem:[%s6354_s3 + $0x578] sm:$0xf0] }
  0x99   :  { %1573 = vmatpush.bf16.msra.mxu0 %v3520_v44  ;;  %1586 = vmatpush.bf16.msra.mxu1 %v3524_v45  ;;  %v4347_v44 = vld [vmem:[%s6354_s3 + $0x56c] sm:$0xf0]  ;;  %v4345_v45 = vld [vmem:[%s6354_s3 + $0x564] sm:$0xf]  ;;  %v3748_v51 = vor.u32 %v4346_v42, %v3745_v62  ;;  %v3700_v42 = vor.u32 %v4334_v27, %v3697_v28  ;;  %v3827_v62 = vld [vmem:[%s6354_s3 + $0x5e8] sm:$0xf] }
  0x9a   :  { %3497 = vmatmul.msk.bf16.vlgmr.msrb.gmra.mxu0 %vm103_vm0, %v1317_v50  ;;  %3498 = vmatmul.msk.bf16.vlgmr.msrb.gmra.mxu1 %vm103_vm0, %v1317_v50  ;;  %v3736_v55 = vor.u32 %v4347_v44, %v3735_v43  ;;  %v3740_v56 = vor.u32 %v4345_v45, %v3737_v46  ;;  %v4364_v43 = vld [vmem:[%s6354_s3 + $0x5f4] sm:$0xf0]  ;;  %v1641_v44 = vpack.c.b16 %v1640_v35, %v1640_v35  ;;  %v3797_v35 = vld [vmem:[%s6354_s3 + $0x5b8] sm:$0xf0] }
  0x9b   :  { %3499 = vmatmul.msk.bf16.vlgmr.msrb.gmra.mxu2 %vm103_vm0, %v1317_v50  ;;  %3500 = vmatmul.msk.bf16.vlgmr.msrb.gmra.mxu3 %vm103_vm0, %v1317_v50  ;;  %v3744_v50 = vor.u32 %v4348_v39, %v3743_v38  ;;  %v3688_v45 = vor.u32 %v4335_v32, %v3687_v31  ;;  %v3692_v46 = vor.u32 %v4333_v33, %v3689_v36  ;;  %v3795_v32 = vld [vmem:[%s6354_s3 + $0x5a8] sm:$0xf]  ;;  %v4356_v33 = vld [vmem:[%s6354_s3 + $0x5b4] sm:$0xf0]  ;;  %v3787_v36 = vld [vmem:[%s6354_s3 + $0x5a0] sm:$0xf] }
  0x9c   :  { %1755 = vmatpush.bf16.msrb.mxu2 %v3660_v57  ;;  %1768 = vmatpush.bf16.msrb.mxu3 %v3664_v58  ;;  %v4342_v57 = vld [vmem:[%s6354_s3 + $0x54c] sm:$0xf]  ;;  %v3729_v58 = vld [vmem:[%s6354_s3 + $0x558] sm:$0xf0] }
  0x9d   :  { %1729 = vmatpush.bf16.msrb.mxu0 %v3652_v61  ;;  %1742 = vmatpush.bf16.msrb.mxu1 %v3656_v0  ;;  %v4341_v61 = vld [vmem:[%s6354_s3 + $0x544] sm:$0xf]  ;;  %v3721_v0 = vld [vmem:[%s6354_s3 + $0x550] sm:$0xf0]  ;;  %v3732_v3 = vor.u32 %v4342_v57, %v3729_v58  ;;  %v4363_v58 = vld [vmem:[%s6354_s3 + $0x5ec] sm:$0xf0] }
  0x9e   :  { %v3724_v7 = vor.u32 %v4341_v61, %v3721_v0 }
  0xa0   :  { %1756 = vmatpush.bf16.msrb.mxu2 %v3644_v9  ;;  %1769 = vmatpush.bf16.msrb.mxu3 %v3648_v11  ;;  %v4338_v9 = vld [vmem:[%s6354_s3 + $0x52c] sm:$0xf]  ;;  %v3713_v11 = vld [vmem:[%s6354_s3 + $0x538] sm:$0xf0] }
  0xa1   :  { %1730 = vmatpush.bf16.msrb.mxu0 %v3636_v14  ;;  %1743 = vmatpush.bf16.msrb.mxu1 %v3640_v15  ;;  %v4339_v15 = vld [vmem:[%s6354_s3 + $0x52c] sm:$0xf0] }
  0xa4   :  { %1757 = vmatpush.bf16.msrb.mxu2 %v3628_v25  ;;  %1770 = vmatpush.bf16.msrb.mxu3 %v3632_v26  ;;  %v3716_v25 = vor.u32 %v4338_v9, %v3713_v11  ;;  %v4336_v26 = vld [vmem:[%s6354_s3 + $0x514] sm:$0xf0]  ;;  %v3811_v11 = vld [vmem:[%s6354_s3 + $0x5c8] sm:$0xf] }
  0xa5   :  { %1731 = vmatpush.bf16.msrb.mxu0 %v3620_v29  ;;  %1744 = vmatpush.bf16.msrb.mxu1 %v3624_v30  ;;  %v3704_v29 = vor.u32 %v4339_v15, %v3703_v12  ;;  %v3708_v30 = vor.u32 %v4337_v16, %v3705_v17  ;;  %v4360_v12 = vld [vmem:[%s6354_s3 + $0x5d4] sm:$0xf0]  ;;  %v3824_v15 = vor.u32 %v4361_v59, %v3821_v60  ;;  %v4358_v16 = vld [vmem:[%s6354_s3 + $0x5cc] sm:$0xf]  ;;  %v3813_v17 = vld [vmem:[%s6354_s3 + $0x5d8] sm:$0xf0] }
  0xa6   :  { %v3816_v31 = vor.u32 %v4358_v16, %v3813_v17  ;;  %v4349_v59 = vld [vmem:[%s6354_s3 + $0x584] sm:$0xf]  ;;  %v3773_v60 = vld [vmem:[%s6354_s3 + $0x590] sm:$0xf0] }
  0xa7   :  { %v5630_v47 = vpop.f32.mrf.mxu0  ;;  %v5632_v48 = vpop.f32.mrf.mxu1  ;;  %v4377_v16 = vld [vmem:[%s6354_s3 + $0x664] sm:$0xf]  ;;  %v3905_v17 = vld [vmem:[%s6354_s3 + $0x670] sm:$0xf0] }
  0xa8   :  { %1758 = vmatpush.bf16.msrb.mxu2 %v3612_v54  ;;  %1771 = vmatpush.bf16.msrb.mxu3 %v3616_v37  ;;  %v4463_v54 = vld [vmem:[%s6355_s0 + $0x18] sm:$0xff]   ;;  %v330_v53 = vadd.f32 %v5630_v47, %v161_v34 }
  0xa9   :  { %1732 = vmatpush.bf16.msrb.mxu0 %v3604_v40  ;;  %1745 = vmatpush.bf16.msrb.mxu1 %v3608_v41  ;;  %v4467_v37 = vld [vmem:[%s6355_s0 + $0x38] sm:$0xff]   ;;  %v4443_v38 = vunpack.c.l.bf16 %v4463_v54  ;;  %v4444_v39 = vunpack.c.h.bf16 %v4463_v54  ;;  %v3696_v41 = vor.u32 %v4336_v26, %v3695_v22  ;;  %v3805_v22 = vld [vmem:[%s6354_s3 + $0x5d0] sm:$0xf0] }
  0xaa   :  { %3581 = vmatmul.msk.bf16.vlgmr.msra.gmra.mxu0 %vm103_vm0, %v1482_v63  ;;  %3582 = vmatmul.msk.bf16.vlgmr.msra.gmra.mxu1 %vm103_vm0, %v1482_v63  ;;  %v4459_v40 = vunpack.c.l.bf16 %v4467_v37 }
  0xab   :  { %3583 = vmatmul.msk.bf16.vlgmr.msra.gmra.mxu2 %vm103_vm0, %v1482_v63  ;;  %3584 = vmatmul.msk.bf16.vlgmr.msra.gmra.mxu3 %vm103_vm0, %v1482_v63  ;;  %v4460_v63 = vunpack.c.h.bf16 %v4467_v37  ;;  %v65_v61 = vmul.f32 %v5309_v1, %v4443_v38  ;;  %v66_v47 = vmul.f32 %v5309_v1, %v4444_v39  ;;  %v4353_v38 = vld [vmem:[%s6354_s3 + $0x5a4] sm:$0xf]  ;;  %v3789_v39 = vld [vmem:[%s6354_s3 + $0x5b0] sm:$0xf0] }
  0xac   :  { %1915 = vmatpush.bf16.msra.mxu2 %v3744_v50  ;;  %1928 = vmatpush.bf16.msra.mxu3 %v3748_v51  ;;  %v4362_v50 = vld [vmem:[%s6354_s3 + $0x5ec] sm:$0xf]  ;;  %v3829_v51 = vld [vmem:[%s6354_s3 + $0x5f8] sm:$0xf0] }
  0xad   :  { %1889 = vmatpush.bf16.msra.mxu0 %v3736_v55  ;;  %1902 = vmatpush.bf16.msra.mxu1 %v3740_v56  ;;  %v331_v55 = vadd.f32 %v5632_v48, %v162_v20  ;;  %v163_v48 = vperm.slane %v5694_v18, 2  ;;  %v74_v4 = vmul.f32 %v5309_v1, %v4460_v63  ;;  %v3832_v9 = vor.u32 %v4362_v50, %v3829_v51  ;;  %v3803_v18 = vld [vmem:[%s6354_s3 + $0x5c0] sm:$0xf]  ;;  %v4354_v20 = vld [vmem:[%s6354_s3 + $0x5ac] sm:$0xf] }
  0xae   :  { %v5678_v13 = vpop.f32.mrf.mxu2  ;;  %v5680_v14 = vpop.f32.mrf.mxu3  ;;  %v1799_v63 = vrot.slane %v5551_v8, 1  ;;  %v3779_v50 = vld [vmem:[%s6354_s3 + $0x588] sm:$0xf]  ;;  %v4352_v51 = vld [vmem:[%s6354_s3 + $0x594] sm:$0xf0] }
  0xaf   :  { %v289_v19 = vpop.f32.mrf.mxu0  ;;  %v302_v21 = vpop.f32.mrf.mxu1  ;;  %v94_v27 = vadd.f32 %v5335_v10, %v74_v4  ;;  %v332_v28 = vadd.f32 %v5678_v13, %v163_v48  ;;  %v333_v34 = vadd.f32 %v5680_v14, %v164_v5  ;;  %v4355_v14 = vld [vmem:[%s6354_s3 + $0x5ac] sm:$0xf0]  ;;  %v4378_v4 = vld [vmem:[%s6354_s3 + $0x66c] sm:$0xf]  ;;  %v3913_v5 = vld [vmem:[%s6354_s3 + $0x678] sm:$0xf0] }
  0xb0   :  { %1916 = vmatpush.bf16.msra.mxu2 %v3728_v49  ;;  %1929 = vmatpush.bf16.msra.mxu3 %v3732_v3  ;;  %v3828_v49 = vor.u32 %v4364_v43, %v3827_v62  ;;  %v73_v3 = vmul.f32 %v5309_v1, %v4459_v40  ;;  %v3820_v1 = vor.u32 %v4363_v58, %v3819_v52  ;;  %v4359_v19 = vld [vmem:[%s6354_s3 + $0x5cc] sm:$0xf0]  ;;  %v4357_v21 = vld [vmem:[%s6354_s3 + $0x5c4] sm:$0xf]  ;;  %v4350_v52 = vld [vmem:[%s6354_s3 + $0x58c] sm:$0xf] }
  0xb1   :  { %1890 = vmatpush.bf16.msra.mxu0 %v3720_v6  ;;  %1903 = vmatpush.bf16.msra.mxu1 %v3724_v7  ;;  %v3808_v13 = vor.u32 %v4357_v21, %v3805_v22  ;;  %v4351_v58 = vld [vmem:[%s6354_s3 + $0x58c] sm:$0xf0] }
  0xb2   :  { %v93_v26 = vadd.f32 %v5335_v10, %v73_v3  ;;  %v3776_v3 = vor.u32 %v4349_v59, %v3773_v60 }
  0xb4   :  { %1917 = vmatpush.bf16.msra.mxu2 %v3712_v24  ;;  %1930 = vmatpush.bf16.msra.mxu3 %v3716_v25  ;;  %v85_v24 = vadd.f32 %v5335_v10, %v65_v61  ;;  %v86_v25 = vadd.f32 %v5335_v10, %v66_v47  ;;  %v3804_v10 = vor.u32 %v4359_v19, %v3803_v18 }
  0xb5   :  { %1891 = vmatpush.bf16.msra.mxu0 %v3704_v29  ;;  %1904 = vmatpush.bf16.msra.mxu1 %v3708_v30  ;;  %v1798_v29 = vrot.slane %v5577_v23, 2  ;;  %v3812_v30 = vor.u32 %v4360_v12, %v3811_v11  ;;  %v3780_v47 = vor.u32 %v4352_v51, %v3779_v50 }
  0xb6   :  { %v315_v56 = vpop.f32.mrf.mxu2  ;;  %v328_v57 = vpop.f32.mrf.mxu3  ;;  %v98_v40 = vmax.f32 %v85_v24, %v86_v25  ;;  %v3916_v25 = vor.u32 %v4378_v4, %v3913_v5 }
  0xb7   :  { %v446_v0 = vpop.f32.mrf.mxu0  ;;  %v459_v2 = vpop.f32.mrf.mxu1  ;;  %v3781_v56 = vld [vmem:[%s6354_s3 + $0x598] sm:$0xf0]  ;;  %v3771_v57 = vld [vmem:[%s6354_s3 + $0x580] sm:$0xf]  ;;  %v1800_v61 = vsel %vm192_vm1, %v1799_v63, %v1798_v29  ;;  %v3908_v29 = vor.u32 %v4377_v16, %v3905_v17  ;;  %v4369_v63 = vld [vmem:[%s6354_s3 + $0x624] sm:$0xf] }
  0xb8   :  { %v5762_v6 = vadd.f32 %v446_v0, %v330_v53  ;;  %v5764_v7 = vadd.f32 %v459_v2, %v331_v55  ;;  %1918 = vmatpush.bf16.msra.mxu2 %v3696_v41  ;;  %1931 = vmatpush.bf16.msra.mxu3 %v3700_v42  ;;  %v3788_v53 = vor.u32 %v4355_v14, %v3787_v36  ;;  %v3911_v0 = vld [vmem:[%s6354_s3 + $0x668] sm:$0xf]  ;;  %v4380_v2 = vld [vmem:[%s6354_s3 + $0x674] sm:$0xf0]  ;;  %v4394_v16 = vld [vmem:[%s6354_s3 + $0x6ec] sm:$0xf] }
  0xb9   :  { %1892 = vmatpush.bf16.msra.mxu0 %v3688_v45  ;;  %1905 = vmatpush.bf16.msra.mxu1 %v3692_v46  ;;  %v3796_v45 = vor.u32 %v4356_v33, %v3795_v32  ;;  %v3800_v46 = vor.u32 %v4354_v20, %v3797_v35  ;;  %v3792_v55 = vor.u32 %v4353_v38, %v3789_v39  ;;  %v4373_v32 = vld [vmem:[%s6354_s3 + $0x644] sm:$0xf]  ;;  %v3889_v33 = vld [vmem:[%s6354_s3 + $0x650] sm:$0xf0]  ;;  %v3881_v38 = vld [vmem:[%s6354_s3 + $0x638] sm:$0xf0] }
  0xba   :  { %3665 = vmatmul.msk.bf16.vlgmr.msrb.gmra.mxu0 %vm103_vm0, %v1641_v44  ;;  %3666 = vmatmul.msk.bf16.vlgmr.msrb.gmra.mxu1 %vm103_vm0, %v1641_v44  ;;  %107 = vst.msk [vmem:[#allocation2 + $0x18] sm:$0xff] %vm103_vm0, %v98_v40  ;;  %v3784_v48 = vor.u32 %v4350_v52, %v3781_v56  ;;  %v3912_v21 = vor.u32 %v4380_v2, %v3911_v0  ;;  %v3871_v39 = vld [vmem:[%s6354_s3 + $0x620] sm:$0xf]  ;;  %v1959_v52 = vrot.slane %v5551_v8, 2  ;;  %v4366_v8 = vld [vmem:[%s6354_s3 + $0x60c] sm:$0xf] }
  0xbb   :  { %3667 = vmatmul.msk.bf16.vlgmr.msrb.gmra.mxu2 %vm103_vm0, %v1641_v44  ;;  %3668 = vmatmul.msk.bf16.vlgmr.msrb.gmra.mxu3 %vm103_vm0, %v1641_v44  ;;  %v102_v44 = vmax.f32 %v93_v26, %v94_v27  ;;  %v3895_v26 = vld [vmem:[%s6354_s3 + $0x648] sm:$0xf]  ;;  %v4376_v27 = vld [vmem:[%s6354_s3 + $0x654] sm:$0xf0]  ;;  %v3892_v14 = vor.u32 %v4373_v32, %v3889_v33  ;;  %v4365_v0 = vld [vmem:[%s6354_s3 + $0x604] sm:$0xf] }
  0xbc   :  { %2075 = vmatpush.bf16.msrb.mxu2 %v3828_v49  ;;  %2088 = vmatpush.bf16.msrb.mxu3 %v3832_v9  ;;  %v3772_v49 = vor.u32 %v4351_v58, %v3771_v57  ;;  %v3903_v9 = vld [vmem:[%s6354_s3 + $0x660] sm:$0xf]  ;;  %v3896_v20 = vor.u32 %v4376_v27, %v3895_v26  ;;  %v3857_v2 = vld [vmem:[%s6354_s3 + $0x610] sm:$0xf0]  ;;  %v3997_v17 = vld [vmem:[%s6354_s3 + $0x6f8] sm:$0xf0] }
  0xbd   :  { %2049 = vmatpush.bf16.msrb.mxu0 %v3820_v1  ;;  %2062 = vmatpush.bf16.msrb.mxu1 %v3824_v15  ;;  %111 = vst.msk [vmem:[#allocation2 + $0x38] sm:$0xff] %vm103_vm0, %v102_v44  ;;  %v1801_v1 = vpack.c.b16 %v1800_v61, %v1800_v61  ;;  %v4379_v15 = vld [vmem:[%s6354_s3 + $0x66c] sm:$0xf0]  ;;  %v3873_v44 = vld [vmem:[%s6354_s3 + $0x630] sm:$0xf0] }
  0xbe   :  { %v472_v54 = vpop.f32.mrf.mxu2  ;;  %v485_v37 = vpop.f32.mrf.mxu3  ;;  %v3876_v60 = vor.u32 %v4369_v63, %v3873_v44  ;;  %v3865_v61 = vld [vmem:[%s6354_s3 + $0x618] sm:$0xf0]  ;;  %v4395_v26 = vld [vmem:[%s6354_s3 + $0x6ec] sm:$0xf0]  ;;  %v4393_v27 = vld [vmem:[%s6354_s3 + $0x6e4] sm:$0xf] }
  0xbf   :  { %v5825_v41 = vadd.f32 %v472_v54, %v332_v28  ;;  %v5827_v42 = vadd.f32 %v485_v37, %v333_v34  ;;  %v448_v62 = vpop.f32.mrf.mxu0  ;;  %v461_v43 = vpop.f32.mrf.mxu1  ;;  %v3904_v28 = vor.u32 %v4379_v15, %v3903_v9  ;;  %v1958_v34 = vrot.slane %v5577_v23, 3  ;;  %v4370_v23 = vld [vmem:[%s6354_s3 + $0x62c] sm:$0xf] }
  0xc0   :  { %2076 = vmatpush.bf16.msrb.mxu2 %v3812_v30  ;;  %2089 = vmatpush.bf16.msrb.mxu3 %v3816_v31  ;;  %v3887_v30 = vld [vmem:[%s6354_s3 + $0x640] sm:$0xf]  ;;  %v4375_v31 = vld [vmem:[%s6354_s3 + $0x64c] sm:$0xf0]  ;;  %v3884_v57 = vor.u32 %v4370_v23, %v3881_v38  ;;  %v3868_v9 = vor.u32 %v4366_v8, %v3865_v61  ;;  %v3860_v15 = vor.u32 %v4365_v0, %v3857_v2  ;;  %v3947_v0 = vld [vmem:[%s6354_s3 + $0x688] sm:$0xf] }
  0xc1   :  { %2050 = vmatpush.bf16.msrb.mxu0 %v3804_v10  ;;  %2063 = vmatpush.bf16.msrb.mxu1 %v3808_v13  ;;  %v3879_v10 = vld [vmem:[%s6354_s3 + $0x628] sm:$0xf]  ;;  %v4372_v13 = vld [vmem:[%s6354_s3 + $0x634] sm:$0xf0]  ;;  %v3888_v37 = vor.u32 %v4375_v31, %v3887_v30  ;;  %v4371_v43 = vld [vmem:[%s6354_s3 + $0x62c] sm:$0xf0] }
  0xc2   :  { %v118_v58 = vld [vmem:[#allocation2 + $0x18] ss:$2 sm:$0xf]  ;;  %v3872_v59 = vor.u32 %v4371_v43, %v3871_v39 }
  0xc3   :  { %v4388_v43 = vld [vmem:[%s6354_s3 + $0x6b4] sm:$0xf0] }
  0xc4   :  { %2077 = vmatpush.bf16.msrb.mxu2 %v3796_v45  ;;  %2090 = vmatpush.bf16.msrb.mxu3 %v3800_v46  ;;  %v126_v36 = vld [vmem:[#allocation2 + $0x38] ss:$2 sm:$0xf]  ;;  %v142_v54 = vld [vmem:[#allocation2 + $0x39] ss:$2 sm:$0xf] }
  0xc5   :  { %2051 = vmatpush.bf16.msrb.mxu0 %v3788_v53  ;;  %2064 = vmatpush.bf16.msrb.mxu1 %v3792_v55  ;;  %v3863_v53 = vld [vmem:[%s6354_s3 + $0x608] sm:$0xf]  ;;  %v4368_v55 = vld [vmem:[%s6354_s3 + $0x614] sm:$0xf0]  ;;  %v150_v56 = vmax.f32 %v126_v36, %v142_v54  ;;  %v3971_v36 = vld [vmem:[%s6354_s3 + $0x6c0] sm:$0xf] }
  0xc6   :  { %v474_v11 = vpop.f32.mrf.mxu2  ;;  %v487_v12 = vpop.f32.mrf.mxu3  ;;  %v3864_v5 = vor.u32 %v4368_v55, %v3863_v53  ;;  %v4391_v54 = vld [vmem:[%s6354_s3 + $0x6cc] sm:$0xf0] }
  0xc7   :  { %v606_v18 = vpop.f32.mrf.mxu0  ;;  %v619_v19 = vpop.f32.mrf.mxu1  ;;  %v158_v4 = vmax.f32 %v150_v56, 0.0  ;;  %v3995_v11 = vld [vmem:[%s6354_s3 + $0x6e8] sm:$0xf]  ;;  %v4396_v12 = vld [vmem:[%s6354_s3 + $0x6f4] sm:$0xf0]  ;;  %v3972_v63 = vor.u32 %v4391_v54, %v3971_v36 }
  0xc8   :  { %v5882_v22 = vadd.f32 %v606_v18, %v5762_v6  ;;  %v5885_v24 = vadd.f32 %v619_v19, %v5764_v7  ;;  %2078 = vmatpush.bf16.msrb.mxu2 %v3780_v47  ;;  %2091 = vmatpush.bf16.msrb.mxu3 %v3784_v48  ;;  %v4374_v6 = vld [vmem:[%s6354_s3 + $0x64c] sm:$0xf]  ;;  %v3897_v7 = vld [vmem:[%s6354_s3 + $0x658] sm:$0xf0]  ;;  %v3855_v47 = vld [vmem:[%s6354_s3 + $0x600] sm:$0xf]  ;;  %v3996_v31 = vor.u32 %v4396_v12, %v3995_v11 }
  0xc9   :  { %2052 = vmatpush.bf16.msrb.mxu0 %v3772_v49  ;;  %2065 = vmatpush.bf16.msrb.mxu1 %v3776_v3  ;;  %v3900_v35 = vor.u32 %v4374_v6, %v3897_v7  ;;  %v4367_v48 = vld [vmem:[%s6354_s3 + $0x60c] sm:$0xf0]  ;;  %v1960_v49 = vsel %vm192_vm1, %v1959_v52, %v1958_v34  ;;  %v3987_v18 = vld [vmem:[%s6354_s3 + $0x6e0] sm:$0xf]  ;;  %v2102_v30 = vpack.c.bf16 %v158_v4, %v158_v4  ;;  %v3941_v11 = vld [vmem:[%s6354_s3 + $0x690] sm:$0xf0] }
  0xca   :  { %3749 = vmatmul.msk.bf16.vlgmr.msra.gmra.mxu0 %vm103_vm0, %v1801_v1  ;;  %3750 = vmatmul.msk.bf16.vlgmr.msra.gmra.mxu1 %vm103_vm0, %v1801_v1  ;;  %v4000_v34 = vor.u32 %v4394_v16, %v3997_v17  ;;  %v3955_v52 = vld [vmem:[%s6354_s3 + $0x6a0] sm:$0xf]  ;;  %v4387_v56 = vld [vmem:[%s6354_s3 + $0x6ac] sm:$0xf0]  ;;  %v4079_v16 = vld [vmem:[%s6354_s3 + $0x768] sm:$0xf] }
  0xcb   :  { %3751 = vmatmul.msk.bf16.vlgmr.msra.gmra.mxu2 %vm103_vm0, %v1801_v1  ;;  %3752 = vmatmul.msk.bf16.vlgmr.msra.gmra.mxu3 %vm103_vm0, %v1801_v1  ;;  %v3856_v1 = vor.u32 %v4367_v48, %v3855_v47  ;;  %v6030_v38 = vunpack.c.l.b16 %v2102_v30  ;;  %v3939_v4 = vld [vmem:[%s6354_s3 + $0x680] sm:$0xf]  ;;  %v4412_v17 = vld [vmem:[%s6354_s3 + $0x774] sm:$0xf0]  ;;  %v4073_v30 = vld [vmem:[%s6354_s3 + $0x770] sm:$0xf0] }
  0xcc   :  { %2240 = vmatpush.bf16.msra.mxu2 %v3912_v21  ;;  %2253 = vmatpush.bf16.msra.mxu3 %v3916_v25  ;;  %v1961_v25 = vpack.c.b16 %v1960_v49, %v1960_v49  ;;  %v4382_v49 = vld [vmem:[%s6354_s3 + $0x68c] sm:$0xf] }
  0xcd   :  { %2214 = vmatpush.bf16.msra.mxu0 %v3904_v28  ;;  %2227 = vmatpush.bf16.msra.mxu1 %v3908_v29  ;;  %v3989_v28 = vld [vmem:[%s6354_s3 + $0x6f0] sm:$0xf0]  ;;  %v2124_v61 = vrot.slane %v6030_v38, 7 }
  0xce   :  { %v632_v40 = vpop.f32.mrf.mxu2  ;;  %v645_v62 = vpop.f32.mrf.mxu3 }
  0xcf   :  { %v5941_v45 = vadd.f32 %v632_v40, %v5825_v41  ;;  %v5944_v46 = vadd.f32 %v645_v62, %v5827_v42  ;;  %v608_v50 = vpop.f32.mrf.mxu0  ;;  %v621_v51 = vpop.f32.mrf.mxu1  ;;  %v3880_v41 = vor.u32 %v4372_v13, %v3879_v10  ;;  %v134_v42 = vld [vmem:[#allocation2 + $0x19] ss:$2 sm:$0xf]  ;;  %v3979_v10 = vld [vmem:[%s6354_s3 + $0x6c8] sm:$0xf] }
  0xd0   :  { %2241 = vmatpush.bf16.msra.mxu2 %v3896_v20  ;;  %2254 = vmatpush.bf16.msra.mxu3 %v3900_v35  ;;  %v146_v3 = vmax.f32 %v118_v58, %v134_v42  ;;  %v4392_v13 = vld [vmem:[%s6354_s3 + $0x6d4] sm:$0xf0]  ;;  %v3988_v20 = vor.u32 %v4395_v26, %v3987_v18  ;;  %v3992_v35 = vor.u32 %v4393_v27, %v3989_v28  ;;  %v3963_v62 = vld [vmem:[%s6354_s3 + $0x6a8] sm:$0xf]  ;;  %v4386_v50 = vld [vmem:[%s6354_s3 + $0x6ac] sm:$0xf] }
  0xd1   :  { %2215 = vmatpush.bf16.msra.mxu0 %v3888_v37  ;;  %2228 = vmatpush.bf16.msra.mxu1 %v3892_v14  ;;  %v4389_v37 = vld [vmem:[%s6354_s3 + $0x6c4] sm:$0xf]  ;;  %v3973_v14 = vld [vmem:[%s6354_s3 + $0x6d0] sm:$0xf0]  ;;  %v3980_v39 = vor.u32 %v4392_v13, %v3979_v10  ;;  %v3965_v51 = vld [vmem:[%s6354_s3 + $0x6b8] sm:$0xf0]  ;;  %v3964_v47 = vor.u32 %v4388_v43, %v3963_v62  ;;  %v4080_v10 = vor.u32 %v4412_v17, %v4079_v16 }
  0xd2   :  { %v154_v7 = vmax.f32 %v146_v3, 0.0  ;;  %v3976_v44 = vor.u32 %v4389_v37, %v3973_v14  ;;  %v3968_v48 = vor.u32 %v4386_v50, %v3965_v51  ;;  %v3949_v3 = vld [vmem:[%s6354_s3 + $0x698] sm:$0xf0]  ;;  %v4071_v26 = vld [vmem:[%s6354_s3 + $0x760] sm:$0xf] }
  0xd3   :  { %v4055_v37 = vld [vmem:[%s6354_s3 + $0x740] sm:$0xf]  ;;  %v4407_v14 = vld [vmem:[%s6354_s3 + $0x74c] sm:$0xf0]  ;;  %v4047_v43 = vld [vmem:[%s6354_s3 + $0x728] sm:$0xf] }
  0xd4   :  { %2242 = vmatpush.bf16.msra.mxu2 %v3880_v41  ;;  %2255 = vmatpush.bf16.msra.mxu3 %v3884_v57  ;;  %v2101_v23 = vpack.c.bf16 %v154_v7, %v154_v7  ;;  %v4385_v41 = vld [vmem:[%s6354_s3 + $0x6a4] sm:$0xf]  ;;  %v3957_v57 = vld [vmem:[%s6354_s3 + $0x6b0] sm:$0xf0]  ;;  %v4402_v51 = vld [vmem:[%s6354_s3 + $0x72c] sm:$0xf] }
  0xd5   :  { %2216 = vmatpush.bf16.msra.mxu0 %v3872_v59  ;;  %2229 = vmatpush.bf16.msra.mxu1 %v3876_v60  ;;  %v3960_v2 = vor.u32 %v4385_v41, %v3957_v57  ;;  %v4409_v7 = vld [vmem:[%s6354_s3 + $0x764] sm:$0xf]  ;;  %v4403_v41 = vld [vmem:[%s6354_s3 + $0x72c] sm:$0xf0]  ;;  %v4163_v17 = vld [vmem:[%s6354_s3 + $0x7e8] sm:$0xf] }
  0xd6   :  { %v634_v19 = vpop.f32.mrf.mxu2  ;;  %v647_v21 = vpop.f32.mrf.mxu3  ;;  %v6062_v8 = vunpack.c.l.b16 %v2101_v23  ;;  %v4076_v54 = vor.u32 %v4409_v7, %v4073_v30  ;;  %v4405_v23 = vld [vmem:[%s6354_s3 + $0x744] sm:$0xf]  ;;  %v4427_v7 = vld [vmem:[%s6354_s3 + $0x7ec] sm:$0xf0] }
  0xd7   :  { %v766_v29 = vpop.f32.mrf.mxu0  ;;  %v779_v6 = vpop.f32.mrf.mxu1  ;;  %v4410_v21 = vld [vmem:[%s6354_s3 + $0x76c] sm:$0xf]  ;;  %v4401_v57 = vld [vmem:[%s6354_s3 + $0x724] sm:$0xf] }
  0xd8   :  { %v5997_v32 = vadd.f32 %v766_v29, %v5882_v22  ;;  %v6000_v33 = vadd.f32 %v779_v6, %v5885_v24  ;;  %2243 = vmatpush.bf16.msra.mxu2 %v3864_v5  ;;  %2256 = vmatpush.bf16.msra.mxu3 %v3868_v9  ;;  %v4390_v22 = vld [vmem:[%s6354_s3 + $0x6cc] sm:$0xf]  ;;  %v3981_v24 = vld [vmem:[%s6354_s3 + $0x6d8] sm:$0xf0]  ;;  %v4383_v5 = vld [vmem:[%s6354_s3 + $0x68c] sm:$0xf0]  ;;  %v2125_v12 = vsel %vm192_vm1, %v2124_v61, %v6062_v8 }
  0xd9   :  { %2217 = vmatpush.bf16.msra.mxu0 %v3856_v1  ;;  %2230 = vmatpush.bf16.msra.mxu1 %v3860_v15  ;;  %v3984_v40 = vor.u32 %v4390_v22, %v3981_v24  ;;  %v4381_v9 = vld [vmem:[%s6354_s3 + $0x684] sm:$0xf]  ;;  %v3952_v15 = vor.u32 %v4382_v49, %v3949_v3  ;;  %v3940_v18 = vor.u32 %v4383_v5, %v3939_v4  ;;  %v4411_v6 = vld [vmem:[%s6354_s3 + $0x76c] sm:$0xf0]  ;;  %v4063_v22 = vld [vmem:[%s6354_s3 + $0x748] sm:$0xf] }
  0xda   :  { %3833 = vmatmul.msk.bf16.vlgmr.msrb.gmra.mxu0 %vm103_vm0, %v1961_v25  ;;  %3834 = vmatmul.msk.bf16.vlgmr.msrb.gmra.mxu1 %vm103_vm0, %v1961_v25  ;;  %v3944_v19 = vor.u32 %v4381_v9, %v3941_v11  ;;  %v2126_v29 = vpack.c.b16 %v2125_v12, %v2125_v12  ;;  %v4408_v24 = vld [vmem:[%s6354_s3 + $0x754] sm:$0xf0]  ;;  %v4072_v36 = vor.u32 %v4411_v6, %v4071_v26  ;;  %v4398_v3 = vld [vmem:[%s6354_s3 + $0x70c] sm:$0xf]  ;;  %v4033_v4 = vld [vmem:[%s6354_s3 + $0x718] sm:$0xf0] }
  0xdb   :  { %3835 = vmatmul.msk.bf16.vlgmr.msrb.gmra.mxu2 %vm103_vm0, %v1961_v25  ;;  %3836 = vmatmul.msk.bf16.vlgmr.msrb.gmra.mxu3 %vm103_vm0, %v1961_v25  ;;  %v4081_v25 = vld [vmem:[%s6354_s3 + $0x778] sm:$0xf0]  ;;  %v4023_v5 = vld [vmem:[%s6354_s3 + $0x700] sm:$0xf]  ;;  %v4399_v9 = vld [vmem:[%s6354_s3 + $0x70c] sm:$0xf0]  ;;  %v4036_v16 = vor.u32 %v4398_v3, %v4033_v4 }
  0xdc   :  { %2399 = vmatpush.bf16.msrb.mxu2 %v3996_v31  ;;  %2412 = vmatpush.bf16.msrb.mxu3 %v4000_v34  ;;  %v4397_v11 = vld [vmem:[%s6354_s3 + $0x704] sm:$0xf]  ;;  %v4025_v12 = vld [vmem:[%s6354_s3 + $0x710] sm:$0xf0]  ;;  %v4165_v26 = vld [vmem:[%s6354_s3 + $0x7f8] sm:$0xf0] }
  0xdd   :  { %2373 = vmatpush.bf16.msrb.mxu0 %v3988_v20  ;;  %2386 = vmatpush.bf16.msrb.mxu1 %v3992_v35  ;;  %v4084_v35 = vor.u32 %v4410_v21, %v4081_v25  ;;  %v4028_v21 = vor.u32 %v4397_v11, %v4025_v12  ;;  %v4426_v25 = vld [vmem:[%s6354_s3 + $0x7ec] sm:$0xf]  ;;  %v4425_v30 = vld [vmem:[%s6354_s3 + $0x7e4] sm:$0xf]  ;;  %v4115_v3 = vld [vmem:[%s6354_s3 + $0x788] sm:$0xf] }
  0xde   :  { %v792_v53 = vpop.f32.mrf.mxu2  ;;  %v805_v55 = vpop.f32.mrf.mxu3  ;;  %v4107_v11 = vld [vmem:[%s6354_s3 + $0x780] sm:$0xf]  ;;  %v4415_v12 = vld [vmem:[%s6354_s3 + $0x78c] sm:$0xf0] }
  0xdf   :  { %v6057_v58 = vadd.f32 %v792_v53, %v5941_v45  ;;  %v6060_v42 = vadd.f32 %v805_v55, %v5944_v46  ;;  %v768_v59 = vpop.f32.mrf.mxu0  ;;  %v781_v60 = vpop.f32.mrf.mxu1  ;;  %v4384_v45 = vld [vmem:[%s6354_s3 + $0x694] sm:$0xf0]  ;;  %v3956_v46 = vor.u32 %v4387_v56, %v3955_v52  ;;  %v4049_v52 = vld [vmem:[%s6354_s3 + $0x738] sm:$0xf0]  ;;  %v4039_v53 = vld [vmem:[%s6354_s3 + $0x720] sm:$0xf] }
  0xe0   :  { %2400 = vmatpush.bf16.msrb.mxu2 %v3980_v39  ;;  %2413 = vmatpush.bf16.msrb.mxu3 %v3984_v40  ;;  %v3948_v1 = vor.u32 %v4384_v45, %v3947_v0  ;;  %v4057_v39 = vld [vmem:[%s6354_s3 + $0x750] sm:$0xf0]  ;;  %v4064_v40 = vor.u32 %v4408_v24, %v4063_v22  ;;  %v2283_v0 = vrot.slane %v6062_v8, 1 }
  0xe1   :  { %2374 = vmatpush.bf16.msrb.mxu0 %v3972_v63  ;;  %2387 = vmatpush.bf16.msrb.mxu1 %v3976_v44  ;;  %v4404_v63 = vld [vmem:[%s6354_s3 + $0x734] sm:$0xf0]  ;;  %v4056_v44 = vor.u32 %v4407_v14, %v4055_v37  ;;  %v4060_v50 = vor.u32 %v4405_v23, %v4057_v39  ;;  %v4041_v59 = vld [vmem:[%s6354_s3 + $0x730] sm:$0xf0]  ;;  %v4139_v14 = vld [vmem:[%s6354_s3 + $0x7c0] sm:$0xf] }
  0xe2   :  { %v4048_v45 = vor.u32 %v4404_v63, %v4047_v43  ;;  %v4044_v49 = vor.u32 %v4401_v57, %v4041_v59  ;;  %v4423_v23 = vld [vmem:[%s6354_s3 + $0x7cc] sm:$0xf0]  ;;  %v4421_v39 = vld [vmem:[%s6354_s3 + $0x7c4] sm:$0xf]  ;;  %v4131_v63 = vld [vmem:[%s6354_s3 + $0x7a8] sm:$0xf] }
  0xe3   :  { %v4419_v57 = vld [vmem:[%s6354_s3 + $0x7ac] sm:$0xf0]  ;;  %v4417_v59 = vld [vmem:[%s6354_s3 + $0x7a4] sm:$0xf] }
  0xe4   :  { %2401 = vmatpush.bf16.msrb.mxu2 %v3964_v47  ;;  %2414 = vmatpush.bf16.msrb.mxu3 %v3968_v48 }
  0xe5   :  { %2375 = vmatpush.bf16.msrb.mxu0 %v3956_v46  ;;  %2388 = vmatpush.bf16.msrb.mxu1 %v3960_v2  ;;  %v4052_v46 = vor.u32 %v4402_v51, %v4049_v52  ;;  %v4031_v2 = vld [vmem:[%s6354_s3 + $0x708] sm:$0xf]  ;;  %v4418_v52 = vld [vmem:[%s6354_s3 + $0x7ac] sm:$0xf] }
  0xe6   :  { %v794_v27 = vpop.f32.mrf.mxu2  ;;  %v807_v28 = vpop.f32.mrf.mxu3 }
  0xe7   :  { %v931_v31 = vpop.f32.mrf.mxu0  ;;  %v944_v34 = vpop.f32.mrf.mxu1  ;;  %v4155_v27 = vld [vmem:[%s6354_s3 + $0x7e0] sm:$0xf] }
  0xe8   :  { %v6116_v13 = vadd.f32 %v931_v31, %v5997_v32  ;;  %v6119_v20 = vadd.f32 %v944_v34, %v6000_v33  ;;  %2402 = vmatpush.bf16.msrb.mxu2 %v3948_v1  ;;  %2415 = vmatpush.bf16.msrb.mxu3 %v3952_v15  ;;  %v4406_v32 = vld [vmem:[%s6354_s3 + $0x74c] sm:$0xf]  ;;  %v4065_v33 = vld [vmem:[%s6354_s3 + $0x758] sm:$0xf0]  ;;  %v2284_v1 = vsel %vm192_vm1, %v6030_v38, %v2283_v0  ;;  %v4157_v31 = vld [vmem:[%s6354_s3 + $0x7f0] sm:$0xf0] }
  0xe9   :  { %2376 = vmatpush.bf16.msrb.mxu0 %v3940_v18  ;;  %2389 = vmatpush.bf16.msrb.mxu1 %v3944_v19  ;;  %v4068_v62 = vor.u32 %v4406_v32, %v4065_v33  ;;  %v4428_v18 = vld [vmem:[%s6354_s3 + $0x7f4] sm:$0xf0]  ;;  %v4024_v19 = vor.u32 %v4399_v9, %v4023_v5  ;;  %v2285_v6 = vpack.c.b16 %v2284_v1, %v2284_v1  ;;  %v4414_v5 = vld [vmem:[%s6354_s3 + $0x78c] sm:$0xf]  ;;  %v4117_v9 = vld [vmem:[%s6354_s3 + $0x798] sm:$0xf0] }
  0xea   :  { %3917 = vmatmul.msk.bf16.vlgmr.msra.gmra.mxu0 %vm103_vm0, %v2126_v29  ;;  %3918 = vmatmul.msk.bf16.vlgmr.msra.gmra.mxu1 %vm103_vm0, %v2126_v29  ;;  %v4424_v32 = vld [vmem:[%s6354_s3 + $0x7d4] sm:$0xf0]  ;;  %v4156_v33 = vor.u32 %v4427_v7, %v4155_v27  ;;  %v4160_v37 = vor.u32 %v4425_v30, %v4157_v31  ;;  %v4413_v1 = vld [vmem:[%s6354_s3 + $0x784] sm:$0xf] }
  0xeb   :  { %3919 = vmatmul.msk.bf16.vlgmr.msra.gmra.mxu2 %vm103_vm0, %v2126_v29  ;;  %3920 = vmatmul.msk.bf16.vlgmr.msra.gmra.mxu3 %vm103_vm0, %v2126_v29 }
  0xec   :  { %2559 = vmatpush.bf16.msra.mxu2 %v4080_v10  ;;  %2572 = vmatpush.bf16.msra.mxu3 %v4084_v35  ;;  %v4164_v35 = vor.u32 %v4428_v18, %v4163_v17  ;;  %v4120_v18 = vor.u32 %v4414_v5, %v4117_v9 }
  0xed   :  { %2533 = vmatpush.bf16.msra.mxu0 %v4072_v36  ;;  %2546 = vmatpush.bf16.msra.mxu1 %v4076_v54  ;;  %v4168_v36 = vor.u32 %v4426_v25, %v4165_v26  ;;  %v4147_v54 = vld [vmem:[%s6354_s3 + $0x7c8] sm:$0xf] }
  0xee   :  { %v957_v55 = vpop.f32.mrf.mxu2  ;;  %v970_v56 = vpop.f32.mrf.mxu3 }
  0xef   :  { %v6174_v60 = vadd.f32 %v957_v55, %v6057_v58  ;;  %v6177_v61 = vadd.f32 %v970_v56, %v6060_v42  ;;  %v933_v47 = vpop.f32.mrf.mxu0  ;;  %v946_v48 = vpop.f32.mrf.mxu1  ;;  %v4400_v58 = vld [vmem:[%s6354_s3 + $0x714] sm:$0xf0]  ;;  %v4040_v42 = vor.u32 %v4403_v41, %v4039_v53  ;;  %v4133_v53 = vld [vmem:[%s6354_s3 + $0x7b8] sm:$0xf0]  ;;  %v4123_v55 = vld [vmem:[%s6354_s3 + $0x7a0] sm:$0xf] }
  0xf0   :  { %2560 = vmatpush.bf16.msra.mxu2 %v4064_v40  ;;  %2573 = vmatpush.bf16.msra.mxu3 %v4068_v62  ;;  %v4032_v15 = vor.u32 %v4400_v58, %v4031_v2  ;;  %v4141_v40 = vld [vmem:[%s6354_s3 + $0x7d0] sm:$0xf0]  ;;  %v4148_v62 = vor.u32 %v4424_v32, %v4147_v54  ;;  %v2442_v2 = vrot.slane %v6062_v8, 2  ;;  %v2443_v58 = vrot.slane %v6030_v38, 1 }
  0xf1   :  { %2534 = vmatpush.bf16.msra.mxu0 %v4056_v44  ;;  %2547 = vmatpush.bf16.msra.mxu1 %v4060_v50  ;;  %v4420_v44 = vld [vmem:[%s6354_s3 + $0x7b4] sm:$0xf0]  ;;  %v4140_v50 = vor.u32 %v4423_v23, %v4139_v14  ;;  %v4144_v51 = vor.u32 %v4421_v39, %v4141_v40  ;;  %v4125_v47 = vld [vmem:[%s6354_s3 + $0x7b0] sm:$0xf0] }
  0xf2   :  { %v4128_v4 = vor.u32 %v4417_v59, %v4125_v47 }
  0xf4   :  { %2561 = vmatpush.bf16.msra.mxu2 %v4048_v45  ;;  %2574 = vmatpush.bf16.msra.mxu3 %v4052_v46 }
  0xf5   :  { %2535 = vmatpush.bf16.msra.mxu0 %v4040_v42  ;;  %2548 = vmatpush.bf16.msra.mxu1 %v4044_v49  ;;  %v4132_v42 = vor.u32 %v4420_v44, %v4131_v63  ;;  %v4136_v49 = vor.u32 %v4418_v52, %v4133_v53 }
  0xf6   :  { %v959_v28 = vpop.f32.mrf.mxu2  ;;  %v972_v29 = vpop.f32.mrf.mxu3 }
  0xf7   :  { %v1090_v34 = vpop.f32.mrf.mxu0  ;;  %v1103_v10 = vpop.f32.mrf.mxu1 }
  0xf8   :  { %v6231_v22 = vadd.f32 %v1090_v34, %v6116_v13  ;;  %v6234_v24 = vadd.f32 %v1103_v10, %v6119_v20  ;;  %2562 = vmatpush.bf16.msra.mxu2 %v4032_v15  ;;  %2575 = vmatpush.bf16.msra.mxu3 %v4036_v16  ;;  %v4422_v13 = vld [vmem:[%s6354_s3 + $0x7cc] sm:$0xf]  ;;  %v4149_v20 = vld [vmem:[%s6354_s3 + $0x7d8] sm:$0xf0]  ;;  %v4109_v15 = vld [vmem:[%s6354_s3 + $0x790] sm:$0xf0]  ;;  %v2444_v16 = vsel %vm192_vm1, %v2443_v58, %v2442_v2 }
  0xf9   :  { %2536 = vmatpush.bf16.msra.mxu0 %v4024_v19  ;;  %2549 = vmatpush.bf16.msra.mxu1 %v4028_v21  ;;  %v4152_v43 = vor.u32 %v4422_v13, %v4149_v20  ;;  %v4108_v19 = vor.u32 %v4415_v12, %v4107_v11  ;;  %v4112_v21 = vor.u32 %v4413_v1, %v4109_v15 }
  0xfa   :  { %4001 = vmatmul.msk.bf16.vlgmr.msrb.gmra.mxu0 %vm103_vm0, %v2285_v6  ;;  %4002 = vmatmul.msk.bf16.vlgmr.msrb.gmra.mxu1 %vm103_vm0, %v2285_v6  ;;  %v2445_v27 = vpack.c.b16 %v2444_v16, %v2444_v16 }
  0xfb   :  { %4003 = vmatmul.msk.bf16.vlgmr.msrb.gmra.mxu2 %vm103_vm0, %v2285_v6  ;;  %4004 = vmatmul.msk.bf16.vlgmr.msrb.gmra.mxu3 %vm103_vm0, %v2285_v6 }
  0xfc   :  { %2719 = vmatpush.bf16.msrb.mxu2 %v4164_v35  ;;  %2732 = vmatpush.bf16.msrb.mxu3 %v4168_v36  ;;  %v2603_v36 = vrot.slane %v6030_v38, 2 }
  0xfd   :  { %2693 = vmatpush.bf16.msrb.mxu0 %v4156_v33  ;;  %2706 = vmatpush.bf16.msrb.mxu1 %v4160_v37 }
  0xfe   :  { %v1116_v56 = vpop.f32.mrf.mxu2  ;;  %v1129_v41 = vpop.f32.mrf.mxu3 }
  0xff   :  { %v1135_v48 = vadd.f32 %v1116_v56, %v6174_v60  ;;  %v1136_v0 = vadd.f32 %v1129_v41, %v6177_v61  ;;  %v1092_v45 = vpop.f32.mrf.mxu0  ;;  %v1105_v46 = vpop.f32.mrf.mxu1  ;;  %v4416_v60 = vld [vmem:[%s6354_s3 + $0x794] sm:$0xf0]  ;;  %v4124_v61 = vor.u32 %v4419_v57, %v4123_v55 }
 0x100   :  { %2720 = vmatpush.bf16.msrb.mxu2 %v4148_v62  ;;  %2733 = vmatpush.bf16.msrb.mxu3 %v4152_v43  ;;  %v4116_v17 = vor.u32 %v4416_v60, %v4115_v3 }
 0x101   :  { %2694 = vmatpush.bf16.msrb.mxu0 %v4140_v50  ;;  %2707 = vmatpush.bf16.msrb.mxu1 %v4144_v51 }
 0x104   :  { %2721 = vmatpush.bf16.msrb.mxu2 %v4132_v42  ;;  %2734 = vmatpush.bf16.msrb.mxu3 %v4136_v49 }
 0x105   :  { %2695 = vmatpush.bf16.msrb.mxu0 %v4124_v61  ;;  %2708 = vmatpush.bf16.msrb.mxu1 %v4128_v4 }
 0x106   :  { %v1118_v25 = vpop.f32.mrf.mxu2  ;;  %v1131_v26 = vpop.f32.mrf.mxu3 }
 0x107   :  { %v1250_v28 = vpop.f32.mrf.mxu0  ;;  %v1263_v29 = vpop.f32.mrf.mxu1 }
 0x108   :  { %v1293_v6 = vadd.f32 %v1250_v28, %v6231_v22  ;;  %v1294_v7 = vadd.f32 %v1263_v29, %v6234_v24  ;;  %2722 = vmatpush.bf16.msrb.mxu2 %v4116_v17  ;;  %2735 = vmatpush.bf16.msrb.mxu3 %v4120_v18  ;;  %v2602_v24 = vrot.slane %v6062_v8, 3 }
 0x109   :  { %2696 = vmatpush.bf16.msrb.mxu0 %v4108_v19  ;;  %2709 = vmatpush.bf16.msrb.mxu1 %v4112_v21 }
 0x10a   :  { %4085 = vmatmul.msk.bf16.vlgmr.msra.gmra.mxu0 %vm103_vm0, %v2445_v27  ;;  %4086 = vmatmul.msk.bf16.vlgmr.msra.gmra.mxu1 %vm103_vm0, %v2445_v27  ;;  %v2604_v54 = vsel %vm192_vm1, %v2603_v36, %v2602_v24 }
 0x10b   :  { %4087 = vmatmul.msk.bf16.vlgmr.msra.gmra.mxu2 %vm103_vm0, %v2445_v27  ;;  %4088 = vmatmul.msk.bf16.vlgmr.msra.gmra.mxu3 %vm103_vm0, %v2445_v27  ;;  %v2605_v37 = vpack.c.b16 %v2604_v54, %v2604_v54 }
 0x10e   :  { %v1276_v30 = vpop.f32.mrf.mxu2  ;;  %v1289_v31 = vpop.f32.mrf.mxu3 }
 0x10f   :  { %v1295_v34 = vadd.f32 %v1276_v30, %v1135_v48  ;;  %v1296_v10 = vadd.f32 %v1289_v31, %v1136_v0  ;;  %v1252_v35 = vpop.f32.mrf.mxu0  ;;  %v1265_v22 = vpop.f32.mrf.mxu1 }
 0x116   :  { %v1278_v32 = vpop.f32.mrf.mxu2  ;;  %v1291_v33 = vpop.f32.mrf.mxu3 }
 0x117   :  { %v1410_v13 = vpop.f32.mrf.mxu0  ;;  %v1423_v20 = vpop.f32.mrf.mxu1 }
 0x118   :  { %v1453_v14 = vadd.f32 %v1410_v13, %v1293_v6  ;;  %v1454_v23 = vadd.f32 %v1423_v20, %v1294_v7 }
 0x11a   :  { %4169 = vmatmul.msk.bf16.vlgmr.msrb.gmra.mxu0 %vm103_vm0, %v2605_v37  ;;  %4170 = vmatmul.msk.bf16.vlgmr.msrb.gmra.mxu1 %vm103_vm0, %v2605_v37 }
 0x11b   :  { %4171 = vmatmul.msk.bf16.vlgmr.msrb.gmra.mxu2 %vm103_vm0, %v2605_v37  ;;  %4172 = vmatmul.msk.bf16.vlgmr.msrb.gmra.mxu3 %vm103_vm0, %v2605_v37 }
 0x11e   :  { %v1436_v8 = vpop.f32.mrf.mxu2  ;;  %v1449_v39 = vpop.f32.mrf.mxu3 }
 0x11f   :  { %v1455_v38 = vadd.f32 %v1436_v8, %v1295_v34  ;;  %v1456_v40 = vadd.f32 %v1449_v39, %v1296_v10  ;;  %v1412_v62 = vpop.f32.mrf.mxu0  ;;  %v1425_v43 = vpop.f32.mrf.mxu1 }
 0x126   :  { %v1438_v63 = vpop.f32.mrf.mxu2  ;;  %v1451_v44 = vpop.f32.mrf.mxu3 }
 0x127   :  { %v1575_v50 = vpop.f32.mrf.mxu0  ;;  %v1588_v51 = vpop.f32.mrf.mxu1 }
 0x128   :  { %v1618_v52 = vadd.f32 %v1575_v50, %v1453_v14  ;;  %v1619_v53 = vadd.f32 %v1588_v51, %v1454_v23 }
 0x12e   :  { %v1601_v55 = vpop.f32.mrf.mxu2  ;;  %v1614_v56 = vpop.f32.mrf.mxu3 }
 0x12f   :  { %v1620_v41 = vadd.f32 %v1601_v55, %v1455_v38  ;;  %v1621_v57 = vadd.f32 %v1614_v56, %v1456_v40  ;;  %v1577_v59 = vpop.f32.mrf.mxu0  ;;  %v1590_v47 = vpop.f32.mrf.mxu1 }
 0x136   :  { %v1603_v48 = vpop.f32.mrf.mxu2  ;;  %v1616_v0 = vpop.f32.mrf.mxu3 }
 0x137   :  { %v1734_v45 = vpop.f32.mrf.mxu0  ;;  %v1747_v46 = vpop.f32.mrf.mxu1 }
 0x138   :  { %v1777_v2 = vadd.f32 %v1734_v45, %v1618_v52  ;;  %v1778_v58 = vadd.f32 %v1747_v46, %v1619_v53 }
 0x13e   :  { %v1760_v42 = vpop.f32.mrf.mxu2  ;;  %v1773_v49 = vpop.f32.mrf.mxu3 }
 0x13f   :  { %v1779_v3 = vadd.f32 %v1760_v42, %v1620_v41  ;;  %v1780_v60 = vadd.f32 %v1773_v49, %v1621_v57  ;;  %v1736_v61 = vpop.f32.mrf.mxu0  ;;  %v1749_v4 = vpop.f32.mrf.mxu1 }
 0x146   :  { %v1762_v5 = vpop.f32.mrf.mxu2  ;;  %v1775_v9 = vpop.f32.mrf.mxu3 }
 0x147   :  { %v1894_v11 = vpop.f32.mrf.mxu0  ;;  %v1907_v12 = vpop.f32.mrf.mxu1 }
 0x148   :  { %v1937_v1 = vadd.f32 %v1894_v11, %v1777_v2  ;;  %v1938_v15 = vadd.f32 %v1907_v12, %v1778_v58 }
 0x14e   :  { %v1920_v16 = vpop.f32.mrf.mxu2  ;;  %v1933_v17 = vpop.f32.mrf.mxu3 }
 0x14f   :  { %v1939_v18 = vadd.f32 %v1920_v16, %v1779_v3  ;;  %v1940_v19 = vadd.f32 %v1933_v17, %v1780_v60  ;;  %v1896_v21 = vpop.f32.mrf.mxu0  ;;  %v1909_v25 = vpop.f32.mrf.mxu1 }
 0x156   :  { %v1922_v26 = vpop.f32.mrf.mxu2  ;;  %v1935_v27 = vpop.f32.mrf.mxu3 }
 0x157   :  { %v2054_v28 = vpop.f32.mrf.mxu0  ;;  %v2067_v29 = vpop.f32.mrf.mxu1 }
 0x158   :  { %v2097_v6 = vadd.f32 %v2054_v28, %v1937_v1  ;;  %v2098_v7 = vadd.f32 %v2067_v29, %v1938_v15 }
 0x15e   :  { %v2080_v30 = vpop.f32.mrf.mxu2  ;;  %v2093_v31 = vpop.f32.mrf.mxu3 }
 0x15f   :  { %v2056_v34 = vpop.f32.mrf.mxu0  ;;  %v2069_v10 = vpop.f32.mrf.mxu1  ;;  %v2099_v59 = vadd.f32 %v2080_v30, %v1939_v18  ;;  %v2100_v46 = vadd.f32 %v2093_v31, %v1940_v19 }
 0x166   :  { %v2082_v35 = vpop.f32.mrf.mxu2  ;;  %v2095_v22 = vpop.f32.mrf.mxu3 }
 0x167   :  { %v2219_v24 = vpop.f32.mrf.mxu0  ;;  %v2232_v36 = vpop.f32.mrf.mxu1 }
 0x168   :  { %v2262_v55 = vadd.f32 %v2219_v24, %v2097_v6  ;;  %v2263_v56 = vadd.f32 %v2232_v36, %v2098_v7 }
 0x16e   :  { %v2245_v54 = vpop.f32.mrf.mxu2  ;;  %v2258_v32 = vpop.f32.mrf.mxu3 }
 0x16f   :  { %v2221_v33 = vpop.f32.mrf.mxu0  ;;  %v2234_v37 = vpop.f32.mrf.mxu1  ;;  %v2264_v2 = vadd.f32 %v2245_v54, %v2099_v59  ;;  %v2265_v60 = vadd.f32 %v2258_v32, %v2100_v46 }
 0x176   :  { %v2247_v13 = vpop.f32.mrf.mxu2  ;;  %v2260_v20 = vpop.f32.mrf.mxu3 }
 0x177   :  { %v2378_v14 = vpop.f32.mrf.mxu0  ;;  %v2391_v23 = vpop.f32.mrf.mxu1 }
 0x178   :  { %v2421_v41 = vadd.f32 %v2378_v14, %v2262_v55  ;;  %v2422_v57 = vadd.f32 %v2391_v23, %v2263_v56 }
 0x17e   :  { %v2404_v8 = vpop.f32.mrf.mxu2  ;;  %v2417_v39 = vpop.f32.mrf.mxu3 }
 0x17f   :  { %v2380_v38 = vpop.f32.mrf.mxu0  ;;  %v2393_v40 = vpop.f32.mrf.mxu1  ;;  %v2423_v61 = vadd.f32 %v2404_v8, %v2264_v2  ;;  %v2424_v16 = vadd.f32 %v2417_v39, %v2265_v60 }
 0x186   :  { %v2406_v62 = vpop.f32.mrf.mxu2  ;;  %v2419_v43 = vpop.f32.mrf.mxu3 }
 0x187   :  { %v2538_v63 = vpop.f32.mrf.mxu0  ;;  %v2551_v44 = vpop.f32.mrf.mxu1 }
 0x188   :  { %v2581_v47 = vadd.f32 %v2538_v63, %v2421_v41  ;;  %v2582_v48 = vadd.f32 %v2551_v44, %v2422_v57 }
 0x18e   :  { %v2564_v50 = vpop.f32.mrf.mxu2  ;;  %v2577_v51 = vpop.f32.mrf.mxu3 }
 0x18f   :  { %v2540_v52 = vpop.f32.mrf.mxu0  ;;  %v2553_v53 = vpop.f32.mrf.mxu1  ;;  %v2583_v17 = vadd.f32 %v2564_v50, %v2423_v61  ;;  %v2584_v28 = vadd.f32 %v2577_v51, %v2424_v16 }
 0x196   :  { %v2566_v0 = vpop.f32.mrf.mxu2  ;;  %v2579_v45 = vpop.f32.mrf.mxu3 }
 0x197   :  { %v2698_v58 = vpop.f32.mrf.mxu0  ;;  %v2711_v42 = vpop.f32.mrf.mxu1 }
 0x198   :  { %v2741_v49 = vadd.f32 %v2698_v58, %v2581_v47  ;;  %v2742_v3 = vadd.f32 %v2711_v42, %v2582_v48 }
 0x19a   :  { %v2760_v4 = vsel %vm2752_vm2, %v2741_v49, 0.0  ;;  %v2788_v5 = vmul.f32 %v2741_v49, %v2741_v49  ;;  %v2749_v9 = vrot.slane %v2742_v3, 6  ;;  %v2767_v11 = vsel %vm2752_vm2, %v2742_v3, 0.0 }
 0x19b   :  { %v2761_v12 = vrot.slane %v2760_v4, 4  ;;  %v2768_v1 = vrot.slane %v2767_v11, 4  ;;  %v2789_v15 = vmul.f32 %v2742_v3, %v2742_v3 }
 0x19c   :  { %v2792_v18 = vsel %vm2752_vm2, %v2788_v5, 0.0  ;;  %v2753_v19 = vsel %vm2752_vm2, %v2741_v49, %v2749_v9 }
 0x19d   :  { %v2762_v21 = vadd.f32 %v2761_v12, %v2760_v4  ;;  %v2793_v25 = vrot.slane %v2792_v18, 4  ;;  %v2769_v26 = vadd.f32 %v2768_v1, %v2767_v11  ;;  %v2799_v27 = vsel %vm2752_vm2, %v2789_v15, 0.0 }
 0x19e   :  { %v2800_v29 = vrot.slane %v2799_v27, 4  ;;  %v2724_v6 = vpop.f32.mrf.mxu2  ;;  %v2737_v7 = vpop.f32.mrf.mxu3 }
 0x19f   :  { %v2763_v30 = vrot.slane %v2762_v21, 2  ;;  %v2794_v31 = vadd.f32 %v2793_v25, %v2792_v18  ;;  %v2770_v34 = vrot.slane %v2769_v26, 2  ;;  %v2743_v10 = vadd.f32 %v2724_v6, %v2583_v17  ;;  %v2700_v35 = vpop.f32.mrf.mxu0  ;;  %v2713_v22 = vpop.f32.mrf.mxu1 }
 0x1a0   :  { %v2801_v24 = vadd.f32 %v2800_v29, %v2799_v27  ;;  %v2744_v36 = vadd.f32 %v2737_v7, %v2584_v28 }
 0x1a1   :  { %v2764_v54 = vadd.f32 %v2763_v30, %v2762_v21  ;;  %v2795_v32 = vrot.slane %v2794_v31, 2  ;;  %v2771_v33 = vadd.f32 %v2770_v34, %v2769_v26  ;;  %v2750_v37 = vrot.slane %v2743_v10, 4 }
 0x1a2   :  { %v2802_v13 = vrot.slane %v2801_v24, 2  ;;  %v2774_v20 = vsel %vm2752_vm2, %v2743_v10, 0.0  ;;  %v2790_v14 = vmul.f32 %v2743_v10, %v2743_v10  ;;  %v2751_v23 = vrot.slane %v2744_v36, 2 }
 0x1a3   :  { %v2796_v8 = vadd.f32 %v2795_v32, %v2794_v31  ;;  %v2772_v39 = vrot.slane %v2771_v33, 1  ;;  %v2775_v38 = vrot.slane %v2774_v20, 4  ;;  %v2781_v63 = vsel %vm2752_vm2, %v2744_v36, 0.0 }
 0x1a4   :  { %v2803_v40 = vadd.f32 %v2802_v13, %v2801_v24  ;;  %v2806_v62 = vsel %vm2752_vm2, %v2790_v14, 0.0  ;;  %v2755_v43 = vsel %vm2754_vm3, %v2750_v37, %v2751_v23  ;;  %v2765_v44 = vrot.slane %v2764_v54, 1 }
 0x1a5   :  { %v2797_v50 = vrot.slane %v2796_v8, 1  ;;  %v2776_v51 = vadd.f32 %v2775_v38, %v2774_v20  ;;  %v2807_v53 = vrot.slane %v2806_v62, 4  ;;  %v2757_v55 = vsel %vm2756_vm4, %v2753_v19, %v2755_v43 }
 0x1a6   :  { %v2804_v52 = vrot.slane %v2803_v40, 1  ;;  %v2782_v56 = vrot.slane %v2781_v63, 4  ;;  %v2726_v41 = vpop.f32.mrf.mxu2  ;;  %v2739_v57 = vpop.f32.mrf.mxu3  ;;  %2759 = vst [vmem:[%s6359_s5] sm:$0xff] %v2757_v55  ;;  %v2791_v48 = vmul.f32 %v2744_v36, %v2744_v36  ;;  %v2773_v0 = vadd.f32 %v2772_v39, %v2771_v33 }
 0x1a7   :  { %v2798_v59 = vadd.f32 %v2797_v50, %v2796_v8  ;;  %v2777_v47 = vrot.slane %v2776_v51, 2  ;;  %v2808_v46 = vadd.f32 %v2807_v53, %v2806_v62  ;;  %v2766_v58 = vadd.f32 %v2765_v44, %v2764_v54 }
 0x1a8   :  { %v2805_v45 = vadd.f32 %v2804_v52, %v2803_v40  ;;  %v2783_v2 = vadd.f32 %v2782_v56, %v2781_v63  ;;  %v2813_v49 = vsel %vm2752_vm2, %v2791_v48, 0.0 }
 0x1a9   :  { %v2778_v42 = vadd.f32 %v2777_v47, %v2776_v51  ;;  %v2809_v60 = vrot.slane %v2808_v46, 2  ;;  %v2814_v4 = vrot.slane %v2813_v49, 4  ;;  %v2821_v5 = vsel %vm2820_vm5, %v2766_v58, %v2798_v59 }
 0x1aa   :  { %v2822_v3 = vsel %vm2820_vm5, %v2773_v0, %v2805_v45  ;;  %v2784_v61 = vrot.slane %v2783_v2, 2 }
 0x1ab   :  { %v2829_v9 = vrot.slane %v2822_v3, 6  ;;  %v2779_v11 = vrot.slane %v2778_v42, 1  ;;  %v2810_v12 = vadd.f32 %v2809_v60, %v2808_v46  ;;  %v2815_v15 = vadd.f32 %v2814_v4, %v2813_v49 }
 0x1ac   :  { %v2785_v1 = vadd.f32 %v2784_v61, %v2783_v2 }
 0x1ad   :  { %v2832_v16 = vsel %vm2752_vm2, %v2821_v5, %v2829_v9  ;;  %v2811_v17 = vrot.slane %v2810_v12, 1  ;;  %v2816_v18 = vrot.slane %v2815_v15, 2  ;;  %v2780_v19 = vadd.f32 %v2779_v11, %v2778_v42 }
 0x1ae   :  { %v2786_v25 = vrot.slane %v2785_v1, 1 }
 0x1af   :  { %v2812_v21 = vadd.f32 %v2811_v17, %v2810_v12  ;;  %v2817_v26 = vadd.f32 %v2816_v18, %v2815_v15 }
 0x1b0   :  { %v2787_v29 = vadd.f32 %v2786_v25, %v2785_v1 }
 0x1b1   :  { %v2823_v27 = vsel %vm2820_vm5, %v2780_v19, %v2812_v21  ;;  %v2818_v28 = vrot.slane %v2817_v26, 1 }
 0x1b2   :  { %v2830_v7 = vrot.slane %v2823_v27, 4 }
 0x1b3   :  { %v2819_v6 = vadd.f32 %v2818_v28, %v2817_v26 }
 0x1b5   :  { %v2824_v30 = vsel %vm2820_vm5, %v2787_v29, %v2819_v6 }
 0x1b6   :  { %v2831_v31 = vrot.slane %v2824_v30, 2 }
 0x1b8   :  { %v2833_v34 = vsel %vm2754_vm3, %v2830_v7, %v2831_v31 }
 0x1b9   :  { %v2834_v10 = vsel %vm2756_vm4, %v2832_v16, %v2833_v34 }
 0x1ba   :  { %2836 = vst [vmem:[%s6360_s6] sm:$0xff] %v2834_v10 }

// kernel: cnn_batch_forward.3
= control target key start
LH: loop header
LB: loop body
LE: loop exit
PB: predicated region body
PF: predicated region fallthrough
CT: control target
= control target key end

     0   :  { %vm547_vm0 = vcmask 261120   ;;  %vm6129_vm1 = vcmask 519168   ;;  %vm6146_vm2 = vcmask 523264   ;;  %vm6237_vm3 = vcmask 1040384   ;;  %s10710_s1 = inlined_call_operand.vmem [shape: bf16[32,128], index: 1, kind: input, shape index: {}]   ;;  %s10711_s2 = inlined_call_operand.vmem [shape: f32[1,128], index: 2, kind: input, shape index: {}]   ;;  %s10712_s0 = inlined_call_operand.vmem [shape: bf16[2,576,32], index: 0, kind: input, shape index: {}]   ;;  %s10713_s3 = inlined_call_operand.vmem [shape: bf16[25,128,64], index: 3, kind: input, shape index: {}]   ;;  %s10714_s4 = inlined_call_operand.vmem [shape: f32[1,64], index: 4, kind: input, shape index: {}]   ;;  %s10715_s5 = inlined_call_operand.vmem [shape: bf16[2,64,64], index: 5, kind: output, shape index: {0}]   ;;  %s10716_s6 = inlined_call_operand.vmem [shape: f32[1,2,64], index: 6, kind: output, shape index: {1}]  }
   0x1   :  { %v7874_v0 = vld [vmem:[%s10710_s1 + $0x8] sm:$0xff]  ;;  %v7873_v1 = vld [vmem:[%s10710_s1] sm:$0xff]  ;;  %v7803_v4 = vld [vmem:[%s10712_s0 + $0x10] sm:$0xff]  ;;  %vm6239_vm4 = vcmask 517120  }
   0x2   :  { %770 = vmatpush.bf16.msra.mxu0 %v7874_v0  ;;  %8075 = vmatpush.bf16.msra.mxu3 %v7874_v0  ;;  %v7801_v2 = vld [vmem:[%s10712_s0] sm:$0xff]  ;;  %v7802_v3 = vld [vmem:[%s10712_s0 + $0x8] sm:$0xff]  ;;  %v7804_v5 = vld [vmem:[%s10712_s0 + $0x18] sm:$0xff] }
   0x3   :  { %v7805_v6 = vld [vmem:[%s10712_s0 + $0x20] sm:$0xff]  ;;  %v7806_v7 = vld [vmem:[%s10712_s0 + $0x28] sm:$0xff]  ;;  %v7807_v8 = vld [vmem:[%s10712_s0 + $0x30] sm:$0xff] }
   0x4   :  { %v7808_v9 = vld [vmem:[%s10712_s0 + $0x38] sm:$0xff]  ;;  %v8206_v10 = vld [vmem:[%s10711_s2] ss:$0 sm:$0xff]  ;;  %v7810_v18 = vld [vmem:[%s10712_s0 + $0x48] sm:$0xff] }
   0x5   :  { %v7809_v11 = vld [vmem:[%s10712_s0 + $0x40] sm:$0xff]  ;;  %v7811_v25 = vld [vmem:[%s10712_s0 + $0x50] sm:$0xff]  ;;  %v7882_v28 = vld [vmem:[%s10713_s3 + $0x38] sm:$0xff] }
   0x6   :  { %771 = vmatpush.bf16.msra.mxu0 %v7873_v1  ;;  %8076 = vmatpush.bf16.msra.mxu3 %v7873_v1  ;;  %v7881_v30 = vld [vmem:[%s10713_s3 + $0x30] sm:$0xff]  ;;  %v7880_v35 = vld [vmem:[%s10713_s3 + $0x28] sm:$0xff]  ;;  %v7879_v41 = vld [vmem:[%s10713_s3 + $0x20] sm:$0xff] }
   0x7   :  { %2332 = vmatpush.bf16.msra.mxu1 %v7882_v28  ;;  %8077 = vmatpush.bf16.msra.mxu2 %v7882_v28  ;;  %v7812_v42 = vld [vmem:[%s10712_s0 + $0x58] sm:$0xff]  ;;  %v7877_v54 = vld [vmem:[%s10713_s3 + $0x10] sm:$0xff]  ;;  %v7876_v58 = vld [vmem:[%s10713_s3 + $0x8] sm:$0xff] }
   0x8   :  { %v7878_v48 = vld [vmem:[%s10713_s3 + $0x18] sm:$0xff]  ;;  %v7875_v60 = vld [vmem:[%s10713_s3] sm:$0xff] }
   0x9   :  { %6545 = vmatmul.msk.bf16.vlgmr.msra.gmra.mxu0 %vm547_vm0, %v7801_v2  ;;  %v7813_v61 = vld [vmem:[%s10712_s0 + $0x60] sm:$0xff] }
   0xa   :  { %8078 = vmatpush.bf16.msrb.mxu3 %v7882_v28 }
   0xb   :  { %2333 = vmatpush.bf16.msra.mxu1 %v7881_v30  ;;  %8079 = vmatpush.bf16.msra.mxu2 %v7881_v30 }
   0xe   :  { %8080 = vmatpush.bf16.msrb.mxu3 %v7881_v30 }
   0xf   :  { %2334 = vmatpush.bf16.msra.mxu1 %v7880_v35  ;;  %8081 = vmatpush.bf16.msra.mxu2 %v7880_v35 }
  0x12   :  { %8082 = vmatpush.bf16.msrb.mxu3 %v7880_v35 }
  0x13   :  { %2335 = vmatpush.bf16.msra.mxu1 %v7879_v41  ;;  %8083 = vmatpush.bf16.msra.mxu2 %v7879_v41 }
  0x16   :  { %8084 = vmatpush.bf16.msrb.mxu3 %v7879_v41  ;;  %v7817_v41 = vld [vmem:[%s10712_s0 + $0x80] sm:$0xff] }
  0x17   :  { %2336 = vmatpush.bf16.msra.mxu1 %v7878_v48  ;;  %8085 = vmatpush.bf16.msra.mxu2 %v7878_v48 }
  0x19   :  { %6546 = vmatmul.msk.bf16.gmra.mxu0 %vm547_vm0, %v7802_v3 }
  0x1a   :  { %8086 = vmatpush.bf16.msrb.mxu3 %v7878_v48 }
  0x1b   :  { %2337 = vmatpush.bf16.msra.mxu1 %v7877_v54  ;;  %8087 = vmatpush.bf16.msra.mxu2 %v7877_v54 }
  0x1e   :  { %8088 = vmatpush.bf16.msrb.mxu3 %v7877_v54  ;;  %v7818_v54 = vld [vmem:[%s10712_s0 + $0x88] sm:$0xff] }
  0x1f   :  { %2338 = vmatpush.bf16.msra.mxu1 %v7876_v58  ;;  %8089 = vmatpush.bf16.msra.mxu2 %v7876_v58 }
  0x22   :  { %8090 = vmatpush.bf16.msrb.mxu3 %v7876_v58 }
  0x23   :  { %2339 = vmatpush.bf16.msra.mxu1 %v7875_v60  ;;  %8091 = vmatpush.bf16.msra.mxu2 %v7875_v60 }
  0x26   :  { %8092 = vmatpush.bf16.msrb.mxu3 %v7875_v60 }
  0x29   :  { %6547 = vmatmul.msk.bf16.gmra.mxu0 %vm547_vm0, %v7803_v4  ;;  %v7814_v4 = vld [vmem:[%s10712_s0 + $0x68] sm:$0xff] }
  0x39   :  { %6548 = vmatmul.msk.bf16.gmra.mxu0 %vm547_vm0, %v7804_v5 }
  0x49   :  { %6549 = vmatmul.msk.bf16.gmra.mxu0 %vm547_vm0, %v7805_v6 }
  0x59   :  { %6550 = vmatmul.msk.bf16.gmra.mxu0 %vm547_vm0, %v7806_v7 }
  0x69   :  { %6551 = vmatmul.msk.bf16.gmra.mxu0 %vm547_vm0, %v7807_v8 }
  0x79   :  { %6552 = vmatmul.msk.bf16.gmra.mxu0 %vm547_vm0, %v7808_v9 }
  0x86   :  { %v773_v12 = vpop.f32.mrf.mxu0 }
  0x87   :  { %v774_v13 = vadd.f32 %v8206_v10, %v773_v12 }
  0x89   :  { %v1133_v14 = vmax.f32 %v774_v13, 0.0  ;;  %6553 = vmatmul.msk.bf16.gmra.mxu0 %vm547_vm0, %v7809_v11 }
  0x8b   :  { %1277 = vst [vmem:[#allocation2] sm:$0xff] %v1133_v14 }
  0x8e   :  { %v775_v15 = vpop.f32.mrf.mxu0 }
  0x8f   :  { %v776_v16 = vadd.f32 %v8206_v10, %v775_v15 }
  0x91   :  { %v1134_v17 = vmax.f32 %v776_v16, 0.0 }
  0x93   :  { %1278 = vst [vmem:[#allocation2 + $0x8] sm:$0xff] %v1134_v17 }
  0x96   :  { %v778_v19 = vpop.f32.mrf.mxu0 }
  0x97   :  { %v779_v20 = vadd.f32 %v8206_v10, %v778_v19 }
  0x99   :  { %v1135_v21 = vmax.f32 %v779_v20, 0.0  ;;  %6554 = vmatmul.msk.bf16.gmra.mxu0 %vm547_vm0, %v7810_v18  ;;  %v7815_v18 = vld [vmem:[%s10712_s0 + $0x70] sm:$0xff] }
  0x9a   :  { %v1421_v33 = vld [vmem:[#allocation2] ss:$2 sm:$0xff]  ;;  %v1613_v34 = vld [vmem:[#allocation2 + $0x1] ss:$2 sm:$0xff] }
  0x9b   :  { %1279 = vst [vmem:[#allocation2 + $0x10] sm:$0xff] %v1135_v21  ;;  %v1804_v39 = vmax.f32 %v1421_v33, %v1613_v34  ;;  %v7816_v34 = vld [vmem:[%s10712_s0 + $0x78] sm:$0xff] }
  0x9e   :  { %v780_v22 = vpop.f32.mrf.mxu0 }
  0x9f   :  { %v781_v23 = vadd.f32 %v8206_v10, %v780_v22 }
  0xa1   :  { %v1136_v24 = vmax.f32 %v781_v23, 0.0 }
  0xa2   :  { %v1423_v45 = vld [vmem:[#allocation2 + $0x10] ss:$2 sm:$0xf]  ;;  %v1615_v47 = vld [vmem:[#allocation2 + $0x11] ss:$2 sm:$0xf] }
  0xa3   :  { %1280 = vst [vmem:[#allocation2 + $0x18] sm:$0xff] %v1136_v24  ;;  %v1805_v52 = vmax.f32 %v1423_v45, %v1615_v47 }
  0xa6   :  { %v783_v26 = vpop.f32.mrf.mxu0 }
  0xa7   :  { %v784_v27 = vadd.f32 %v8206_v10, %v783_v26 }
  0xa9   :  { %v1137_v29 = vmax.f32 %v784_v27, 0.0  ;;  %6555 = vmatmul.msk.bf16.gmra.mxu0 %vm547_vm0, %v7811_v25 }
  0xab   :  { %1281 = vst [vmem:[#allocation2 + $0x20] sm:$0xff] %v1137_v29 }
  0xae   :  { %v785_v31 = vpop.f32.mrf.mxu0 }
  0xaf   :  { %v786_v32 = vadd.f32 %v8206_v10, %v785_v31 }
  0xb1   :  { %v1138_v36 = vmax.f32 %v786_v32, 0.0 }
  0xb2   :  { %v1425_v37 = vld [vmem:[#allocation2 + $0x18] ss:$2 sm:$0xff]  ;;  %v1617_v38 = vld [vmem:[#allocation2 + $0x19] ss:$2 sm:$0xff] }
  0xb3   :  { %v1806_v40 = vmax.f32 %v1425_v37, %v1617_v38  ;;  %1282 = vst [vmem:[#allocation2 + $0x28] sm:$0xff] %v1138_v36 }
  0xb5   :  { %v8241_v43 = vmax.f32 %v1804_v39, %v1806_v40 }
  0xb6   :  { %v788_v44 = vpop.f32.mrf.mxu0 }
  0xb7   :  { %v789_v46 = vadd.f32 %v8206_v10, %v788_v44  ;;  %1948 = vst [vmem:[#allocation3] sm:$0xff] %v8241_v43 }
  0xb9   :  { %v1139_v49 = vmax.f32 %v789_v46, 0.0  ;;  %6556 = vmatmul.msk.bf16.gmra.mxu0 %vm547_vm0, %v7812_v42 }
  0xba   :  { %v1427_v50 = vld [vmem:[#allocation2 + $0x28] ss:$2 sm:$0xf]  ;;  %v1619_v51 = vld [vmem:[#allocation2 + $0x29] ss:$2 sm:$0xf] }
  0xbb   :  { %v1807_v53 = vmax.f32 %v1427_v50, %v1619_v51  ;;  %1283 = vst [vmem:[#allocation2 + $0x30] sm:$0xff] %v1139_v49 }
  0xbd   :  { %v1901_v55 = vmax.f32 %v1805_v52, %v1807_v53 }
  0xbe   :  { %v790_v56 = vpop.f32.mrf.mxu0 }
  0xbf   :  { %v791_v57 = vadd.f32 %v8206_v10, %v790_v56  ;;  %1949 = vst [vmem:[#allocation3 + $0x8] sm:$0xf] %v1901_v55 }
  0xc1   :  { %v1140_v59 = vmax.f32 %v791_v57, 0.0 }
  0xc3   :  { %1284 = vst [vmem:[#allocation2 + $0x38] sm:$0xff] %v1140_v59 }
  0xc6   :  { %v793_v62 = vpop.f32.mrf.mxu0 }
  0xc7   :  { %v794_v63 = vadd.f32 %v8206_v10, %v793_v62 }
  0xc9   :  { %v1141_v0 = vmax.f32 %v794_v63, 0.0  ;;  %6557 = vmatmul.msk.bf16.gmra.mxu0 %vm547_vm0, %v7813_v61  ;;  %v7906_v61 = vld [vmem:[%s10713_s3 + $0xf8] sm:$0xff] }
  0xca   :  { %v1429_v11 = vld [vmem:[#allocation2 + $0x30] ss:$2 sm:$0xff]  ;;  %v1621_v12 = vld [vmem:[#allocation2 + $0x31] ss:$2 sm:$0xff]  ;;  %2794 = vmatpush.bf16.msrb.mxu1 %v7906_v61 }
  0xcb   :  { %1285 = vst [vmem:[#allocation2 + $0x40] sm:$0xff] %v1141_v0  ;;  %v1808_v16 = vmax.f32 %v1429_v11, %v1621_v12  ;;  %v7819_v12 = vld [vmem:[%s10712_s0 + $0x90] sm:$0xff] }
  0xce   :  { %v795_v1 = vpop.f32.mrf.mxu0 }
  0xcf   :  { %v796_v2 = vadd.f32 %v8206_v10, %v795_v1 }
  0xd1   :  { %v1142_v3 = vmax.f32 %v796_v2, 0.0 }
  0xd2   :  { %v1431_v23 = vld [vmem:[#allocation2 + $0x40] ss:$2 sm:$0xf]  ;;  %v1623_v24 = vld [vmem:[#allocation2 + $0x41] ss:$2 sm:$0xf] }
  0xd3   :  { %1286 = vst [vmem:[#allocation2 + $0x48] sm:$0xff] %v1142_v3  ;;  %v1809_v28 = vmax.f32 %v1431_v23, %v1623_v24  ;;  %v7905_v3 = vld [vmem:[%s10713_s3 + $0xf0] sm:$0xff] }
  0xd4   :  { %2795 = vmatpush.bf16.msrb.mxu1 %v7905_v3 }
  0xd6   :  { %v798_v5 = vpop.f32.mrf.mxu0 }
  0xd7   :  { %v799_v6 = vadd.f32 %v8206_v10, %v798_v5 }
  0xd9   :  { %v1143_v7 = vmax.f32 %v799_v6, 0.0  ;;  %6558 = vmatmul.msk.bf16.gmra.mxu0 %vm547_vm0, %v7814_v4 }
  0xdb   :  { %1287 = vst [vmem:[#allocation2 + $0x50] sm:$0xff] %v1143_v7  ;;  %v7904_v7 = vld [vmem:[%s10713_s3 + $0xe8] sm:$0xff] }
  0xdc   :  { %2796 = vmatpush.bf16.msrb.mxu1 %v7904_v7 }
  0xde   :  { %v800_v8 = vpop.f32.mrf.mxu0 }
  0xdf   :  { %v801_v9 = vadd.f32 %v8206_v10, %v800_v8 }
  0xe1   :  { %v1144_v13 = vmax.f32 %v801_v9, 0.0  ;;  %v7903_v9 = vld [vmem:[%s10713_s3 + $0xe0] sm:$0xff] }
  0xe2   :  { %v1433_v14 = vld [vmem:[#allocation2 + $0x48] ss:$2 sm:$0xff]  ;;  %v1625_v15 = vld [vmem:[#allocation2 + $0x49] ss:$2 sm:$0xff]  ;;  %2797 = vmatpush.bf16.msrb.mxu1 %v7903_v9 }
  0xe3   :  { %v1810_v17 = vmax.f32 %v1433_v14, %v1625_v15  ;;  %1288 = vst [vmem:[#allocation2 + $0x58] sm:$0xff] %v1144_v13 }
  0xe5   :  { %v8274_v19 = vmax.f32 %v1808_v16, %v1810_v17 }
  0xe6   :  { %v803_v20 = vpop.f32.mrf.mxu0 }
  0xe7   :  { %v804_v21 = vadd.f32 %v8206_v10, %v803_v20  ;;  %1950 = vst [vmem:[#allocation3 + $0x10] sm:$0xff] %v8274_v19  ;;  %v2260_v22 = vpack.c.bf16 %v8274_v19, %v8241_v43 }
  0xe9   :  { %v1145_v25 = vmax.f32 %v804_v21, 0.0  ;;  %6559 = vmatmul.msk.bf16.gmra.mxu0 %vm547_vm0, %v7815_v18  ;;  %2340 = vmatmul.bf16.vlgmr.msra.gmra.mxu1 %v2260_v22 }
  0xea   :  { %v1435_v26 = vld [vmem:[#allocation2 + $0x58] ss:$2 sm:$0xf]  ;;  %v1627_v27 = vld [vmem:[#allocation2 + $0x59] ss:$2 sm:$0xf] }
  0xeb   :  { %v1811_v29 = vmax.f32 %v1435_v26, %v1627_v27  ;;  %1289 = vst [vmem:[#allocation2 + $0x60] sm:$0xff] %v1145_v25  ;;  %v7902_v26 = vld [vmem:[%s10713_s3 + $0xd8] sm:$0xff] }
  0xec   :  { %2798 = vmatpush.bf16.msrb.mxu1 %v7902_v26 }
  0xed   :  { %v1903_v30 = vmax.f32 %v1809_v28, %v1811_v29  ;;  %v7901_v29 = vld [vmem:[%s10713_s3 + $0xd0] sm:$0xff] }
  0xee   :  { %v805_v31 = vpop.f32.mrf.mxu0 }
  0xef   :  { %v806_v32 = vadd.f32 %v8206_v10, %v805_v31  ;;  %1951 = vst [vmem:[#allocation3 + $0x18] sm:$0xf] %v1903_v30 }
  0xf0   :  { %2799 = vmatpush.bf16.msrb.mxu1 %v7901_v29 }
  0xf1   :  { %v1146_v33 = vmax.f32 %v806_v32, 0.0  ;;  %v7900_v32 = vld [vmem:[%s10713_s3 + $0xc8] sm:$0xff] }
  0xf3   :  { %1290 = vst [vmem:[#allocation2 + $0x68] sm:$0xff] %v1146_v33 }
  0xf4   :  { %2800 = vmatpush.bf16.msrb.mxu1 %v7900_v32 }
  0xf6   :  { %v808_v35 = vpop.f32.mrf.mxu0  ;;  %v8317_v11 = vld [vmem:[#allocation3 + $0x13] sm:$0xff] }
  0xf7   :  { %v809_v36 = vadd.f32 %v8206_v10, %v808_v35  ;;  %10806 = vst [vmem:[#allocation5_spill] sm:$0xff] %v8317_v11  ;;  %v8322_v13 = vld [vmem:[#allocation3 + $0x11] sm:$0xff] }
  0xf8   :  { %v8324_v14 = vld [vmem:[#allocation3 + $0x12] sm:$0xff] }
  0xf9   :  { %v1147_v37 = vmax.f32 %v809_v36, 0.0  ;;  %6560 = vmatmul.msk.bf16.gmra.mxu0 %vm547_vm0, %v7816_v34  ;;  %v8337_v23 = vld [vmem:[#allocation3 + $0x14] sm:$0xff]  ;;  %v7899_v34 = vld [vmem:[%s10713_s3 + $0xc0] sm:$0xff] }
  0xfa   :  { %v1437_v47 = vld [vmem:[#allocation2 + $0x60] ss:$2 sm:$0xff]  ;;  %v1629_v48 = vld [vmem:[#allocation2 + $0x61] ss:$2 sm:$0xff]  ;;  %v7820_v35 = vld [vmem:[%s10712_s0 + $0x98] sm:$0xff]  ;;  %2801 = vmatpush.bf16.msrb.mxu1 %v7899_v34 }
  0xfb   :  { %1291 = vst [vmem:[#allocation2 + $0x70] sm:$0xff] %v1147_v37  ;;  %v1812_v52 = vmax.f32 %v1437_v47, %v1629_v48  ;;  %v7821_v48 = vld [vmem:[%s10712_s0 + $0xa0] sm:$0xff] }
  0xfe   :  { %v810_v38 = vpop.f32.mrf.mxu0 }
  0xff   :  { %v811_v39 = vadd.f32 %v8206_v10, %v810_v38 }
 0x101   :  { %v1148_v40 = vmax.f32 %v811_v39, 0.0 }
 0x102   :  { %v1439_v57 = vld [vmem:[#allocation2 + $0x70] ss:$2 sm:$0xf]  ;;  %v1631_v60 = vld [vmem:[#allocation2 + $0x71] ss:$2 sm:$0xf] }
 0x103   :  { %1292 = vst [vmem:[#allocation2 + $0x78] sm:$0xff] %v1148_v40  ;;  %v1813_v1 = vmax.f32 %v1439_v57, %v1631_v60 }
 0x106   :  { %v813_v42 = vpop.f32.mrf.mxu0 }
 0x107   :  { %v814_v43 = vadd.f32 %v8206_v10, %v813_v42 }
 0x109   :  { %v1149_v44 = vmax.f32 %v814_v43, 0.0  ;;  %6561 = vmatmul.msk.bf16.gmra.mxu0 %vm547_vm0, %v7817_v41 }
 0x10b   :  { %1293 = vst [vmem:[#allocation2 + $0x80] sm:$0xff] %v1149_v44 }
 0x10e   :  { %v815_v45 = vpop.f32.mrf.mxu0 }
 0x10f   :  { %v816_v46 = vadd.f32 %v8206_v10, %v815_v45 }
 0x111   :  { %v1150_v49 = vmax.f32 %v816_v46, 0.0 }
 0x112   :  { %v1441_v50 = vld [vmem:[#allocation2 + $0x78] ss:$2 sm:$0xff]  ;;  %v1633_v51 = vld [vmem:[#allocation2 + $0x79] ss:$2 sm:$0xff] }
 0x113   :  { %v1814_v53 = vmax.f32 %v1441_v50, %v1633_v51  ;;  %1294 = vst [vmem:[#allocation2 + $0x88] sm:$0xff] %v1150_v49 }
 0x115   :  { %v8297_v55 = vmax.f32 %v1812_v52, %v1814_v53 }
 0x116   :  { %v818_v56 = vpop.f32.mrf.mxu0 }
 0x117   :  { %v819_v58 = vadd.f32 %v8206_v10, %v818_v56  ;;  %1952 = vst [vmem:[#allocation3 + $0x20] sm:$0xff] %v8297_v55 }
 0x119   :  { %v1151_v62 = vmax.f32 %v819_v58, 0.0  ;;  %6562 = vmatmul.msk.bf16.gmra.mxu0 %vm547_vm0, %v7818_v54 }
 0x11a   :  { %v1443_v63 = vld [vmem:[#allocation2 + $0x88] ss:$2 sm:$0xf]  ;;  %v1635_v0 = vld [vmem:[#allocation2 + $0x89] ss:$2 sm:$0xf] }
 0x11b   :  { %v1815_v2 = vmax.f32 %v1443_v63, %v1635_v0  ;;  %1295 = vst [vmem:[#allocation2 + $0x90] sm:$0xff] %v1151_v62 }
 0x11d   :  { %v1905_v4 = vmax.f32 %v1813_v1, %v1815_v2  ;;  %v7822_v2 = vld [vmem:[%s10712_s0 + $0xa8] sm:$0xff] }
 0x11e   :  { %v820_v5 = vpop.f32.mrf.mxu0 }
 0x11f   :  { %v821_v6 = vadd.f32 %v8206_v10, %v820_v5  ;;  %1953 = vst [vmem:[#allocation3 + $0x28] sm:$0xf] %v1905_v4  ;;  %v2142_v4 = vld [vmem:[#allocation3 + $0x3] sm:$0xff] }
 0x121   :  { %v1152_v8 = vmax.f32 %v821_v6, 0.0  ;;  %v2721_v6 = vpack.c.bf16 %v8317_v11, %v2142_v4 }
 0x123   :  { %1296 = vst [vmem:[#allocation2 + $0x98] sm:$0xff] %v1152_v8 }
 0x126   :  { %v823_v15 = vpop.f32.mrf.mxu0  ;;  %v8326_v16 = vld [vmem:[#allocation3 + $0x23] sm:$0xff] }
 0x127   :  { %10807 = vst [vmem:[#allocation6_spill] sm:$0xff] %v8326_v16  ;;  %v8328_v17 = vld [vmem:[#allocation3 + $0x21] sm:$0xff]  ;;  %v824_v20 = vadd.f32 %v8206_v10, %v823_v15 }
 0x128   :  { %v8330_v18 = vld [vmem:[#allocation3 + $0x22] sm:$0xff] }
 0x129   :  { %v8341_v25 = vld [vmem:[#allocation3 + $0x24] sm:$0xff]  ;;  %v1153_v28 = vmax.f32 %v824_v20, 0.0  ;;  %6563 = vmatmul.msk.bf16.gmra.mxu0 %vm547_vm0, %v7819_v12  ;;  %v7823_v20 = vld [vmem:[%s10712_s0 + $0xb0] sm:$0xff] }
 0x12a   :  { %v1445_v41 = vld [vmem:[#allocation2 + $0x90] ss:$2 sm:$0xff]  ;;  %v1637_v42 = vld [vmem:[#allocation2 + $0x91] ss:$2 sm:$0xff] }
 0x12b   :  { %1297 = vst [vmem:[#allocation2 + $0xa0] sm:$0xff] %v1153_v28  ;;  %v1816_v46 = vmax.f32 %v1445_v41, %v1637_v42  ;;  %v7824_v41 = vld [vmem:[%s10712_s0 + $0xb8] sm:$0xff] }
 0x12e   :  { %v825_v30 = vpop.f32.mrf.mxu0 }
 0x12f   :  { %v826_v31 = vadd.f32 %v8206_v10, %v825_v30 }
 0x131   :  { %v1154_v33 = vmax.f32 %v826_v31, 0.0 }
 0x132   :  { %v1447_v53 = vld [vmem:[#allocation2 + $0xa0] ss:$2 sm:$0xf]  ;;  %v1639_v54 = vld [vmem:[#allocation2 + $0xa1] ss:$2 sm:$0xf] }
 0x133   :  { %1298 = vst [vmem:[#allocation2 + $0xa8] sm:$0xff] %v1154_v33  ;;  %v1817_v60 = vmax.f32 %v1447_v53, %v1639_v54 }
 0x136   :  { %v828_v36 = vpop.f32.mrf.mxu0 }
 0x137   :  { %v829_v37 = vadd.f32 %v8206_v10, %v828_v36 }
 0x139   :  { %v1155_v38 = vmax.f32 %v829_v37, 0.0  ;;  %6564 = vmatmul.msk.bf16.gmra.mxu0 %vm547_vm0, %v7820_v35 }
 0x13b   :  { %1299 = vst [vmem:[#allocation2 + $0xb0] sm:$0xff] %v1155_v38 }
 0x13e   :  { %v830_v39 = vpop.f32.mrf.mxu0 }
 0x13f   :  { %v831_v40 = vadd.f32 %v8206_v10, %v830_v39 }
 0x141   :  { %v1156_v43 = vmax.f32 %v831_v40, 0.0 }
 0x142   :  { %v1449_v44 = vld [vmem:[#allocation2 + $0xa8] ss:$2 sm:$0xff]  ;;  %v1641_v45 = vld [vmem:[#allocation2 + $0xa9] ss:$2 sm:$0xff] }
 0x143   :  { %v1818_v47 = vmax.f32 %v1449_v44, %v1641_v45  ;;  %1300 = vst [vmem:[#allocation2 + $0xb8] sm:$0xff] %v1156_v43 }
 0x145   :  { %v1906_v49 = vmax.f32 %v1816_v46, %v1818_v47 }
 0x146   :  { %v833_v50 = vpop.f32.mrf.mxu0 }
 0x147   :  { %v834_v51 = vadd.f32 %v8206_v10, %v833_v50  ;;  %1954 = vst [vmem:[#allocation3 + $0x30] sm:$0xff] %v1906_v49  ;;  %v8370_v52 = vpack.c.bf16 %v1906_v49, %v8297_v55 }
 0x149   :  { %10808 = vst [vmem:[#allocation7_spill] sm:$0xff] %v8370_v52  ;;  %v1157_v56 = vmax.f32 %v834_v51, 0.0  ;;  %6565 = vmatmul.msk.bf16.gmra.mxu0 %vm547_vm0, %v7821_v48  ;;  %2345 = vmatmul.bf16.gmra.mxu1 %v8370_v52 }
 0x14a   :  { %v1451_v57 = vld [vmem:[#allocation2 + $0xb8] ss:$2 sm:$0xf]  ;;  %v1643_v58 = vld [vmem:[#allocation2 + $0xb9] ss:$2 sm:$0xf] }
 0x14b   :  { %v1819_v61 = vmax.f32 %v1451_v57, %v1643_v58  ;;  %1301 = vst [vmem:[#allocation2 + $0xc0] sm:$0xff] %v1157_v56 }
 0x14d   :  { %v1907_v62 = vmax.f32 %v1817_v60, %v1819_v61 }
 0x14e   :  { %v835_v63 = vpop.f32.mrf.mxu0 }
 0x14f   :  { %v836_v0 = vadd.f32 %v8206_v10, %v835_v63  ;;  %1955 = vst [vmem:[#allocation3 + $0x38] sm:$0xf] %v1907_v62 }
 0x151   :  { %v1158_v1 = vmax.f32 %v836_v0, 0.0 }
 0x153   :  { %1302 = vst [vmem:[#allocation2 + $0xc8] sm:$0xff] %v1158_v1 }
 0x156   :  { %v838_v3 = vpop.f32.mrf.mxu0  ;;  %v2145_v15 = vld [vmem:[#allocation3 + $0x33] sm:$0xff] }
 0x157   :  { %v839_v5 = vadd.f32 %v8206_v10, %v838_v3  ;;  %v8387_v29 = vpack.c.bf16 %v2145_v15, %v8326_v16  ;;  %v2047_v60 = vld [vmem:[#allocation3 + $0x31] sm:$0xff] }
 0x158   :  { %v2096_v61 = vld [vmem:[#allocation3 + $0x32] sm:$0xff] }
 0x159   :  { %v1159_v7 = vmax.f32 %v839_v5, 0.0  ;;  %6566 = vmatmul.msk.bf16.gmra.mxu0 %vm547_vm0, %v7822_v2  ;;  %2802 = vmatmul.bf16.vlgmr.msrb.gmra.mxu1 %v2721_v6  ;;  %10809 = vst [vmem:[#allocation8_spill] sm:$0xff] %v8387_v29  ;;  %v2194_v5 = vld [vmem:[#allocation3 + $0x34] sm:$0xff] }
 0x15a   :  { %v1453_v33 = vld [vmem:[#allocation2 + $0xc0] ss:$2 sm:$0xff]  ;;  %v1645_v34 = vld [vmem:[#allocation2 + $0xc1] ss:$2 sm:$0xff] }
 0x15b   :  { %1303 = vst [vmem:[#allocation2 + $0xd0] sm:$0xff] %v1159_v7  ;;  %v1820_v38 = vmax.f32 %v1453_v33, %v1645_v34 }
 0x15e   :  { %v840_v8 = vpop.f32.mrf.mxu0 }
 0x15f   :  { %v841_v9 = vadd.f32 %v8206_v10, %v840_v8 }
 0x161   :  { %v1160_v12 = vmax.f32 %v841_v9, 0.0 }
 0x162   :  { %v1455_v45 = vld [vmem:[#allocation2 + $0xd0] ss:$2 sm:$0xf]  ;;  %v1647_v46 = vld [vmem:[#allocation2 + $0xd1] ss:$2 sm:$0xf] }
 0x163   :  { %1304 = vst [vmem:[#allocation2 + $0xd8] sm:$0xff] %v1160_v12  ;;  %v1821_v51 = vmax.f32 %v1455_v45, %v1647_v46 }
 0x166   :  { %v843_v26 = vpop.f32.mrf.mxu0 }
 0x167   :  { %v844_v28 = vadd.f32 %v8206_v10, %v843_v26 }
 0x169   :  { %v1161_v30 = vmax.f32 %v844_v28, 0.0  ;;  %6567 = vmatmul.msk.bf16.gmra.mxu0 %vm547_vm0, %v7823_v20  ;;  %2807 = vmatmul.bf16.gmra.mxu1 %v8387_v29 }
 0x16b   :  { %1305 = vst [vmem:[#allocation2 + $0xe0] sm:$0xff] %v1161_v30 }
 0x16e   :  { %v845_v31 = vpop.f32.mrf.mxu0 }
 0x16f   :  { %v846_v32 = vadd.f32 %v8206_v10, %v845_v31 }
 0x171   :  { %v1162_v35 = vmax.f32 %v846_v32, 0.0 }
 0x172   :  { %v1457_v36 = vld [vmem:[#allocation2 + $0xd8] ss:$2 sm:$0xff]  ;;  %v1649_v37 = vld [vmem:[#allocation2 + $0xd9] ss:$2 sm:$0xff] }
 0x173   :  { %v1822_v39 = vmax.f32 %v1457_v36, %v1649_v37  ;;  %1306 = vst [vmem:[#allocation2 + $0xe8] sm:$0xff] %v1162_v35 }
 0x175   :  { %v8392_v40 = vmax.f32 %v1820_v38, %v1822_v39 }
 0x176   :  { %v848_v42 = vpop.f32.mrf.mxu0 }
 0x177   :  { %1956 = vst [vmem:[#allocation3 + $0x40] sm:$0xff] %v8392_v40  ;;  %v849_v43 = vadd.f32 %v8206_v10, %v848_v42  ;;  %v8400_v44 = vpack.c.bf16 %v8392_v40, %v1906_v49  ;;  %v7825_v49 = vld [vmem:[%s10712_s0 + $0xc0] sm:$0xff] }
 0x179   :  { %v1163_v47 = vmax.f32 %v849_v43, 0.0  ;;  %6568 = vmatmul.msk.bf16.gmra.mxu0 %vm547_vm0, %v7824_v41  ;;  %v7827_v43 = vld [vmem:[%s10712_s0 + $0xd0] sm:$0xff] }
 0x17a   :  { %v1459_v48 = vld [vmem:[#allocation2 + $0xe8] ss:$2 sm:$0xf]  ;;  %v1651_v50 = vld [vmem:[#allocation2 + $0xe9] ss:$2 sm:$0xf] }
 0x17b   :  { %v1823_v53 = vmax.f32 %v1459_v48, %v1651_v50  ;;  %1307 = vst [vmem:[#allocation2 + $0xf0] sm:$0xff] %v1163_v47 }
 0x17d   :  { %v1909_v54 = vmax.f32 %v1821_v51, %v1823_v53 }
 0x17e   :  { %v850_v56 = vpop.f32.mrf.mxu0 }
 0x17f   :  { %1957 = vst [vmem:[#allocation3 + $0x48] sm:$0xf] %v1909_v54  ;;  %v851_v57 = vadd.f32 %v8206_v10, %v850_v56 }
 0x181   :  { %v1164_v58 = vmax.f32 %v851_v57, 0.0 }
 0x183   :  { %1308 = vst [vmem:[#allocation2 + $0xf8] sm:$0xff] %v1164_v58 }
 0x186   :  { %v2146_v62 = vld [vmem:[#allocation3 + $0x43] sm:$0xff]  ;;  %v853_v63 = vpop.f32.mrf.mxu0 }
 0x187   :  { %v2048_v0 = vld [vmem:[#allocation3 + $0x41] sm:$0xff]  ;;  %v8407_v2 = vpack.c.bf16 %v2146_v62, %v2145_v15  ;;  %v854_v3 = vadd.f32 %v8206_v10, %v853_v63 }
 0x188   :  { %v2097_v1 = vld [vmem:[#allocation3 + $0x42] sm:$0xff]  ;;  %v8412_v6 = vpack.c.bf16 %v2048_v0, %v2047_v60 }
 0x189   :  { %10810 = vst [vmem:[#allocation9_spill] sm:$0xff] %v8407_v2  ;;  %v8410_v4 = vpack.c.bf16 %v2097_v1, %v2096_v61  ;;  %v2195_v7 = vld [vmem:[#allocation3 + $0x44] sm:$0xff]  ;;  %v1165_v9 = vmax.f32 %v854_v3, 0.0  ;;  %6569 = vmatmul.msk.bf16.gmra.mxu0 %vm547_vm0, %v7825_v49 }
 0x18a   :  { %10811 = vst [vmem:[#allocation10_spill] sm:$0xff] %v8412_v6  ;;  %v8414_v8 = vpack.c.bf16 %v2195_v7, %v2194_v5  ;;  %v7826_v15 = vld [vmem:[%s10712_s0 + $0xc8] sm:$0xff]  ;;  %v1461_v34 = vld [vmem:[#allocation2 + $0xf0] ss:$2 sm:$0xff]  ;;  %v1653_v35 = vld [vmem:[#allocation2 + $0xf1] ss:$2 sm:$0xff] }
 0x18b   :  { %1309 = vst [vmem:[#allocation2 + $0x100] sm:$0xff] %v1165_v9  ;;  %v1824_v39 = vmax.f32 %v1461_v34, %v1653_v35 }
 0x18c   :  { %10812 = vst [vmem:[#allocation11_spill] sm:$0xff] %v8414_v8 }
 0x18e   :  { %v855_v12 = vpop.f32.mrf.mxu0 }
 0x18f   :  { %v856_v20 = vadd.f32 %v8206_v10, %v855_v12 }
 0x191   :  { %v1166_v26 = vmax.f32 %v856_v20, 0.0  ;;  %v7829_v20 = vld [vmem:[%s10712_s0 + $0xe0] sm:$0xff] }
 0x192   :  { %v1463_v48 = vld [vmem:[#allocation2 + $0x100] ss:$2 sm:$0xf]  ;;  %v1655_v50 = vld [vmem:[#allocation2 + $0x101] ss:$2 sm:$0xf] }
 0x193   :  { %1310 = vst [vmem:[#allocation2 + $0x108] sm:$0xff] %v1166_v26  ;;  %v1825_v56 = vmax.f32 %v1463_v48, %v1655_v50 }
 0x196   :  { %v858_v28 = vpop.f32.mrf.mxu0 }
 0x197   :  { %v859_v30 = vadd.f32 %v8206_v10, %v858_v28 }
 0x199   :  { %v1167_v31 = vmax.f32 %v859_v30, 0.0  ;;  %6570 = vmatmul.msk.bf16.gmra.mxu0 %vm547_vm0, %v7826_v15 }
 0x19b   :  { %1311 = vst [vmem:[#allocation2 + $0x110] sm:$0xff] %v1167_v31 }
 0x19e   :  { %v860_v32 = vpop.f32.mrf.mxu0 }
 0x19f   :  { %v861_v33 = vadd.f32 %v8206_v10, %v860_v32 }
 0x1a1   :  { %v1168_v36 = vmax.f32 %v861_v33, 0.0 }
 0x1a2   :  { %v1465_v37 = vld [vmem:[#allocation2 + $0x108] ss:$2 sm:$0xff]  ;;  %v1657_v38 = vld [vmem:[#allocation2 + $0x109] ss:$2 sm:$0xff] }
 0x1a3   :  { %v1826_v41 = vmax.f32 %v1465_v37, %v1657_v38  ;;  %1312 = vst [vmem:[#allocation2 + $0x118] sm:$0xff] %v1168_v36 }
 0x1a5   :  { %v1910_v42 = vmax.f32 %v1824_v39, %v1826_v41  ;;  %v7830_v39 = vld [vmem:[%s10712_s0 + $0xe8] sm:$0xff] }
 0x1a6   :  { %v863_v45 = vpop.f32.mrf.mxu0 }
 0x1a7   :  { %1958 = vst [vmem:[#allocation3 + $0x50] sm:$0xff] %v1910_v42  ;;  %v864_v46 = vadd.f32 %v8206_v10, %v863_v45  ;;  %v8429_v47 = vpack.c.bf16 %v1910_v42, %v8392_v40  ;;  %v7828_v40 = vld [vmem:[%s10712_s0 + $0xd8] sm:$0xff] }
 0x1a9   :  { %10813 = vst [vmem:[#allocation12_spill] sm:$0xff] %v8429_v47  ;;  %v1169_v51 = vmax.f32 %v864_v46, 0.0  ;;  %6571 = vmatmul.msk.bf16.gmra.mxu0 %vm547_vm0, %v7827_v43  ;;  %2350 = vmatmul.bf16.vlgmr.msra.gmra.mxu2 %v8429_v47 }
 0x1aa   :  { %v1467_v53 = vld [vmem:[#allocation2 + $0x118] ss:$2 sm:$0xf]  ;;  %v1659_v54 = vld [vmem:[#allocation2 + $0x119] ss:$2 sm:$0xf] }
 0x1ab   :  { %v1827_v57 = vmax.f32 %v1467_v53, %v1659_v54  ;;  %1313 = vst [vmem:[#allocation2 + $0x120] sm:$0xff] %v1169_v51 }
 0x1ad   :  { %v1911_v58 = vmax.f32 %v1825_v56, %v1827_v57 }
 0x1ae   :  { %v865_v49 = vpop.f32.mrf.mxu0 }
 0x1af   :  { %v866_v60 = vadd.f32 %v8206_v10, %v865_v49  ;;  %1959 = vst [vmem:[#allocation3 + $0x58] sm:$0xf] %v1911_v58 }
 0x1b1   :  { %v1170_v61 = vmax.f32 %v866_v60, 0.0 }
 0x1b3   :  { %1314 = vst [vmem:[#allocation2 + $0x128] sm:$0xff] %v1170_v61 }
 0x1b6   :  { %v868_v63 = vpop.f32.mrf.mxu0  ;;  %v2147_v0 = vld [vmem:[#allocation3 + $0x53] sm:$0xff] }
 0x1b7   :  { %v869_v1 = vadd.f32 %v8206_v10, %v868_v63  ;;  %v8438_v3 = vpack.c.bf16 %v2147_v0, %v2146_v62  ;;  %v8464_v61 = vld [vmem:[#allocation3 + $0x51] sm:$0xff] }
 0x1b9   :  { %10814 = vst [vmem:[#allocation13_spill] sm:$0xff] %v8438_v3  ;;  %v1171_v5 = vmax.f32 %v869_v1, 0.0  ;;  %6572 = vmatmul.msk.bf16.gmra.mxu0 %vm547_vm0, %v7828_v40  ;;  %2812 = vmatmul.bf16.gmra.mxu1 %v8438_v3  ;;  %v2098_v40 = vld [vmem:[#allocation3 + $0x52] sm:$0xff] }
 0x1ba   :  { %v1469_v31 = vld [vmem:[#allocation2 + $0x120] ss:$2 sm:$0xff]  ;;  %v1661_v32 = vld [vmem:[#allocation2 + $0x121] ss:$2 sm:$0xff] }
 0x1bb   :  { %1315 = vst [vmem:[#allocation2 + $0x130] sm:$0xff] %v1171_v5  ;;  %v1828_v36 = vmax.f32 %v1469_v31, %v1661_v32 }
 0x1be   :  { %v870_v7 = vpop.f32.mrf.mxu0 }
 0x1bf   :  { %v871_v9 = vadd.f32 %v8206_v10, %v870_v7 }
 0x1c1   :  { %v1172_v12 = vmax.f32 %v871_v9, 0.0 }
 0x1c2   :  { %v1471_v46 = vld [vmem:[#allocation2 + $0x130] ss:$2 sm:$0xf]  ;;  %v1663_v48 = vld [vmem:[#allocation2 + $0x131] ss:$2 sm:$0xf] }
 0x1c3   :  { %1316 = vst [vmem:[#allocation2 + $0x138] sm:$0xff] %v1172_v12  ;;  %v1829_v54 = vmax.f32 %v1471_v46, %v1663_v48  ;;  %v2196_v12 = vld [vmem:[#allocation3 + $0x54] sm:$0xff] }
 0x1c6   :  { %v873_v26 = vpop.f32.mrf.mxu0 }
 0x1c7   :  { %v874_v15 = vadd.f32 %v8206_v10, %v873_v26 }
 0x1c9   :  { %v1173_v62 = vmax.f32 %v874_v15, 0.0  ;;  %6573 = vmatmul.msk.bf16.gmra.mxu0 %vm547_vm0, %v7829_v20 }
 0x1cb   :  { %1317 = vst [vmem:[#allocation2 + $0x140] sm:$0xff] %v1173_v62 }
 0x1ce   :  { %v875_v28 = vpop.f32.mrf.mxu0 }
 0x1cf   :  { %v876_v30 = vadd.f32 %v8206_v10, %v875_v28 }
 0x1d1   :  { %v1174_v33 = vmax.f32 %v876_v30, 0.0 }
 0x1d2   :  { %v1473_v34 = vld [vmem:[#allocation2 + $0x138] ss:$2 sm:$0xff]  ;;  %v1665_v35 = vld [vmem:[#allocation2 + $0x139] ss:$2 sm:$0xff] }
 0x1d3   :  { %v1830_v37 = vmax.f32 %v1473_v34, %v1665_v35  ;;  %1318 = vst [vmem:[#allocation2 + $0x148] sm:$0xff] %v1174_v33  ;;  %v7832_v34 = vld [vmem:[%s10712_s0 + $0xf8] sm:$0xff] }
 0x1d5   :  { %v8449_v38 = vmax.f32 %v1828_v36, %v1830_v37 }
 0x1d6   :  { %v878_v41 = vpop.f32.mrf.mxu0 }
 0x1d7   :  { %1960 = vst [vmem:[#allocation3 + $0x60] sm:$0xff] %v8449_v38  ;;  %v879_v43 = vadd.f32 %v8206_v10, %v878_v41  ;;  %v8457_v45 = vpack.c.bf16 %v8449_v38, %v1910_v42  ;;  %v7831_v42 = vld [vmem:[%s10712_s0 + $0xf0] sm:$0xff] }
 0x1d9   :  { %v1175_v50 = vmax.f32 %v879_v43, 0.0  ;;  %6574 = vmatmul.msk.bf16.gmra.mxu0 %vm547_vm0, %v7830_v39 }
 0x1da   :  { %v1475_v51 = vld [vmem:[#allocation2 + $0x148] ss:$2 sm:$0xf]  ;;  %v1667_v53 = vld [vmem:[#allocation2 + $0x149] ss:$2 sm:$0xf] }
 0x1db   :  { %v1831_v56 = vmax.f32 %v1475_v51, %v1667_v53  ;;  %1319 = vst [vmem:[#allocation2 + $0x150] sm:$0xff] %v1175_v50 }
 0x1dd   :  { %v1913_v57 = vmax.f32 %v1829_v54, %v1831_v56  ;;  %v7833_v56 = vld [vmem:[%s10712_s0 + $0x100] sm:$0xff] }
 0x1de   :  { %v880_v58 = vpop.f32.mrf.mxu0 }
 0x1df   :  { %v881_v49 = vadd.f32 %v8206_v10, %v880_v58  ;;  %1961 = vst [vmem:[#allocation3 + $0x68] sm:$0xf] %v1913_v57 }
 0x1e1   :  { %v1176_v60 = vmax.f32 %v881_v49, 0.0 }
 0x1e3   :  { %1320 = vst [vmem:[#allocation2 + $0x158] sm:$0xff] %v1176_v60 }
 0x1e6   :  { %v883_v63 = vpop.f32.mrf.mxu0  ;;  %v2148_v1 = vld [vmem:[#allocation3 + $0x63] sm:$0xff] }
 0x1e7   :  { %v2050_v5 = vld [vmem:[#allocation3 + $0x61] sm:$0xff]  ;;  %v884_v9 = vadd.f32 %v8206_v10, %v883_v63  ;;  %v8472_v62 = vpack.c.bf16 %v2148_v1, %v2147_v0 }
 0x1e8   :  { %v2099_v7 = vld [vmem:[#allocation3 + $0x62] sm:$0xff]  ;;  %v8468_v20 = vpack.c.bf16 %v2050_v5, %v8464_v61 }
 0x1e9   :  { %v2197_v26 = vld [vmem:[#allocation3 + $0x64] sm:$0xff]  ;;  %v8470_v15 = vpack.c.bf16 %v2099_v7, %v2098_v40  ;;  %10817 = vst [vmem:[#allocation16_spill] sm:$0xff] %v8472_v62  ;;  %v1177_v30 = vmax.f32 %v884_v9, 0.0  ;;  %6575 = vmatmul.msk.bf16.gmra.mxu0 %vm547_vm0, %v7831_v42 }
 0x1ea   :  { %10815 = vst [vmem:[#allocation14_spill] sm:$0xff] %v8468_v20  ;;  %v8474_v28 = vpack.c.bf16 %v2197_v26, %v2196_v12  ;;  %v1477_v41 = vld [vmem:[#allocation2 + $0x150] ss:$2 sm:$0xff]  ;;  %v1669_v43 = vld [vmem:[#allocation2 + $0x151] ss:$2 sm:$0xff] }
 0x1eb   :  { %10816 = vst [vmem:[#allocation15_spill] sm:$0xff] %v8470_v15  ;;  %v1832_v51 = vmax.f32 %v1477_v41, %v1669_v43  ;;  %v7835_v41 = vld [vmem:[%s10712_s0 + $0x110] sm:$0xff] }
 0x1ec   :  { %10818 = vst [vmem:[#allocation17_spill] sm:$0xff] %v8474_v28 }
 0x1ed   :  { %1321 = vst [vmem:[#allocation2 + $0x160] sm:$0xff] %v1177_v30 }
 0x1ee   :  { %v885_v31 = vpop.f32.mrf.mxu0 }
 0x1ef   :  { %v886_v32 = vadd.f32 %v8206_v10, %v885_v31 }
 0x1f1   :  { %v1178_v33 = vmax.f32 %v886_v32, 0.0 }
 0x1f3   :  { %1322 = vst [vmem:[#allocation2 + $0x168] sm:$0xff] %v1178_v33 }
 0x1f4   :  { %v1479_v60 = vld [vmem:[#allocation2 + $0x160] ss:$2 sm:$0xf]  ;;  %v1671_v42 = vld [vmem:[#allocation2 + $0x161] ss:$2 sm:$0xf] }
 0x1f5   :  { %v1833_v7 = vmax.f32 %v1479_v60, %v1671_v42 }
 0x1f6   :  { %v888_v35 = vpop.f32.mrf.mxu0 }
 0x1f7   :  { %v889_v36 = vadd.f32 %v8206_v10, %v888_v35 }
 0x1f9   :  { %v1179_v0 = vmax.f32 %v889_v36, 0.0  ;;  %6576 = vmatmul.msk.bf16.gmra.mxu0 %vm547_vm0, %v7832_v34 }
 0x1fb   :  { %1323 = vst [vmem:[#allocation2 + $0x170] sm:$0xff] %v1179_v0 }
 0x1fe   :  { %v890_v37 = vpop.f32.mrf.mxu0 }
 0x1ff   :  { %v891_v39 = vadd.f32 %v8206_v10, %v890_v37 }
 0x201   :  { %v1180_v46 = vmax.f32 %v891_v39, 0.0 }
 0x202   :  { %v1481_v48 = vld [vmem:[#allocation2 + $0x168] ss:$2 sm:$0xff]  ;;  %v1673_v50 = vld [vmem:[#allocation2 + $0x169] ss:$2 sm:$0xff] }
 0x203   :  { %v1834_v53 = vmax.f32 %v1481_v48, %v1673_v50  ;;  %1324 = vst [vmem:[#allocation2 + $0x178] sm:$0xff] %v1180_v46 }
 0x205   :  { %v1914_v54 = vmax.f32 %v1832_v51, %v1834_v53 }
 0x206   :  { %v893_v57 = vpop.f32.mrf.mxu0 }
 0x207   :  { %1962 = vst [vmem:[#allocation3 + $0x70] sm:$0xff] %v1914_v54  ;;  %v894_v58 = vadd.f32 %v8206_v10, %v893_v57  ;;  %v8489_v49 = vpack.c.bf16 %v1914_v54, %v8449_v38  ;;  %v7834_v38 = vld [vmem:[%s10712_s0 + $0x108] sm:$0xff] }
 0x209   :  { %10819 = vst [vmem:[#allocation18_spill] sm:$0xff] %v8489_v49  ;;  %v1181_v40 = vmax.f32 %v894_v58, 0.0  ;;  %6577 = vmatmul.msk.bf16.gmra.mxu0 %vm547_vm0, %v7833_v56  ;;  %2355 = vmatmul.bf16.gmra.mxu2 %v8489_v49 }
 0x20a   :  { %v1483_v63 = vld [vmem:[#allocation2 + $0x178] ss:$2 sm:$0xf]  ;;  %v1675_v5 = vld [vmem:[#allocation2 + $0x179] ss:$2 sm:$0xf] }
 0x20b   :  { %v1835_v9 = vmax.f32 %v1483_v63, %v1675_v5  ;;  %1325 = vst [vmem:[#allocation2 + $0x180] sm:$0xff] %v1181_v40  ;;  %v7836_v40 = vld [vmem:[%s10712_s0 + $0x118] sm:$0xff]  ;;  %v8515_v5 = vld [vmem:[%s10711_s2] ss:$0 sm:$0xff] }
 0x20d   :  { %v1915_v12 = vmax.f32 %v1833_v7, %v1835_v9 }
 0x20e   :  { %v895_v26 = vpop.f32.mrf.mxu0 }
 0x20f   :  { %v896_v30 = vadd.f32 %v8206_v10, %v895_v26  ;;  %1963 = vst [vmem:[#allocation3 + $0x78] sm:$0xf] %v1915_v12 }
 0x211   :  { %v1182_v31 = vmax.f32 %v896_v30, 0.0 }
 0x213   :  { %1326 = vst [vmem:[#allocation2 + $0x188] sm:$0xff] %v1182_v31 }
 0x216   :  { %v898_v32 = vpop.f32.mrf.mxu0  ;;  %v2149_v33 = vld [vmem:[#allocation3 + $0x73] sm:$0xff] }
 0x217   :  { %v899_v34 = vadd.f32 %v8206_v10, %v898_v32  ;;  %v8498_v35 = vpack.c.bf16 %v2149_v33, %v2148_v1 }
 0x219   :  { %10820 = vst [vmem:[#allocation19_spill] sm:$0xff] %v8498_v35  ;;  %v1183_v36 = vmax.f32 %v899_v34, 0.0  ;;  %6578 = vmatmul.msk.bf16.gmra.mxu0 %vm547_vm0, %v7834_v38  ;;  %2817 = vmatmul.bf16.gmra.mxu1 %v8498_v35 }
 0x21a   :  { %v1485_v51 = vld [vmem:[#allocation2 + $0x180] ss:$2 sm:$0xff]  ;;  %v1677_v53 = vld [vmem:[#allocation2 + $0x181] ss:$2 sm:$0xff] }
 0x21b   :  { %1327 = vst [vmem:[#allocation2 + $0x190] sm:$0xff] %v1183_v36  ;;  %v1836_v58 = vmax.f32 %v1485_v51, %v1677_v53 }
 0x21e   :  { %v900_v0 = vpop.f32.mrf.mxu0 }
 0x21f   :  { %v901_v37 = vadd.f32 %v8206_v10, %v900_v0  ;;  %v7837_v0 = vld [vmem:[%s10712_s0 + $0x120] sm:$0xff] }
 0x221   :  { %v1184_v39 = vmax.f32 %v901_v37, 0.0 }
 0x222   :  { %v1487_v7 = vld [vmem:[#allocation2 + $0x190] ss:$2 sm:$0xf]  ;;  %v1679_v9 = vld [vmem:[#allocation2 + $0x191] ss:$2 sm:$0xf] }
 0x223   :  { %1328 = vst [vmem:[#allocation2 + $0x198] sm:$0xff] %v1184_v39  ;;  %v1837_v31 = vmax.f32 %v1487_v7, %v1679_v9  ;;  %v7839_v9 = vld [vmem:[%s10712_s0 + $0x130] sm:$0xff] }
 0x226   :  { %v903_v43 = vpop.f32.mrf.mxu0 }
 0x227   :  { %v904_v46 = vadd.f32 %v8206_v10, %v903_v43 }
 0x229   :  { %v1185_v1 = vmax.f32 %v904_v46, 0.0  ;;  %6579 = vmatmul.msk.bf16.gmra.mxu0 %vm547_vm0, %v7835_v41 }
 0x22b   :  { %1329 = vst [vmem:[#allocation2 + $0x1a0] sm:$0xff] %v1185_v1 }
 0x22e   :  { %v905_v48 = vpop.f32.mrf.mxu0 }
 0x22f   :  { %v906_v50 = vadd.f32 %v8206_v10, %v905_v48  ;;  %v7838_v48 = vld [vmem:[%s10712_s0 + $0x128] sm:$0xff] }
 0x231   :  { %v1186_v54 = vmax.f32 %v906_v50, 0.0 }
 0x232   :  { %v1489_v56 = vld [vmem:[#allocation2 + $0x198] ss:$2 sm:$0xff]  ;;  %v1681_v57 = vld [vmem:[#allocation2 + $0x199] ss:$2 sm:$0xff] }
 0x233   :  { %v1838_v60 = vmax.f32 %v1489_v56, %v1681_v57  ;;  %1330 = vst [vmem:[#allocation2 + $0x1a8] sm:$0xff] %v1186_v54 }
 0x235   :  { %v1916_v42 = vmax.f32 %v1836_v58, %v1838_v60 }
 0x236   :  { %v908_v63 = vpop.f32.mrf.mxu0 }
 0x237   :  { %1964 = vst [vmem:[#allocation3 + $0x80] sm:$0xff] %v1916_v42  ;;  %v909_v10 = vadd.f32 %v8515_v5, %v908_v63 }
 0x239   :  { %v1187_v12 = vmax.f32 %v909_v10, 0.0  ;;  %6580 = vmatmul.msk.bf16.gmra.mxu0 %vm547_vm0, %v7836_v40 }
 0x23a   :  { %v1491_v26 = vld [vmem:[#allocation2 + $0x1a8] ss:$2 sm:$0xf]  ;;  %v1683_v30 = vld [vmem:[#allocation2 + $0x1a9] ss:$2 sm:$0xf] }
 0x23b   :  { %v1839_v38 = vmax.f32 %v1491_v26, %v1683_v30  ;;  %1331 = vst [vmem:[#allocation2 + $0x1b0] sm:$0xff] %v1187_v12 }
 0x23d   :  { %v1917_v32 = vmax.f32 %v1837_v31, %v1839_v38 }
 0x23e   :  { %v910_v33 = vpop.f32.mrf.mxu0 }
 0x23f   :  { %v911_v34 = vadd.f32 %v8515_v5, %v910_v33  ;;  %1965 = vst [vmem:[#allocation3 + $0x88] sm:$0xf] %v1917_v32 }
 0x241   :  { %v1188_v36 = vmax.f32 %v911_v34, 0.0 }
 0x243   :  { %1332 = vst [vmem:[#allocation2 + $0x1b8] sm:$0xff] %v1188_v36 }
 0x246   :  { %v913_v37 = vpop.f32.mrf.mxu0 }
 0x247   :  { %v914_v39 = vadd.f32 %v8515_v5, %v913_v37 }
 0x249   :  { %v1189_v41 = vmax.f32 %v914_v39, 0.0  ;;  %6581 = vmatmul.msk.bf16.gmra.mxu0 %vm547_vm0, %v7837_v0 }
 0x24a   :  { %v1493_v57 = vld [vmem:[#allocation2 + $0x1b0] ss:$2 sm:$0xff]  ;;  %v1685_v58 = vld [vmem:[#allocation2 + $0x1b1] ss:$2 sm:$0xff] }
 0x24b   :  { %1333 = vst [vmem:[#allocation2 + $0x1c0] sm:$0xff] %v1189_v41  ;;  %v1840_v63 = vmax.f32 %v1493_v57, %v1685_v58 }
 0x24e   :  { %v915_v43 = vpop.f32.mrf.mxu0 }
 0x24f   :  { %v916_v46 = vadd.f32 %v8515_v5, %v915_v43  ;;  %v7840_v43 = vld [vmem:[%s10712_s0 + $0x138] sm:$0xff] }
 0x251   :  { %v1190_v1 = vmax.f32 %v916_v46, 0.0 }
 0x252   :  { %v1495_v30 = vld [vmem:[#allocation2 + $0x1c0] ss:$2 sm:$0xf]  ;;  %v1687_v31 = vld [vmem:[#allocation2 + $0x1c1] ss:$2 sm:$0xf] }
 0x253   :  { %1334 = vst [vmem:[#allocation2 + $0x1c8] sm:$0xff] %v1190_v1  ;;  %v1841_v34 = vmax.f32 %v1495_v30, %v1687_v31  ;;  %v7842_v31 = vld [vmem:[%s10712_s0 + $0x148] sm:$0xff] }
 0x256   :  { %v918_v50 = vpop.f32.mrf.mxu0 }
 0x257   :  { %v919_v51 = vadd.f32 %v8515_v5, %v918_v50 }
 0x259   :  { %v1191_v53 = vmax.f32 %v919_v51, 0.0  ;;  %6582 = vmatmul.msk.bf16.gmra.mxu0 %vm547_vm0, %v7838_v48 }
 0x25b   :  { %1335 = vst [vmem:[#allocation2 + $0x1d0] sm:$0xff] %v1191_v53 }
 0x25e   :  { %v920_v54 = vpop.f32.mrf.mxu0 }
 0x25f   :  { %v921_v56 = vadd.f32 %v8515_v5, %v920_v54  ;;  %v7841_v54 = vld [vmem:[%s10712_s0 + $0x140] sm:$0xff] }
 0x261   :  { %v1192_v60 = vmax.f32 %v921_v56, 0.0 }
 0x262   :  { %v1497_v42 = vld [vmem:[#allocation2 + $0x1c8] ss:$2 sm:$0xff]  ;;  %v1689_v40 = vld [vmem:[#allocation2 + $0x1c9] ss:$2 sm:$0xff] }
 0x263   :  { %v1842_v10 = vmax.f32 %v1497_v42, %v1689_v40  ;;  %1336 = vst [vmem:[#allocation2 + $0x1d8] sm:$0xff] %v1192_v60 }
 0x265   :  { %v1918_v7 = vmax.f32 %v1840_v63, %v1842_v10 }
 0x266   :  { %v923_v12 = vpop.f32.mrf.mxu0 }
 0x267   :  { %1966 = vst [vmem:[#allocation3 + $0x90] sm:$0xff] %v1918_v7  ;;  %v924_v26 = vadd.f32 %v8515_v5, %v923_v12 }
 0x269   :  { %v1193_v38 = vmax.f32 %v924_v26, 0.0  ;;  %6583 = vmatmul.msk.bf16.gmra.mxu0 %vm547_vm0, %v7839_v9 }
 0x26a   :  { %v1499_v32 = vld [vmem:[#allocation2 + $0x1d8] ss:$2 sm:$0xf]  ;;  %v1691_v33 = vld [vmem:[#allocation2 + $0x1d9] ss:$2 sm:$0xf] }
 0x26b   :  { %v1843_v36 = vmax.f32 %v1499_v32, %v1691_v33  ;;  %1337 = vst [vmem:[#allocation2 + $0x1e0] sm:$0xff] %v1193_v38 }
 0x26d   :  { %v1919_v0 = vmax.f32 %v1841_v34, %v1843_v36 }
 0x26e   :  { %v925_v37 = vpop.f32.mrf.mxu0 }
 0x26f   :  { %v926_v39 = vadd.f32 %v8515_v5, %v925_v37  ;;  %1967 = vst [vmem:[#allocation3 + $0x98] sm:$0xf] %v1919_v0 }
 0x271   :  { %v1194_v41 = vmax.f32 %v926_v39, 0.0 }
 0x273   :  { %1338 = vst [vmem:[#allocation2 + $0x1e8] sm:$0xff] %v1194_v41 }
 0x276   :  { %v928_v46 = vpop.f32.mrf.mxu0 }
 0x277   :  { %v929_v1 = vadd.f32 %v8515_v5, %v928_v46 }
 0x279   :  { %v1195_v48 = vmax.f32 %v929_v1, 0.0  ;;  %6584 = vmatmul.msk.bf16.gmra.mxu0 %vm547_vm0, %v7840_v43 }
 0x27a   :  { %v1501_v40 = vld [vmem:[#allocation2 + $0x1e0] ss:$2 sm:$0xff]  ;;  %v1693_v63 = vld [vmem:[#allocation2 + $0x1e1] ss:$2 sm:$0xff] }
 0x27b   :  { %1339 = vst [vmem:[#allocation2 + $0x1f0] sm:$0xff] %v1195_v48  ;;  %v1844_v12 = vmax.f32 %v1501_v40, %v1693_v63 }
 0x27e   :  { %v930_v50 = vpop.f32.mrf.mxu0 }
 0x27f   :  { %v931_v51 = vadd.f32 %v8515_v5, %v930_v50  ;;  %v7843_v50 = vld [vmem:[%s10712_s0 + $0x150] sm:$0xff] }
 0x281   :  { %v1196_v53 = vmax.f32 %v931_v51, 0.0 }
 0x282   :  { %v1503_v33 = vld [vmem:[#allocation2 + $0x1f0] ss:$2 sm:$0xf]  ;;  %v1695_v34 = vld [vmem:[#allocation2 + $0x1f1] ss:$2 sm:$0xf] }
 0x283   :  { %1340 = vst [vmem:[#allocation2 + $0x1f8] sm:$0xff] %v1196_v53  ;;  %v1845_v39 = vmax.f32 %v1503_v33, %v1695_v34  ;;  %v7845_v34 = vld [vmem:[%s10712_s0 + $0x160] sm:$0xff] }
 0x286   :  { %v933_v56 = vpop.f32.mrf.mxu0 }
 0x287   :  { %v934_v57 = vadd.f32 %v8515_v5, %v933_v56 }
 0x289   :  { %v1197_v58 = vmax.f32 %v934_v57, 0.0  ;;  %6585 = vmatmul.msk.bf16.gmra.mxu0 %vm547_vm0, %v7841_v54 }
 0x28b   :  { %1341 = vst [vmem:[#allocation2 + $0x200] sm:$0xff] %v1197_v58 }
 0x28e   :  { %v935_v60 = vpop.f32.mrf.mxu0 }
 0x28f   :  { %v936_v42 = vadd.f32 %v8515_v5, %v935_v60  ;;  %v7844_v60 = vld [vmem:[%s10712_s0 + $0x158] sm:$0xff] }
 0x291   :  { %v1198_v10 = vmax.f32 %v936_v42, 0.0 }
 0x292   :  { %v1505_v7 = vld [vmem:[#allocation2 + $0x1f8] ss:$2 sm:$0xff]  ;;  %v1697_v9 = vld [vmem:[#allocation2 + $0x1f9] ss:$2 sm:$0xff] }
 0x293   :  { %v1846_v26 = vmax.f32 %v1505_v7, %v1697_v9  ;;  %1342 = vst [vmem:[#allocation2 + $0x208] sm:$0xff] %v1198_v10 }
 0x295   :  { %v1920_v30 = vmax.f32 %v1844_v12, %v1846_v26 }
 0x296   :  { %v938_v38 = vpop.f32.mrf.mxu0 }
 0x297   :  { %1968 = vst [vmem:[#allocation3 + $0xa0] sm:$0xff] %v1920_v30  ;;  %v939_v32 = vadd.f32 %v8515_v5, %v938_v38 }
 0x299   :  { %v1199_v36 = vmax.f32 %v939_v32, 0.0  ;;  %6586 = vmatmul.msk.bf16.gmra.mxu0 %vm547_vm0, %v7842_v31 }
 0x29a   :  { %v1507_v0 = vld [vmem:[#allocation2 + $0x208] ss:$2 sm:$0xf]  ;;  %v1699_v37 = vld [vmem:[#allocation2 + $0x209] ss:$2 sm:$0xf] }
 0x29b   :  { %v1847_v41 = vmax.f32 %v1507_v0, %v1699_v37  ;;  %1343 = vst [vmem:[#allocation2 + $0x210] sm:$0xff] %v1199_v36 }
 0x29d   :  { %v1921_v43 = vmax.f32 %v1845_v39, %v1847_v41 }
 0x29e   :  { %v940_v46 = vpop.f32.mrf.mxu0 }
 0x29f   :  { %v941_v1 = vadd.f32 %v8515_v5, %v940_v46  ;;  %1969 = vst [vmem:[#allocation3 + $0xa8] sm:$0xf] %v1921_v43 }
 0x2a1   :  { %v1200_v48 = vmax.f32 %v941_v1, 0.0 }
 0x2a3   :  { %1344 = vst [vmem:[#allocation2 + $0x218] sm:$0xff] %v1200_v48 }
 0x2a6   :  { %v943_v51 = vpop.f32.mrf.mxu0 }
 0x2a7   :  { %v944_v53 = vadd.f32 %v8515_v5, %v943_v51 }
 0x2a9   :  { %v1201_v54 = vmax.f32 %v944_v53, 0.0  ;;  %6587 = vmatmul.msk.bf16.gmra.mxu0 %vm547_vm0, %v7843_v50 }
 0x2aa   :  { %v1509_v9 = vld [vmem:[#allocation2 + $0x210] ss:$2 sm:$0xff]  ;;  %v1701_v12 = vld [vmem:[#allocation2 + $0x211] ss:$2 sm:$0xff] }
 0x2ab   :  { %1345 = vst [vmem:[#allocation2 + $0x220] sm:$0xff] %v1201_v54  ;;  %v1848_v38 = vmax.f32 %v1509_v9, %v1701_v12 }
 0x2ae   :  { %v945_v56 = vpop.f32.mrf.mxu0 }
 0x2af   :  { %v946_v57 = vadd.f32 %v8515_v5, %v945_v56  ;;  %v7846_v56 = vld [vmem:[%s10712_s0 + $0x168] sm:$0xff] }
 0x2b1   :  { %v1202_v58 = vmax.f32 %v946_v57, 0.0 }
 0x2b2   :  { %v1511_v37 = vld [vmem:[#allocation2 + $0x220] ss:$2 sm:$0xf]  ;;  %v1703_v39 = vld [vmem:[#allocation2 + $0x221] ss:$2 sm:$0xf] }
 0x2b3   :  { %1346 = vst [vmem:[#allocation2 + $0x228] sm:$0xff] %v1202_v58  ;;  %v1849_v1 = vmax.f32 %v1511_v37, %v1703_v39  ;;  %v7848_v37 = vld [vmem:[%s10712_s0 + $0x178] sm:$0xff] }
 0x2b6   :  { %v948_v42 = vpop.f32.mrf.mxu0 }
 0x2b7   :  { %v949_v40 = vadd.f32 %v8515_v5, %v948_v42 }
 0x2b9   :  { %v1203_v63 = vmax.f32 %v949_v40, 0.0  ;;  %6588 = vmatmul.msk.bf16.gmra.mxu0 %vm547_vm0, %v7844_v60 }
 0x2bb   :  { %1347 = vst [vmem:[#allocation2 + $0x230] sm:$0xff] %v1203_v63 }
 0x2be   :  { %v950_v10 = vpop.f32.mrf.mxu0 }
 0x2bf   :  { %v951_v7 = vadd.f32 %v8515_v5, %v950_v10  ;;  %v7847_v10 = vld [vmem:[%s10712_s0 + $0x170] sm:$0xff] }
 0x2c1   :  { %v1204_v26 = vmax.f32 %v951_v7, 0.0 }
 0x2c2   :  { %v1513_v30 = vld [vmem:[#allocation2 + $0x228] ss:$2 sm:$0xff]  ;;  %v1705_v31 = vld [vmem:[#allocation2 + $0x229] ss:$2 sm:$0xff] }
 0x2c3   :  { %v1850_v32 = vmax.f32 %v1513_v30, %v1705_v31  ;;  %1348 = vst [vmem:[#allocation2 + $0x238] sm:$0xff] %v1204_v26 }
 0x2c5   :  { %v1922_v33 = vmax.f32 %v1848_v38, %v1850_v32 }
 0x2c6   :  { %v953_v36 = vpop.f32.mrf.mxu0 }
 0x2c7   :  { %1970 = vst [vmem:[#allocation3 + $0xb0] sm:$0xff] %v1922_v33  ;;  %v954_v0 = vadd.f32 %v8515_v5, %v953_v36 }
 0x2c9   :  { %v1205_v41 = vmax.f32 %v954_v0, 0.0  ;;  %6589 = vmatmul.msk.bf16.gmra.mxu0 %vm547_vm0, %v7845_v34 }
 0x2ca   :  { %v1515_v43 = vld [vmem:[#allocation2 + $0x238] ss:$2 sm:$0xf]  ;;  %v1707_v46 = vld [vmem:[#allocation2 + $0x239] ss:$2 sm:$0xf] }
 0x2cb   :  { %v1851_v48 = vmax.f32 %v1515_v43, %v1707_v46  ;;  %1349 = vst [vmem:[#allocation2 + $0x240] sm:$0xff] %v1205_v41 }
 0x2cd   :  { %v1923_v50 = vmax.f32 %v1849_v1, %v1851_v48 }
 0x2ce   :  { %v955_v51 = vpop.f32.mrf.mxu0 }
 0x2cf   :  { %v956_v53 = vadd.f32 %v8515_v5, %v955_v51  ;;  %1971 = vst [vmem:[#allocation3 + $0xb8] sm:$0xf] %v1923_v50 }
 0x2d1   :  { %v1206_v54 = vmax.f32 %v956_v53, 0.0 }
 0x2d3   :  { %1350 = vst [vmem:[#allocation2 + $0x248] sm:$0xff] %v1206_v54 }
 0x2d6   :  { %v958_v57 = vpop.f32.mrf.mxu0 }
 0x2d7   :  { %v959_v58 = vadd.f32 %v8515_v5, %v958_v57 }
 0x2d9   :  { %v1207_v60 = vmax.f32 %v959_v58, 0.0  ;;  %6590 = vmatmul.msk.bf16.gmra.mxu0 %vm547_vm0, %v7846_v56 }
 0x2da   :  { %v1517_v31 = vld [vmem:[#allocation2 + $0x240] ss:$2 sm:$0xff]  ;;  %v1709_v38 = vld [vmem:[#allocation2 + $0x241] ss:$2 sm:$0xff] }
 0x2db   :  { %1351 = vst [vmem:[#allocation2 + $0x250] sm:$0xff] %v1207_v60  ;;  %v1852_v36 = vmax.f32 %v1517_v31, %v1709_v38 }
 0x2de   :  { %v960_v42 = vpop.f32.mrf.mxu0 }
 0x2df   :  { %v961_v40 = vadd.f32 %v8515_v5, %v960_v42  ;;  %v7849_v42 = vld [vmem:[%s10712_s0 + $0x180] sm:$0xff] }
 0x2e1   :  { %v1208_v63 = vmax.f32 %v961_v40, 0.0 }
 0x2e2   :  { %v1519_v46 = vld [vmem:[#allocation2 + $0x250] ss:$2 sm:$0xf]  ;;  %v1711_v1 = vld [vmem:[#allocation2 + $0x251] ss:$2 sm:$0xf] }
 0x2e3   :  { %1352 = vst [vmem:[#allocation2 + $0x258] sm:$0xff] %v1208_v63  ;;  %v1853_v53 = vmax.f32 %v1519_v46, %v1711_v1  ;;  %v7851_v1 = vld [vmem:[%s10712_s0 + $0x190] sm:$0xff] }
 0x2e6   :  { %v963_v7 = vpop.f32.mrf.mxu0 }
 0x2e7   :  { %v964_v9 = vadd.f32 %v8515_v5, %v963_v7 }
 0x2e9   :  { %v1209_v12 = vmax.f32 %v964_v9, 0.0  ;;  %6591 = vmatmul.msk.bf16.gmra.mxu0 %vm547_vm0, %v7847_v10 }
 0x2eb   :  { %1353 = vst [vmem:[#allocation2 + $0x260] sm:$0xff] %v1209_v12 }
 0x2ee   :  { %v965_v26 = vpop.f32.mrf.mxu0 }
 0x2ef   :  { %v966_v30 = vadd.f32 %v8515_v5, %v965_v26  ;;  %v7850_v26 = vld [vmem:[%s10712_s0 + $0x188] sm:$0xff] }
 0x2f1   :  { %v1210_v32 = vmax.f32 %v966_v30, 0.0 }
 0x2f2   :  { %v1521_v33 = vld [vmem:[#allocation2 + $0x258] ss:$2 sm:$0xff]  ;;  %v1713_v34 = vld [vmem:[#allocation2 + $0x259] ss:$2 sm:$0xff] }
 0x2f3   :  { %v1854_v0 = vmax.f32 %v1521_v33, %v1713_v34  ;;  %1354 = vst [vmem:[#allocation2 + $0x268] sm:$0xff] %v1210_v32 }
 0x2f5   :  { %v1924_v39 = vmax.f32 %v1852_v36, %v1854_v0 }
 0x2f6   :  { %v968_v41 = vpop.f32.mrf.mxu0 }
 0x2f7   :  { %v969_v43 = vadd.f32 %v8515_v5, %v968_v41  ;;  %1972 = vst [vmem:[#allocation3 + $0xc0] sm:$0xff] %v1924_v39 }
 0x2f9   :  { %v1211_v48 = vmax.f32 %v969_v43, 0.0  ;;  %6592 = vmatmul.msk.bf16.gmra.mxu0 %vm547_vm0, %v7848_v37 }
 0x2fa   :  { %v1523_v50 = vld [vmem:[#allocation2 + $0x268] ss:$2 sm:$0xf]  ;;  %v1715_v51 = vld [vmem:[#allocation2 + $0x269] ss:$2 sm:$0xf] }
 0x2fb   :  { %v1855_v54 = vmax.f32 %v1523_v50, %v1715_v51  ;;  %1355 = vst [vmem:[#allocation2 + $0x270] sm:$0xff] %v1211_v48 }
 0x2fd   :  { %v1925_v56 = vmax.f32 %v1853_v53, %v1855_v54 }
 0x2fe   :  { %v970_v57 = vpop.f32.mrf.mxu0 }
 0x2ff   :  { %v971_v58 = vadd.f32 %v8515_v5, %v970_v57  ;;  %1973 = vst [vmem:[#allocation3 + $0xc8] sm:$0xf] %v1925_v56 }
 0x301   :  { %v1212_v60 = vmax.f32 %v971_v58, 0.0 }
 0x303   :  { %1356 = vst [vmem:[#allocation2 + $0x278] sm:$0xff] %v1212_v60 }
 0x306   :  { %v973_v40 = vpop.f32.mrf.mxu0 }
 0x307   :  { %v974_v63 = vadd.f32 %v8515_v5, %v973_v40 }
 0x309   :  { %v1213_v10 = vmax.f32 %v974_v63, 0.0  ;;  %6593 = vmatmul.msk.bf16.gmra.mxu0 %vm547_vm0, %v7849_v42 }
 0x30a   :  { %v1525_v34 = vld [vmem:[#allocation2 + $0x270] ss:$2 sm:$0xff]  ;;  %v1717_v36 = vld [vmem:[#allocation2 + $0x271] ss:$2 sm:$0xff] }
 0x30b   :  { %1357 = vst [vmem:[#allocation2 + $0x280] sm:$0xff] %v1213_v10  ;;  %v1856_v43 = vmax.f32 %v1525_v34, %v1717_v36 }
 0x30e   :  { %v975_v7 = vpop.f32.mrf.mxu0 }
 0x30f   :  { %v976_v9 = vadd.f32 %v8515_v5, %v975_v7 }
 0x311   :  { %v1214_v12 = vmax.f32 %v976_v9, 0.0 }
 0x312   :  { %v1527_v54 = vld [vmem:[#allocation2 + $0x280] ss:$2 sm:$0xf]  ;;  %v1719_v56 = vld [vmem:[#allocation2 + $0x281] ss:$2 sm:$0xf] }
 0x313   :  { %1358 = vst [vmem:[#allocation2 + $0x288] sm:$0xff] %v1214_v12  ;;  %v1857_v42 = vmax.f32 %v1527_v54, %v1719_v56 }
 0x316   :  { %v978_v30 = vpop.f32.mrf.mxu0 }
 0x317   :  { %v979_v31 = vadd.f32 %v8515_v5, %v978_v30 }
 0x319   :  { %v1215_v38 = vmax.f32 %v979_v31, 0.0  ;;  %6594 = vmatmul.msk.bf16.gmra.mxu0 %vm547_vm0, %v7850_v26  ;;  %v2154_v26 = vld [vmem:[#allocation3 + $0xc3] sm:$0xff] }
 0x31b   :  { %1359 = vst [vmem:[#allocation2 + $0x290] sm:$0xff] %v1215_v38 }
 0x31e   :  { %v980_v32 = vpop.f32.mrf.mxu0 }
 0x31f   :  { %v981_v33 = vadd.f32 %v8515_v5, %v980_v32 }
 0x321   :  { %v1216_v0 = vmax.f32 %v981_v33, 0.0 }
 0x322   :  { %v1529_v37 = vld [vmem:[#allocation2 + $0x288] ss:$2 sm:$0xff]  ;;  %v1721_v41 = vld [vmem:[#allocation2 + $0x289] ss:$2 sm:$0xff] }
 0x323   :  { %v1858_v46 = vmax.f32 %v1529_v37, %v1721_v41  ;;  %1360 = vst [vmem:[#allocation2 + $0x298] sm:$0xff] %v1216_v0  ;;  %v7853_v0 = vld [vmem:[%s10712_s0 + $0x1a0] sm:$0xff] }
 0x325   :  { %v8607_v48 = vmax.f32 %v1856_v43, %v1858_v46 }
 0x326   :  { %v983_v50 = vpop.f32.mrf.mxu0 }
 0x327   :  { %10821 = vst [vmem:[#allocation20_spill] sm:$0xff] %v8607_v48  ;;  %v984_v51 = vadd.f32 %v8515_v5, %v983_v50  ;;  %v2264_v53 = vpack.c.bf16 %v8607_v48, %v1924_v39  ;;  %v7852_v39 = vld [vmem:[%s10712_s0 + $0x198] sm:$0xff] }
 0x328   :  { %1974 = vst [vmem:[#allocation3 + $0xd0] sm:$0xff] %v8607_v48 }
 0x329   :  { %v1217_v57 = vmax.f32 %v984_v51, 0.0  ;;  %6595 = vmatmul.msk.bf16.gmra.mxu0 %vm547_vm0, %v7851_v1  ;;  %2360 = vmatmul.bf16.gmra.mxu2 %v2264_v53 }
 0x32a   :  { %v1531_v58 = vld [vmem:[#allocation2 + $0x298] ss:$2 sm:$0xf]  ;;  %v1723_v60 = vld [vmem:[#allocation2 + $0x299] ss:$2 sm:$0xf] }
 0x32b   :  { %v1859_v40 = vmax.f32 %v1531_v58, %v1723_v60  ;;  %1361 = vst [vmem:[#allocation2 + $0x2a0] sm:$0xff] %v1217_v57  ;;  %v7854_v60 = vld [vmem:[%s10712_s0 + $0x1a8] sm:$0xff] }
 0x32d   :  { %v1927_v63 = vmax.f32 %v1857_v42, %v1859_v40 }
 0x32e   :  { %v985_v10 = vpop.f32.mrf.mxu0 }
 0x32f   :  { %v986_v7 = vadd.f32 %v8515_v5, %v985_v10  ;;  %1975 = vst [vmem:[#allocation3 + $0xd8] sm:$0xf] %v1927_v63 }
 0x331   :  { %v1218_v9 = vmax.f32 %v986_v7, 0.0  ;;  %v8763_v7 = vld [vmem:[#allocation3 + $0x71] sm:$0xff] }
 0x333   :  { %1362 = vst [vmem:[#allocation2 + $0x2a8] sm:$0xff] %v1218_v9 }
 0x336   :  { %v988_v12 = vpop.f32.mrf.mxu0  ;;  %v8617_v30 = vld [vmem:[#allocation3 + $0xd3] sm:$0xff] }
 0x337   :  { %10822 = vst [vmem:[#allocation21_spill] sm:$0xff] %v8617_v30  ;;  %v989_v31 = vadd.f32 %v8515_v5, %v988_v12  ;;  %v2725_v38 = vpack.c.bf16 %v8617_v30, %v2154_v26 }
 0x339   :  { %v1219_v32 = vmax.f32 %v989_v31, 0.0  ;;  %6596 = vmatmul.msk.bf16.gmra.mxu0 %vm547_vm0, %v7852_v39  ;;  %2822 = vmatmul.bf16.gmra.mxu1 %v2725_v38  ;;  %v7890_v39 = vld [vmem:[%s10713_s3 + $0x78] sm:$0xff] }
 0x33a   :  { %v1533_v50 = vld [vmem:[#allocation2 + $0x2a0] ss:$2 sm:$0xff]  ;;  %v1725_v51 = vld [vmem:[#allocation2 + $0x2a1] ss:$2 sm:$0xff]  ;;  %2486 = vmatpush.bf16.msrb.mxu2 %v7890_v39 }
 0x33b   :  { %1363 = vst [vmem:[#allocation2 + $0x2b0] sm:$0xff] %v1219_v32  ;;  %v1860_v57 = vmax.f32 %v1533_v50, %v1725_v51  ;;  %v8657_v50 = vld [vmem:[#allocation3 + $0xd2] sm:$0xff] }
 0x33c   :  { %10824 = vst [vmem:[#allocation23_spill] sm:$0xff] %v8657_v50 }
 0x33e   :  { %v990_v33 = vpop.f32.mrf.mxu0 }
 0x33f   :  { %v991_v34 = vadd.f32 %v8515_v5, %v990_v33  ;;  %v7889_v33 = vld [vmem:[%s10713_s3 + $0x70] sm:$0xff] }
 0x340   :  { %2487 = vmatpush.bf16.msrb.mxu2 %v7889_v33 }
 0x341   :  { %v1220_v36 = vmax.f32 %v991_v34, 0.0 }
 0x342   :  { %v1535_v63 = vld [vmem:[#allocation2 + $0x2b0] ss:$2 sm:$0xf]  ;;  %v1727_v9 = vld [vmem:[#allocation2 + $0x2b1] ss:$2 sm:$0xf] }
 0x343   :  { %1364 = vst [vmem:[#allocation2 + $0x2b8] sm:$0xff] %v1220_v36  ;;  %v1861_v38 = vmax.f32 %v1535_v63, %v1727_v9  ;;  %v7886_v9 = vld [vmem:[%s10713_s3 + $0x58] sm:$0xff] }
 0x346   :  { %v993_v37 = vpop.f32.mrf.mxu0 }
 0x347   :  { %v994_v41 = vadd.f32 %v8515_v5, %v993_v37  ;;  %v7888_v37 = vld [vmem:[%s10713_s3 + $0x68] sm:$0xff] }
 0x348   :  { %2488 = vmatpush.bf16.msrb.mxu2 %v7888_v37 }
 0x349   :  { %v1221_v43 = vmax.f32 %v994_v41, 0.0  ;;  %6597 = vmatmul.msk.bf16.gmra.mxu0 %vm547_vm0, %v7853_v0 }
 0x34b   :  { %1365 = vst [vmem:[#allocation2 + $0x2c0] sm:$0xff] %v1221_v43  ;;  %v7887_v43 = vld [vmem:[%s10713_s3 + $0x60] sm:$0xff] }
 0x34c   :  { %2489 = vmatpush.bf16.msrb.mxu2 %v7887_v43 }
 0x34e   :  { %v995_v46 = vpop.f32.mrf.mxu0 }
 0x34f   :  { %v996_v1 = vadd.f32 %v8515_v5, %v995_v46  ;;  %v7855_v46 = vld [vmem:[%s10712_s0 + $0x1b0] sm:$0xff] }
 0x350   :  { %2490 = vmatpush.bf16.msrb.mxu2 %v7886_v9 }
 0x351   :  { %v1222_v53 = vmax.f32 %v996_v1, 0.0  ;;  %v8655_v1 = vld [vmem:[#allocation3 + $0xd1] sm:$0xff] }
 0x352   :  { %v1537_v54 = vld [vmem:[#allocation2 + $0x2b8] ss:$2 sm:$0xff]  ;;  %v1729_v56 = vld [vmem:[#allocation2 + $0x2b9] ss:$2 sm:$0xff] }
 0x353   :  { %v1862_v58 = vmax.f32 %v1537_v54, %v1729_v56  ;;  %1366 = vst [vmem:[#allocation2 + $0x2c8] sm:$0xff] %v1222_v53 }
 0x355   :  { %v8632_v42 = vmax.f32 %v1860_v57, %v1862_v58 }
 0x356   :  { %v998_v40 = vpop.f32.mrf.mxu0 }
 0x357   :  { %10823 = vst [vmem:[#allocation22_spill] sm:$0xff] %v8632_v42  ;;  %v999_v10 = vadd.f32 %v8515_v5, %v998_v40  ;;  %v8670_v40 = vld [vmem:[#allocation3 + $0xd4] sm:$0xff] }
 0x358   :  { %1976 = vst [vmem:[#allocation3 + $0xe0] sm:$0xff] %v8632_v42 }
 0x359   :  { %v1223_v12 = vmax.f32 %v999_v10, 0.0  ;;  %6598 = vmatmul.msk.bf16.gmra.mxu0 %vm547_vm0, %v7854_v60  ;;  %10827 = vst [vmem:[#allocation26_spill] sm:$0xff] %v8670_v40 }
 0x35a   :  { %v1539_v26 = vld [vmem:[#allocation2 + $0x2c8] ss:$2 sm:$0xf]  ;;  %v1731_v31 = vld [vmem:[#allocation2 + $0x2c9] ss:$2 sm:$0xf] }
 0x35b   :  { %v1863_v32 = vmax.f32 %v1539_v26, %v1731_v31  ;;  %1367 = vst [vmem:[#allocation2 + $0x2d0] sm:$0xff] %v1223_v12  ;;  %v7885_v26 = vld [vmem:[%s10713_s3 + $0x50] sm:$0xff] }
 0x35c   :  { %2491 = vmatpush.bf16.msrb.mxu2 %v7885_v26 }
 0x35d   :  { %v1929_v34 = vmax.f32 %v1861_v38, %v1863_v32  ;;  %v7884_v32 = vld [vmem:[%s10713_s3 + $0x48] sm:$0xff] }
 0x35e   :  { %v1000_v36 = vpop.f32.mrf.mxu0 }
 0x35f   :  { %v1001_v0 = vadd.f32 %v8515_v5, %v1000_v36  ;;  %1977 = vst [vmem:[#allocation3 + $0xe8] sm:$0xf] %v1929_v34  ;;  %v7883_v34 = vld [vmem:[%s10713_s3 + $0x40] sm:$0xff]  ;;  %v7856_v36 = vld [vmem:[%s10712_s0 + $0x1b8] sm:$0xff] }
 0x360   :  { %2492 = vmatpush.bf16.msrb.mxu2 %v7884_v32  ;;  %v7857_v32 = vld [vmem:[%s10712_s0 + $0x1c0] sm:$0xff] }
 0x361   :  { %v1224_v41 = vmax.f32 %v1001_v0, 0.0 }
 0x363   :  { %1368 = vst [vmem:[#allocation2 + $0x2d8] sm:$0xff] %v1224_v41 }
 0x364   :  { %2493 = vmatpush.bf16.msrb.mxu2 %v7883_v34 }
 0x366   :  { %v1003_v51 = vpop.f32.mrf.mxu0  ;;  %v8659_v53 = vld [vmem:[#allocation3 + $0xe3] sm:$0xff] }
 0x367   :  { %10825 = vst [vmem:[#allocation24_spill] sm:$0xff] %v8659_v53  ;;  %v8661_v54 = vld [vmem:[#allocation3 + $0xe1] sm:$0xff]  ;;  %v1004_v57 = vadd.f32 %v8515_v5, %v1003_v51 }
 0x368   :  { %v8663_v56 = vld [vmem:[#allocation3 + $0xe2] sm:$0xff] }
 0x369   :  { %10826 = vst [vmem:[#allocation25_spill] sm:$0xff] %v8663_v56  ;;  %v8674_v10 = vld [vmem:[#allocation3 + $0xe4] sm:$0xff]  ;;  %v1225_v12 = vmax.f32 %v1004_v57, 0.0  ;;  %6599 = vmatmul.msk.bf16.gmra.mxu0 %vm547_vm0, %v7855_v46 }
 0x36a   :  { %10828 = vst [vmem:[#allocation27_spill] sm:$0xff] %v8674_v10  ;;  %v1541_v51 = vld [vmem:[#allocation2 + $0x2d0] ss:$2 sm:$0xff]  ;;  %v1733_v57 = vld [vmem:[#allocation2 + $0x2d1] ss:$2 sm:$0xff]  ;;  %v7912_v10 = vld [vmem:[%s10713_s3 + $0x128] sm:$0xff] }
 0x36b   :  { %1369 = vst [vmem:[#allocation2 + $0x2e0] sm:$0xff] %v1225_v12 }
 0x36e   :  { %v1005_v31 = vpop.f32.mrf.mxu0 }
 0x36f   :  { %v1006_v38 = vadd.f32 %v8515_v5, %v1005_v31  ;;  %v1864_v31 = vmax.f32 %v1541_v51, %v1733_v57 }
 0x371   :  { %v1226_v33 = vmax.f32 %v1006_v38, 0.0 }
 0x373   :  { %1370 = vst [vmem:[#allocation2 + $0x2e8] sm:$0xff] %v1226_v33 }
 0x376   :  { %v1008_v0 = vpop.f32.mrf.mxu0 }
 0x377   :  { %v1009_v37 = vadd.f32 %v8515_v5, %v1008_v0 }
 0x379   :  { %v1227_v41 = vmax.f32 %v1009_v37, 0.0  ;;  %6600 = vmatmul.msk.bf16.gmra.mxu0 %vm547_vm0, %v7856_v36  ;;  %v1543_v37 = vld [vmem:[#allocation2 + $0x2e0] ss:$2 sm:$0xf] }
 0x37b   :  { %1371 = vst [vmem:[#allocation2 + $0x2f0] sm:$0xff] %v1227_v41  ;;  %v1735_v41 = vld [vmem:[#allocation2 + $0x2e1] ss:$2 sm:$0xf] }
 0x37c   :  { %v1865_v57 = vmax.f32 %v1543_v37, %v1735_v41  ;;  %v2044_v41 = vld [vmem:[#allocation3 + $0x1] sm:$0xff] }
 0x37e   :  { %v1010_v43 = vpop.f32.mrf.mxu0 }
 0x37f   :  { %v1011_v46 = vadd.f32 %v8515_v5, %v1010_v43 }
 0x381   :  { %v1228_v9 = vmax.f32 %v1011_v46, 0.0 }
 0x382   :  { %v1545_v12 = vld [vmem:[#allocation2 + $0x2e8] ss:$2 sm:$0xff]  ;;  %v1737_v26 = vld [vmem:[#allocation2 + $0x2e9] ss:$2 sm:$0xff] }
 0x383   :  { %v1866_v38 = vmax.f32 %v1545_v12, %v1737_v26  ;;  %1372 = vst [vmem:[#allocation2 + $0x2f8] sm:$0xff] %v1228_v9 }
 0x385   :  { %v8701_v33 = vmax.f32 %v1864_v31, %v1866_v38 }
 0x386   :  { %v1013_v34 = vpop.f32.mrf.mxu0 }
 0x387   :  { %v1014_v36 = vadd.f32 %v8515_v5, %v1013_v34  ;;  %1978 = vst [vmem:[#allocation3 + $0xf0] sm:$0xff] %v8701_v33  ;;  %v8707_v0 = vpack.c.bf16 %v8701_v33, %v8632_v42  ;;  %v7858_v34 = vld [vmem:[%s10712_s0 + $0x1c8] sm:$0xff] }
 0x389   :  { %10829 = vst [vmem:[#allocation28_spill] sm:$0xff] %v8707_v0  ;;  %v1229_v43 = vmax.f32 %v1014_v36, 0.0  ;;  %6601 = vmatmul.msk.bf16.gmra.mxu0 %vm547_vm0, %v7857_v32  ;;  %2365 = vmatmul.bf16.gmra.mxu2 %v8707_v0 }
 0x38a   :  { %v1547_v46 = vld [vmem:[#allocation2 + $0x2f8] ss:$2 sm:$0xf]  ;;  %v1739_v51 = vld [vmem:[#allocation2 + $0x2f9] ss:$2 sm:$0xf] }
 0x38b   :  { %v1867_v9 = vmax.f32 %v1547_v46, %v1739_v51  ;;  %1373 = vst [vmem:[#allocation2 + $0x300] sm:$0xff] %v1229_v43  ;;  %v8096_v43 = vld [vmem:[#allocation3 + $0x11] sm:$0xff]  ;;  %v7870_v51 = vld [vmem:[%s10712_s0 + $0x228] sm:$0xff] }
 0x38c   :  { %v2413_v46 = vpack.c.bf16 %v8096_v43, %v2044_v41  ;;  %6614 = vmatmul.msk.bf16.vlgmr.msra.gmra.mxu3 %vm547_vm0, %v7870_v51  ;;  %v7871_v43 = vld [vmem:[%s10712_s0 + $0x230] sm:$0xff] }
 0x38d   :  { %v1931_v12 = vmax.f32 %v1865_v57, %v1867_v9 }
 0x38e   :  { %v1015_v26 = vpop.f32.mrf.mxu0 }
 0x38f   :  { %v1016_v31 = vadd.f32 %v8515_v5, %v1015_v26  ;;  %1979 = vst [vmem:[#allocation3 + $0xf8] sm:$0xf] %v1931_v12 }
 0x391   :  { %v1230_v38 = vmax.f32 %v1016_v31, 0.0  ;;  %v7859_v31 = vld [vmem:[%s10712_s0 + $0x1d0] sm:$0xff] }
 0x393   :  { %1374 = vst [vmem:[#allocation2 + $0x308] sm:$0xff] %v1230_v38 }
 0x396   :  { %v1018_v36 = vpop.f32.mrf.mxu0  ;;  %v8715_v32 = vld [vmem:[#allocation3 + $0xf3] sm:$0xff] }
 0x397   :  { %v1019_v58 = vadd.f32 %v8515_v5, %v1018_v36  ;;  %v8720_v37 = vpack.c.bf16 %v8715_v32, %v8659_v53  ;;  %v8097_v36 = vld [vmem:[#allocation3 + $0x21] sm:$0xff]  ;;  %v8768_v27 = vld [vmem:[#allocation3 + $0xf2] sm:$0xff] }
 0x399   :  { %10830 = vst [vmem:[#allocation29_spill] sm:$0xff] %v8720_v37  ;;  %v1231_v57 = vmax.f32 %v1019_v58, 0.0  ;;  %6602 = vmatmul.msk.bf16.gmra.mxu0 %vm547_vm0, %v7858_v34  ;;  %2827 = vmatmul.bf16.gmra.mxu1 %v8720_v37  ;;  %v8098_v34 = vld [vmem:[#allocation3 + $0x31] sm:$0xff] }
 0x39a   :  { %2494 = vmatmul.bf16.vlgmr.msrb.gmra.mxu2 %v2413_v46  ;;  %v8733_v41 = vpack.c.bf16 %v8098_v34, %v8097_v36 }
 0x39b   :  { %1375 = vst [vmem:[#allocation2 + $0x310] sm:$0xff] %v1231_v57 }
 0x39c   :  { %10831 = vst [vmem:[#allocation30_spill] sm:$0xff] %v8733_v41  ;;  %6615 = vmatmul.msk.bf16.gmra.mxu3 %vm547_vm0, %v7871_v43 }
 0x39e   :  { %v1020_v9 = vpop.f32.mrf.mxu0 }
 0x39f   :  { %v1021_v12 = vadd.f32 %v8515_v5, %v1020_v9  ;;  %v1549_v9 = vld [vmem:[#allocation2 + $0x300] ss:$2 sm:$0xff] }
 0x3a1   :  { %v1232_v26 = vmax.f32 %v1021_v12, 0.0  ;;  %v1741_v12 = vld [vmem:[#allocation2 + $0x301] ss:$2 sm:$0xff] }
 0x3a2   :  { %v1868_v34 = vmax.f32 %v1549_v9, %v1741_v12  ;;  %v1551_v43 = vld [vmem:[#allocation2 + $0x310] ss:$2 sm:$0xf]  ;;  %v8099_v9 = vld [vmem:[#allocation3 + $0x41] sm:$0xff] }
 0x3a3   :  { %1376 = vst [vmem:[#allocation2 + $0x318] sm:$0xff] %v1232_v26  ;;  %v8754_v12 = vpack.c.bf16 %v8464_v61, %v8099_v9 }
 0x3a5   :  { %10833 = vst [vmem:[#allocation32_spill] sm:$0xff] %v8754_v12 }
 0x3a6   :  { %v1023_v38 = vpop.f32.mrf.mxu0 }
 0x3a7   :  { %v1024_v58 = vadd.f32 %v8515_v5, %v1023_v38 }
 0x3a9   :  { %v1233_v46 = vmax.f32 %v1024_v58, 0.0  ;;  %6603 = vmatmul.msk.bf16.gmra.mxu0 %vm547_vm0, %v7859_v31  ;;  %v7860_v31 = vld [vmem:[%s10712_s0 + $0x1d8] sm:$0xff] }
 0x3aa   :  { %2499 = vmatmul.bf16.gmra.mxu2 %v8733_v41 }
 0x3ab   :  { %1377 = vst [vmem:[#allocation2 + $0x320] sm:$0xff] %v1233_v46 }
 0x3ae   :  { %v1025_v51 = vpop.f32.mrf.mxu0 }
 0x3af   :  { %v1026_v57 = vadd.f32 %v8515_v5, %v1025_v51 }
 0x3b1   :  { %v1234_v26 = vmax.f32 %v1026_v57, 0.0  ;;  %v1743_v57 = vld [vmem:[#allocation2 + $0x311] ss:$2 sm:$0xf] }
 0x3b2   :  { %v1553_v38 = vld [vmem:[#allocation2 + $0x318] ss:$2 sm:$0xff]  ;;  %v1745_v36 = vld [vmem:[#allocation2 + $0x319] ss:$2 sm:$0xff] }
 0x3b3   :  { %v1870_v21 = vmax.f32 %v1553_v38, %v1745_v36  ;;  %1378 = vst [vmem:[#allocation2 + $0x328] sm:$0xff] %v1234_v26 }
 0x3b5   :  { %v8742_v39 = vmax.f32 %v1868_v34, %v1870_v21  ;;  %v7872_v21 = vld [vmem:[%s10712_s0 + $0x238] sm:$0xff] }
 0x3b6   :  { %v1028_v58 = vpop.f32.mrf.mxu0  ;;  %6616 = vmatmul.msk.bf16.gmra.mxu3 %vm547_vm0, %v7872_v21 }
 0x3b7   :  { %1980 = vst [vmem:[#allocation3 + $0x100] sm:$0xff] %v8742_v39  ;;  %v1029_v46 = vadd.f32 %v8515_v5, %v1028_v58  ;;  %v8751_v51 = vpack.c.bf16 %v8742_v39, %v8701_v33  ;;  %v1869_v33 = vmax.f32 %v1551_v43, %v1743_v57 }
 0x3b9   :  { %10832 = vst [vmem:[#allocation31_spill] sm:$0xff] %v8751_v51  ;;  %v1235_v26 = vmax.f32 %v1029_v46, 0.0  ;;  %6604 = vmatmul.msk.bf16.gmra.mxu0 %vm547_vm0, %v7860_v31  ;;  %v7861_v31 = vld [vmem:[%s10712_s0 + $0x1e0] sm:$0xff]  ;;  %v2059_v46 = vld [vmem:[#allocation3 + $0xf1] sm:$0xff] }
 0x3ba   :  { %v1555_v38 = vld [vmem:[#allocation2 + $0x328] ss:$2 sm:$0xf]  ;;  %v1747_v36 = vld [vmem:[#allocation2 + $0x329] ss:$2 sm:$0xf]  ;;  %2504 = vmatmul.bf16.gmra.mxu2 %v8754_v12 }
 0x3bb   :  { %v1871_v34 = vmax.f32 %v1555_v38, %v1747_v36  ;;  %1379 = vst [vmem:[#allocation2 + $0x330] sm:$0xff] %v1235_v26 }
 0x3bd   :  { %v1933_v58 = vmax.f32 %v1869_v33, %v1871_v34  ;;  %v8784_v33 = vld [vmem:[#allocation3 + $0xf4] sm:$0xff] }
 0x3be   :  { %v1030_v63 = vpop.f32.mrf.mxu0 }
 0x3bf   :  { %v1031_v61 = vadd.f32 %v8515_v5, %v1030_v63  ;;  %1981 = vst [vmem:[#allocation3 + $0x108] sm:$0xf] %v1933_v58 }
 0x3c1   :  { %v1236_v9 = vmax.f32 %v1031_v61, 0.0  ;;  %v8100_v61 = vld [vmem:[#allocation3 + $0x61] sm:$0xff] }
 0x3c3   :  { %1380 = vst [vmem:[#allocation2 + $0x338] sm:$0xff] %v1236_v9  ;;  %v8793_v9 = vpack.c.bf16 %v8763_v7, %v8100_v61  ;;  %v8805_v61 = vpop.f32.mrf.mxu2 }
 0x3c5   :  { %10837 = vst [vmem:[#allocation36_spill] sm:$0xff] %v8793_v9 }
 0x3c6   :  { %v1033_v21 = vpop.f32.mrf.mxu0  ;;  %v8770_v43 = vld [vmem:[#allocation3 + $0x101] sm:$0xff] }
 0x3c7   :  { %v8772_v57 = vld [vmem:[#allocation3 + $0x103] sm:$0xff]  ;;  %v1034_v63 = vadd.f32 %v8515_v5, %v1033_v21  ;;  %v8778_v38 = vpack.c.bf16 %v8770_v43, %v2059_v46 }
 0x3c8   :  { %v8774_v26 = vld [vmem:[#allocation3 + $0x102] sm:$0xff]  ;;  %v8790_v58 = vpack.c.bf16 %v8772_v57, %v8715_v32 }
 0x3c9   :  { %10834 = vst [vmem:[#allocation33_spill] sm:$0xff] %v8778_v38  ;;  %v8782_v36 = vpack.c.bf16 %v8774_v26, %v8768_v27  ;;  %v8786_v34 = vld [vmem:[#allocation3 + $0x104] sm:$0xff]  ;;  %v1237_v24 = vmax.f32 %v1034_v63, 0.0  ;;  %6605 = vmatmul.msk.bf16.gmra.mxu0 %vm547_vm0, %v7861_v31 }
 0x3ca   :  { %10836 = vst [vmem:[#allocation35_spill] sm:$0xff] %v8790_v58  ;;  %v8797_v21 = vpack.c.bf16 %v8786_v34, %v8784_v33  ;;  %2509 = vmatmul.bf16.gmra.mxu2 %v8793_v9  ;;  %v7862_v32 = vld [vmem:[%s10712_s0 + $0x1e8] sm:$0xff]  ;;  %v1749_v9 = vld [vmem:[#allocation2 + $0x331] ss:$2 sm:$0xff] }
 0x3cb   :  { %10835 = vst [vmem:[#allocation34_spill] sm:$0xff] %v8782_v36  ;;  %v2056_v63 = vld [vmem:[#allocation3 + $0xc1] sm:$0xff] }
 0x3cc   :  { %10838 = vst [vmem:[#allocation37_spill] sm:$0xff] %v8797_v21  ;;  %v2417_v31 = vpack.c.bf16 %v8655_v1, %v2056_v63  ;;  %v7893_v21 = vld [vmem:[%s10713_s3 + $0x90] sm:$0xff] }
 0x3cd   :  { %1381 = vst [vmem:[#allocation2 + $0x340] sm:$0xff] %v1237_v24  ;;  %v8811_v24 = vpop.f32.mrf.mxu2 }
 0x3ce   :  { %v1035_v59 = vpop.f32.mrf.mxu0 }
 0x3cf   :  { %v1036_v60 = vadd.f32 %v8515_v5, %v1035_v59 }
 0x3d1   :  { %v1238_v22 = vmax.f32 %v1036_v60, 0.0  ;;  %v1557_v60 = vld [vmem:[#allocation2 + $0x330] ss:$2 sm:$0xff] }
 0x3d2   :  { %v1872_v58 = vmax.f32 %v1557_v60, %v1749_v9 }
 0x3d3   :  { %1382 = vst [vmem:[#allocation2 + $0x348] sm:$0xff] %v1238_v22 }
 0x3d4   :  { %v1559_v9 = vld [vmem:[#allocation2 + $0x340] ss:$2 sm:$0xf] }
 0x3d6   :  { %v1038_v37 = vpop.f32.mrf.mxu0 }
 0x3d7   :  { %v1039_v35 = vadd.f32 %v8515_v5, %v1038_v37 }
 0x3d9   :  { %v1239_v3 = vmax.f32 %v1039_v35, 0.0  ;;  %6606 = vmatmul.msk.bf16.gmra.mxu0 %vm547_vm0, %v7862_v32  ;;  %v7863_v35 = vld [vmem:[%s10712_s0 + $0x1f0] sm:$0xff] }
 0x3da   :  { %2514 = vmatmul.bf16.gmra.mxu2 %v2417_v31  ;;  %v8824_v31 = vpop.f32.mrf.mxu2 }
 0x3db   :  { %1383 = vst [vmem:[#allocation2 + $0x350] sm:$0xff] %v1239_v3 }
 0x3de   :  { %v1040_v59 = vpop.f32.mrf.mxu0 }
 0x3df   :  { %v1041_v22 = vadd.f32 %v8515_v5, %v1040_v59 }
 0x3e1   :  { %v1240_v12 = vmax.f32 %v1041_v22, 0.0 }
 0x3e2   :  { %v1561_v29 = vld [vmem:[#allocation2 + $0x348] ss:$2 sm:$0xff]  ;;  %v1753_v41 = vld [vmem:[#allocation2 + $0x349] ss:$2 sm:$0xff] }
 0x3e3   :  { %v1874_v37 = vmax.f32 %v1561_v29, %v1753_v41  ;;  %1384 = vst [vmem:[#allocation2 + $0x358] sm:$0xff] %v1240_v12  ;;  %v1751_v29 = vld [vmem:[#allocation2 + $0x341] ss:$2 sm:$0xf]  ;;  %v8827_v41 = vpack.c.bf16 %v2059_v46, %v8661_v54  ;;  %v8833_v46 = vpop.f32.mrf.mxu2 }
 0x3e4   :  { %v1873_v22 = vmax.f32 %v1559_v9, %v1751_v29  ;;  %10841 = vst [vmem:[#allocation40_spill] sm:$0xff] %v8833_v46  ;;  %v8845_v9 = vld [vmem:[%s10711_s2] ss:$0 sm:$0xff] }
 0x3e5   :  { %v8813_v0 = vmax.f32 %v1872_v58, %v1874_v37  ;;  %10840 = vst [vmem:[#allocation39_spill] sm:$0xff] %v8827_v41 }
 0x3e6   :  { %v1043_v3 = vpop.f32.mrf.mxu0 }
 0x3e7   :  { %1982 = vst [vmem:[#allocation3 + $0x110] sm:$0xff] %v8813_v0  ;;  %v1044_v32 = vadd.f32 %v8515_v5, %v1043_v3  ;;  %v8822_v63 = vpack.c.bf16 %v8813_v0, %v8742_v39 }
 0x3e9   :  { %10839 = vst [vmem:[#allocation38_spill] sm:$0xff] %v8822_v63  ;;  %v1241_v12 = vmax.f32 %v1044_v32, 0.0  ;;  %6607 = vmatmul.msk.bf16.gmra.mxu0 %vm547_vm0, %v7863_v35  ;;  %2370 = vmatmul.bf16.vlgmr.msrb.gmra.mxu3 %v8822_v63  ;;  %v7864_v35 = vld [vmem:[%s10712_s0 + $0x1f8] sm:$0xff] }
 0x3ea   :  { %v1563_v58 = vld [vmem:[#allocation2 + $0x358] ss:$2 sm:$0xf]  ;;  %v1755_v59 = vld [vmem:[#allocation2 + $0x359] ss:$2 sm:$0xf]  ;;  %2519 = vmatmul.bf16.gmra.mxu2 %v8827_v41 }
 0x3eb   :  { %v1875_v60 = vmax.f32 %v1563_v58, %v1755_v59  ;;  %1385 = vst [vmem:[#allocation2 + $0x360] sm:$0xff] %v1241_v12  ;;  %v8858_v58 = vpop.f32.mrf.mxu2 }
 0x3ed   :  { %v1935_v39 = vmax.f32 %v1873_v22, %v1875_v60 }
 0x3ee   :  { %v1045_v37 = vpop.f32.mrf.mxu0 }
 0x3ef   :  { %v1046_v3 = vadd.f32 %v8515_v5, %v1045_v37  ;;  %1983 = vst [vmem:[#allocation3 + $0x118] sm:$0xf] %v1935_v39 }
 0x3f1   :  { %v1242_v30 = vmax.f32 %v1046_v3, 0.0 }
 0x3f3   :  { %1386 = vst [vmem:[#allocation2 + $0x368] sm:$0xff] %v1242_v30 }
 0x3f6   :  { %v1048_v32 = vpop.f32.mrf.mxu0  ;;  %v8838_v63 = vld [vmem:[#allocation3 + $0x113] sm:$0xff] }
 0x3f7   :  { %v8840_v41 = vld [vmem:[#allocation3 + $0x111] sm:$0xff]  ;;  %v1049_v5 = vadd.f32 %v8845_v9, %v1048_v32  ;;  %v8850_v29 = vpack.c.bf16 %v8838_v63, %v8772_v57  ;;  %v8862_v57 = vpop.f32.mrf.mxu2 }
 0x3f8   :  { %v8854_v30 = vpack.c.bf16 %v8840_v41, %v8770_v43  ;;  %10844 = vst [vmem:[#allocation43_spill] sm:$0xff] %v8862_v57  ;;  %v7865_v43 = vld [vmem:[%s10712_s0 + $0x200] sm:$0xff] }
 0x3f9   :  { %10842 = vst [vmem:[#allocation41_spill] sm:$0xff] %v8850_v29  ;;  %v1243_v12 = vmax.f32 %v1049_v5, 0.0  ;;  %6608 = vmatmul.msk.bf16.gmra.mxu0 %vm547_vm0, %v7864_v35  ;;  %2832 = vmatmul.bf16.gmra.mxu1 %v8850_v29 }
 0x3fa   :  { %10843 = vst [vmem:[#allocation42_spill] sm:$0xff] %v8854_v30  ;;  %2524 = vmatmul.bf16.gmra.mxu2 %v8854_v30 }
 0x3fb   :  { %1387 = vst [vmem:[#allocation2 + $0x370] sm:$0xff] %v1243_v12  ;;  %v1565_v12 = vld [vmem:[#allocation2 + $0x360] ss:$2 sm:$0xff] }
 0x3fe   :  { %v1050_v59 = vpop.f32.mrf.mxu0 }
 0x3ff   :  { %v1051_v22 = vadd.f32 %v8845_v9, %v1050_v59  ;;  %v1757_v59 = vld [vmem:[#allocation2 + $0x361] ss:$2 sm:$0xff] }
 0x400   :  { %v1876_v30 = vmax.f32 %v1565_v12, %v1757_v59  ;;  %v7898_v59 = vld [vmem:[%s10713_s3 + $0xb8] sm:$0xff] }
 0x401   :  { %v1244_v60 = vmax.f32 %v1051_v22, 0.0  ;;  %2640 = vmatpush.bf16.msra.mxu3 %v7898_v59 }
 0x403   :  { %1388 = vst [vmem:[#allocation2 + $0x378] sm:$0xff] %v1244_v60 }
 0x406   :  { %v1053_v39 = vpop.f32.mrf.mxu0 }
 0x407   :  { %v1054_v37 = vadd.f32 %v8845_v9, %v1053_v39 }
 0x409   :  { %v1245_v3 = vmax.f32 %v1054_v37, 0.0  ;;  %6609 = vmatmul.msk.bf16.gmra.mxu0 %vm547_vm0, %v7865_v43  ;;  %v7866_v43 = vld [vmem:[%s10712_s0 + $0x208] sm:$0xff] }
 0x40b   :  { %1389 = vst [vmem:[#allocation2 + $0x380] sm:$0xff] %v1245_v3  ;;  %v8882_v3 = vld [vmem:[%s10714_s4] ss:$0 sm:$0xff] }
 0x40c   :  { %v8869_v35 = vpop.f32.mrf.mxu2 }
 0x40e   :  { %v1055_v32 = vpop.f32.mrf.mxu0 }
 0x40f   :  { %v1056_v5 = vadd.f32 %v8845_v9, %v1055_v32  ;;  %v2341_v32 = vpop.f32.mrf.mxu1 }
 0x411   :  { %v1246_v22 = vmax.f32 %v1056_v5, 0.0 }
 0x412   :  { %v1569_v60 = vld [vmem:[#allocation2 + $0x378] ss:$2 sm:$0xff]  ;;  %v1761_v29 = vld [vmem:[#allocation2 + $0x379] ss:$2 sm:$0xff] }
 0x413   :  { %v1878_v53 = vmax.f32 %v1569_v60, %v1761_v29  ;;  %1390 = vst [vmem:[#allocation2 + $0x388] sm:$0xff] %v1246_v22 }
 0x414   :  { %v8872_v49 = vpop.f32.mrf.mxu2 }
 0x415   :  { %10845 = vst [vmem:[#allocation44_spill] sm:$0xff] %v8872_v49  ;;  %v8874_v39 = vmax.f32 %v1876_v30, %v1878_v53  ;;  %v1567_v53 = vld [vmem:[#allocation2 + $0x370] ss:$2 sm:$0xf] }
 0x416   :  { %v1058_v37 = vpop.f32.mrf.mxu0  ;;  %v1759_v30 = vld [vmem:[#allocation2 + $0x371] ss:$2 sm:$0xf] }
 0x417   :  { %1984 = vst [vmem:[#allocation3 + $0x120] sm:$0xff] %v8874_v39  ;;  %v1059_v29 = vadd.f32 %v8845_v9, %v1058_v37  ;;  %v8888_v5 = vpack.c.bf16 %v8874_v39, %v8813_v0  ;;  %v1877_v62 = vmax.f32 %v1567_v53, %v1759_v30  ;;  %v2381_v37 = vadd.f32 %v8882_v3, %v2341_v32  ;;  %v1118_v0 = vpop.f32.mrf.mxu3  ;;  %v8901_v53 = vpop.f32.mrf.mxu1  ;;  %v7896_v32 = vld [vmem:[%s10713_s3 + $0xa8] sm:$0xff] }
 0x419   :  { %10846 = vst [vmem:[#allocation45_spill] sm:$0xff] %v8888_v5  ;;  %v1247_v12 = vmax.f32 %v1059_v29, 0.0  ;;  %6610 = vmatmul.msk.bf16.gmra.mxu0 %vm547_vm0, %v7866_v43  ;;  %v7897_v29 = vld [vmem:[%s10713_s3 + $0xb0] sm:$0xff] }
 0x41a   :  { %v1571_v22 = vld [vmem:[#allocation2 + $0x388] ss:$2 sm:$0xf]  ;;  %v1763_v60 = vld [vmem:[#allocation2 + $0x389] ss:$2 sm:$0xf]  ;;  %2641 = vmatpush.bf16.msra.mxu3 %v7897_v29 }
 0x41b   :  { %v1879_v47 = vmax.f32 %v1571_v22, %v1763_v60  ;;  %1391 = vst [vmem:[#allocation2 + $0x390] sm:$0xff] %v1247_v12  ;;  %v8914_v12 = vld [vmem:[#allocation3 + $0x112] sm:$0xff] }
 0x41c   :  { %v8923_v29 = vld [vmem:[#allocation3 + $0x114] sm:$0xff] }
 0x41d   :  { %v2495_v2 = vpop.f32.mrf.mxu2  ;;  %v1937_v52 = vmax.f32 %v1877_v62, %v1879_v47  ;;  %v7867_v47 = vld [vmem:[%s10712_s0 + $0x210] sm:$0xff] }
 0x41e   :  { %v1060_v43 = vpop.f32.mrf.mxu0  ;;  %v8898_v11 = vadd.f32 %v2495_v2, %v2381_v37  ;;  %2642 = vmatpush.bf16.msra.mxu3 %v7896_v32 }
 0x41f   :  { %v1061_v16 = vadd.f32 %v8845_v9, %v1060_v43  ;;  %1985 = vst [vmem:[#allocation3 + $0x128] sm:$0xf] %v1937_v52  ;;  %v1120_v2 = vpop.f32.mrf.mxu3  ;;  %v7895_v52 = vld [vmem:[%s10713_s3 + $0xa0] sm:$0xff] }
 0x421   :  { %v1248_v30 = vmax.f32 %v1061_v16, 0.0 }
 0x422   :  { %2643 = vmatpush.bf16.msra.mxu3 %v7895_v52  ;;  %v2346_v52 = vpop.f32.mrf.mxu1 }
 0x423   :  { %1392 = vst [vmem:[#allocation2 + $0x398] sm:$0xff] %v1248_v30 }
 0x425   :  { %v8909_v62 = vpop.f32.mrf.mxu2 }
 0x426   :  { %v1063_v16 = vpop.f32.mrf.mxu0  ;;  %v8916_v59 = vld [vmem:[#allocation3 + $0x121] sm:$0xff] }
 0x427   :  { %v8918_v22 = vld [vmem:[#allocation3 + $0x123] sm:$0xff]  ;;  %v1064_v37 = vadd.f32 %v8845_v9, %v1063_v16  ;;  %v8927_v43 = vpack.c.bf16 %v8916_v59, %v8840_v41  ;;  %v7914_v41 = vld [vmem:[%s10713_s3 + $0x138] sm:$0xff] }
 0x428   :  { %v8920_v60 = vld [vmem:[#allocation3 + $0x122] sm:$0xff]  ;;  %v8937_v49 = vpack.c.bf16 %v8918_v22, %v8838_v63  ;;  %v7894_v63 = vld [vmem:[%s10713_s3 + $0x98] sm:$0xff]  ;;  %2948 = vmatpush.bf16.msra.mxu2 %v7914_v41  ;;  %v1119_v41 = vadd.f32 %v8845_v9, %v1118_v0 }
 0x429   :  { %10847 = vst [vmem:[#allocation46_spill] sm:$0xff] %v8927_v43  ;;  %v8929_v30 = vld [vmem:[#allocation3 + $0x124] sm:$0xff]  ;;  %v8933_v32 = vpack.c.bf16 %v8920_v60, %v8914_v12  ;;  %v1249_v5 = vmax.f32 %v1064_v37, 0.0  ;;  %6611 = vmatmul.msk.bf16.gmra.mxu0 %vm547_vm0, %v7867_v47  ;;  %2644 = vmatpush.bf16.msra.mxu3 %v7894_v63  ;;  %v7913_v47 = vld [vmem:[%s10713_s3 + $0x130] sm:$0xff]  ;;  %v1121_v63 = vadd.f32 %v8845_v9, %v1120_v2 }
 0x42a   :  { %10849 = vst [vmem:[#allocation48_spill] sm:$0xff] %v8937_v49  ;;  %v8941_v16 = vpack.c.bf16 %v8929_v30, %v8923_v29  ;;  %v2383_v49 = vadd.f32 %v8882_v3, %v2346_v52  ;;  %v1271_v51 = vmax.f32 %v1119_v41, 0.0  ;;  %v7911_v2 = vld [vmem:[%s10713_s3 + $0x120] sm:$0xff] }
 0x42b   :  { %10848 = vst [vmem:[#allocation47_spill] sm:$0xff] %v8933_v32  ;;  %v7930_v32 = vld [vmem:[%s10713_s3 + $0x1b8] sm:$0xff]  ;;  %v1272_v40 = vmax.f32 %v1121_v63, 0.0  ;;  %v2385_v63 = vadd.f32 %v8882_v3, %v8805_v61 }
 0x42c   :  { %10850 = vst [vmem:[#allocation49_spill] sm:$0xff] %v8941_v16  ;;  %3258 = vmatpush.bf16.msra.mxu1 %v7930_v32  ;;  %v7929_v16 = vld [vmem:[%s10713_s3 + $0x1b0] sm:$0xff]  ;;  %v1123_v32 = vpop.f32.mrf.mxu3  ;;  %2949 = vmatpush.bf16.msra.mxu2 %v7913_v47  ;;  %v7910_v47 = vld [vmem:[%s10713_s3 + $0x118] sm:$0xff] }
 0x42d   :  { %1393 = vst [vmem:[#allocation2 + $0x3a0] sm:$0xff] %v1249_v5  ;;  %v2500_v37 = vpop.f32.mrf.mxu2  ;;  %2645 = vmatpush.bf16.msra.mxu3 %v7893_v21  ;;  %v7868_v21 = vld [vmem:[%s10712_s0 + $0x218] sm:$0xff]  ;;  %v1124_v41 = vadd.f32 %v8845_v9, %v1123_v32 }
 0x42e   :  { %v1065_v36 = vpop.f32.mrf.mxu0  ;;  %v8963_v5 = vadd.f32 %v2500_v37, %v2383_v49  ;;  %v7928_v49 = vld [vmem:[%s10713_s3 + $0x1a8] sm:$0xff]  ;;  %1415 = vst [vmem:[#allocation2 + $0x450] sm:$0xff] %v1271_v51  ;;  %v1765_v32 = vld [vmem:[#allocation2 + $0x391] ss:$2 sm:$0xff] }
 0x42f   :  { %v1066_v52 = vadd.f32 %v8845_v9, %v1065_v36  ;;  %v7892_v36 = vld [vmem:[%s10713_s3 + $0x88] sm:$0xff]  ;;  %1416 = vst [vmem:[#allocation2 + $0x458] sm:$0xff] %v1272_v40 }
 0x430   :  { %3259 = vmatpush.bf16.msra.mxu1 %v7929_v16  ;;  %2950 = vmatpush.bf16.msra.mxu2 %v7912_v10  ;;  %v7927_v16 = vld [vmem:[%s10713_s3 + $0x1a0] sm:$0xff] }
 0x431   :  { %v1250_v57 = vmax.f32 %v1066_v52, 0.0  ;;  %2646 = vmatpush.bf16.msra.mxu3 %v7892_v36  ;;  %v7891_v10 = vld [vmem:[%s10713_s3 + $0x80] sm:$0xff]  ;;  %v7926_v52 = vld [vmem:[%s10713_s3 + $0x198] sm:$0xff]  ;;  %v1273_v36 = vmax.f32 %v1124_v41, 0.0 }
 0x433   :  { %1394 = vst [vmem:[#allocation2 + $0x3a8] sm:$0xff] %v1250_v57 }
 0x434   :  { %3260 = vmatpush.bf16.msra.mxu1 %v7928_v49  ;;  %2951 = vmatpush.bf16.msra.mxu2 %v7911_v2  ;;  %v1125_v51 = vpop.f32.mrf.mxu3  ;;  %v7925_v2 = vld [vmem:[%s10713_s3 + $0x190] sm:$0xff]  ;;  %1417 = vst [vmem:[#allocation2 + $0x460] sm:$0xff] %v1273_v36  ;;  %v7922_v36 = vld [vmem:[%s10713_s3 + $0x178] sm:$0xff] }
 0x435   :  { %v8980_v0 = vpop.f32.mrf.mxu2  ;;  %2647 = vmatpush.bf16.msra.mxu3 %v7891_v10 }
 0x436   :  { %v1068_v57 = vpop.f32.mrf.mxu0 }
 0x437   :  { %v1069_v37 = vadd.f32 %v8845_v9, %v1068_v57  ;;  %v1573_v57 = vld [vmem:[#allocation2 + $0x390] ss:$2 sm:$0xff] }
 0x438   :  { %3261 = vmatpush.bf16.msra.mxu1 %v7927_v16  ;;  %2952 = vmatpush.bf16.msra.mxu2 %v7910_v47  ;;  %v7924_v47 = vld [vmem:[%s10713_s3 + $0x188] sm:$0xff] }
 0x439   :  { %v1251_v40 = vmax.f32 %v1069_v37, 0.0  ;;  %6612 = vmatmul.msk.bf16.gmra.mxu0 %vm547_vm0, %v7868_v21  ;;  %v7909_v21 = vld [vmem:[%s10713_s3 + $0x110] sm:$0xff]  ;;  %3103 = vmatpush.bf16.msrb.mxu3 %v7922_v36 }
 0x43b   :  { %1395 = vst [vmem:[#allocation2 + $0x3b0] sm:$0xff] %v1251_v40  ;;  %v7908_v40 = vld [vmem:[%s10713_s3 + $0x108] sm:$0xff] }
 0x43c   :  { %3262 = vmatpush.bf16.msra.mxu1 %v7926_v52  ;;  %2953 = vmatpush.bf16.msra.mxu2 %v7909_v21  ;;  %v1880_v52 = vmax.f32 %v1573_v57, %v1765_v32  ;;  %v7869_v57 = vld [vmem:[%s10712_s0 + $0x220] sm:$0xff] }
 0x43d   :  { %v2505_v49 = vpop.f32.mrf.mxu2 }
 0x43e   :  { %v1070_v16 = vpop.f32.mrf.mxu0  ;;  %v9008_v10 = vadd.f32 %v2505_v49, %v2385_v63  ;;  %v1128_v49 = vpop.f32.mrf.mxu3 }
 0x43f   :  { %v1071_v37 = vadd.f32 %v8845_v9, %v1070_v16  ;;  %v1126_v16 = vadd.f32 %v8845_v9, %v1125_v51  ;;  %v1129_v21 = vadd.f32 %v8845_v9, %v1128_v49  ;;  %v7907_v51 = vld [vmem:[%s10713_s3 + $0x100] sm:$0xff] }
 0x440   :  { %3263 = vmatpush.bf16.msra.mxu1 %v7925_v2  ;;  %2954 = vmatpush.bf16.msra.mxu2 %v7908_v40  ;;  %v7923_v40 = vld [vmem:[%s10713_s3 + $0x180] sm:$0xff] }
 0x441   :  { %v1252_v61 = vmax.f32 %v1071_v37, 0.0  ;;  %v1274_v37 = vmax.f32 %v1126_v16, 0.0 }
 0x442   :  { %v1577_v41 = vld [vmem:[#allocation2 + $0x3a8] ss:$2 sm:$0xff]  ;;  %v1769_v63 = vld [vmem:[#allocation2 + $0x3a9] ss:$2 sm:$0xff] }
 0x443   :  { %v1882_v50 = vmax.f32 %v1577_v41, %v1769_v63  ;;  %1396 = vst [vmem:[#allocation2 + $0x3b8] sm:$0xff] %v1252_v61  ;;  %v1275_v61 = vmax.f32 %v1129_v21, 0.0  ;;  %v1767_v63 = vld [vmem:[#allocation2 + $0x3a1] ss:$2 sm:$0xf]  ;;  %v9043_v21 = vpop.f32.mrf.mxu1 }
 0x444   :  { %3264 = vmatpush.bf16.msra.mxu1 %v7924_v47  ;;  %2955 = vmatpush.bf16.msra.mxu2 %v7907_v51  ;;  %1418 = vst [vmem:[#allocation2 + $0x468] sm:$0xff] %v1274_v37  ;;  %v1605_v51 = vld [vmem:[#allocation2 + $0x450] ss:$2 sm:$0xff] }
 0x445   :  { %v9022_v2 = vmax.f32 %v1880_v52, %v1882_v50  ;;  %v9027_v32 = vpop.f32.mrf.mxu2  ;;  %v1575_v50 = vld [vmem:[#allocation2 + $0x3a0] ss:$2 sm:$0xf]  ;;  %1419 = vst [vmem:[#allocation2 + $0x470] sm:$0xff] %v1275_v61 }
 0x446   :  { %v1073_v47 = vpop.f32.mrf.mxu0  ;;  %v1881_v56 = vmax.f32 %v1575_v50, %v1767_v63 }
 0x447   :  { %10851 = vst [vmem:[#allocation50_spill] sm:$0xff] %v9022_v2  ;;  %v1074_v52 = vadd.f32 %v8845_v9, %v1073_v47  ;;  %v9039_v41 = vpack.c.bf16 %v9022_v2, %v8874_v39  ;;  %v2387_v39 = vadd.f32 %v8882_v3, %v8824_v31 }
 0x448   :  { %1986 = vst [vmem:[#allocation3 + $0x130] sm:$0xff] %v9022_v2  ;;  %3265 = vmatpush.bf16.msra.mxu1 %v7923_v40  ;;  %v1797_v40 = vld [vmem:[#allocation2 + $0x451] ss:$2 sm:$0xff] }
 0x449   :  { %10852 = vst [vmem:[#allocation51_spill] sm:$0xff] %v9039_v41  ;;  %v1253_v49 = vmax.f32 %v1074_v52, 0.0  ;;  %6613 = vmatmul.msk.bf16.gmra.mxu0 %vm547_vm0, %v7869_v57  ;;  %2375 = vmatmul.bf16.gmra.mxu3 %v9039_v41  ;;  %v1896_v57 = vmax.f32 %v1605_v51, %v1797_v40  ;;  %v8102_v51 = vld [vmem:[#allocation3 + $0x12] sm:$0xff] }
 0x44a   :  { %v1579_v16 = vld [vmem:[#allocation2 + $0x3b8] ss:$2 sm:$0xf]  ;;  %v1771_v36 = vld [vmem:[#allocation2 + $0x3b9] ss:$2 sm:$0xf] }
 0x44b   :  { %v1883_v47 = vmax.f32 %v1579_v16, %v1771_v36  ;;  %1397 = vst [vmem:[#allocation2 + $0x3c0] sm:$0xff] %v1253_v49  ;;  %v9050_v49 = vpop.f32.mrf.mxu1 }
 0x44c   :  { %v1609_v41 = vld [vmem:[#allocation2 + $0x468] ss:$2 sm:$0xff]  ;;  %v1801_v48 = vld [vmem:[#allocation2 + $0x469] ss:$2 sm:$0xff] }
 0x44d   :  { %v1939_v2 = vmax.f32 %v1881_v56, %v1883_v47  ;;  %v2510_v37 = vpop.f32.mrf.mxu2  ;;  %v1898_v50 = vmax.f32 %v1609_v41, %v1801_v48  ;;  %v1130_v47 = vpop.f32.mrf.mxu3 }
 0x44e   :  { %v1075_v52 = vpop.f32.mrf.mxu0  ;;  %v9047_v46 = vadd.f32 %v2510_v37, %v2387_v39  ;;  %v1131_v41 = vadd.f32 %v8845_v9, %v1130_v47 }
 0x44f   :  { %1987 = vst [vmem:[#allocation3 + $0x138] sm:$0xf] %v1939_v2  ;;  %v1076_v61 = vadd.f32 %v8845_v9, %v1075_v52  ;;  %v1946_v63 = vmax.f32 %v1896_v57, %v1898_v50 }
 0x450   :  { %10853 = vst [vmem:[#allocation52_spill] sm:$0xff] %v9047_v46  ;;  %v1276_v52 = vmax.f32 %v1131_v41, 0.0  ;;  %v8103_v41 = vld [vmem:[#allocation3 + $0x14] sm:$0xff] }
 0x451   :  { %v1254_v42 = vmax.f32 %v1076_v61, 0.0  ;;  %1994 = vst [vmem:[#allocation3 + $0x170] sm:$0xff] %v1946_v63  ;;  %v7921_v63 = vld [vmem:[%s10713_s3 + $0x170] sm:$0xff] }
 0x452   :  { %1420 = vst [vmem:[#allocation2 + $0x478] sm:$0xff] %v1276_v52  ;;  %3104 = vmatpush.bf16.msrb.mxu3 %v7921_v63  ;;  %v2391_v63 = vadd.f32 %v8882_v3, %v8869_v35 }
 0x453   :  { %1398 = vst [vmem:[#allocation2 + $0x3c8] sm:$0xff] %v1254_v42  ;;  %v2093_v42 = vld [vmem:[#allocation3 + $0x2] sm:$0xff] }
 0x454   :  { %v2567_v40 = vpack.c.bf16 %v8102_v51, %v2093_v42 }
 0x455   :  { %v9052_v31 = vpop.f32.mrf.mxu2 }
 0x456   :  { %10854 = vst [vmem:[#allocation53_spill] sm:$0xff] %v9052_v31  ;;  %v1078_v56 = vpop.f32.mrf.mxu0  ;;  %v9054_v16 = vld [vmem:[#allocation3 + $0x131] sm:$0xff] }
 0x457   :  { %v2161_v36 = vld [vmem:[#allocation3 + $0x133] sm:$0xff]  ;;  %v1079_v2 = vadd.f32 %v8845_v9, %v1078_v56  ;;  %v9059_v39 = vpack.c.bf16 %v9054_v16, %v8916_v59  ;;  %v2389_v59 = vadd.f32 %v8882_v3, %v8858_v58  ;;  %v9075_v56 = vpop.f32.mrf.mxu1  ;;  %v2191_v58 = vld [vmem:[#allocation3 + $0x4] sm:$0xff] }
 0x458   :  { %v9062_v48 = vpack.c.bf16 %v2161_v36, %v8918_v22  ;;  %v2875_v51 = vpack.c.bf16 %v8103_v41, %v2191_v58 }
 0x459   :  { %10855 = vst [vmem:[#allocation54_spill] sm:$0xff] %v9059_v39  ;;  %v1255_v37 = vmax.f32 %v1079_v2, 0.0  ;;  %2529 = vmatmul.bf16.gmra.mxu2 %v9059_v39  ;;  %2648 = vmatmul.bf16.vlgmr.msra.gmra.mxu3 %v2567_v40  ;;  %v8104_v40 = vld [vmem:[#allocation3 + $0x22] sm:$0xff] }
 0x45a   :  { %10856 = vst [vmem:[#allocation55_spill] sm:$0xff] %v9062_v48  ;;  %2837 = vmatmul.bf16.gmra.mxu1 %v9062_v48  ;;  %v1773_v58 = vld [vmem:[#allocation2 + $0x3c1] ss:$2 sm:$0xff] }
 0x45b   :  { %1399 = vst [vmem:[#allocation2 + $0x3d0] sm:$0xff] %v1255_v37  ;;  %v8105_v37 = vld [vmem:[#allocation3 + $0x32] sm:$0xff]  ;;  %v1799_v48 = vld [vmem:[#allocation2 + $0x461] ss:$2 sm:$0xf] }
 0x45c   :  { %v9080_v52 = vpack.c.bf16 %v8105_v37, %v8104_v40 }
 0x45d   :  { %v2515_v57 = vpop.f32.mrf.mxu2 }
 0x45e   :  { %v1080_v22 = vpop.f32.mrf.mxu0  ;;  %v9069_v61 = vadd.f32 %v2515_v57, %v2389_v59  ;;  %10859 = vst [vmem:[#allocation58_spill] sm:$0xff] %v9080_v52  ;;  %v10860_v57 = vpack.c.bf16 %v8328_v17, %v8322_v13 }
 0x45f   :  { %v1081_v50 = vadd.f32 %v8845_v9, %v1080_v22  ;;  %v9085_v22 = vpop.f32.mrf.mxu1 }
 0x460   :  { %10857 = vst [vmem:[#allocation56_spill] sm:$0xff] %v9069_v61 }
 0x461   :  { %v1256_v36 = vmax.f32 %v1081_v50, 0.0  ;;  %v7920_v50 = vld [vmem:[%s10713_s3 + $0x168] sm:$0xff] }
 0x462   :  { %3105 = vmatpush.bf16.msrb.mxu3 %v7920_v50  ;;  %v1607_v50 = vld [vmem:[#allocation2 + $0x460] ss:$2 sm:$0xf] }
 0x463   :  { %1400 = vst [vmem:[#allocation2 + $0x3d8] sm:$0xff] %v1256_v36 }
 0x465   :  { %v9077_v47 = vpop.f32.mrf.mxu2 }
 0x466   :  { %10858 = vst [vmem:[#allocation57_spill] sm:$0xff] %v9077_v47  ;;  %v1083_v2 = vpop.f32.mrf.mxu0 }
 0x467   :  { %v1084_v42 = vadd.f32 %v8845_v9, %v1083_v2  ;;  %v1581_v2 = vld [vmem:[#allocation2 + $0x3c0] ss:$2 sm:$0xff]  ;;  %v9099_v35 = vpop.f32.mrf.mxu1 }
 0x468   :  { %v1884_v17 = vmax.f32 %v1581_v2, %v1773_v58  ;;  %v1583_v2 = vld [vmem:[#allocation2 + $0x3d0] ss:$2 sm:$0xf]  ;;  %v1775_v58 = vld [vmem:[#allocation2 + $0x3d1] ss:$2 sm:$0xf] }
 0x469   :  { %v1257_v59 = vmax.f32 %v1084_v42, 0.0  ;;  %2956 = vmatmul.bf16.vlgmr.msra.gmra.mxu2 %v2875_v51  ;;  %2653 = vmatmul.bf16.gmra.mxu3 %v9080_v52  ;;  %v1885_v31 = vmax.f32 %v1583_v2, %v1775_v58 }
 0x46a   :  { %3266 = vmatmul.bf16.vlgmr.msra.gmra.mxu1 %v10860_v57  ;;  %v7919_v57 = vld [vmem:[%s10713_s3 + $0x160] sm:$0xff] }
 0x46b   :  { %1401 = vst [vmem:[#allocation2 + $0x3e0] sm:$0xff] %v1257_v59  ;;  %3106 = vmatpush.bf16.msrb.mxu3 %v7919_v57 }
 0x46d   :  { %v2520_v36 = vpop.f32.mrf.mxu2 }
 0x46e   :  { %v1085_v42 = vpop.f32.mrf.mxu0  ;;  %v9093_v41 = vadd.f32 %v2520_v36, %v2391_v63  ;;  %v1611_v63 = vld [vmem:[#allocation2 + $0x478] ss:$2 sm:$0xf]  ;;  %v1803_v36 = vld [vmem:[#allocation2 + $0x479] ss:$2 sm:$0xf] }
 0x46f   :  { %v1086_v13 = vadd.f32 %v8845_v9, %v1085_v42  ;;  %v1899_v47 = vmax.f32 %v1611_v63, %v1803_v36 }
 0x470   :  { %10861 = vst [vmem:[#allocation59_spill] sm:$0xff] %v9093_v41  ;;  %v1897_v41 = vmax.f32 %v1607_v50, %v1799_v48 }
 0x471   :  { %v1258_v51 = vmax.f32 %v1086_v13, 0.0 }
 0x472   :  { %v1585_v40 = vld [vmem:[#allocation2 + $0x3d8] ss:$2 sm:$0xff]  ;;  %v1777_v37 = vld [vmem:[#allocation2 + $0x3d9] ss:$2 sm:$0xff]  ;;  %v1947_v50 = vmax.f32 %v1897_v41, %v1899_v47 }
 0x473   :  { %v1886_v59 = vmax.f32 %v1585_v40, %v1777_v37  ;;  %1402 = vst [vmem:[#allocation2 + $0x3e8] sm:$0xff] %v1258_v51  ;;  %v8106_v51 = vld [vmem:[#allocation3 + $0x24] sm:$0xff]  ;;  %v8107_v40 = vld [vmem:[#allocation3 + $0x34] sm:$0xff] }
 0x474   :  { %v9107_v37 = vpack.c.bf16 %v8107_v40, %v8106_v51  ;;  %v9114_v51 = vpop.f32.mrf.mxu1  ;;  %1995 = vst [vmem:[#allocation3 + $0x178] sm:$0xf] %v1947_v50  ;;  %v8111_v47 = vld [vmem:[#allocation3 + $0x54] sm:$0xff]  ;;  %v8112_v41 = vld [vmem:[#allocation3 + $0x62] sm:$0xff] }
 0x475   :  { %v9101_v39 = vmax.f32 %v1884_v17, %v1886_v59  ;;  %v9103_v52 = vpop.f32.mrf.mxu2  ;;  %v8108_v17 = vld [vmem:[#allocation3 + $0x42] sm:$0xff]  ;;  %v8109_v59 = vld [vmem:[#allocation3 + $0x52] sm:$0xff] }
 0x476   :  { %10863 = vst [vmem:[#allocation61_spill] sm:$0xff] %v9103_v52  ;;  %v1088_v42 = vpop.f32.mrf.mxu0  ;;  %v9109_v61 = vpack.c.bf16 %v8109_v59, %v8108_v17  ;;  %v2371_v52 = vpop.f32.mrf.mxu3  ;;  %v9120_v17 = vld [vmem:[#allocation3 + $0x72] sm:$0xff] }
 0x477   :  { %10862 = vst [vmem:[#allocation60_spill] sm:$0xff] %v9101_v39  ;;  %v1089_v13 = vadd.f32 %v8845_v9, %v1088_v42  ;;  %v2393_v48 = vadd.f32 %v8882_v3, %v2371_v52  ;;  %v8110_v52 = vld [vmem:[#allocation3 + $0x44] sm:$0xff] }
 0x478   :  { %1988 = vst [vmem:[#allocation3 + $0x140] sm:$0xff] %v9101_v39 }
 0x479   :  { %10864 = vst [vmem:[#allocation62_spill] sm:$0xff] %v9107_v37  ;;  %v1259_v57 = vmax.f32 %v1089_v13, 0.0  ;;  %2961 = vmatmul.bf16.gmra.mxu2 %v9107_v37  ;;  %2658 = vmatmul.bf16.gmra.mxu3 %v9109_v61 }
 0x47a   :  { %10865 = vst [vmem:[#allocation63_spill] sm:$0xff] %v9109_v61  ;;  %3271 = vmatmul.bf16.gmra.mxu1 %v8412_v6  ;;  %v1587_v39 = vld [vmem:[#allocation2 + $0x3e8] ss:$2 sm:$0xf]  ;;  %v8115_v61 = vld [vmem:[#allocation3 + $0xd4] sm:$0xff] }
 0x47b   :  { %v1779_v46 = vld [vmem:[#allocation2 + $0x3e9] ss:$2 sm:$0xf]  ;;  %1403 = vst [vmem:[#allocation2 + $0x3f0] sm:$0xff] %v1259_v57  ;;  %v9128_v57 = vpack.c.bf16 %v9120_v17, %v8112_v41 }
 0x47c   :  { %v1887_v42 = vmax.f32 %v1587_v39, %v1779_v46  ;;  %v9122_v46 = vpop.f32.mrf.mxu1 }
 0x47d   :  { %v2525_v36 = vpop.f32.mrf.mxu2  ;;  %10867 = vst [vmem:[#allocation65_spill] sm:$0xff] %v9128_v57 }
 0x47e   :  { %v1941_v63 = vmax.f32 %v1885_v31, %v1887_v42  ;;  %v1090_v2 = vpop.f32.mrf.mxu0  ;;  %v9117_v58 = vadd.f32 %v2525_v36, %v2393_v48  ;;  %v9125_v31 = vpack.c.bf16 %v8111_v47, %v8110_v52  ;;  %v7918_v36 = vld [vmem:[%s10713_s3 + $0x158] sm:$0xff]  ;;  %v8113_v52 = vld [vmem:[#allocation3 + $0x64] sm:$0xff] }
 0x47f   :  { %v1091_v13 = vadd.f32 %v8845_v9, %v1090_v2  ;;  %3107 = vmatpush.bf16.msrb.mxu3 %v7918_v36 }
 0x480   :  { %1989 = vst [vmem:[#allocation3 + $0x148] sm:$0xf] %v1941_v63 }
 0x481   :  { %v1260_v40 = vmax.f32 %v1091_v13, 0.0  ;;  %10866 = vst [vmem:[#allocation64_spill] sm:$0xff] %v9125_v31  ;;  %v9139_v13 = vld [vmem:[#allocation3 + $0x74] sm:$0xff] }
 0x482   :  { %v9143_v47 = vpack.c.bf16 %v9139_v13, %v8113_v52 }
 0x483   :  { %1404 = vst [vmem:[#allocation2 + $0x3f8] sm:$0xff] %v1260_v40  ;;  %v2052_v40 = vld [vmem:[#allocation3 + $0x81] sm:$0xff] }
 0x484   :  { %v9133_v48 = vpop.f32.mrf.mxu1  ;;  %10868 = vst [vmem:[#allocation66_spill] sm:$0xff] %v9143_v47  ;;  %v9146_v41 = vpack.c.bf16 %v2052_v40, %v8763_v7 }
 0x486   :  { %v1093_v39 = vpop.f32.mrf.mxu0  ;;  %10869 = vst [vmem:[#allocation67_spill] sm:$0xff] %v9146_v41 }
 0x487   :  { %v1094_v59 = vadd.f32 %v8845_v9, %v1093_v39 }
 0x489   :  { %v1261_v42 = vmax.f32 %v1094_v59, 0.0  ;;  %2966 = vmatmul.bf16.gmra.mxu2 %v9125_v31  ;;  %2663 = vmatmul.bf16.gmra.mxu3 %v9128_v57 }
 0x48a   :  { %3276 = vmatmul.bf16.gmra.mxu1 %v8468_v20  ;;  %v8114_v20 = vld [vmem:[#allocation3 + $0xd2] sm:$0xff] }
 0x48b   :  { %1405 = vst [vmem:[#allocation2 + $0x400] sm:$0xff] %v1261_v42  ;;  %v2105_v42 = vld [vmem:[#allocation3 + $0xc2] sm:$0xff]  ;;  %v1781_v7 = vld [vmem:[#allocation2 + $0x3f1] ss:$2 sm:$0xff] }
 0x48e   :  { %v1095_v50 = vpop.f32.mrf.mxu0 }
 0x48f   :  { %v1096_v63 = vadd.f32 %v8845_v9, %v1095_v50  ;;  %v9148_v50 = vpop.f32.mrf.mxu1 }
 0x491   :  { %v1262_v2 = vmax.f32 %v1096_v63, 0.0  ;;  %v2571_v63 = vpack.c.bf16 %v8114_v20, %v2105_v42 }
 0x492   :  { %v1783_v37 = vld [vmem:[#allocation2 + $0x401] ss:$2 sm:$0xf] }
 0x493   :  { %1406 = vst [vmem:[#allocation2 + $0x408] sm:$0xff] %v1262_v2  ;;  %v7917_v2 = vld [vmem:[%s10713_s3 + $0x150] sm:$0xff] }
 0x494   :  { %3108 = vmatpush.bf16.msrb.mxu3 %v7917_v2  ;;  %v1591_v2 = vld [vmem:[#allocation2 + $0x400] ss:$2 sm:$0xf] }
 0x496   :  { %v1098_v39 = vpop.f32.mrf.mxu0 }
 0x497   :  { %v1099_v59 = vadd.f32 %v8845_v9, %v1098_v39  ;;  %v1589_v39 = vld [vmem:[#allocation2 + $0x3f0] ss:$2 sm:$0xff]  ;;  %v9156_v31 = vpop.f32.mrf.mxu1 }
 0x498   :  { %v1888_v20 = vmax.f32 %v1589_v39, %v1781_v7  ;;  %v8116_v7 = vld [vmem:[#allocation3 + $0xe2] sm:$0xff] }
 0x499   :  { %v1263_v36 = vmax.f32 %v1099_v59, 0.0  ;;  %2971 = vmatmul.bf16.gmra.mxu2 %v9143_v47  ;;  %2668 = vmatmul.bf16.gmra.mxu3 %v2571_v63  ;;  %v7916_v63 = vld [vmem:[%s10713_s3 + $0x148] sm:$0xff] }
 0x49a   :  { %3281 = vmatmul.bf16.gmra.mxu1 %v9146_v41  ;;  %v2203_v41 = vld [vmem:[#allocation3 + $0xc4] sm:$0xff]  ;;  %3109 = vmatpush.bf16.msrb.mxu3 %v7916_v63 }
 0x49b   :  { %1407 = vst [vmem:[#allocation2 + $0x410] sm:$0xff] %v1263_v36  ;;  %v2879_v39 = vpack.c.bf16 %v8115_v61, %v2203_v41 }
 0x49e   :  { %v1100_v40 = vpop.f32.mrf.mxu0 }
 0x49f   :  { %v1101_v52 = vadd.f32 %v8845_v9, %v1100_v40  ;;  %v9174_v61 = vpop.f32.mrf.mxu1 }
 0x4a1   :  { %v1264_v59 = vmax.f32 %v1101_v52, 0.0  ;;  %v9163_v52 = vpack.c.bf16 %v8768_v27, %v8116_v7 }
 0x4a2   :  { %v1593_v42 = vld [vmem:[#allocation2 + $0x408] ss:$2 sm:$0xff]  ;;  %v1785_v47 = vld [vmem:[#allocation2 + $0x409] ss:$2 sm:$0xff] }
 0x4a3   :  { %v1890_v6 = vmax.f32 %v1593_v42, %v1785_v47  ;;  %1408 = vst [vmem:[#allocation2 + $0x418] sm:$0xff] %v1264_v59  ;;  %v1889_v47 = vmax.f32 %v1591_v2, %v1783_v37  ;;  %v7953_v42 = vld [vmem:[%s10713_s3 + $0x270] sm:$0xff] }
 0x4a5   :  { %v1942_v36 = vmax.f32 %v1888_v20, %v1890_v6  ;;  %v10870_v6 = vpack.c.bf16 %v8661_v54, %v8655_v1  ;;  %v7938_v20 = vld [vmem:[%s10713_s3 + $0x1f8] sm:$0xff]  ;;  %v7937_v54 = vld [vmem:[%s10713_s3 + $0x1f0] sm:$0xff] }
 0x4a6   :  { %v1103_v57 = vpop.f32.mrf.mxu0  ;;  %3413 = vmatpush.bf16.msrb.mxu2 %v7938_v20 }
 0x4a7   :  { %1990 = vst [vmem:[#allocation3 + $0x150] sm:$0xff] %v1942_v36  ;;  %v1104_v40 = vadd.f32 %v8845_v9, %v1103_v57  ;;  %v7954_v57 = vld [vmem:[%s10713_s3 + $0x278] sm:$0xff]  ;;  %v9190_v7 = vpop.f32.mrf.mxu1 }
 0x4a8   :  { %3723 = vmatpush.bf16.msrb.mxu1 %v7954_v57 }
 0x4a9   :  { %v1265_v59 = vmax.f32 %v1104_v40, 0.0  ;;  %2976 = vmatmul.bf16.gmra.mxu2 %v2879_v39  ;;  %2673 = vmatmul.bf16.gmra.mxu3 %v9163_v52  ;;  %v7936_v40 = vld [vmem:[%s10713_s3 + $0x1e8] sm:$0xff] }
 0x4aa   :  { %3286 = vmatmul.bf16.gmra.mxu1 %v10870_v6  ;;  %v1595_v41 = vld [vmem:[#allocation2 + $0x418] ss:$2 sm:$0xf]  ;;  %v1787_v27 = vld [vmem:[#allocation2 + $0x419] ss:$2 sm:$0xf]  ;;  %3414 = vmatpush.bf16.msrb.mxu2 %v7937_v54 }
 0x4ab   :  { %v1891_v37 = vmax.f32 %v1595_v41, %v1787_v27  ;;  %1409 = vst [vmem:[#allocation2 + $0x420] sm:$0xff] %v1265_v59  ;;  %v7952_v39 = vld [vmem:[%s10713_s3 + $0x268] sm:$0xff]  ;;  %v7935_v59 = vld [vmem:[%s10713_s3 + $0x1e0] sm:$0xff]  ;;  %v7934_v54 = vld [vmem:[%s10713_s3 + $0x1d8] sm:$0xff] }
 0x4ac   :  { %3724 = vmatpush.bf16.msrb.mxu1 %v7953_v42  ;;  %v7951_v6 = vld [vmem:[%s10713_s3 + $0x260] sm:$0xff]  ;;  %v7949_v42 = vld [vmem:[%s10713_s3 + $0x250] sm:$0xff] }
 0x4ad   :  { %v1943_v1 = vmax.f32 %v1889_v47, %v1891_v37  ;;  %v7915_v47 = vld [vmem:[%s10713_s3 + $0x140] sm:$0xff]  ;;  %v9207_v37 = vpack.c.bf16 %v8914_v12, %v8774_v26  ;;  %v7933_v12 = vld [vmem:[%s10713_s3 + $0x1d0] sm:$0xff] }
 0x4ae   :  { %v1105_v63 = vpop.f32.mrf.mxu0  ;;  %3415 = vmatpush.bf16.msrb.mxu2 %v7936_v40  ;;  %v8117_v41 = vld [vmem:[#allocation3 + $0xe4] sm:$0xff]  ;;  %3110 = vmatpush.bf16.msrb.mxu3 %v7915_v47 }
 0x4af   :  { %1991 = vst [vmem:[#allocation3 + $0x158] sm:$0xf] %v1943_v1  ;;  %v1106_v36 = vadd.f32 %v8845_v9, %v1105_v63  ;;  %v9203_v27 = vpack.c.bf16 %v8784_v33, %v8117_v41  ;;  %v7950_v33 = vld [vmem:[%s10713_s3 + $0x258] sm:$0xff]  ;;  %v9218_v26 = vpop.f32.mrf.mxu1  ;;  %v7932_v40 = vld [vmem:[%s10713_s3 + $0x1c8] sm:$0xff]  ;;  %v7947_v41 = vld [vmem:[%s10713_s3 + $0x240] sm:$0xff] }
 0x4b0   :  { %3725 = vmatpush.bf16.msrb.mxu1 %v7952_v39  ;;  %10872 = vst [vmem:[#allocation69_spill] sm:$0xff] %v9207_v37  ;;  %v7948_v39 = vld [vmem:[%s10713_s3 + $0x248] sm:$0xff] }
 0x4b1   :  { %v1266_v2 = vmax.f32 %v1106_v36, 0.0  ;;  %10871 = vst [vmem:[#allocation68_spill] sm:$0xff] %v9203_v27 }
 0x4b2   :  { %3416 = vmatpush.bf16.msrb.mxu2 %v7935_v59 }
 0x4b3   :  { %1410 = vst [vmem:[#allocation2 + $0x428] sm:$0xff] %v1266_v2  ;;  %v7946_v2 = vld [vmem:[%s10713_s3 + $0x238] sm:$0xff] }
 0x4b4   :  { %3726 = vmatpush.bf16.msrb.mxu1 %v7951_v6  ;;  %3568 = vmatpush.bf16.msra.mxu3 %v7946_v2  ;;  %v9238_v6 = vpop.f32.mrf.mxu3 }
 0x4b6   :  { %v1108_v20 = vpop.f32.mrf.mxu0  ;;  %3417 = vmatpush.bf16.msrb.mxu2 %v7934_v54 }
 0x4b7   :  { %v1109_v57 = vadd.f32 %v8845_v9, %v1108_v20  ;;  %v9236_v59 = vpop.f32.mrf.mxu1  ;;  %v9240_v20 = vld [vmem:[#allocation3 + $0x132] sm:$0xff] }
 0x4b8   :  { %3727 = vmatpush.bf16.msrb.mxu1 %v7950_v33  ;;  %v9251_v33 = vpack.c.bf16 %v8923_v29, %v8786_v34 }
 0x4b9   :  { %v1267_v1 = vmax.f32 %v1109_v57, 0.0  ;;  %2981 = vmatmul.bf16.gmra.mxu2 %v9203_v27  ;;  %2678 = vmatmul.bf16.gmra.mxu3 %v9207_v37  ;;  %v7931_v57 = vld [vmem:[%s10713_s3 + $0x1c0] sm:$0xff] }
 0x4ba   :  { %3291 = vmatmul.bf16.gmra.mxu1 %v8778_v38  ;;  %3418 = vmatpush.bf16.msrb.mxu2 %v7933_v12  ;;  %10873 = vst [vmem:[#allocation70_spill] sm:$0xff] %v9251_v33  ;;  %v9255_v12 = vpack.c.bf16 %v9240_v20, %v8920_v60  ;;  %v1597_v2 = vld [vmem:[#allocation2 + $0x420] ss:$2 sm:$0xff]  ;;  %v1789_v34 = vld [vmem:[#allocation2 + $0x421] ss:$2 sm:$0xff]  ;;  %v7945_v60 = vld [vmem:[%s10713_s3 + $0x230] sm:$0xff] }
 0x4bb   :  { %1411 = vst [vmem:[#allocation2 + $0x430] sm:$0xff] %v1267_v1  ;;  %3569 = vmatpush.bf16.msra.mxu3 %v7945_v60 }
 0x4bc   :  { %3728 = vmatpush.bf16.msrb.mxu1 %v7949_v42  ;;  %10874 = vst [vmem:[#allocation71_spill] sm:$0xff] %v9255_v12 }
 0x4be   :  { %v1110_v63 = vpop.f32.mrf.mxu0  ;;  %3419 = vmatpush.bf16.msrb.mxu2 %v7932_v40 }
 0x4bf   :  { %v1111_v36 = vadd.f32 %v8845_v9, %v1110_v63 }
 0x4c0   :  { %3729 = vmatpush.bf16.msrb.mxu1 %v7948_v39  ;;  %v1892_v39 = vmax.f32 %v1597_v2, %v1789_v34 }
 0x4c1   :  { %v1268_v47 = vmax.f32 %v1111_v36, 0.0  ;;  %v9260_v36 = vpop.f32.mrf.mxu1 }
 0x4c2   :  { %3420 = vmatpush.bf16.msrb.mxu2 %v7931_v57  ;;  %v1599_v27 = vld [vmem:[#allocation2 + $0x430] ss:$2 sm:$0xf] }
 0x4c3   :  { %1412 = vst [vmem:[#allocation2 + $0x438] sm:$0xff] %v1268_v47 }
 0x4c4   :  { %3730 = vmatpush.bf16.msrb.mxu1 %v7947_v41 }
 0x4c6   :  { %v1113_v1 = vpop.f32.mrf.mxu0 }
 0x4c7   :  { %v1114_v54 = vadd.f32 %v8845_v9, %v1113_v1 }
 0x4c9   :  { %v1269_v42 = vmax.f32 %v1114_v54, 0.0  ;;  %2986 = vmatmul.bf16.gmra.mxu2 %v9251_v33  ;;  %2683 = vmatmul.bf16.gmra.mxu3 %v9255_v12  ;;  %v9266_v54 = vpop.f32.mrf.mxu2  ;;  %v1791_v12 = vld [vmem:[#allocation2 + $0x431] ss:$2 sm:$0xf] }
 0x4ca   :  { %3296 = vmatmul.bf16.gmra.mxu1 %v8927_v43  ;;  %v2064_v43 = vld [vmem:[#allocation3 + $0x141] sm:$0xff]  ;;  %v1893_v34 = vmax.f32 %v1599_v27, %v1791_v12 }
 0x4cb   :  { %1413 = vst [vmem:[#allocation2 + $0x440] sm:$0xff] %v1269_v42  ;;  %v9268_v42 = vld [vmem:[#allocation3 + $0x134] sm:$0xff]  ;;  %v9277_v2 = vpack.c.bf16 %v2064_v43, %v9054_v16  ;;  %v7944_v12 = vld [vmem:[%s10713_s3 + $0x228] sm:$0xff] }
 0x4cc   :  { %v2376_v63 = vpop.f32.mrf.mxu3  ;;  %3570 = vmatpush.bf16.msra.mxu3 %v7944_v12 }
 0x4ce   :  { %v1115_v29 = vpop.f32.mrf.mxu0 }
 0x4cf   :  { %v1116_v40 = vadd.f32 %v8845_v9, %v1115_v29  ;;  %v9274_v9 = vpack.c.bf16 %v9268_v42, %v8929_v30 }
 0x4d1   :  { %v1270_v47 = vmax.f32 %v1116_v40, 0.0  ;;  %v10875_v40 = vpack.c.bf16 %v8297_v55, %v8274_v19 }
 0x4d2   :  { %v1601_v57 = vld [vmem:[#allocation2 + $0x438] ss:$2 sm:$0xff]  ;;  %v1793_v41 = vld [vmem:[#allocation2 + $0x439] ss:$2 sm:$0xff] }
 0x4d3   :  { %v1894_v1 = vmax.f32 %v1601_v57, %v1793_v41  ;;  %1414 = vst [vmem:[#allocation2 + $0x448] sm:$0xff] %v1270_v47 }
 0x4d4   :  { %v2378_v33 = vpop.f32.mrf.mxu3 }
 0x4d5   :  { %v1944_v38 = vmax.f32 %v1892_v39, %v1894_v1  ;;  %v2396_v19 = vadd.f32 %v8882_v3, %v2378_v33 }
 0x4d7   :  { %v9270_v37 = vpop.f32.mrf.mxu1  ;;  %1992 = vst [vmem:[#allocation3 + $0x160] sm:$0xff] %v1944_v38  ;;  %v2395_v38 = vadd.f32 %v8882_v3, %v2376_v63 }
 0x4d9   :  { %2991 = vmatmul.bf16.gmra.mxu2 %v9274_v9  ;;  %3111 = vmatmul.bf16.vlgmr.msrb.gmra.mxu3 %v10875_v40 }
 0x4da   :  { %3301 = vmatmul.bf16.gmra.mxu1 %v9277_v2  ;;  %v1603_v29 = vld [vmem:[#allocation2 + $0x448] ss:$2 sm:$0xf]  ;;  %v1795_v60 = vld [vmem:[#allocation2 + $0x449] ss:$2 sm:$0xf] }
 0x4db   :  { %v1895_v39 = vmax.f32 %v1603_v29, %v1795_v60  ;;  %v2382_v29 = vadd.f32 %v8882_v3, %v8901_v53 }
 0x4dc   :  { %v2530_v47 = vpop.f32.mrf.mxu2  ;;  %v2649_v43 = vpop.f32.mrf.mxu3 }
 0x4dd   :  { %v1945_v30 = vmax.f32 %v1893_v34, %v1895_v39  ;;  %v9285_v57 = vadd.f32 %v2530_v47, %v2395_v38  ;;  %v2689_v27 = vadd.f32 %v2649_v43, %v8898_v11  ;;  %v10876_v34 = vpack.c.bf16 %v8330_v18, %v8324_v14  ;;  %v7943_v18 = vld [vmem:[%s10713_s3 + $0x220] sm:$0xff] }
 0x4de   :  { %v10877_v11 = vpack.c.bf16 %v8341_v25, %v8337_v23  ;;  %v2536_v40 = vadd.f32 %v8909_v62, %v2382_v29  ;;  %3571 = vmatpush.bf16.msra.mxu3 %v7943_v18 }
 0x4df   :  { %v9287_v16 = vpop.f32.mrf.mxu1  ;;  %1993 = vst [vmem:[#allocation3 + $0x168] sm:$0xf] %v1945_v30  ;;  %v2843_v33 = vadd.f32 %v9050_v49, %v2689_v27 }
 0x4e4   :  { %v2532_v55 = vpop.f32.mrf.mxu2  ;;  %v2651_v63 = vpop.f32.mrf.mxu3 }
 0x4e5   :  { %v9294_v41 = vadd.f32 %v2532_v55, %v2396_v19  ;;  %v2690_v23 = vadd.f32 %v2651_v63, %v2536_v40  ;;  %v8118_v40 = vld [vmem:[#allocation3 + $0x70] sm:$0xff] }
 0x4e7   :  { %v9296_v1 = vpop.f32.mrf.mxu1  ;;  %v2844_v25 = vadd.f32 %v9075_v56, %v2690_v23 }
 0x4e9   :  { %3421 = vmatmul.bf16.vlgmr.msrb.gmra.mxu2 %v10876_v34  ;;  %3116 = vmatmul.bf16.gmra.mxu3 %v8400_v44  ;;  %v7942_v34 = vld [vmem:[%s10713_s3 + $0x218] sm:$0xff] }
 0x4ea   :  { %3731 = vmatmul.bf16.vlgmr.msrb.gmra.mxu1 %v10877_v11  ;;  %3572 = vmatpush.bf16.msra.mxu3 %v7942_v34 }
 0x4ec   :  { %v2957_v60 = vpop.f32.mrf.mxu2  ;;  %v2654_v38 = vpop.f32.mrf.mxu3 }
 0x4ed   :  { %v9309_v39 = vadd.f32 %v2957_v60, %v2843_v33  ;;  %v2691_v14 = vadd.f32 %v2654_v38, %v8963_v5  ;;  %v2384_v5 = vadd.f32 %v8882_v3, %v9043_v21 }
 0x4ef   :  { %v9311_v47 = vpop.f32.mrf.mxu1  ;;  %v2845_v43 = vadd.f32 %v9085_v22, %v2691_v14  ;;  %v2538_v56 = vadd.f32 %v8980_v0, %v2384_v5  ;;  %v9340_v0 = vld [vmem:[#allocation3 + $0x80] sm:$0xff] }
 0x4f0   :  { %v9345_v38 = vpack.c.bf16 %v9340_v0, %v8118_v40  ;;  %v10884_v40 = vld [vmem:[#allocation40_spill] sm:$0xff] }
 0x4f4   :  { %v2959_v53 = vpop.f32.mrf.mxu2  ;;  %v2656_v30 = vpop.f32.mrf.mxu3 }
 0x4f5   :  { %v9318_v49 = vadd.f32 %v2959_v53, %v2844_v25  ;;  %v2692_v11 = vadd.f32 %v2656_v30, %v2538_v56  ;;  %v10878_v30 = vld [vmem:[#allocation52_spill] sm:$0xff]  ;;  %v2199_v56 = vld [vmem:[#allocation3 + $0x84] sm:$0xff] }
 0x4f7   :  { %v9320_v62 = vpop.f32.mrf.mxu1  ;;  %v2846_v21 = vadd.f32 %v9099_v35, %v2692_v11  ;;  %v9374_v11 = vpack.c.bf16 %v2199_v56, %v9139_v13 }
 0x4f9   :  { %3426 = vmatmul.bf16.gmra.mxu2 %v8410_v4  ;;  %3121 = vmatmul.bf16.gmra.mxu3 %v8457_v45  ;;  %10880 = vst [vmem:[#allocation72_spill] sm:$0xff] %v9374_v11 }
 0x4fa   :  { %3736 = vmatmul.bf16.gmra.mxu1 %v8414_v8 }
 0x4fc   :  { %v2962_v27 = vpop.f32.mrf.mxu2  ;;  %v2659_v19 = vpop.f32.mrf.mxu3 }
 0x4fd   :  { %v9329_v12 = vadd.f32 %v2962_v27, %v2845_v43  ;;  %v2693_v63 = vadd.f32 %v2659_v19, %v9008_v10  ;;  %v2386_v10 = vadd.f32 %v8882_v3, %v8811_v24  ;;  %v7941_v43 = vld [vmem:[%s10713_s3 + $0x210] sm:$0xff] }
 0x4fe   :  { %3573 = vmatpush.bf16.msra.mxu3 %v7941_v43  ;;  %v10886_v43 = vld [vmem:[#allocation56_spill] sm:$0xff] }
 0x4ff   :  { %v9331_v55 = vpop.f32.mrf.mxu1  ;;  %v2847_v35 = vadd.f32 %v9114_v51, %v2693_v63  ;;  %v2540_v18 = vadd.f32 %v9027_v32, %v2386_v10  ;;  %v9363_v51 = vld [vmem:[#allocation3 + $0x82] sm:$0xff] }
 0x500   :  { %v9371_v34 = vpack.c.bf16 %v9363_v51, %v9120_v17 }
 0x502   :  { %10879 = vst [vmem:[#allocation52_spill] sm:$0xff] %v9371_v34 }
 0x504   :  { %v2964_v29 = vpop.f32.mrf.mxu2  ;;  %v2661_v33 = vpop.f32.mrf.mxu3 }
 0x505   :  { %v9338_v22 = vadd.f32 %v2964_v29, %v2846_v21  ;;  %v2694_v27 = vadd.f32 %v2661_v33, %v2540_v18  ;;  %v10882_v21 = vld [vmem:[#allocation20_spill] sm:$0xff]  ;;  %v9384_v33 = vld [vmem:[%s10714_s4] ss:$0 sm:$0xff] }
 0x506   :  { %v2388_v17 = vadd.f32 %v9384_v33, %v10884_v40  ;;  %v10888_v40 = vld [vmem:[#allocation23_spill] sm:$0xff] }
 0x507   :  { %v9342_v60 = vpop.f32.mrf.mxu1  ;;  %v2848_v24 = vadd.f32 %v9122_v46, %v2694_v27  ;;  %v10881_v46 = vld [vmem:[#allocation22_spill] sm:$0xff] }
 0x508   :  { %v10883_v29 = vpack.c.bf16 %v10881_v46, %v10882_v21 }
 0x509   :  { %3431 = vmatmul.bf16.gmra.mxu2 %v8470_v15  ;;  %3126 = vmatmul.bf16.gmra.mxu3 %v9345_v38 }
 0x50a   :  { %3741 = vmatmul.bf16.gmra.mxu1 %v8474_v28 }
 0x50c   :  { %v2967_v14 = vpop.f32.mrf.mxu2  ;;  %v2664_v25 = vpop.f32.mrf.mxu3 }
 0x50d   :  { %v9354_v23 = vadd.f32 %v2967_v14, %v2847_v35  ;;  %v2695_v5 = vadd.f32 %v2664_v25, %v10878_v30  ;;  %v10885_v35 = vld [vmem:[#allocation53_spill] sm:$0xff] }
 0x50e   :  { %v2542_v14 = vadd.f32 %v10885_v35, %v2388_v17 }
 0x50f   :  { %v9356_v53 = vpop.f32.mrf.mxu1  ;;  %v2849_v10 = vadd.f32 %v9133_v48, %v2695_v5 }
 0x514   :  { %v2969_v3 = vpop.f32.mrf.mxu2  ;;  %v2666_v19 = vpop.f32.mrf.mxu3 }
 0x515   :  { %v9365_v32 = vadd.f32 %v2969_v3, %v2848_v24  ;;  %v7940_v24 = vld [vmem:[%s10713_s3 + $0x208] sm:$0xff]  ;;  %v2696_v3 = vadd.f32 %v2666_v19, %v2542_v14  ;;  %v7962_v19 = vld [vmem:[%s10713_s3 + $0x2b8] sm:$0xff]  ;;  %v10893_v14 = vld [vmem:[#allocation31_spill] sm:$0xff] }
 0x516   :  { %3574 = vmatpush.bf16.msra.mxu3 %v7940_v24  ;;  %3878 = vmatpush.bf16.msra.mxu2 %v7962_v19 }
 0x517   :  { %v9367_v63 = vpop.f32.mrf.mxu1  ;;  %v2850_v56 = vadd.f32 %v9148_v50, %v2696_v3  ;;  %v7978_v50 = vld [vmem:[%s10713_s3 + $0x338] sm:$0xff] }
 0x518   :  { %4188 = vmatpush.bf16.msra.mxu1 %v7978_v50  ;;  %v7960_v50 = vld [vmem:[%s10713_s3 + $0x2a8] sm:$0xff] }
 0x519   :  { %3436 = vmatmul.bf16.gmra.mxu2 %v9371_v34  ;;  %3131 = vmatmul.bf16.gmra.mxu3 %v10883_v29  ;;  %v10887_v29 = vld [vmem:[#allocation25_spill] sm:$0xff] }
 0x51a   :  { %3746 = vmatmul.bf16.gmra.mxu1 %v9374_v11  ;;  %v10889_v17 = vpack.c.bf16 %v10887_v29, %v10888_v40  ;;  %v7973_v11 = vld [vmem:[%s10713_s3 + $0x310] sm:$0xff] }
 0x51c   :  { %v2972_v13 = vpop.f32.mrf.mxu2  ;;  %v2669_v25 = vpop.f32.mrf.mxu3 }
 0x51d   :  { %v9390_v18 = vadd.f32 %v2972_v13, %v2849_v10  ;;  %v2697_v27 = vadd.f32 %v2669_v25, %v10886_v43  ;;  %v10890_v10 = vld [vmem:[#allocation27_spill] sm:$0xff]  ;;  %v10891_v13 = vld [vmem:[#allocation26_spill] sm:$0xff] }
 0x51e   :  { %v10892_v35 = vpack.c.bf16 %v10890_v10, %v10891_v13  ;;  %v10894_v25 = vld [vmem:[#allocation43_spill] sm:$0xff] }
 0x51f   :  { %v9392_v30 = vpop.f32.mrf.mxu1  ;;  %v2390_v43 = vadd.f32 %v9384_v33, %v10894_v25  ;;  %v2851_v24 = vadd.f32 %v9156_v31, %v2697_v27  ;;  %v7977_v10 = vld [vmem:[%s10713_s3 + $0x330] sm:$0xff]  ;;  %v7939_v27 = vld [vmem:[%s10713_s3 + $0x200] sm:$0xff]  ;;  %v7976_v25 = vld [vmem:[%s10713_s3 + $0x328] sm:$0xff] }
 0x520   :  { %4189 = vmatpush.bf16.msra.mxu1 %v7977_v10  ;;  %3575 = vmatpush.bf16.msra.mxu3 %v7939_v27  ;;  %v7958_v10 = vld [vmem:[%s10713_s3 + $0x298] sm:$0xff]  ;;  %v10899_v27 = vld [vmem:[#allocation45_spill] sm:$0xff] }
 0x524   :  { %v2974_v46 = vpop.f32.mrf.mxu2  ;;  %v2671_v5 = vpop.f32.mrf.mxu3  ;;  %4190 = vmatpush.bf16.msra.mxu1 %v7976_v25 }
 0x525   :  { %v9399_v48 = vadd.f32 %v2974_v46, %v2850_v56  ;;  %v10895_v56 = vld [vmem:[#allocation57_spill] sm:$0xff] }
 0x526   :  { %v2544_v46 = vadd.f32 %v10895_v56, %v2390_v43 }
 0x527   :  { %v9401_v21 = vpop.f32.mrf.mxu1 }
 0x528   :  { %v2698_v19 = vadd.f32 %v2671_v5, %v2544_v46  ;;  %v7959_v5 = vld [vmem:[%s10713_s3 + $0x2a0] sm:$0xff] }
 0x529   :  { %3441 = vmatmul.bf16.gmra.mxu2 %v10889_v17  ;;  %3136 = vmatmul.bf16.gmra.mxu3 %v10893_v14  ;;  %v7961_v17 = vld [vmem:[%s10713_s3 + $0x2b0] sm:$0xff]  ;;  %v7975_v46 = vld [vmem:[%s10713_s3 + $0x320] sm:$0xff] }
 0x52a   :  { %3751 = vmatmul.bf16.gmra.mxu1 %v10892_v35  ;;  %v10896_v35 = vld [vmem:[#allocation59_spill] sm:$0xff]  ;;  %3879 = vmatpush.bf16.msra.mxu2 %v7961_v17  ;;  %v2852_v43 = vadd.f32 %v9174_v61, %v2698_v19  ;;  %v10897_v17 = vld [vmem:[#allocation34_spill] sm:$0xff]  ;;  %v10898_v61 = vld [vmem:[#allocation37_spill] sm:$0xff] }
 0x52b   :  { %4191 = vmatpush.bf16.msra.mxu1 %v7975_v46  ;;  %v10900_v19 = vld [vmem:[#allocation44_spill] sm:$0xff] }
 0x52c   :  { %v2977_v3 = vpop.f32.mrf.mxu2  ;;  %v2674_v40 = vpop.f32.mrf.mxu3 }
 0x52d   :  { %v9420_v29 = vadd.f32 %v2977_v3, %v2851_v24  ;;  %v2699_v31 = vadd.f32 %v2674_v40, %v10896_v35  ;;  %v7974_v35 = vld [vmem:[%s10713_s3 + $0x318] sm:$0xff] }
 0x52e   :  { %3880 = vmatpush.bf16.msra.mxu2 %v7960_v50  ;;  %v2392_v50 = vadd.f32 %v9384_v33, %v10900_v19  ;;  %v7972_v19 = vld [vmem:[%s10713_s3 + $0x308] sm:$0xff] }
 0x52f   :  { %v9428_v13 = vpop.f32.mrf.mxu1  ;;  %v2853_v25 = vadd.f32 %v9190_v7, %v2699_v31  ;;  %4192 = vmatpush.bf16.msra.mxu1 %v7974_v35  ;;  %v7970_v31 = vld [vmem:[%s10713_s3 + $0x2f8] sm:$0xff]  ;;  %v7956_v35 = vld [vmem:[%s10713_s3 + $0x288] sm:$0xff] }
 0x530   :  { %4033 = vmatpush.bf16.msrb.mxu3 %v7970_v31  ;;  %v10905_v31 = vld [vmem:[#allocation49_spill] sm:$0xff] }
 0x532   :  { %3881 = vmatpush.bf16.msra.mxu2 %v7959_v5 }
 0x533   :  { %4193 = vmatpush.bf16.msra.mxu1 %v7973_v11  ;;  %v7955_v11 = vld [vmem:[%s10713_s3 + $0x280] sm:$0xff] }
 0x534   :  { %v2979_v24 = vpop.f32.mrf.mxu2  ;;  %v2676_v56 = vpop.f32.mrf.mxu3 }
 0x535   :  { %v9441_v3 = vadd.f32 %v2979_v24, %v2852_v43  ;;  %v10901_v24 = vld [vmem:[#allocation61_spill] sm:$0xff] }
 0x536   :  { %3882 = vmatpush.bf16.msra.mxu2 %v7958_v10  ;;  %v2546_v5 = vadd.f32 %v10901_v24, %v2392_v50 }
 0x537   :  { %v9449_v40 = vpop.f32.mrf.mxu1  ;;  %4194 = vmatpush.bf16.msra.mxu1 %v7972_v19 }
 0x538   :  { %v2700_v10 = vadd.f32 %v2676_v56, %v2546_v5  ;;  %v7971_v56 = vld [vmem:[%s10713_s3 + $0x300] sm:$0xff]  ;;  %v10904_v5 = vld [vmem:[#allocation47_spill] sm:$0xff] }
 0x539   :  { %3446 = vmatmul.bf16.gmra.mxu2 %v10897_v17  ;;  %3141 = vmatmul.bf16.gmra.mxu3 %v10899_v27  ;;  %v7957_v17 = vld [vmem:[%s10713_s3 + $0x290] sm:$0xff] }
 0x53a   :  { %3756 = vmatmul.bf16.gmra.mxu1 %v10898_v61  ;;  %3883 = vmatpush.bf16.msra.mxu2 %v7957_v17  ;;  %v2854_v50 = vadd.f32 %v9218_v26, %v2700_v10  ;;  %v10903_v26 = vld [vmem:[#allocation60_spill] sm:$0xff]  ;;  %v2394_v10 = vadd.f32 %v9384_v33, %v9238_v6 }
 0x53b   :  { %4195 = vmatpush.bf16.msra.mxu1 %v7971_v56 }
 0x53c   :  { %v2982_v43 = vpop.f32.mrf.mxu2  ;;  %v2679_v61 = vpop.f32.mrf.mxu3 }
 0x53d   :  { %v9464_v46 = vadd.f32 %v2982_v43, %v2853_v25  ;;  %v2701_v7 = vadd.f32 %v2679_v61, %v9117_v58  ;;  %v10902_v43 = vld [vmem:[#allocation50_spill] sm:$0xff] }
 0x53e   :  { %3884 = vmatpush.bf16.msra.mxu2 %v7956_v35  ;;  %v9497_v24 = vpack.c.bf16 %v10903_v26, %v10902_v43  ;;  %v7969_v26 = vld [vmem:[%s10713_s3 + $0x2f0] sm:$0xff] }
 0x53f   :  { %v9472_v34 = vpop.f32.mrf.mxu1  ;;  %v2855_v35 = vadd.f32 %v9236_v59, %v2701_v7  ;;  %4034 = vmatpush.bf16.msrb.mxu3 %v7969_v26  ;;  %v9515_v59 = vld [vmem:[#allocation3 + $0x142] sm:$0xff] }
 0x540   :  { %v2211_v7 = vld [vmem:[#allocation3 + $0x144] sm:$0xff] }
 0x542   :  { %3885 = vmatpush.bf16.msra.mxu2 %v7955_v11 }
 0x544   :  { %v2984_v58 = vpop.f32.mrf.mxu2  ;;  %v2681_v25 = vpop.f32.mrf.mxu3 }
 0x545   :  { %v9485_v61 = vadd.f32 %v2984_v58, %v2854_v50  ;;  %v2548_v50 = vadd.f32 %v9266_v54, %v2394_v10 }
 0x547   :  { %v9493_v17 = vpop.f32.mrf.mxu1 }
 0x549   :  { %3451 = vmatmul.bf16.gmra.mxu2 %v10904_v5  ;;  %3146 = vmatmul.bf16.gmra.mxu3 %v9497_v24  ;;  %v2102_v5 = vld [vmem:[#allocation3 + $0x92] sm:$0xff] }
 0x54a   :  { %3761 = vmatmul.bf16.gmra.mxu1 %v10905_v31  ;;  %v2702_v31 = vadd.f32 %v2681_v25, %v2548_v50  ;;  %v9527_v25 = vpack.c.bf16 %v2211_v7, %v9268_v42  ;;  %v7968_v42 = vld [vmem:[%s10713_s3 + $0x2e8] sm:$0xff] }
 0x54b   :  { %4035 = vmatpush.bf16.msrb.mxu3 %v7968_v42 }
 0x54c   :  { %v2987_v19 = vpop.f32.mrf.mxu2  ;;  %v2684_v11 = vpop.f32.mrf.mxu3  ;;  %v2856_v6 = vadd.f32 %v9260_v36, %v2702_v31  ;;  %10907 = vst [vmem:[#allocation20_spill] sm:$0xff] %v9527_v25  ;;  %v10908_v36 = vld [vmem:[#allocation6_spill] sm:$0xff]  ;;  %v10909_v31 = vld [vmem:[#allocation5_spill] sm:$0xff] }
 0x54d   :  { %v9506_v58 = vadd.f32 %v2987_v19, %v2855_v35  ;;  %v2703_v43 = vadd.f32 %v2684_v11, %v9285_v57  ;;  %v9524_v57 = vpack.c.bf16 %v9515_v59, %v9240_v20  ;;  %v10910_v50 = vpack.c.bf16 %v10908_v36, %v10909_v31 }
 0x54f   :  { %v9508_v56 = vpop.f32.mrf.mxu1  ;;  %10906 = vst [vmem:[#allocation22_spill] sm:$0xff] %v9524_v57  ;;  %v2857_v11 = vadd.f32 %v9270_v37, %v2703_v43 }
 0x554   :  { %v2989_v33 = vpop.f32.mrf.mxu2  ;;  %v2686_v10 = vpop.f32.mrf.mxu3 }
 0x555   :  { %v9517_v54 = vadd.f32 %v2989_v33, %v2856_v6  ;;  %v2704_v19 = vadd.f32 %v2686_v10, %v9294_v41 }
 0x557   :  { %v9519_v35 = vpop.f32.mrf.mxu1  ;;  %v2858_v7 = vadd.f32 %v9287_v16, %v2704_v19 }
 0x559   :  { %3456 = vmatmul.bf16.gmra.mxu2 %v9524_v57  ;;  %3576 = vmatmul.bf16.vlgmr.msra.gmra.mxu3 %v10910_v50  ;;  %v10911_v50 = vld [vmem:[#allocation7_spill] sm:$0xff]  ;;  %v10918_v57 = vld [vmem:[#allocation65_spill] sm:$0xff] }
 0x55a   :  { %3766 = vmatmul.bf16.gmra.mxu1 %v9527_v25 }
 0x55c   :  { %v2992_v26 = vpop.f32.mrf.mxu2  ;;  %v3112_v41 = vpop.f32.mrf.mxu3 }
 0x55d   :  { %v9535_v6 = vadd.f32 %v2992_v26, %v2857_v11  ;;  %v3152_v20 = vadd.f32 %v3112_v41, %v9309_v39  ;;  %v10912_v11 = vld [vmem:[#allocation58_spill] sm:$0xff]  ;;  %v10913_v39 = vld [vmem:[#allocation9_spill] sm:$0xff] }
 0x55f   :  { %v9537_v33 = vpop.f32.mrf.mxu1  ;;  %v3307_v26 = vadd.f32 %v9296_v1, %v3152_v20 }
 0x564   :  { %v2994_v10 = vpop.f32.mrf.mxu2  ;;  %v3114_v31 = vpop.f32.mrf.mxu3 }
 0x565   :  { %v9544_v36 = vadd.f32 %v2994_v10, %v2858_v7  ;;  %v3153_v43 = vadd.f32 %v3114_v31, %v9318_v49  ;;  %v7967_v49 = vld [vmem:[%s10713_s3 + $0x2e0] sm:$0xff] }
 0x566   :  { %4036 = vmatpush.bf16.msrb.mxu3 %v7967_v49 }
 0x567   :  { %v9546_v37 = vpop.f32.mrf.mxu1  ;;  %v3308_v10 = vadd.f32 %v9311_v47, %v3153_v43 }
 0x569   :  { %3886 = vmatmul.bf16.vlgmr.msra.gmra.mxu2 %v10911_v50  ;;  %3581 = vmatmul.bf16.gmra.mxu3 %v10913_v39 }
 0x56a   :  { %4196 = vmatmul.bf16.vlgmr.msra.gmra.mxu1 %v10912_v11 }
 0x56c   :  { %v3422_v41 = vpop.f32.mrf.mxu2  ;;  %v3117_v16 = vpop.f32.mrf.mxu3 }
 0x56d   :  { %v9553_v42 = vadd.f32 %v3422_v41, %v3307_v26  ;;  %v3154_v7 = vadd.f32 %v3117_v16, %v9329_v12  ;;  %v10914_v26 = vld [vmem:[#allocation12_spill] sm:$0xff]  ;;  %v10915_v41 = vld [vmem:[#allocation63_spill] sm:$0xff] }
 0x56e   :  { %v10916_v12 = vld [vmem:[#allocation16_spill] sm:$0xff] }
 0x56f   :  { %v9555_v19 = vpop.f32.mrf.mxu1  ;;  %v3309_v16 = vadd.f32 %v9320_v62, %v3154_v7  ;;  %v9582_v62 = vld [vmem:[#allocation3 + $0x83] sm:$0xff] }
 0x574   :  { %v3424_v31 = vpop.f32.mrf.mxu2  ;;  %v3119_v11 = vpop.f32.mrf.mxu3 }
 0x575   :  { %v9562_v50 = vadd.f32 %v3424_v31, %v3308_v10  ;;  %v3155_v20 = vadd.f32 %v3119_v11, %v9338_v22  ;;  %v7966_v22 = vld [vmem:[%s10713_s3 + $0x2d8] sm:$0xff] }
 0x576   :  { %4037 = vmatpush.bf16.msrb.mxu3 %v7966_v22 }
 0x577   :  { %v9564_v1 = vpop.f32.mrf.mxu1  ;;  %v3310_v31 = vadd.f32 %v9331_v55, %v3155_v20 }
 0x579   :  { %3891 = vmatmul.bf16.gmra.mxu2 %v10914_v26  ;;  %3586 = vmatmul.bf16.gmra.mxu3 %v10916_v12 }
 0x57a   :  { %4201 = vmatmul.bf16.gmra.mxu1 %v10915_v41 }
 0x57c   :  { %v3427_v25 = vpop.f32.mrf.mxu2  ;;  %v3122_v47 = vpop.f32.mrf.mxu3 }
 0x57d   :  { %v9571_v49 = vadd.f32 %v3427_v25, %v3309_v16  ;;  %v3156_v10 = vadd.f32 %v3122_v47, %v9354_v23  ;;  %v8120_v16 = vld [vmem:[#allocation3 + $0x73] sm:$0xff]  ;;  %v10917_v47 = vld [vmem:[#allocation18_spill] sm:$0xff] }
 0x57e   :  { %v9588_v23 = vpack.c.bf16 %v9582_v62, %v8120_v16 }
 0x57f   :  { %v9573_v43 = vpop.f32.mrf.mxu1  ;;  %v3311_v55 = vadd.f32 %v9342_v60, %v3156_v10 }
 0x584   :  { %v3429_v11 = vpop.f32.mrf.mxu2  ;;  %v3124_v26 = vpop.f32.mrf.mxu3 }
 0x585   :  { %v9580_v41 = vadd.f32 %v3429_v11, %v3310_v31  ;;  %v3157_v7 = vadd.f32 %v3124_v26, %v9365_v32  ;;  %v7965_v26 = vld [vmem:[%s10713_s3 + $0x2d0] sm:$0xff] }
 0x586   :  { %4038 = vmatpush.bf16.msrb.mxu3 %v7965_v26 }
 0x587   :  { %v9584_v25 = vpop.f32.mrf.mxu1  ;;  %v3312_v16 = vadd.f32 %v9356_v53, %v3157_v7  ;;  %v10921_v53 = vld [vmem:[#allocation24_spill] sm:$0xff]  ;;  %v10922_v7 = vld [vmem:[#allocation21_spill] sm:$0xff] }
 0x589   :  { %3896 = vmatmul.bf16.gmra.mxu2 %v10917_v47  ;;  %3591 = vmatmul.bf16.gmra.mxu3 %v9588_v23  ;;  %v9603_v47 = vld [vmem:[#allocation3 + $0x90] sm:$0xff] }
 0x58a   :  { %4206 = vmatmul.bf16.gmra.mxu1 %v10918_v57 }
 0x58c   :  { %v3432_v20 = vpop.f32.mrf.mxu2  ;;  %v3127_v31 = vpop.f32.mrf.mxu3 }
 0x58d   :  { %v9594_v22 = vadd.f32 %v3432_v20, %v3311_v55  ;;  %v3158_v32 = vadd.f32 %v3127_v31, %v9390_v18  ;;  %v9612_v18 = vpack.c.bf16 %v9603_v47, %v9340_v0  ;;  %v9615_v31 = vpack.c.bf16 %v2102_v5, %v9363_v51  ;;  %v7964_v51 = vld [vmem:[%s10713_s3 + $0x2c8] sm:$0xff] }
 0x58e   :  { %4039 = vmatpush.bf16.msrb.mxu3 %v7964_v51 }
 0x58f   :  { %v9596_v11 = vpop.f32.mrf.mxu1  ;;  %10919 = vst [vmem:[#allocation40_spill] sm:$0xff] %v9612_v18  ;;  %v3313_v26 = vadd.f32 %v9367_v63, %v3158_v32 }
 0x590   :  { %10920 = vst [vmem:[#allocation53_spill] sm:$0xff] %v9615_v31 }
 0x594   :  { %v3434_v57 = vpop.f32.mrf.mxu2  ;;  %v3129_v10 = vpop.f32.mrf.mxu3 }
 0x595   :  { %v9605_v60 = vadd.f32 %v3434_v57, %v3312_v16  ;;  %v3159_v20 = vadd.f32 %v3129_v10, %v9399_v48  ;;  %v10923_v57 = vpack.c.bf16 %v10921_v53, %v10922_v7 }
 0x597   :  { %v9607_v55 = vpop.f32.mrf.mxu1  ;;  %v3314_v5 = vadd.f32 %v9392_v30, %v3159_v20  ;;  %v8002_v30 = vld [vmem:[%s10713_s3 + $0x3f8] sm:$0xff]  ;;  %v10925_v20 = vld [vmem:[#allocation35_spill] sm:$0xff] }
 0x598   :  { %4653 = vmatpush.bf16.msrb.mxu1 %v8002_v30 }
 0x599   :  { %3901 = vmatmul.bf16.gmra.mxu2 %v9612_v18  ;;  %3596 = vmatmul.bf16.gmra.mxu3 %v10923_v57  ;;  %v10924_v57 = vld [vmem:[#allocation28_spill] sm:$0xff] }
 0x59a   :  { %4211 = vmatmul.bf16.gmra.mxu1 %v9615_v31 }
 0x59c   :  { %v3437_v16 = vpop.f32.mrf.mxu2  ;;  %v3132_v48 = vpop.f32.mrf.mxu3 }
 0x59d   :  { %v9623_v28 = vadd.f32 %v3437_v16, %v3313_v26  ;;  %v3160_v0 = vadd.f32 %v3132_v48, %v9420_v29  ;;  %v7986_v29 = vld [vmem:[%s10713_s3 + $0x378] sm:$0xff]  ;;  %v8001_v48 = vld [vmem:[%s10713_s3 + $0x3f0] sm:$0xff] }
 0x59e   :  { %4343 = vmatpush.bf16.msrb.mxu2 %v7986_v29  ;;  %4654 = vmatpush.bf16.msrb.mxu1 %v8001_v48  ;;  %v7982_v48 = vld [vmem:[%s10713_s3 + $0x358] sm:$0xff] }
 0x59f   :  { %v9625_v10 = vpop.f32.mrf.mxu1 }
 0x5a4   :  { %v3439_v31 = vpop.f32.mrf.mxu2  ;;  %v3134_v7 = vpop.f32.mrf.mxu3 }
 0x5a5   :  { %v9632_v53 = vadd.f32 %v3439_v31, %v3314_v5  ;;  %v3161_v32 = vadd.f32 %v3134_v7, %v9441_v3  ;;  %v3315_v31 = vadd.f32 %v9401_v21, %v3160_v0  ;;  %v7963_v21 = vld [vmem:[%s10713_s3 + $0x2c0] sm:$0xff]  ;;  %v7984_v0 = vld [vmem:[%s10713_s3 + $0x368] sm:$0xff] }
 0x5a6   :  { %v8000_v7 = vld [vmem:[%s10713_s3 + $0x3e8] sm:$0xff]  ;;  %4040 = vmatpush.bf16.msrb.mxu3 %v7963_v21  ;;  %v7998_v21 = vld [vmem:[%s10713_s3 + $0x3d8] sm:$0xff] }
 0x5a7   :  { %v9634_v63 = vpop.f32.mrf.mxu1  ;;  %4655 = vmatpush.bf16.msrb.mxu1 %v8000_v7 }
 0x5a9   :  { %3906 = vmatmul.bf16.gmra.mxu2 %v10924_v57  ;;  %3601 = vmatmul.bf16.gmra.mxu3 %v10925_v20  ;;  %v3316_v57 = vadd.f32 %v9428_v13, %v3161_v32  ;;  %v10926_v13 = vld [vmem:[#allocation38_spill] sm:$0xff]  ;;  %v10927_v32 = vld [vmem:[#allocation69_spill] sm:$0xff] }
 0x5aa   :  { %4216 = vmatmul.bf16.gmra.mxu1 %v9163_v52  ;;  %v7985_v52 = vld [vmem:[%s10713_s3 + $0x370] sm:$0xff] }
 0x5ab   :  { %4344 = vmatpush.bf16.msrb.mxu2 %v7985_v52 }
 0x5ac   :  { %v3442_v26 = vpop.f32.mrf.mxu2  ;;  %v3137_v16 = vpop.f32.mrf.mxu3 }
 0x5ad   :  { %v9647_v3 = vadd.f32 %v3442_v26, %v3315_v31  ;;  %v3162_v5 = vadd.f32 %v3137_v16, %v9464_v46  ;;  %v7983_v31 = vld [vmem:[%s10713_s3 + $0x360] sm:$0xff] }
 0x5ae   :  { %v7999_v26 = vld [vmem:[%s10713_s3 + $0x3e0] sm:$0xff] }
 0x5af   :  { %v9655_v51 = vpop.f32.mrf.mxu1  ;;  %4345 = vmatpush.bf16.msrb.mxu2 %v7984_v0  ;;  %4656 = vmatpush.bf16.msrb.mxu1 %v7999_v26  ;;  %v10928_v0 = vld [vmem:[#allocation48_spill] sm:$0xff]  ;;  %v3317_v7 = vadd.f32 %v9449_v40, %v3162_v5  ;;  %v7980_v5 = vld [vmem:[%s10713_s3 + $0x348] sm:$0xff] }
 0x5b0   :  { %v7994_v40 = vld [vmem:[%s10713_s3 + $0x3b8] sm:$0xff] }
 0x5b1   :  { %4498 = vmatpush.bf16.msra.mxu3 %v7994_v40 }
 0x5b3   :  { %4346 = vmatpush.bf16.msrb.mxu2 %v7983_v31  ;;  %4657 = vmatpush.bf16.msrb.mxu1 %v7998_v21  ;;  %v7997_v31 = vld [vmem:[%s10713_s3 + $0x3d0] sm:$0xff] }
 0x5b4   :  { %v3444_v46 = vpop.f32.mrf.mxu2  ;;  %v3139_v30 = vpop.f32.mrf.mxu3 }
 0x5b5   :  { %v9668_v29 = vadd.f32 %v3444_v46, %v3316_v57  ;;  %v3163_v52 = vadd.f32 %v3139_v30, %v9485_v61  ;;  %v7981_v30 = vld [vmem:[%s10713_s3 + $0x350] sm:$0xff] }
 0x5b7   :  { %v9676_v16 = vpop.f32.mrf.mxu1  ;;  %4347 = vmatpush.bf16.msrb.mxu2 %v7982_v48  ;;  %4658 = vmatpush.bf16.msrb.mxu1 %v7997_v31  ;;  %v7996_v48 = vld [vmem:[%s10713_s3 + $0x3c8] sm:$0xff]  ;;  %v3318_v21 = vadd.f32 %v9472_v34, %v3163_v52  ;;  %v7995_v31 = vld [vmem:[%s10713_s3 + $0x3c0] sm:$0xff]  ;;  %v8121_v52 = vld [vmem:[#allocation3 + $0x133] sm:$0xff] }
 0x5b9   :  { %3911 = vmatmul.bf16.gmra.mxu2 %v10926_v13  ;;  %3606 = vmatmul.bf16.gmra.mxu3 %v10928_v0 }
 0x5ba   :  { %4221 = vmatmul.bf16.gmra.mxu1 %v10927_v32 }
 0x5bb   :  { %4348 = vmatpush.bf16.msrb.mxu2 %v7981_v30  ;;  %4659 = vmatpush.bf16.msrb.mxu1 %v7996_v48  ;;  %v7979_v30 = vld [vmem:[%s10713_s3 + $0x340] sm:$0xff]  ;;  %v10930_v48 = vld [vmem:[#allocation71_spill] sm:$0xff] }
 0x5bc   :  { %v3447_v61 = vpop.f32.mrf.mxu2  ;;  %v3142_v46 = vpop.f32.mrf.mxu3 }
 0x5bd   :  { %v9689_v57 = vadd.f32 %v3447_v61, %v3317_v7  ;;  %v3164_v32 = vadd.f32 %v3142_v46, %v9506_v58  ;;  %v9712_v46 = vld [vmem:[#allocation3 + $0x143] sm:$0xff] }
 0x5be   :  { %v9724_v40 = vpack.c.bf16 %v9712_v46, %v8121_v52  ;;  %v9739_v52 = vld [vmem:[#allocation3 + $0x150] sm:$0xff] }
 0x5bf   :  { %v9697_v26 = vpop.f32.mrf.mxu1  ;;  %4349 = vmatpush.bf16.msrb.mxu2 %v7980_v5  ;;  %4660 = vmatpush.bf16.msrb.mxu1 %v7995_v31  ;;  %v10929_v5 = vld [vmem:[#allocation51_spill] sm:$0xff] }
 0x5c3   :  { %4350 = vmatpush.bf16.msrb.mxu2 %v7979_v30 }
 0x5c4   :  { %v3449_v58 = vpop.f32.mrf.mxu2  ;;  %v3144_v61 = vpop.f32.mrf.mxu3 }
 0x5c5   :  { %v9710_v7 = vadd.f32 %v3449_v58, %v3318_v21  ;;  %v3165_v34 = vadd.f32 %v3144_v61, %v9517_v54  ;;  %v3319_v21 = vadd.f32 %v9493_v17, %v3164_v32  ;;  %v7993_v61 = vld [vmem:[%s10713_s3 + $0x3b0] sm:$0xff] }
 0x5c6   :  { %4499 = vmatpush.bf16.msra.mxu3 %v7993_v61 }
 0x5c7   :  { %v9720_v13 = vpop.f32.mrf.mxu1  ;;  %v3320_v30 = vadd.f32 %v9508_v56, %v3165_v34  ;;  %v10933_v56 = vld [vmem:[#allocation30_spill] sm:$0xff] }
 0x5c9   :  { %3916 = vmatmul.bf16.gmra.mxu2 %v10929_v5  ;;  %3611 = vmatmul.bf16.gmra.mxu3 %v9724_v40  ;;  %v8122_v5 = vld [vmem:[#allocation3 + $0x140] sm:$0xff] }
 0x5ca   :  { %4226 = vmatmul.bf16.gmra.mxu1 %v10930_v48  ;;  %v2114_v48 = vld [vmem:[#allocation3 + $0x152] sm:$0xff] }
 0x5cc   :  { %v3452_v58 = vpop.f32.mrf.mxu2  ;;  %v3147_v15 = vpop.f32.mrf.mxu3 }
 0x5cd   :  { %v9730_v18 = vadd.f32 %v3452_v58, %v3319_v21  ;;  %v3166_v54 = vadd.f32 %v3147_v15, %v9535_v6  ;;  %v9747_v15 = vpack.c.bf16 %v9739_v52, %v8122_v5  ;;  %v9750_v6 = vpack.c.bf16 %v2114_v48, %v9515_v59  ;;  %v7992_v59 = vld [vmem:[%s10713_s3 + $0x3a8] sm:$0xff] }
 0x5ce   :  { %4500 = vmatpush.bf16.msra.mxu3 %v7992_v59 }
 0x5cf   :  { %v9732_v8 = vpop.f32.mrf.mxu1  ;;  %10931 = vst [vmem:[#allocation56_spill] sm:$0xff] %v9747_v15  ;;  %v3321_v34 = vadd.f32 %v9519_v35, %v3166_v54 }
 0x5d0   :  { %10932 = vst [vmem:[#allocation25_spill] sm:$0xff] %v9750_v6 }
 0x5d4   :  { %v3454_v31 = vpop.f32.mrf.mxu2  ;;  %v3149_v32 = vpop.f32.mrf.mxu3 }
 0x5d5   :  { %v9741_v17 = vadd.f32 %v3454_v31, %v3320_v30  ;;  %v3167_v58 = vadd.f32 %v3149_v32, %v9544_v36 }
 0x5d7   :  { %v9743_v21 = vpop.f32.mrf.mxu1  ;;  %v3322_v48 = vadd.f32 %v9537_v33, %v3167_v58 }
 0x5d9   :  { %3921 = vmatmul.bf16.gmra.mxu2 %v9747_v15  ;;  %4041 = vmatmul.bf16.vlgmr.msrb.gmra.mxu3 %v10933_v56  ;;  %v2006_v15 = vld [vmem:[#allocation3 + $0xa0] sm:$0xff] }
 0x5da   :  { %4231 = vmatmul.bf16.gmra.mxu1 %v9750_v6 }
 0x5dc   :  { %v3457_v61 = vpop.f32.mrf.mxu2  ;;  %v3577_v31 = vpop.f32.mrf.mxu3 }
 0x5dd   :  { %v9756_v30 = vadd.f32 %v3457_v61, %v3321_v34  ;;  %v3617_v5 = vadd.f32 %v3577_v31, %v9553_v42  ;;  %v10934_v34 = vld [vmem:[#allocation8_spill] sm:$0xff] }
 0x5de   :  { %v10935_v42 = vld [vmem:[#allocation32_spill] sm:$0xff] }
 0x5df   :  { %v9758_v36 = vpop.f32.mrf.mxu1  ;;  %v3772_v61 = vadd.f32 %v9546_v37, %v3617_v5 }
 0x5e4   :  { %v3459_v32 = vpop.f32.mrf.mxu2  ;;  %v3579_v56 = vpop.f32.mrf.mxu3 }
 0x5e5   :  { %v9765_v6 = vadd.f32 %v3459_v32, %v3322_v48  ;;  %v3618_v54 = vadd.f32 %v3579_v56, %v9562_v50  ;;  %v7991_v50 = vld [vmem:[%s10713_s3 + $0x3a0] sm:$0xff] }
 0x5e6   :  { %4501 = vmatpush.bf16.msra.mxu3 %v7991_v50 }
 0x5e7   :  { %v9767_v35 = vpop.f32.mrf.mxu1  ;;  %v3773_v32 = vadd.f32 %v9555_v19, %v3618_v54 }
 0x5e9   :  { %4351 = vmatmul.bf16.vlgmr.msrb.gmra.mxu2 %v10934_v34  ;;  %4046 = vmatmul.bf16.gmra.mxu3 %v10935_v42 }
 0x5ea   :  { %4661 = vmatmul.bf16.vlgmr.msrb.gmra.mxu1 %v8400_v44 }
 0x5ec   :  { %v3887_v31 = vpop.f32.mrf.mxu2  ;;  %v3582_v33 = vpop.f32.mrf.mxu3 }
 0x5ed   :  { %v9774_v59 = vadd.f32 %v3887_v31, %v3772_v61  ;;  %v3619_v48 = vadd.f32 %v3582_v33, %v9571_v49  ;;  %v10936_v61 = vld [vmem:[#allocation13_spill] sm:$0xff]  ;;  %v10937_v49 = vld [vmem:[#allocation36_spill] sm:$0xff] }
 0x5ef   :  { %v9776_v58 = vpop.f32.mrf.mxu1  ;;  %v3774_v31 = vadd.f32 %v9564_v1, %v3619_v48  ;;  %v9803_v1 = vld [vmem:[#allocation3 + $0x91] sm:$0xff] }
 0x5f4   :  { %v3889_v44 = vpop.f32.mrf.mxu2  ;;  %v3584_v34 = vpop.f32.mrf.mxu3 }
 0x5f5   :  { %v9783_v56 = vadd.f32 %v3889_v44, %v3773_v32  ;;  %v3620_v5 = vadd.f32 %v3584_v34, %v9580_v41  ;;  %v7990_v41 = vld [vmem:[%s10713_s3 + $0x398] sm:$0xff] }
 0x5f6   :  { %4502 = vmatpush.bf16.msra.mxu3 %v7990_v41 }
 0x5f7   :  { %v9785_v37 = vpop.f32.mrf.mxu1  ;;  %v3775_v44 = vadd.f32 %v9573_v43, %v3620_v5 }
 0x5f9   :  { %4356 = vmatmul.bf16.gmra.mxu2 %v10936_v61  ;;  %4051 = vmatmul.bf16.gmra.mxu3 %v10937_v49 }
 0x5fa   :  { %4666 = vmatmul.bf16.gmra.mxu1 %v8457_v45 }
 0x5fc   :  { %v3892_v33 = vpop.f32.mrf.mxu2  ;;  %v3587_v19 = vpop.f32.mrf.mxu3 }
 0x5fd   :  { %v9792_v50 = vadd.f32 %v3892_v33, %v3774_v31  ;;  %v3621_v32 = vadd.f32 %v3587_v19, %v9594_v22  ;;  %v8123_v33 = vld [vmem:[#allocation3 + $0x81] sm:$0xff]  ;;  %v10939_v19 = vld [vmem:[#allocation19_spill] sm:$0xff] }
 0x5fe   :  { %v9809_v22 = vpack.c.bf16 %v9803_v1, %v8123_v33 }
 0x5ff   :  { %v9794_v54 = vpop.f32.mrf.mxu1  ;;  %v3776_v43 = vadd.f32 %v9584_v25, %v3621_v32 }
 0x600   :  { %10938 = vst [vmem:[#allocation23_spill] sm:$0xff] %v9809_v22 }
 0x604   :  { %v3894_v45 = vpop.f32.mrf.mxu2  ;;  %v3589_v61 = vpop.f32.mrf.mxu3 }
 0x605   :  { %v9801_v34 = vadd.f32 %v3894_v45, %v3775_v44  ;;  %v3622_v31 = vadd.f32 %v3589_v61, %v9605_v60  ;;  %v7989_v61 = vld [vmem:[%s10713_s3 + $0x390] sm:$0xff] }
 0x606   :  { %4503 = vmatpush.bf16.msra.mxu3 %v7989_v61 }
 0x607   :  { %v9805_v48 = vpop.f32.mrf.mxu1  ;;  %v3777_v33 = vadd.f32 %v9596_v11, %v3622_v31  ;;  %v10941_v11 = vld [vmem:[#allocation39_spill] sm:$0xff] }
 0x609   :  { %4361 = vmatmul.bf16.gmra.mxu2 %v10939_v19  ;;  %4056 = vmatmul.bf16.gmra.mxu3 %v9809_v22  ;;  %v9824_v19 = vld [vmem:[#allocation3 + $0x93] sm:$0xff] }
 0x60a   :  { %4671 = vmatmul.bf16.gmra.mxu1 %v9345_v38 }
 0x60c   :  { %v3897_v5 = vpop.f32.mrf.mxu2  ;;  %v3592_v44 = vpop.f32.mrf.mxu3 }
 0x60d   :  { %v9815_v41 = vadd.f32 %v3897_v5, %v3776_v43  ;;  %v3623_v60 = vadd.f32 %v3592_v44, %v9623_v28  ;;  %v9833_v28 = vpack.c.bf16 %v9824_v19, %v9582_v62  ;;  %v4583_v44 = vpack.c.bf16 %v2006_v15, %v9603_v47  ;;  %v7988_v62 = vld [vmem:[%s10713_s3 + $0x388] sm:$0xff] }
 0x60e   :  { %4504 = vmatpush.bf16.msra.mxu3 %v7988_v62  ;;  %v8025_v62 = vld [vmem:[%s10713_s3 + $0x4b0] sm:$0xff] }
 0x60f   :  { %v9817_v45 = vpop.f32.mrf.mxu1  ;;  %10940 = vst [vmem:[#allocation27_spill] sm:$0xff] %v9833_v28  ;;  %v3778_v31 = vadd.f32 %v9607_v55, %v3623_v60 }
 0x614   :  { %v3899_v38 = vpop.f32.mrf.mxu2  ;;  %v3594_v32 = vpop.f32.mrf.mxu3 }
 0x615   :  { %v9826_v25 = vadd.f32 %v3899_v38, %v3777_v33  ;;  %v3624_v5 = vadd.f32 %v3594_v32, %v9632_v53 }
 0x617   :  { %v9828_v43 = vpop.f32.mrf.mxu1  ;;  %v3779_v47 = vadd.f32 %v9625_v10, %v3624_v5  ;;  %v8026_v10 = vld [vmem:[%s10713_s3 + $0x4b8] sm:$0xff]  ;;  %v10943_v5 = vld [vmem:[#allocation42_spill] sm:$0xff] }
 0x618   :  { %5118 = vmatpush.bf16.msra.mxu1 %v8026_v10 }
 0x619   :  { %4366 = vmatmul.bf16.gmra.mxu2 %v9833_v28  ;;  %4061 = vmatmul.bf16.gmra.mxu3 %v10941_v11  ;;  %v10942_v11 = vld [vmem:[#allocation29_spill] sm:$0xff] }
 0x61a   :  { %4676 = vmatmul.bf16.gmra.mxu1 %v4583_v44 }
 0x61c   :  { %v3902_v61 = vpop.f32.mrf.mxu2  ;;  %v3597_v38 = vpop.f32.mrf.mxu3  ;;  %5119 = vmatpush.bf16.msra.mxu1 %v8025_v62  ;;  %v8022_v62 = vld [vmem:[%s10713_s3 + $0x498] sm:$0xff] }
 0x61d   :  { %v9839_v33 = vadd.f32 %v3902_v61, %v3778_v31  ;;  %v3625_v53 = vadd.f32 %v3597_v38, %v9647_v3  ;;  %v8010_v3 = vld [vmem:[%s10713_s3 + $0x438] sm:$0xff] }
 0x61e   :  { %4808 = vmatpush.bf16.msra.mxu2 %v8010_v3 }
 0x61f   :  { %v9841_v22 = vpop.f32.mrf.mxu1  ;;  %v3780_v31 = vadd.f32 %v9634_v63, %v3625_v53  ;;  %v7987_v63 = vld [vmem:[%s10713_s3 + $0x380] sm:$0xff]  ;;  %v8008_v53 = vld [vmem:[%s10713_s3 + $0x428] sm:$0xff] }
 0x620   :  { %4505 = vmatpush.bf16.msra.mxu3 %v7987_v63  ;;  %v10945_v63 = vld [vmem:[#allocation54_spill] sm:$0xff] }
 0x624   :  { %v3904_v15 = vpop.f32.mrf.mxu2  ;;  %v3599_v44 = vpop.f32.mrf.mxu3 }
 0x625   :  { %v9848_v32 = vadd.f32 %v3904_v15, %v3779_v47  ;;  %v3626_v60 = vadd.f32 %v3599_v44, %v9668_v29  ;;  %v8024_v44 = vld [vmem:[%s10713_s3 + $0x4a8] sm:$0xff] }
 0x626   :  { %5120 = vmatpush.bf16.msra.mxu1 %v8024_v44 }
 0x627   :  { %v9850_v55 = vpop.f32.mrf.mxu1 }
 0x629   :  { %4371 = vmatmul.bf16.gmra.mxu2 %v10942_v11  ;;  %4066 = vmatmul.bf16.gmra.mxu3 %v10943_v5  ;;  %v3781_v11 = vadd.f32 %v9655_v51, %v3626_v60  ;;  %v10944_v51 = vld [vmem:[#allocation41_spill] sm:$0xff]  ;;  %v8006_v60 = vld [vmem:[%s10713_s3 + $0x418] sm:$0xff] }
 0x62a   :  { %4681 = vmatmul.bf16.gmra.mxu1 %v10893_v14  ;;  %v8009_v14 = vld [vmem:[%s10713_s3 + $0x430] sm:$0xff] }
 0x62b   :  { %4809 = vmatpush.bf16.msra.mxu2 %v8009_v14 }
 0x62c   :  { %v3907_v61 = vpop.f32.mrf.mxu2  ;;  %v3602_v38 = vpop.f32.mrf.mxu3 }
 0x62d   :  { %v9863_v29 = vadd.f32 %v3907_v61, %v3780_v31  ;;  %v3627_v15 = vadd.f32 %v3602_v38, %v9689_v57  ;;  %v8007_v31 = vld [vmem:[%s10713_s3 + $0x420] sm:$0xff] }
 0x62e   :  { %v8023_v61 = vld [vmem:[%s10713_s3 + $0x4a0] sm:$0xff] }
 0x62f   :  { %v9871_v47 = vpop.f32.mrf.mxu1  ;;  %4810 = vmatpush.bf16.msra.mxu2 %v8008_v53  ;;  %5121 = vmatpush.bf16.msra.mxu1 %v8023_v61  ;;  %v3782_v53 = vadd.f32 %v9676_v16, %v3627_v15  ;;  %v8018_v16 = vld [vmem:[%s10713_s3 + $0x478] sm:$0xff]  ;;  %v8004_v15 = vld [vmem:[%s10713_s3 + $0x408] sm:$0xff] }
 0x630   :  { %v8020_v61 = vld [vmem:[%s10713_s3 + $0x488] sm:$0xff]  ;;  %4963 = vmatpush.bf16.msrb.mxu3 %v8018_v16 }
 0x633   :  { %4811 = vmatpush.bf16.msra.mxu2 %v8007_v31  ;;  %5122 = vmatpush.bf16.msra.mxu1 %v8022_v62 }
 0x634   :  { %v3909_v57 = vpop.f32.mrf.mxu2  ;;  %v3604_v10 = vpop.f32.mrf.mxu3 }
 0x635   :  { %v9884_v3 = vadd.f32 %v3909_v57, %v3781_v11  ;;  %v3628_v14 = vadd.f32 %v3604_v10, %v9710_v7  ;;  %v8021_v57 = vld [vmem:[%s10713_s3 + $0x490] sm:$0xff] }
 0x637   :  { %v9892_v38 = vpop.f32.mrf.mxu1  ;;  %4812 = vmatpush.bf16.msra.mxu2 %v8006_v60  ;;  %5123 = vmatpush.bf16.msra.mxu1 %v8021_v57  ;;  %v3783_v60 = vadd.f32 %v9697_v26, %v3628_v14  ;;  %v8124_v14 = vld [vmem:[#allocation3 + $0x141] sm:$0xff] }
 0x639   :  { %4376 = vmatmul.bf16.gmra.mxu2 %v10944_v51  ;;  %4071 = vmatmul.bf16.gmra.mxu3 %v10945_v63 }
 0x63a   :  { %4686 = vmatmul.bf16.gmra.mxu1 %v10899_v27  ;;  %v8005_v27 = vld [vmem:[%s10713_s3 + $0x410] sm:$0xff] }
 0x63b   :  { %4813 = vmatpush.bf16.msra.mxu2 %v8005_v27  ;;  %5124 = vmatpush.bf16.msra.mxu1 %v8020_v61  ;;  %v8019_v27 = vld [vmem:[%s10713_s3 + $0x480] sm:$0xff] }
 0x63c   :  { %v3912_v7 = vpop.f32.mrf.mxu2  ;;  %v3607_v11 = vpop.f32.mrf.mxu3 }
 0x63d   :  { %v9905_v44 = vadd.f32 %v3912_v7, %v3782_v53  ;;  %v3629_v31 = vadd.f32 %v3607_v11, %v9730_v18  ;;  %v9928_v7 = vld [vmem:[#allocation3 + $0x151] sm:$0xff]  ;;  %v8003_v11 = vld [vmem:[%s10713_s3 + $0x400] sm:$0xff] }
 0x63e   :  { %v9940_v16 = vpack.c.bf16 %v9928_v7, %v8124_v14 }
 0x63f   :  { %v9913_v10 = vpop.f32.mrf.mxu1  ;;  %4814 = vmatpush.bf16.msra.mxu2 %v8004_v15  ;;  %5125 = vmatpush.bf16.msra.mxu1 %v8019_v27  ;;  %v10946_v15 = vld [vmem:[#allocation55_spill] sm:$0xff]  ;;  %v3784_v61 = vadd.f32 %v9720_v13, %v3629_v31 }
 0x640   :  { %v9955_v27 = vld [vmem:[#allocation3 + $0x153] sm:$0xff] }
 0x643   :  { %4815 = vmatpush.bf16.msra.mxu2 %v8003_v11 }
 0x644   :  { %v3914_v18 = vpop.f32.mrf.mxu2  ;;  %v3609_v53 = vpop.f32.mrf.mxu3 }
 0x645   :  { %v9926_v62 = vadd.f32 %v3914_v18, %v3783_v60  ;;  %v3630_v26 = vadd.f32 %v3609_v53, %v9741_v17  ;;  %v8017_v53 = vld [vmem:[%s10713_s3 + $0x470] sm:$0xff] }
 0x646   :  { %4964 = vmatpush.bf16.msrb.mxu3 %v8017_v53 }
 0x647   :  { %v9936_v57 = vpop.f32.mrf.mxu1  ;;  %v3785_v11 = vadd.f32 %v9732_v8, %v3630_v26  ;;  %v10949_v8 = vld [vmem:[#allocation62_spill] sm:$0xff] }
 0x649   :  { %4381 = vmatmul.bf16.gmra.mxu2 %v10946_v15  ;;  %4076 = vmatmul.bf16.gmra.mxu3 %v9940_v16 }
 0x64a   :  { %4691 = vmatmul.bf16.gmra.mxu1 %v9497_v24 }
 0x64c   :  { %v3917_v60 = vpop.f32.mrf.mxu2  ;;  %v3612_v51 = vpop.f32.mrf.mxu3 }
 0x64d   :  { %v9946_v18 = vadd.f32 %v3917_v60, %v3784_v61  ;;  %v3631_v17 = vadd.f32 %v3612_v51, %v9756_v30  ;;  %v9961_v61 = vld [vmem:[#allocation3 + $0x160] sm:$0xff]  ;;  %v9966_v30 = vpack.c.bf16 %v9955_v27, %v9712_v46  ;;  %v8016_v46 = vld [vmem:[%s10713_s3 + $0x468] sm:$0xff] }
 0x64e   :  { %10947 = vst [vmem:[#allocation26_spill] sm:$0xff] %v9961_v61  ;;  %v4587_v51 = vpack.c.bf16 %v9961_v61, %v9739_v52  ;;  %4965 = vmatpush.bf16.msrb.mxu3 %v8016_v46 }
 0x64f   :  { %v9948_v28 = vpop.f32.mrf.mxu1  ;;  %10948 = vst [vmem:[#allocation31_spill] sm:$0xff] %v9966_v30  ;;  %v3786_v26 = vadd.f32 %v9743_v21, %v3631_v17 }
 0x654   :  { %v3919_v24 = vpop.f32.mrf.mxu2  ;;  %v3614_v13 = vpop.f32.mrf.mxu3 }
 0x655   :  { %v9957_v14 = vadd.f32 %v3919_v24, %v3785_v11  ;;  %v3632_v60 = vadd.f32 %v3614_v13, %v9765_v6 }
 0x657   :  { %v9959_v31 = vpop.f32.mrf.mxu1  ;;  %v3787_v52 = vadd.f32 %v9758_v36, %v3632_v60 }
 0x659   :  { %4386 = vmatmul.bf16.gmra.mxu2 %v9966_v30  ;;  %4506 = vmatmul.bf16.vlgmr.msra.gmra.mxu3 %v10949_v8  ;;  %v10043_v30 = vld [vmem:[#allocation3 + $0xa3] sm:$0xff] }
 0x65a   :  { %4696 = vmatmul.bf16.gmra.mxu1 %v4587_v51 }
 0x65c   :  { %v3922_v53 = vpop.f32.mrf.mxu2  ;;  %v4042_v24 = vpop.f32.mrf.mxu3 }
 0x65d   :  { %v9973_v11 = vadd.f32 %v3922_v53, %v3786_v26  ;;  %v4082_v6 = vadd.f32 %v4042_v24, %v9774_v59  ;;  %v10950_v26 = vld [vmem:[#allocation10_spill] sm:$0xff]  ;;  %v10951_v59 = vld [vmem:[#allocation64_spill] sm:$0xff] }
 0x65f   :  { %v9975_v15 = vpop.f32.mrf.mxu1  ;;  %v4237_v53 = vadd.f32 %v9767_v35, %v4082_v6 }
 0x664   :  { %v3924_v13 = vpop.f32.mrf.mxu2  ;;  %v4044_v8 = vpop.f32.mrf.mxu3 }
 0x665   :  { %v9982_v51 = vadd.f32 %v3924_v13, %v3787_v52  ;;  %v4083_v17 = vadd.f32 %v4044_v8, %v9783_v56  ;;  %v8015_v56 = vld [vmem:[%s10713_s3 + $0x460] sm:$0xff] }
 0x666   :  { %4966 = vmatpush.bf16.msrb.mxu3 %v8015_v56 }
 0x667   :  { %v9984_v21 = vpop.f32.mrf.mxu1  ;;  %v4238_v13 = vadd.f32 %v9776_v58, %v4083_v17 }
 0x669   :  { %4816 = vmatmul.bf16.vlgmr.msra.gmra.mxu2 %v10950_v26  ;;  %4511 = vmatmul.bf16.gmra.mxu3 %v10951_v59 }
 0x66a   :  { %5126 = vmatmul.bf16.vlgmr.msra.gmra.mxu1 %v10913_v39 }
 0x66c   :  { %v4352_v24 = vpop.f32.mrf.mxu2  ;;  %v4047_v36 = vpop.f32.mrf.mxu3 }
 0x66d   :  { %v9991_v46 = vadd.f32 %v4352_v24, %v4237_v53  ;;  %v4084_v52 = vadd.f32 %v4047_v36, %v9792_v50  ;;  %v10952_v53 = vld [vmem:[#allocation14_spill] sm:$0xff] }
 0x66e   :  { %v10953_v50 = vld [vmem:[#allocation66_spill] sm:$0xff] }
 0x66f   :  { %v9993_v60 = vpop.f32.mrf.mxu1  ;;  %v4239_v24 = vadd.f32 %v9785_v37, %v4084_v52  ;;  %v10020_v37 = vld [vmem:[#allocation3 + $0x94] sm:$0xff] }
 0x674   :  { %v4354_v39 = vpop.f32.mrf.mxu2  ;;  %v4049_v26 = vpop.f32.mrf.mxu3 }
 0x675   :  { %v10000_v8 = vadd.f32 %v4354_v39, %v4238_v13  ;;  %v4085_v6 = vadd.f32 %v4049_v26, %v9801_v34  ;;  %v8014_v34 = vld [vmem:[%s10713_s3 + $0x458] sm:$0xff] }
 0x676   :  { %4967 = vmatpush.bf16.msrb.mxu3 %v8014_v34 }
 0x677   :  { %v10002_v35 = vpop.f32.mrf.mxu1  ;;  %v4240_v39 = vadd.f32 %v9794_v54, %v4085_v6 }
 0x679   :  { %4821 = vmatmul.bf16.gmra.mxu2 %v10952_v53  ;;  %4516 = vmatmul.bf16.gmra.mxu3 %v10953_v50 }
 0x67a   :  { %5131 = vmatmul.bf16.gmra.mxu1 %v10916_v12 }
 0x67c   :  { %v4357_v36 = vpop.f32.mrf.mxu2  ;;  %v4052_v58 = vpop.f32.mrf.mxu3 }
 0x67d   :  { %v10009_v56 = vadd.f32 %v4357_v36, %v4239_v24  ;;  %v4086_v13 = vadd.f32 %v4052_v58, %v9815_v41  ;;  %v8125_v36 = vld [vmem:[#allocation3 + $0x84] sm:$0xff]  ;;  %v10954_v58 = vld [vmem:[#allocation67_spill] sm:$0xff] }
 0x67e   :  { %v10026_v41 = vpack.c.bf16 %v10020_v37, %v8125_v36 }
 0x67f   :  { %v10011_v17 = vpop.f32.mrf.mxu1  ;;  %v4241_v54 = vadd.f32 %v9805_v48, %v4086_v13 }
 0x684   :  { %v4359_v12 = vpop.f32.mrf.mxu2  ;;  %v4054_v53 = vpop.f32.mrf.mxu3 }
 0x685   :  { %v10018_v26 = vadd.f32 %v4359_v12, %v4240_v39  ;;  %v4087_v24 = vadd.f32 %v4054_v53, %v9826_v25  ;;  %v8013_v53 = vld [vmem:[%s10713_s3 + $0x450] sm:$0xff] }
 0x686   :  { %4968 = vmatpush.bf16.msrb.mxu3 %v8013_v53 }
 0x687   :  { %v10022_v52 = vpop.f32.mrf.mxu1  ;;  %v4242_v36 = vadd.f32 %v9817_v45, %v4087_v24  ;;  %v10955_v45 = vld [vmem:[#allocation68_spill] sm:$0xff] }
 0x689   :  { %4826 = vmatmul.bf16.gmra.mxu2 %v10954_v58  ;;  %4521 = vmatmul.bf16.gmra.mxu3 %v10026_v41  ;;  %v10041_v58 = vld [vmem:[#allocation3 + $0xa1] sm:$0xff] }
 0x68a   :  { %5136 = vmatmul.bf16.gmra.mxu1 %v9588_v23 }
 0x68c   :  { %v4362_v6 = vpop.f32.mrf.mxu2  ;;  %v4057_v39 = vpop.f32.mrf.mxu3 }
 0x68d   :  { %v10032_v34 = vadd.f32 %v4362_v6, %v4241_v54  ;;  %v4088_v25 = vadd.f32 %v4057_v39, %v9839_v33  ;;  %v4738_v33 = vpack.c.bf16 %v10041_v58, %v9803_v1  ;;  %v5048_v39 = vpack.c.bf16 %v10043_v30, %v9824_v19  ;;  %v8012_v1 = vld [vmem:[%s10713_s3 + $0x448] sm:$0xff] }
 0x68e   :  { %4969 = vmatpush.bf16.msrb.mxu3 %v8012_v1  ;;  %v8049_v1 = vld [vmem:[%s10713_s3 + $0x570] sm:$0xff] }
 0x68f   :  { %v10034_v12 = vpop.f32.mrf.mxu1  ;;  %v4243_v24 = vadd.f32 %v9828_v43, %v4088_v25 }
 0x694   :  { %v4364_v23 = vpop.f32.mrf.mxu2  ;;  %v4059_v13 = vpop.f32.mrf.mxu3 }
 0x695   :  { %v10045_v48 = vadd.f32 %v4364_v23, %v4242_v36  ;;  %v4089_v6 = vadd.f32 %v4059_v13, %v9848_v32 }
 0x697   :  { %v10047_v54 = vpop.f32.mrf.mxu1  ;;  %v4244_v19 = vadd.f32 %v9841_v22, %v4089_v6  ;;  %v8050_v22 = vld [vmem:[%s10713_s3 + $0x578] sm:$0xff]  ;;  %v10957_v6 = vld [vmem:[#allocation70_spill] sm:$0xff] }
 0x698   :  { %5583 = vmatpush.bf16.msrb.mxu1 %v8050_v22 }
 0x699   :  { %4831 = vmatmul.bf16.gmra.mxu2 %v4738_v33  ;;  %4526 = vmatmul.bf16.gmra.mxu3 %v10955_v45  ;;  %v10956_v45 = vld [vmem:[#allocation33_spill] sm:$0xff] }
 0x69a   :  { %5141 = vmatmul.bf16.gmra.mxu1 %v5048_v39 }
 0x69c   :  { %v4367_v53 = vpop.f32.mrf.mxu2  ;;  %v4062_v23 = vpop.f32.mrf.mxu3  ;;  %5584 = vmatpush.bf16.msrb.mxu1 %v8049_v1  ;;  %v8046_v1 = vld [vmem:[%s10713_s3 + $0x558] sm:$0xff] }
 0x69d   :  { %v10056_v36 = vadd.f32 %v4367_v53, %v4243_v24  ;;  %v4090_v32 = vadd.f32 %v4062_v23, %v9863_v29  ;;  %v8034_v29 = vld [vmem:[%s10713_s3 + $0x4f8] sm:$0xff] }
 0x69e   :  { %5273 = vmatpush.bf16.msrb.mxu2 %v8034_v29 }
 0x69f   :  { %v10058_v61 = vpop.f32.mrf.mxu1  ;;  %v4245_v24 = vadd.f32 %v9850_v55, %v4090_v32  ;;  %v8011_v55 = vld [vmem:[%s10713_s3 + $0x440] sm:$0xff]  ;;  %v8032_v32 = vld [vmem:[%s10713_s3 + $0x4e8] sm:$0xff] }
 0x6a0   :  { %4970 = vmatpush.bf16.msrb.mxu3 %v8011_v55 }
 0x6a4   :  { %v4369_v13 = vpop.f32.mrf.mxu2  ;;  %v4064_v39 = vpop.f32.mrf.mxu3 }
 0x6a5   :  { %v10065_v33 = vadd.f32 %v4369_v13, %v4244_v19  ;;  %v4091_v25 = vadd.f32 %v4064_v39, %v9884_v3  ;;  %v8048_v39 = vld [vmem:[%s10713_s3 + $0x568] sm:$0xff] }
 0x6a6   :  { %5585 = vmatpush.bf16.msrb.mxu1 %v8048_v39 }
 0x6a7   :  { %v10067_v43 = vpop.f32.mrf.mxu1 }
 0x6a9   :  { %4836 = vmatmul.bf16.gmra.mxu2 %v10956_v45  ;;  %4531 = vmatmul.bf16.gmra.mxu3 %v10957_v6  ;;  %v4246_v45 = vadd.f32 %v9871_v47, %v4091_v25  ;;  %v10958_v47 = vld [vmem:[#allocation46_spill] sm:$0xff]  ;;  %v8030_v25 = vld [vmem:[%s10713_s3 + $0x4d8] sm:$0xff] }
 0x6aa   :  { %5146 = vmatmul.bf16.gmra.mxu1 %v10925_v20  ;;  %v8033_v20 = vld [vmem:[%s10713_s3 + $0x4f0] sm:$0xff] }
 0x6ab   :  { %5274 = vmatpush.bf16.msrb.mxu2 %v8033_v20 }
 0x6ac   :  { %v4372_v53 = vpop.f32.mrf.mxu2  ;;  %v4067_v23 = vpop.f32.mrf.mxu3 }
 0x6ad   :  { %v10080_v3 = vadd.f32 %v4372_v53, %v4245_v24  ;;  %v4092_v13 = vadd.f32 %v4067_v23, %v9905_v44  ;;  %v8031_v24 = vld [vmem:[%s10713_s3 + $0x4e0] sm:$0xff] }
 0x6ae   :  { %v8047_v53 = vld [vmem:[%s10713_s3 + $0x560] sm:$0xff] }
 0x6af   :  { %v10088_v19 = vpop.f32.mrf.mxu1  ;;  %5275 = vmatpush.bf16.msrb.mxu2 %v8032_v32  ;;  %5586 = vmatpush.bf16.msrb.mxu1 %v8047_v53 }
 0x6b3   :  { %5276 = vmatpush.bf16.msrb.mxu2 %v8031_v24  ;;  %5587 = vmatpush.bf16.msrb.mxu1 %v8046_v1  ;;  %v10145_v1 = vld [vmem:[#allocation3 + $0x154] sm:$0xff] }
 0x6b4   :  { %v4374_v44 = vpop.f32.mrf.mxu2  ;;  %v4069_v22 = vpop.f32.mrf.mxu3 }
 0x6b5   :  { %v10101_v29 = vadd.f32 %v4374_v44, %v4246_v45  ;;  %v4093_v23 = vadd.f32 %v4069_v22, %v9926_v62  ;;  %v4247_v62 = vadd.f32 %v9892_v38, %v4092_v13  ;;  %v8045_v45 = vld [vmem:[%s10713_s3 + $0x550] sm:$0xff]  ;;  %v8042_v38 = vld [vmem:[%s10713_s3 + $0x538] sm:$0xff]  ;;  %v8028_v13 = vld [vmem:[%s10713_s3 + $0x4c8] sm:$0xff] }
 0x6b6   :  { %v8044_v22 = vld [vmem:[%s10713_s3 + $0x548] sm:$0xff]  ;;  %5428 = vmatpush.bf16.msra.mxu3 %v8042_v38 }
 0x6b7   :  { %v10110_v20 = vpop.f32.mrf.mxu1  ;;  %5277 = vmatpush.bf16.msrb.mxu2 %v8030_v25  ;;  %5588 = vmatpush.bf16.msrb.mxu1 %v8045_v45  ;;  %v4248_v53 = vadd.f32 %v9913_v10, %v4093_v23  ;;  %v8126_v10 = vld [vmem:[#allocation3 + $0x144] sm:$0xff] }
 0x6b8   :  { %v10155_v23 = vpack.c.bf16 %v10145_v1, %v8126_v10 }
 0x6b9   :  { %4841 = vmatmul.bf16.gmra.mxu2 %v10958_v47  ;;  %4536 = vmatmul.bf16.gmra.mxu3 %v9274_v9 }
 0x6ba   :  { %5151 = vmatmul.bf16.gmra.mxu1 %v10928_v0  ;;  %v8029_v0 = vld [vmem:[%s10713_s3 + $0x4d0] sm:$0xff] }
 0x6bb   :  { %5278 = vmatpush.bf16.msrb.mxu2 %v8029_v0  ;;  %5589 = vmatpush.bf16.msrb.mxu1 %v8044_v22 }
 0x6bc   :  { %v4377_v55 = vpop.f32.mrf.mxu2  ;;  %v4072_v39 = vpop.f32.mrf.mxu3 }
 0x6bd   :  { %v10122_v32 = vadd.f32 %v4377_v55, %v4247_v62  ;;  %v4094_v44 = vadd.f32 %v4072_v39, %v9946_v18  ;;  %v8027_v62 = vld [vmem:[%s10713_s3 + $0x4c0] sm:$0xff] }
 0x6be   :  { %v8043_v55 = vld [vmem:[%s10713_s3 + $0x540] sm:$0xff] }
 0x6bf   :  { %v10140_v24 = vpop.f32.mrf.mxu1  ;;  %5279 = vmatpush.bf16.msrb.mxu2 %v8028_v13  ;;  %5590 = vmatpush.bf16.msrb.mxu1 %v8043_v55  ;;  %v4249_v45 = vadd.f32 %v9936_v57, %v4094_v44  ;;  %v10174_v57 = vld [vmem:[#allocation3 + $0x161] sm:$0xff] }
 0x6c0   :  { %v10176_v44 = vld [vmem:[#allocation3 + $0x163] sm:$0xff] }
 0x6c1   :  { %v5052_v10 = vpack.c.bf16 %v10176_v44, %v9955_v27 }
 0x6c3   :  { %5280 = vmatpush.bf16.msrb.mxu2 %v8027_v62 }
 0x6c4   :  { %v4379_v18 = vpop.f32.mrf.mxu2  ;;  %v4074_v25 = vpop.f32.mrf.mxu3 }
 0x6c5   :  { %v10143_v47 = vadd.f32 %v4379_v18, %v4248_v53  ;;  %v4095_v39 = vadd.f32 %v4074_v25, %v9957_v14  ;;  %v8041_v53 = vld [vmem:[%s10713_s3 + $0x530] sm:$0xff] }
 0x6c6   :  { %5429 = vmatpush.bf16.msra.mxu3 %v8041_v53 }
 0x6c7   :  { %v10160_v0 = vpop.f32.mrf.mxu1 }
 0x6c9   :  { %4846 = vmatmul.bf16.gmra.mxu2 %v9277_v2  ;;  %4541 = vmatmul.bf16.gmra.mxu3 %v10155_v23  ;;  %v4250_v2 = vadd.f32 %v9948_v28, %v4095_v39 }
 0x6ca   :  { %5156 = vmatmul.bf16.gmra.mxu1 %v9724_v40 }
 0x6cc   :  { %v4382_v38 = vpop.f32.mrf.mxu2  ;;  %v4077_v14 = vpop.f32.mrf.mxu3 }
 0x6cd   :  { %v10163_v13 = vadd.f32 %v4382_v38, %v4249_v45  ;;  %v4096_v22 = vadd.f32 %v4077_v14, %v9973_v11  ;;  %v4742_v11 = vpack.c.bf16 %v10174_v57, %v9928_v7 }
 0x6cf   :  { %v10170_v18 = vpop.f32.mrf.mxu1  ;;  %v4251_v28 = vadd.f32 %v9959_v31, %v4096_v22 }
 0x6d4   :  { %v4384_v40 = vpop.f32.mrf.mxu2  ;;  %v4079_v62 = vpop.f32.mrf.mxu3 }
 0x6d5   :  { %v10172_v25 = vadd.f32 %v4384_v40, %v4250_v2  ;;  %v4097_v55 = vadd.f32 %v4079_v62, %v9982_v51  ;;  %v8040_v51 = vld [vmem:[%s10713_s3 + $0x528] sm:$0xff]  ;;  %v10959_v40 = vld [vmem:[#allocation11_spill] sm:$0xff] }
 0x6d6   :  { %5430 = vmatpush.bf16.msra.mxu3 %v8040_v51 }
 0x6d7   :  { %v10191_v7 = vpop.f32.mrf.mxu1  ;;  %v4252_v27 = vadd.f32 %v9975_v15, %v4097_v55 }
 0x6d9   :  { %4851 = vmatmul.bf16.gmra.mxu2 %v4742_v11  ;;  %4971 = vmatmul.bf16.vlgmr.msrb.gmra.mxu3 %v8410_v4 }
 0x6da   :  { %5161 = vmatmul.bf16.gmra.mxu1 %v5052_v10 }
 0x6dc   :  { %v4387_v39 = vpop.f32.mrf.mxu2  ;;  %v4507_v38 = vpop.f32.mrf.mxu3 }
 0x6dd   :  { %v10185_v45 = vadd.f32 %v4387_v39, %v4251_v28  ;;  %v4547_v14 = vadd.f32 %v4507_v38, %v9991_v46  ;;  %v10960_v46 = vld [vmem:[#allocation15_spill] sm:$0xff] }
 0x6df   :  { %v10197_v22 = vpop.f32.mrf.mxu1  ;;  %v4702_v62 = vadd.f32 %v9984_v21, %v4547_v14  ;;  %v10961_v14 = vld [vmem:[#allocation17_spill] sm:$0xff] }
 0x6e4   :  { %v4389_v53 = vpop.f32.mrf.mxu2  ;;  %v4509_v4 = vpop.f32.mrf.mxu3 }
 0x6e5   :  { %v10194_v2 = vadd.f32 %v4389_v53, %v4252_v27  ;;  %v4548_v31 = vadd.f32 %v4509_v4, %v10000_v8  ;;  %v8039_v8 = vld [vmem:[%s10713_s3 + $0x520] sm:$0xff] }
 0x6e6   :  { %5431 = vmatpush.bf16.msra.mxu3 %v8039_v8  ;;  %v8127_v8 = vld [vmem:[#allocation3 + $0x92] sm:$0xff] }
 0x6e7   :  { %v10209_v28 = vpop.f32.mrf.mxu1  ;;  %v4703_v39 = vadd.f32 %v9993_v60, %v4548_v31 }
 0x6e9   :  { %5281 = vmatmul.bf16.vlgmr.msrb.gmra.mxu2 %v10959_v40  ;;  %4976 = vmatmul.bf16.gmra.mxu3 %v10960_v46 }
 0x6ea   :  { %5591 = vmatmul.bf16.vlgmr.msrb.gmra.mxu1 %v10935_v42 }
 0x6ec   :  { %v4817_v11 = vpop.f32.mrf.mxu2  ;;  %v4512_v15 = vpop.f32.mrf.mxu3 }
 0x6ed   :  { %v10203_v10 = vadd.f32 %v4817_v11, %v4702_v62  ;;  %v4549_v55 = vadd.f32 %v4512_v15, %v10009_v56  ;;  %v10962_v56 = vld [vmem:[#allocation52_spill] sm:$0xff] }
 0x6ef   :  { %v4704_v27 = vadd.f32 %v10002_v35, %v4549_v55  ;;  %v10219_v4 = vpop.f32.mrf.mxu1  ;;  %v10230_v35 = vld [vmem:[#allocation3 + $0xa2] sm:$0xff] }
 0x6f4   :  { %v4819_v42 = vpop.f32.mrf.mxu2  ;;  %v4514_v51 = vpop.f32.mrf.mxu3 }
 0x6f5   :  { %v10212_v38 = vadd.f32 %v4819_v42, %v4703_v39  ;;  %v4550_v21 = vadd.f32 %v4514_v51, %v10018_v26  ;;  %v8038_v26 = vld [vmem:[%s10713_s3 + $0x518] sm:$0xff]  ;;  %v10964_v42 = vld [vmem:[#allocation23_spill] sm:$0xff] }
 0x6f6   :  { %5432 = vmatpush.bf16.msra.mxu3 %v8038_v26  ;;  %v10963_v39 = vld [vmem:[#allocation72_spill] sm:$0xff]  ;;  %v10248_v26 = vld [vmem:[#allocation3 + $0xa4] sm:$0xff] }
 0x6f7   :  { %v4705_v46 = vadd.f32 %v10011_v17, %v4550_v21  ;;  %v10233_v55 = vpop.f32.mrf.mxu1 }
 0x6f9   :  { %5286 = vmatmul.bf16.gmra.mxu2 %v10961_v14  ;;  %4981 = vmatmul.bf16.gmra.mxu3 %v10962_v56 }
 0x6fa   :  { %5596 = vmatmul.bf16.gmra.mxu1 %v10937_v49 }
 0x6fc   :  { %v4822_v53 = vpop.f32.mrf.mxu2  ;;  %v4517_v60 = vpop.f32.mrf.mxu3 }
 0x6fd   :  { %v10221_v40 = vadd.f32 %v4822_v53, %v4704_v27  ;;  %v4551_v31 = vadd.f32 %v4517_v60, %v10032_v34  ;;  %v4893_v34 = vpack.c.bf16 %v10230_v35, %v8127_v8  ;;  %v10965_v8 = vld [vmem:[#allocation34_spill] sm:$0xff] }
 0x6ff   :  { %v4706_v17 = vadd.f32 %v10022_v52, %v4551_v31  ;;  %v10245_v27 = vpop.f32.mrf.mxu1 }
 0x704   :  { %v4824_v49 = vpop.f32.mrf.mxu2  ;;  %v4519_v11 = vpop.f32.mrf.mxu3 }
 0x705   :  { %v10228_v62 = vadd.f32 %v4824_v49, %v4705_v46  ;;  %v4552_v15 = vadd.f32 %v4519_v11, %v10045_v48  ;;  %v8037_v48 = vld [vmem:[%s10713_s3 + $0x510] sm:$0xff] }
 0x706   :  { %5433 = vmatpush.bf16.msra.mxu3 %v8037_v48  ;;  %v2055_v46 = vld [vmem:[#allocation3 + $0xb1] sm:$0xff] }
 0x707   :  { %v4707_v53 = vadd.f32 %v10034_v12, %v4552_v15  ;;  %v5513_v11 = vpack.c.bf16 %v2055_v46, %v10041_v58 }
 0x709   :  { %5291 = vmatmul.bf16.gmra.mxu2 %v10963_v39  ;;  %4986 = vmatmul.bf16.gmra.mxu3 %v4893_v34  ;;  %v10257_v34 = vpop.f32.mrf.mxu1 }
 0x70a   :  { %5601 = vmatmul.bf16.gmra.mxu1 %v10964_v42 }
 0x70c   :  { %v4827_v51 = vpop.f32.mrf.mxu2  ;;  %v4522_v14 = vpop.f32.mrf.mxu3 }
 0x70d   :  { %v10239_v21 = vadd.f32 %v4827_v51, %v4706_v17  ;;  %v4553_v56 = vadd.f32 %v4522_v14, %v10056_v36  ;;  %v5203_v36 = vpack.c.bf16 %v10248_v26, %v10020_v37  ;;  %v8036_v37 = vld [vmem:[%s10713_s3 + $0x508] sm:$0xff] }
 0x70e   :  { %5434 = vmatpush.bf16.msra.mxu3 %v8036_v37  ;;  %v8055_v37 = vld [vmem:[%s10713_s3 + $0x5a0] sm:$0xff] }
 0x70f   :  { %v4708_v12 = vadd.f32 %v10047_v54, %v4553_v56  ;;  %v10966_v56 = vld [vmem:[#allocation37_spill] sm:$0xff] }
 0x711   :  { %v10267_v51 = vpop.f32.mrf.mxu1 }
 0x714   :  { %v4829_v60 = vpop.f32.mrf.mxu2  ;;  %v4524_v31 = vpop.f32.mrf.mxu3 }
 0x715   :  { %v10250_v52 = vadd.f32 %v4829_v60, %v4707_v53  ;;  %v4554_v49 = vadd.f32 %v4524_v31, %v10065_v33  ;;  %v10967_v53 = vld [vmem:[#allocation47_spill] sm:$0xff] }
 0x717   :  { %v4709_v58 = vadd.f32 %v10058_v61, %v4554_v49  ;;  %v8074_v61 = vld [vmem:[%s10713_s3 + $0x638] sm:$0xff]  ;;  %v8073_v49 = vld [vmem:[%s10713_s3 + $0x630] sm:$0xff] }
 0x718   :  { %6048 = vmatpush.bf16.msra.mxu1 %v8074_v61 }
 0x719   :  { %5296 = vmatmul.bf16.gmra.mxu2 %v5203_v36  ;;  %4991 = vmatmul.bf16.gmra.mxu3 %v10965_v8  ;;  %v8056_v8 = vld [vmem:[%s10713_s3 + $0x5a8] sm:$0xff] }
 0x71a   :  { %5606 = vmatmul.bf16.gmra.mxu1 %v5513_v11  ;;  %v10294_v11 = vpop.f32.mrf.mxu1 }
 0x71c   :  { %v4832_v15 = vpop.f32.mrf.mxu2  ;;  %v4527_v42 = vpop.f32.mrf.mxu3  ;;  %6049 = vmatpush.bf16.msra.mxu1 %v8073_v49  ;;  %v8068_v49 = vld [vmem:[%s10713_s3 + $0x608] sm:$0xff] }
 0x71d   :  { %v10260_v39 = vadd.f32 %v4832_v15, %v4708_v12  ;;  %v4555_v17 = vadd.f32 %v4527_v42, %v10080_v3  ;;  %v8058_v3 = vld [vmem:[%s10713_s3 + $0x5b8] sm:$0xff]  ;;  %v8072_v12 = vld [vmem:[%s10713_s3 + $0x628] sm:$0xff] }
 0x71e   :  { %5738 = vmatpush.bf16.msra.mxu2 %v8058_v3  ;;  %v10969_v3 = vld [vmem:[#allocation22_spill] sm:$0xff] }
 0x71f   :  { %v4710_v60 = vadd.f32 %v10067_v43, %v4555_v17  ;;  %v8035_v43 = vld [vmem:[%s10713_s3 + $0x500] sm:$0xff] }
 0x720   :  { %5435 = vmatpush.bf16.msra.mxu3 %v8035_v43  ;;  %6050 = vmatpush.bf16.msra.mxu1 %v8072_v12 }
 0x724   :  { %v4834_v33 = vpop.f32.mrf.mxu2  ;;  %v4529_v48 = vpop.f32.mrf.mxu3 }
 0x725   :  { %v10269_v14 = vadd.f32 %v4834_v33, %v4709_v58  ;;  %v4556_v54 = vadd.f32 %v4529_v48, %v10101_v29  ;;  %v8071_v58 = vld [vmem:[%s10713_s3 + $0x620] sm:$0xff]  ;;  %v10312_v48 = vpop.f32.mrf.mxu1 }
 0x726   :  { %6051 = vmatpush.bf16.msra.mxu1 %v8071_v58 }
 0x727   :  { %v4711_v15 = vadd.f32 %v10088_v19, %v4556_v54  ;;  %v10968_v19 = vld [vmem:[#allocation49_spill] sm:$0xff]  ;;  %v8054_v54 = vld [vmem:[%s10713_s3 + $0x598] sm:$0xff] }
 0x729   :  { %5301 = vmatmul.bf16.gmra.mxu2 %v10966_v56  ;;  %4996 = vmatmul.bf16.gmra.mxu3 %v10967_v53  ;;  %v8070_v56 = vld [vmem:[%s10713_s3 + $0x618] sm:$0xff] }
 0x72a   :  { %5611 = vmatmul.bf16.gmra.mxu1 %v10943_v5  ;;  %v8057_v5 = vld [vmem:[%s10713_s3 + $0x5b0] sm:$0xff] }
 0x72b   :  { %5739 = vmatpush.bf16.msra.mxu2 %v8057_v5  ;;  %6052 = vmatpush.bf16.msra.mxu1 %v8070_v56  ;;  %v8052_v5 = vld [vmem:[%s10713_s3 + $0x588] sm:$0xff] }
 0x72c   :  { %v4837_v46 = vpop.f32.mrf.mxu2  ;;  %v4532_v31 = vpop.f32.mrf.mxu3 }
 0x72d   :  { %v10282_v29 = vadd.f32 %v4837_v46, %v4710_v60  ;;  %v4557_v36 = vadd.f32 %v4532_v31, %v10122_v32  ;;  %v8069_v46 = vld [vmem:[%s10713_s3 + $0x610] sm:$0xff] }
 0x72f   :  { %5740 = vmatpush.bf16.msra.mxu2 %v8056_v8  ;;  %6053 = vmatpush.bf16.msra.mxu1 %v8069_v46 }
 0x733   :  { %5741 = vmatpush.bf16.msra.mxu2 %v8055_v37  ;;  %6054 = vmatpush.bf16.msra.mxu1 %v8068_v49  ;;  %v10354_v37 = vld [vmem:[#allocation3 + $0x162] sm:$0xff] }
 0x734   :  { %v4839_v32 = vpop.f32.mrf.mxu2  ;;  %v4534_v17 = vpop.f32.mrf.mxu3 }
 0x735   :  { %v10303_v42 = vadd.f32 %v4839_v32, %v4711_v15  ;;  %v4558_v33 = vadd.f32 %v4534_v17, %v10143_v47  ;;  %v4712_v47 = vadd.f32 %v10110_v20, %v4557_v36  ;;  %v8066_v20 = vld [vmem:[%s10713_s3 + $0x5f8] sm:$0xff]  ;;  %v10342_v36 = vpop.f32.mrf.mxu1  ;;  %v8051_v15 = vld [vmem:[%s10713_s3 + $0x580] sm:$0xff] }
 0x736   :  { %5893 = vmatpush.bf16.msrb.mxu3 %v8066_v20  ;;  %v8067_v32 = vld [vmem:[%s10713_s3 + $0x600] sm:$0xff] }
 0x737   :  { %5742 = vmatpush.bf16.msra.mxu2 %v8054_v54  ;;  %v4713_v43 = vadd.f32 %v10140_v24, %v4558_v33  ;;  %6055 = vmatpush.bf16.msra.mxu1 %v8067_v32  ;;  %v8128_v24 = vld [vmem:[#allocation3 + $0x152] sm:$0xff] }
 0x738   :  { %v4897_v58 = vpack.c.bf16 %v10354_v37, %v8128_v24  ;;  %v10970_v33 = vld [vmem:[#allocation20_spill] sm:$0xff] }
 0x739   :  { %5306 = vmatmul.bf16.gmra.mxu2 %v10968_v19  ;;  %5001 = vmatmul.bf16.gmra.mxu3 %v10969_v3 }
 0x73a   :  { %5616 = vmatmul.bf16.gmra.mxu1 %v10945_v63  ;;  %v8053_v63 = vld [vmem:[%s10713_s3 + $0x590] sm:$0xff] }
 0x73b   :  { %5743 = vmatpush.bf16.msra.mxu2 %v8053_v63 }
 0x73c   :  { %v4842_v61 = vpop.f32.mrf.mxu2  ;;  %v4537_v60 = vpop.f32.mrf.mxu3 }
 0x73d   :  { %v10324_v53 = vadd.f32 %v4842_v61, %v4712_v47  ;;  %v4559_v31 = vadd.f32 %v4537_v60, %v10163_v13  ;;  %v10360_v56 = vpop.f32.mrf.mxu1  ;;  %v8065_v61 = vld [vmem:[%s10713_s3 + $0x5f0] sm:$0xff] }
 0x73e   :  { %5894 = vmatpush.bf16.msrb.mxu3 %v8065_v61 }
 0x73f   :  { %5744 = vmatpush.bf16.msra.mxu2 %v8052_v5  ;;  %v4714_v19 = vadd.f32 %v10160_v0, %v4559_v31  ;;  %v10371_v0 = vld [vmem:[#allocation3 + $0x164] sm:$0xff]  ;;  %v2067_v31 = vld [vmem:[#allocation3 + $0x171] sm:$0xff] }
 0x740   :  { %v5517_v49 = vpack.c.bf16 %v2067_v31, %v10174_v57 }
 0x743   :  { %5745 = vmatpush.bf16.msra.mxu2 %v8051_v15 }
 0x744   :  { %v4844_v13 = vpop.f32.mrf.mxu2  ;;  %v4539_v12 = vpop.f32.mrf.mxu3 }
 0x745   :  { %v10345_v8 = vadd.f32 %v4844_v13, %v4713_v43  ;;  %v4560_v17 = vadd.f32 %v4539_v12, %v10172_v25  ;;  %v10374_v5 = vpop.f32.mrf.mxu1  ;;  %v10971_v43 = vld [vmem:[#allocation12_spill] sm:$0xff] }
 0x747   :  { %v4715_v60 = vadd.f32 %v10170_v18, %v4560_v17 }
 0x749   :  { %5311 = vmatmul.bf16.gmra.mxu2 %v10970_v33  ;;  %5006 = vmatmul.bf16.gmra.mxu3 %v4897_v58  ;;  %v10972_v33 = vld [vmem:[#allocation63_spill] sm:$0xff] }
 0x74a   :  { %5621 = vmatmul.bf16.gmra.mxu1 %v9940_v16 }
 0x74c   :  { %v4847_v54 = vpop.f32.mrf.mxu2  ;;  %v4542_v25 = vpop.f32.mrf.mxu3 }
 0x74d   :  { %v10362_v3 = vadd.f32 %v4847_v54, %v4714_v19  ;;  %v4561_v47 = vadd.f32 %v4542_v25, %v10185_v45  ;;  %v5207_v45 = vpack.c.bf16 %v10371_v0, %v10145_v1  ;;  %v10387_v1 = vpop.f32.mrf.mxu1 }
 0x74f   :  { %v4716_v18 = vadd.f32 %v10191_v7, %v4561_v47 }
 0x754   :  { %v4849_v63 = vpop.f32.mrf.mxu2  ;;  %v4544_v46 = vpop.f32.mrf.mxu3 }
 0x755   :  { %v10369_v16 = vadd.f32 %v4849_v63, %v4715_v60  ;;  %v4562_v20 = vadd.f32 %v4544_v46, %v10194_v2  ;;  %v8064_v2 = vld [vmem:[%s10713_s3 + $0x5e8] sm:$0xff]  ;;  %v10396_v19 = vpop.f32.mrf.mxu1 }
 0x756   :  { %5895 = vmatpush.bf16.msrb.mxu3 %v8064_v2 }
 0x757   :  { %v4717_v57 = vadd.f32 %v10197_v22, %v4562_v20  ;;  %v10974_v20 = vld [vmem:[#allocation65_spill] sm:$0xff] }
 0x759   :  { %5316 = vmatmul.bf16.gmra.mxu2 %v5207_v45  ;;  %5436 = vmatmul.bf16.vlgmr.msra.gmra.mxu3 %v10971_v43 }
 0x75a   :  { %5626 = vmatmul.bf16.gmra.mxu1 %v5517_v49 }
 0x75c   :  { %v4852_v13 = vpop.f32.mrf.mxu2  ;;  %v4972_v15 = vpop.f32.mrf.mxu3 }
 0x75d   :  { %v10381_v12 = vadd.f32 %v4852_v13, %v4716_v18  ;;  %v5012_v32 = vadd.f32 %v4972_v15, %v10203_v10  ;;  %v10973_v10 = vld [vmem:[#allocation18_spill] sm:$0xff]  ;;  %v10406_v63 = vpop.f32.mrf.mxu1  ;;  %v8062_v13 = vld [vmem:[%s10713_s3 + $0x5d8] sm:$0xff] }
 0x75f   :  { %v5167_v54 = vadd.f32 %v10209_v28, %v5012_v32 }
 0x764   :  { %v4854_v17 = vpop.f32.mrf.mxu2  ;;  %v4974_v58 = vpop.f32.mrf.mxu3 }
 0x765   :  { %v10390_v24 = vadd.f32 %v4854_v17, %v4717_v57  ;;  %v5013_v7 = vadd.f32 %v4974_v58, %v10212_v38  ;;  %v8063_v38 = vld [vmem:[%s10713_s3 + $0x5e0] sm:$0xff]  ;;  %v10421_v15 = vpop.f32.mrf.mxu1 }
 0x766   :  { %5896 = vmatpush.bf16.msrb.mxu3 %v8063_v38  ;;  %v8129_v17 = vld [vmem:[#allocation3 + $0xa0] sm:$0xff] }
 0x767   :  { %v5168_v60 = vadd.f32 %v10219_v4, %v5013_v7 }
 0x769   :  { %5746 = vmatmul.bf16.vlgmr.msra.gmra.mxu2 %v10972_v33  ;;  %5441 = vmatmul.bf16.gmra.mxu3 %v10973_v10 }
 0x76a   :  { %6056 = vmatmul.bf16.vlgmr.msra.gmra.mxu1 %v10951_v59  ;;  %5897 = vmatpush.bf16.msrb.mxu3 %v8062_v13 }
 0x76c   :  { %v5282_v25 = vpop.f32.mrf.mxu2  ;;  %v4977_v22 = vpop.f32.mrf.mxu3 }
 0x76d   :  { %v10399_v47 = vadd.f32 %v5282_v25, %v5167_v54  ;;  %v5014_v61 = vadd.f32 %v4977_v22, %v10221_v40  ;;  %v10975_v40 = vld [vmem:[#allocation40_spill] sm:$0xff]  ;;  %v10427_v7 = vpop.f32.mrf.mxu1 }
 0x76f   :  { %v5169_v45 = vadd.f32 %v10233_v55, %v5014_v61  ;;  %v2007_v55 = vld [vmem:[#allocation3 + $0xb0] sm:$0xff] }
 0x770   :  { %v5358_v58 = vpack.c.bf16 %v2007_v55, %v8129_v17 }
 0x774   :  { %v5284_v59 = vpop.f32.mrf.mxu2  ;;  %v4979_v31 = vpop.f32.mrf.mxu3 }
 0x775   :  { %v10408_v46 = vadd.f32 %v5284_v59, %v5168_v60  ;;  %v5015_v28 = vadd.f32 %v4979_v31, %v10228_v62  ;;  %v10438_v22 = vpop.f32.mrf.mxu1  ;;  %v2202_v60 = vld [vmem:[#allocation3 + $0xb4] sm:$0xff] }
 0x777   :  { %v5170_v62 = vadd.f32 %v10245_v27, %v5015_v28 }
 0x779   :  { %5751 = vmatmul.bf16.gmra.mxu2 %v10974_v20  ;;  %5446 = vmatmul.bf16.gmra.mxu3 %v10975_v40  ;;  %v10977_v20 = vld [vmem:[#allocation38_spill] sm:$0xff] }
 0x77a   :  { %6061 = vmatmul.bf16.gmra.mxu1 %v10953_v50 }
 0x77c   :  { %v5287_v49 = vpop.f32.mrf.mxu2  ;;  %v4982_v4 = vpop.f32.mrf.mxu3 }
 0x77d   :  { %v10415_v43 = vadd.f32 %v5287_v49, %v5169_v45  ;;  %v5016_v18 = vadd.f32 %v4982_v4, %v10239_v21  ;;  %v10976_v21 = vld [vmem:[#allocation53_spill] sm:$0xff] }
 0x77f   :  { %v5171_v33 = vadd.f32 %v10257_v34, %v5016_v18 }
 0x784   :  { %v5289_v50 = vpop.f32.mrf.mxu2  ;;  %v4984_v2 = vpop.f32.mrf.mxu3 }
 0x785   :  { %v10424_v32 = vadd.f32 %v5289_v50, %v5170_v62  ;;  %v5017_v57 = vadd.f32 %v4984_v2, %v10250_v52  ;;  %v8061_v52 = vld [vmem:[%s10713_s3 + $0x5d0] sm:$0xff]  ;;  %v10978_v2 = vld [vmem:[#allocation69_spill] sm:$0xff] }
 0x786   :  { %5898 = vmatpush.bf16.msrb.mxu3 %v8061_v52 }
 0x787   :  { %v5172_v61 = vadd.f32 %v10267_v51, %v5017_v57  ;;  %v10448_v51 = vpop.f32.mrf.mxu1 }
 0x789   :  { %5756 = vmatmul.bf16.gmra.mxu2 %v10976_v21  ;;  %5451 = vmatmul.bf16.gmra.mxu3 %v5358_v58 }
 0x78a   :  { %6066 = vmatmul.bf16.gmra.mxu1 %v10026_v41  ;;  %v2104_v41 = vld [vmem:[#allocation3 + $0xb2] sm:$0xff] }
 0x78b   :  { %v5668_v28 = vpack.c.bf16 %v2104_v41, %v10230_v35  ;;  %v8060_v35 = vld [vmem:[%s10713_s3 + $0x5c8] sm:$0xff] }
 0x78c   :  { %v5292_v10 = vpop.f32.mrf.mxu2  ;;  %v4987_v54 = vpop.f32.mrf.mxu3  ;;  %5899 = vmatpush.bf16.msrb.mxu3 %v8060_v35 }
 0x78d   :  { %v10432_v27 = vadd.f32 %v5292_v10, %v5171_v33  ;;  %v5018_v25 = vadd.f32 %v4987_v54, %v10260_v39  ;;  %v5978_v39 = vpack.c.bf16 %v2202_v60, %v10248_v26 }
 0x78f   :  { %v5173_v40 = vadd.f32 %v10294_v11, %v5018_v25  ;;  %v10460_v50 = vpop.f32.mrf.mxu1  ;;  %v10980_v25 = vld [vmem:[#allocation71_spill] sm:$0xff] }
 0x794   :  { %v5294_v38 = vpop.f32.mrf.mxu2  ;;  %v4989_v34 = vpop.f32.mrf.mxu3 }
 0x795   :  { %v10441_v59 = vadd.f32 %v5294_v38, %v5172_v61  ;;  %v5019_v31 = vadd.f32 %v4989_v34, %v10269_v14 }
 0x797   :  { %v5174_v26 = vadd.f32 %v10312_v48, %v5019_v31  ;;  %v10472_v21 = vpop.f32.mrf.mxu1 }
 0x799   :  { %5761 = vmatmul.bf16.gmra.mxu2 %v5668_v28  ;;  %5456 = vmatmul.bf16.gmra.mxu3 %v10977_v20  ;;  %v2019_v20 = vld [vmem:[#allocation3 + $0x170] sm:$0xff] }
 0x79a   :  { %6071 = vmatmul.bf16.gmra.mxu1 %v5978_v39 }
 0x79c   :  { %v5297_v45 = vpop.f32.mrf.mxu2  ;;  %v4992_v4 = vpop.f32.mrf.mxu3 }
 0x79d   :  { %v10450_v49 = vadd.f32 %v5297_v45, %v5173_v40  ;;  %v5020_v18 = vadd.f32 %v4992_v4, %v10282_v29  ;;  %v10979_v29 = vld [vmem:[#allocation51_spill] sm:$0xff]  ;;  %v10982_v40 = vld [vmem:[#allocation26_spill] sm:$0xff] }
 0x79e   :  { %v5362_v45 = vpack.c.bf16 %v2019_v20, %v10982_v40 }
 0x79f   :  { %v5175_v55 = vadd.f32 %v10342_v36, %v5020_v18  ;;  %v10481_v52 = vpop.f32.mrf.mxu1 }
 0x7a4   :  { %v5299_v14 = vpop.f32.mrf.mxu2  ;;  %v4994_v62 = vpop.f32.mrf.mxu3 }
 0x7a5   :  { %v10457_v13 = vadd.f32 %v5299_v14, %v5174_v26  ;;  %v5021_v11 = vadd.f32 %v4994_v62, %v10303_v42  ;;  %v8059_v42 = vld [vmem:[%s10713_s3 + $0x5c0] sm:$0xff] }
 0x7a6   :  { %5900 = vmatpush.bf16.msrb.mxu3 %v8059_v42 }
 0x7a7   :  { %v5176_v33 = vadd.f32 %v10360_v56, %v5021_v11 }
 0x7a9   :  { %5766 = vmatmul.bf16.gmra.mxu2 %v10978_v2  ;;  %5461 = vmatmul.bf16.gmra.mxu3 %v10979_v29  ;;  %v2116_v2 = vld [vmem:[#allocation3 + $0x172] sm:$0xff] }
 0x7aa   :  { %6076 = vmatmul.bf16.gmra.mxu1 %v10957_v6  ;;  %v2214_v29 = vld [vmem:[#allocation3 + $0x174] sm:$0xff] }
 0x7ac   :  { %v5302_v57 = vpop.f32.mrf.mxu2  ;;  %v4997_v48 = vpop.f32.mrf.mxu3 }
 0x7ad   :  { %v10466_v17 = vadd.f32 %v5302_v57, %v5175_v55  ;;  %v5022_v58 = vadd.f32 %v4997_v48, %v10324_v53  ;;  %v10981_v53 = vld [vmem:[#allocation56_spill] sm:$0xff]  ;;  %v5982_v55 = vpack.c.bf16 %v2214_v29, %v10371_v0 }
 0x7af   :  { %v5177_v61 = vadd.f32 %v10374_v5, %v5022_v58  ;;  %v10983_v5 = vld [vmem:[#allocation25_spill] sm:$0xff] }
 0x7b4   :  { %v5304_v6 = vpop.f32.mrf.mxu2  ;;  %v4999_v54 = vpop.f32.mrf.mxu3 }
 0x7b5   :  { %v10475_v10 = vadd.f32 %v5304_v6, %v5176_v33  ;;  %v5023_v36 = vadd.f32 %v4999_v54, %v10345_v8  ;;  %v10488_v8 = vpop.f32.mrf.mxu1 }
 0x7b7   :  { %v5178_v34 = vadd.f32 %v10387_v1, %v5023_v36  ;;  %v10985_v36 = vld [vmem:[#allocation19_spill] sm:$0xff] }
 0x7b9   :  { %5771 = vmatmul.bf16.gmra.mxu2 %v10980_v25  ;;  %5466 = vmatmul.bf16.gmra.mxu3 %v10981_v53 }
 0x7ba   :  { %6081 = vmatmul.bf16.gmra.mxu1 %v9274_v9 }
 0x7bc   :  { %v5307_v38 = vpop.f32.mrf.mxu2  ;;  %v5002_v56 = vpop.f32.mrf.mxu3 }
 0x7bd   :  { %v10484_v41 = vadd.f32 %v5307_v38, %v5177_v61  ;;  %v5024_v60 = vadd.f32 %v5002_v56, %v10362_v3  ;;  %v10500_v26 = vpop.f32.mrf.mxu1 }
 0x7bf   :  { %v5179_v3 = vadd.f32 %v10396_v19, %v5024_v60  ;;  %v5672_v19 = vpack.c.bf16 %v2116_v2, %v10354_v37  ;;  %v10989_v2 = vld [vmem:[#allocation31_spill] sm:$0xff] }
 0x7c4   :  { %v5309_v31 = vpop.f32.mrf.mxu2  ;;  %v5004_v9 = vpop.f32.mrf.mxu3 }
 0x7c5   :  { %v10490_v28 = vadd.f32 %v5309_v31, %v5178_v34  ;;  %v5025_v39 = vadd.f32 %v5004_v9, %v10369_v16  ;;  %v10508_v57 = vpop.f32.mrf.mxu1  ;;  %v2153_v31 = vld [vmem:[#allocation3 + $0xb3] sm:$0xff] }
 0x7c6   :  { %v5823_v9 = vpack.c.bf16 %v2153_v31, %v10043_v30 }
 0x7c7   :  { %v5180_v16 = vadd.f32 %v10406_v63, %v5025_v39 }
 0x7c9   :  { %5776 = vmatmul.bf16.gmra.mxu2 %v10983_v5  ;;  %5471 = vmatmul.bf16.gmra.mxu3 %v5362_v45  ;;  %v10987_v5 = vld [vmem:[#allocation41_spill] sm:$0xff] }
 0x7ca   :  { %6086 = vmatmul.bf16.gmra.mxu1 %v10155_v23 }
 0x7cc   :  { %v5312_v4 = vpop.f32.mrf.mxu2  ;;  %v5007_v18 = vpop.f32.mrf.mxu3 }
 0x7cd   :  { %v10497_v1 = vadd.f32 %v5312_v4, %v5179_v3  ;;  %v5026_v35 = vadd.f32 %v5007_v18, %v10381_v12  ;;  %v10984_v12 = vld [vmem:[#allocation13_spill] sm:$0xff]  ;;  %v10988_v18 = vld [vmem:[#allocation55_spill] sm:$0xff] }
 0x7cf   :  { %v5181_v63 = vadd.f32 %v10421_v15, %v5026_v35  ;;  %v10521_v15 = vpop.f32.mrf.mxu1 }
 0x7d4   :  { %v5314_v14 = vpop.f32.mrf.mxu2  ;;  %v5009_v11 = vpop.f32.mrf.mxu3 }
 0x7d5   :  { %v10503_v62 = vadd.f32 %v5314_v14, %v5180_v16  ;;  %v5027_v23 = vadd.f32 %v5009_v11, %v10390_v24 }
 0x7d7   :  { %v5182_v6 = vadd.f32 %v10427_v7, %v5027_v23  ;;  %v10527_v7 = vpop.f32.mrf.mxu1 }
 0x7d9   :  { %5781 = vmatmul.bf16.gmra.mxu2 %v5672_v19  ;;  %5901 = vmatmul.bf16.vlgmr.msrb.gmra.mxu3 %v10984_v12 }
 0x7da   :  { %6091 = vmatmul.bf16.gmra.mxu1 %v5982_v55 }
 0x7dc   :  { %v5317_v48 = vpop.f32.mrf.mxu2  ;;  %v5437_v42 = vpop.f32.mrf.mxu3 }
 0x7dd   :  { %v5336_v58 = vadd.f32 %v5317_v48, %v5181_v63  ;;  %v5477_v33 = vadd.f32 %v5437_v42, %v10399_v47  ;;  %v10986_v47 = vld [vmem:[#allocation27_spill] sm:$0xff] }
 0x7df   :  { %v10532_v60 = vpop.f32.mrf.mxu1 }
 0x7e4   :  { %v5319_v24 = vpop.f32.mrf.mxu2  ;;  %v5439_v37 = vpop.f32.mrf.mxu3 }
 0x7e5   :  { %v5337_v54 = vadd.f32 %v5319_v24, %v5182_v6  ;;  %v10515_v0 = vadd.f32 %v5439_v37, %v10408_v46 }
 0x7e7   :  { %v10541_v20 = vpop.f32.mrf.mxu1 }
 0x7e9   :  { %5906 = vmatmul.bf16.gmra.mxu3 %v10985_v36 }
 0x7ec   :  { %v5442_v25 = vpop.f32.mrf.mxu3  ;;  %v5747_v29 = vpop.f32.mrf.mxu2 }
 0x7ed   :  { %v10519_v53 = vadd.f32 %v5442_v25, %v10415_v43 }
 0x7ef   :  { %v10546_v45 = vpop.f32.mrf.mxu1 }
 0x7f4   :  { %v5444_v61 = vpop.f32.mrf.mxu3  ;;  %v5749_v55 = vpop.f32.mrf.mxu2 }
 0x7f5   :  { %v10524_v38 = vadd.f32 %v5444_v61, %v10424_v32  ;;  %v5632_v61 = vadd.f32 %v10438_v22, %v5477_v33 }
 0x7f7   :  { %v10552_v30 = vpop.f32.mrf.mxu1 }
 0x7f9   :  { %5911 = vmatmul.bf16.gmra.mxu3 %v10986_v47  ;;  %v5787_v47 = vadd.f32 %v5747_v29, %v5632_v61 }
 0x7fc   :  { %v5447_v56 = vpop.f32.mrf.mxu3  ;;  %v5752_v24 = vpop.f32.mrf.mxu2 }
 0x7fd   :  { %v10530_v46 = vadd.f32 %v5447_v56, %v10432_v27 }
 0x7ff   :  { %v10558_v35 = vpop.f32.mrf.mxu1 }
 0x804   :  { %v5449_v34 = vpop.f32.mrf.mxu3 }
 0x805   :  { %v10535_v43 = vadd.f32 %v5449_v34, %v10441_v59 }
 0x809   :  { %5916 = vmatmul.bf16.gmra.mxu3 %v5823_v9 }
 0x80c   :  { %v5452_v32 = vpop.f32.mrf.mxu3 }
 0x80d   :  { %v10539_v39 = vadd.f32 %v5452_v32, %v10450_v49 }
 0x814   :  { %v5454_v40 = vpop.f32.mrf.mxu3 }
 0x815   :  { %v10544_v27 = vadd.f32 %v5454_v40, %v10457_v13 }
 0x819   :  { %5921 = vmatmul.bf16.gmra.mxu3 %v10987_v5  ;;  %v5634_v5 = vadd.f32 %v10460_v50, %v10519_v53 }
 0x81c   :  { %v5457_v3 = vpop.f32.mrf.mxu3 }
 0x81d   :  { %v10550_v59 = vadd.f32 %v5457_v3, %v10466_v17  ;;  %v10566_v17 = vpop.f32.mrf.mxu1 }
 0x824   :  { %v5459_v4 = vpop.f32.mrf.mxu3 }
 0x825   :  { %v10555_v49 = vadd.f32 %v5459_v4, %v10475_v10  ;;  %v6057_v19 = vpop.f32.mrf.mxu1 }
 0x829   :  { %5926 = vmatmul.bf16.gmra.mxu3 %v10988_v18 }
 0x82c   :  { %v5462_v13 = vpop.f32.mrf.mxu3 }
 0x82d   :  { %v10561_v16 = vadd.f32 %v5462_v13, %v10484_v41  ;;  %v2165_v41 = vld [vmem:[#allocation3 + $0x173] sm:$0xff] }
 0x82e   :  { %v5827_v48 = vpack.c.bf16 %v2165_v41, %v10176_v44  ;;  %v5633_v44 = vadd.f32 %v10448_v51, %v10515_v0 }
 0x830   :  { %v5788_v32 = vadd.f32 %v5749_v55, %v5633_v44 }
 0x834   :  { %v5464_v14 = vpop.f32.mrf.mxu3 }
 0x835   :  { %v10564_v11 = vadd.f32 %v5464_v14, %v10490_v28  ;;  %v6059_v28 = vpop.f32.mrf.mxu1  ;;  %v5789_v14 = vadd.f32 %v5752_v24, %v5634_v5 }
 0x839   :  { %5931 = vmatmul.bf16.gmra.mxu3 %v10989_v2 }
 0x83c   :  { %v5467_v23 = vpop.f32.mrf.mxu3 }
 0x83d   :  { %v10570_v10 = vadd.f32 %v5467_v23, %v10497_v1  ;;  %v6062_v37 = vpop.f32.mrf.mxu1  ;;  %v5754_v1 = vpop.f32.mrf.mxu2 }
 0x844   :  { %v5469_v12 = vpop.f32.mrf.mxu3 }
 0x845   :  { %v10573_v63 = vadd.f32 %v5469_v12, %v10503_v62  ;;  %v6064_v34 = vpop.f32.mrf.mxu1  ;;  %v5635_v12 = vadd.f32 %v10472_v21, %v10524_v38  ;;  %v5636_v21 = vadd.f32 %v10481_v52, %v10530_v46  ;;  %v5637_v52 = vadd.f32 %v10488_v8, %v10535_v43 }
 0x846   :  { %v5638_v8 = vadd.f32 %v10500_v26, %v10539_v39  ;;  %v5639_v26 = vadd.f32 %v10508_v57, %v10544_v27  ;;  %v5640_v57 = vadd.f32 %v10521_v15, %v10550_v59  ;;  %v5641_v15 = vadd.f32 %v10527_v7, %v10555_v49 }
 0x847   :  { %v5642_v7 = vadd.f32 %v10532_v60, %v10561_v16  ;;  %v5643_v60 = vadd.f32 %v10541_v20, %v10564_v11  ;;  %v5644_v20 = vadd.f32 %v10546_v45, %v10570_v10  ;;  %v5645_v45 = vadd.f32 %v10552_v30, %v10573_v63 }
 0x849   :  { %5936 = vmatmul.bf16.gmra.mxu3 %v5827_v48 }
 0x84c   :  { %v5472_v42 = vpop.f32.mrf.mxu3 }
 0x84d   :  { %v10576_v6 = vadd.f32 %v5472_v42, %v5336_v58  ;;  %v5757_v58 = vpop.f32.mrf.mxu2  ;;  %v6067_v3 = vpop.f32.mrf.mxu1 }
 0x84f   :  { %v5646_v30 = vadd.f32 %v10558_v35, %v10576_v6 }
 0x854   :  { %v5474_v36 = vpop.f32.mrf.mxu3 }
 0x855   :  { %v10578_v25 = vadd.f32 %v5474_v36, %v5337_v54  ;;  %v5759_v23 = vpop.f32.mrf.mxu2  ;;  %v6069_v42 = vpop.f32.mrf.mxu1  ;;  %v5790_v36 = vadd.f32 %v5754_v1, %v5635_v12 }
 0x857   :  { %v5647_v35 = vadd.f32 %v10566_v17, %v10578_v25 }
 0x85c   :  { %v5902_v56 = vpop.f32.mrf.mxu3 }
 0x85d   :  { %v5942_v62 = vadd.f32 %v5902_v56, %v5787_v47 }
 0x85f   :  { %v6097_v31 = vadd.f32 %v6057_v19, %v5942_v62  ;;  %v5762_v62 = vpop.f32.mrf.mxu2 }
 0x860   :  { %v5793_v12 = vadd.f32 %v5762_v62, %v5638_v8 }
 0x861   :  { %v6113_v9 = vpack.c.bf16 %v6097_v31, %v6097_v31  ;;  %v6184_v22 = vmul.f32 %v6097_v31, %v6097_v31  ;;  %v6147_v4 = vsel %vm6146_vm2, %v6097_v31, 0.0 }
 0x863   :  { %6130 = vst.msk [vmem:[%s10715_s5] sm:$0xf] %vm6129_vm1, %v6113_v9  ;;  %v6200_v2 = vsel %vm6146_vm2, %v6184_v22, 0.0 }
 0x864   :  { %v5904_v54 = vpop.f32.mrf.mxu3 }
 0x865   :  { %v5943_v40 = vadd.f32 %v5904_v54, %v5788_v32  ;;  %v5791_v32 = vadd.f32 %v5757_v58, %v5636_v21 }
 0x867   :  { %v6098_v33 = vadd.f32 %v6059_v28, %v5943_v40  ;;  %v6072_v40 = vpop.f32.mrf.mxu1 }
 0x869   :  { %v6114_v51 = vpack.c.bf16 %v6098_v33, %v6098_v33  ;;  %v6148_v0 = vsel %vm6146_vm2, %v6098_v33, 0.0  ;;  %v6185_v18 = vmul.f32 %v6098_v33, %v6098_v33 }
 0x86a   :  { %v6149_v13 = vadd.f32 %v6148_v0, %v6147_v4  ;;  %v5764_v4 = vpop.f32.mrf.mxu2 }
 0x86b   :  { %6131 = vst.msk [vmem:[%s10715_s5 + $0x4] sm:$0xf] %vm6129_vm1, %v6114_v51  ;;  %v6201_v29 = vsel %vm6146_vm2, %v6185_v18, 0.0  ;;  %v5792_v18 = vadd.f32 %v5759_v23, %v5637_v52 }
 0x86c   :  { %v6202_v50 = vadd.f32 %v6201_v29, %v6200_v2  ;;  %v5907_v53 = vpop.f32.mrf.mxu3 }
 0x86d   :  { %v5944_v19 = vadd.f32 %v5907_v53, %v5789_v14 }
 0x86f   :  { %v6099_v55 = vadd.f32 %v6062_v37, %v5944_v19  ;;  %v6074_v29 = vpop.f32.mrf.mxu1 }
 0x871   :  { %v6115_v41 = vpack.c.bf16 %v6099_v55, %v6099_v55  ;;  %v6150_v48 = vsel %vm6146_vm2, %v6099_v55, 0.0  ;;  %v6186_v28 = vmul.f32 %v6099_v55, %v6099_v55 }
 0x872   :  { %v6151_v24 = vadd.f32 %v6150_v48, %v6149_v13  ;;  %v5767_v23 = vpop.f32.mrf.mxu2 }
 0x873   :  { %6132 = vst.msk [vmem:[%s10715_s5 + $0x8] sm:$0xf] %vm6129_vm1, %v6115_v41  ;;  %v6203_v61 = vsel %vm6146_vm2, %v6186_v28, 0.0 }
 0x874   :  { %v6204_v47 = vadd.f32 %v6203_v61, %v6202_v50  ;;  %v5909_v56 = vpop.f32.mrf.mxu3 }
 0x875   :  { %v5945_v37 = vadd.f32 %v5909_v56, %v5790_v36 }
 0x877   :  { %v6100_v31 = vadd.f32 %v6064_v34, %v5945_v37  ;;  %v6077_v36 = vpop.f32.mrf.mxu1  ;;  %v5794_v37 = vadd.f32 %v5764_v4, %v5639_v26 }
 0x879   :  { %v6116_v38 = vpack.c.bf16 %v6100_v31, %v6100_v31  ;;  %v6152_v44 = vsel %vm6146_vm2, %v6100_v31, 0.0  ;;  %v6187_v9 = vmul.f32 %v6100_v31, %v6100_v31 }
 0x87a   :  { %v6153_v1 = vadd.f32 %v6152_v44, %v6151_v24  ;;  %v5769_v31 = vpop.f32.mrf.mxu2 }
 0x87b   :  { %6133 = vst.msk [vmem:[%s10715_s5 + $0xc] sm:$0xf] %vm6129_vm1, %v6116_v38  ;;  %v6205_v54 = vsel %vm6146_vm2, %v6187_v9, 0.0 }
 0x87c   :  { %v6206_v22 = vadd.f32 %v6205_v54, %v6204_v47  ;;  %v5912_v33 = vpop.f32.mrf.mxu3 }
 0x87d   :  { %v5946_v34 = vadd.f32 %v5912_v33, %v5791_v32 }
 0x87f   :  { %v6101_v5 = vadd.f32 %v6067_v3, %v5946_v34  ;;  %v6079_v54 = vpop.f32.mrf.mxu1 }
 0x881   :  { %v6117_v46 = vpack.c.bf16 %v6101_v5, %v6101_v5  ;;  %v6154_v51 = vsel %vm6146_vm2, %v6101_v5, 0.0  ;;  %v6188_v58 = vmul.f32 %v6101_v5, %v6101_v5 }
 0x882   :  { %v6155_v0 = vadd.f32 %v6154_v51, %v6153_v1  ;;  %v5772_v52 = vpop.f32.mrf.mxu2 }
 0x883   :  { %6134 = vst.msk [vmem:[%s10715_s5 + $0x10] sm:$0xf] %vm6129_vm1, %v6117_v46  ;;  %v6207_v13 = vsel %vm6146_vm2, %v6188_v58, 0.0 }
 0x884   :  { %v6208_v14 = vadd.f32 %v6207_v13, %v6206_v22  ;;  %v5914_v2 = vpop.f32.mrf.mxu3  ;;  %v5795_v22 = vadd.f32 %v5767_v23, %v5640_v57  ;;  %v5797_v23 = vadd.f32 %v5772_v52, %v5642_v7 }
 0x885   :  { %v5947_v3 = vadd.f32 %v5914_v2, %v5792_v18  ;;  %v5796_v18 = vadd.f32 %v5769_v31, %v5641_v15 }
 0x887   :  { %v6102_v50 = vadd.f32 %v6069_v42, %v5947_v3 }
 0x889   :  { %v6118_v43 = vpack.c.bf16 %v6102_v50, %v6102_v50  ;;  %v6156_v53 = vsel %vm6146_vm2, %v6102_v50, 0.0  ;;  %v6189_v19 = vmul.f32 %v6102_v50, %v6102_v50 }
 0x88a   :  { %v6157_v55 = vadd.f32 %v6156_v53, %v6155_v0  ;;  %v5774_v8 = vpop.f32.mrf.mxu2 }
 0x88b   :  { %6135 = vst.msk [vmem:[%s10715_s5 + $0x14] sm:$0xf] %vm6129_vm1, %v6118_v43  ;;  %v6209_v41 = vsel %vm6146_vm2, %v6189_v19, 0.0 }
 0x88c   :  { %v6210_v48 = vadd.f32 %v6209_v41, %v6208_v14  ;;  %v5917_v28 = vpop.f32.mrf.mxu3  ;;  %v6082_v14 = vpop.f32.mrf.mxu1 }
 0x88d   :  { %v5948_v42 = vadd.f32 %v5917_v28, %v5793_v12 }
 0x88f   :  { %v6103_v24 = vadd.f32 %v6072_v40, %v5948_v42 }
 0x891   :  { %v6119_v39 = vpack.c.bf16 %v6103_v24, %v6103_v24  ;;  %v6158_v61 = vsel %vm6146_vm2, %v6103_v24, 0.0  ;;  %v6190_v47 = vmul.f32 %v6103_v24, %v6103_v24 }
 0x892   :  { %v6159_v56 = vadd.f32 %v6158_v61, %v6157_v55  ;;  %v5777_v26 = vpop.f32.mrf.mxu2  ;;  %v5798_v61 = vadd.f32 %v5774_v8, %v5643_v60 }
 0x893   :  { %6136 = vst.msk [vmem:[%s10715_s5 + $0x18] sm:$0xf] %vm6129_vm1, %v6119_v39  ;;  %v6211_v62 = vsel %vm6146_vm2, %v6190_v47, 0.0  ;;  %v5799_v57 = vadd.f32 %v5777_v26, %v5644_v20 }
 0x894   :  { %v6212_v21 = vadd.f32 %v6211_v62, %v6210_v48  ;;  %v5919_v38 = vpop.f32.mrf.mxu3  ;;  %v6084_v28 = vpop.f32.mrf.mxu1 }
 0x895   :  { %v5949_v44 = vadd.f32 %v5919_v38, %v5794_v37 }
 0x897   :  { %v6104_v9 = vadd.f32 %v6074_v29, %v5949_v44 }
 0x899   :  { %v6120_v27 = vpack.c.bf16 %v6104_v9, %v6104_v9  ;;  %v6160_v1 = vsel %vm6146_vm2, %v6104_v9, 0.0  ;;  %v6191_v32 = vmul.f32 %v6104_v9, %v6104_v9 }
 0x89a   :  { %v6161_v40 = vadd.f32 %v6160_v1, %v6159_v56  ;;  %v5779_v1 = vpop.f32.mrf.mxu2 }
 0x89b   :  { %6137 = vst.msk [vmem:[%s10715_s5 + $0x1c] sm:$0xf] %vm6129_vm1, %v6120_v27  ;;  %v6213_v33 = vsel %vm6146_vm2, %v6191_v32, 0.0  ;;  %v5800_v52 = vadd.f32 %v5779_v1, %v5645_v45 }
 0x89c   :  { %v6214_v34 = vadd.f32 %v6213_v33, %v6212_v21  ;;  %v5922_v5 = vpop.f32.mrf.mxu3  ;;  %v6087_v21 = vpop.f32.mrf.mxu1 }
 0x89d   :  { %v5950_v4 = vadd.f32 %v5922_v5, %v5795_v22 }
 0x89f   :  { %v6105_v46 = vadd.f32 %v6077_v36, %v5950_v4 }
 0x8a1   :  { %v6121_v59 = vpack.c.bf16 %v6105_v46, %v6105_v46  ;;  %v6162_v51 = vsel %vm6146_vm2, %v6105_v46, 0.0  ;;  %v6192_v58 = vmul.f32 %v6105_v46, %v6105_v46 }
 0x8a2   :  { %v6163_v0 = vadd.f32 %v6162_v51, %v6161_v40 }
 0x8a3   :  { %6138 = vst.msk [vmem:[%s10715_s5 + $0x20] sm:$0xf] %vm6129_vm1, %v6121_v59  ;;  %v6215_v13 = vsel %vm6146_vm2, %v6192_v58, 0.0  ;;  %v5782_v58 = vpop.f32.mrf.mxu2 }
 0x8a4   :  { %v6216_v2 = vadd.f32 %v6215_v13, %v6214_v34  ;;  %v5924_v3 = vpop.f32.mrf.mxu3  ;;  %v6089_v5 = vpop.f32.mrf.mxu1 }
 0x8a5   :  { %v5951_v29 = vadd.f32 %v5924_v3, %v5796_v18 }
 0x8a7   :  { %v6106_v50 = vadd.f32 %v6079_v54, %v5951_v29 }
 0x8a9   :  { %v6122_v49 = vpack.c.bf16 %v6106_v50, %v6106_v50  ;;  %v6164_v43 = vsel %vm6146_vm2, %v6106_v50, 0.0  ;;  %v6193_v53 = vmul.f32 %v6106_v50, %v6106_v50 }
 0x8aa   :  { %v6165_v19 = vadd.f32 %v6164_v43, %v6163_v0 }
 0x8ab   :  { %6139 = vst.msk [vmem:[%s10715_s5 + $0x24] sm:$0xf] %vm6129_vm1, %v6122_v49  ;;  %v6217_v55 = vsel %vm6146_vm2, %v6193_v53, 0.0  ;;  %v5784_v43 = vpop.f32.mrf.mxu2 }
 0x8ac   :  { %v6218_v12 = vadd.f32 %v6217_v55, %v6216_v2  ;;  %v5927_v41 = vpop.f32.mrf.mxu3  ;;  %v5801_v2 = vadd.f32 %v5782_v58, %v5646_v30  ;;  %v6092_v29 = vpop.f32.mrf.mxu1  ;;  %v5802_v55 = vadd.f32 %v5784_v43, %v5647_v35 }
 0x8ad   :  { %v5952_v48 = vadd.f32 %v5927_v41, %v5797_v23 }
 0x8af   :  { %v6107_v42 = vadd.f32 %v6082_v14, %v5952_v48 }
 0x8b1   :  { %v6123_v16 = vpack.c.bf16 %v6107_v42, %v6107_v42  ;;  %v6166_v24 = vsel %vm6146_vm2, %v6107_v42, 0.0  ;;  %v6194_v36 = vmul.f32 %v6107_v42, %v6107_v42 }
 0x8b2   :  { %v6167_v39 = vadd.f32 %v6166_v24, %v6165_v19 }
 0x8b3   :  { %6140 = vst.msk [vmem:[%s10715_s5 + $0x28] sm:$0xf] %vm6129_vm1, %v6123_v16  ;;  %v6219_v47 = vsel %vm6146_vm2, %v6194_v36, 0.0 }
 0x8b4   :  { %v6220_v56 = vadd.f32 %v6219_v47, %v6218_v12  ;;  %v5929_v37 = vpop.f32.mrf.mxu3  ;;  %v6094_v42 = vpop.f32.mrf.mxu1 }
 0x8b5   :  { %v5953_v62 = vadd.f32 %v5929_v37, %v5798_v61 }
 0x8b7   :  { %v6108_v31 = vadd.f32 %v6084_v28, %v5953_v62 }
 0x8b9   :  { %v6124_v11 = vpack.c.bf16 %v6108_v31, %v6108_v31  ;;  %v6168_v38 = vsel %vm6146_vm2, %v6108_v31, 0.0  ;;  %v6195_v44 = vmul.f32 %v6108_v31, %v6108_v31 }
 0x8ba   :  { %v6169_v9 = vadd.f32 %v6168_v38, %v6167_v39 }
 0x8bb   :  { %6141 = vst.msk [vmem:[%s10715_s5 + $0x2c] sm:$0xf] %vm6129_vm1, %v6124_v11  ;;  %v6221_v27 = vsel %vm6146_vm2, %v6195_v44, 0.0 }
 0x8bc   :  { %v6222_v32 = vadd.f32 %v6221_v27, %v6220_v56  ;;  %v5932_v54 = vpop.f32.mrf.mxu3 }
 0x8bd   :  { %v5954_v40 = vadd.f32 %v5932_v54, %v5799_v57 }
 0x8bf   :  { %v6109_v22 = vadd.f32 %v6087_v21, %v5954_v40 }
 0x8c1   :  { %v6125_v10 = vpack.c.bf16 %v6109_v22, %v6109_v22  ;;  %v6170_v33 = vsel %vm6146_vm2, %v6109_v22, 0.0  ;;  %v6196_v34 = vmul.f32 %v6109_v22, %v6109_v22 }
 0x8c2   :  { %v6171_v4 = vadd.f32 %v6170_v33, %v6169_v9 }
 0x8c3   :  { %6142 = vst.msk [vmem:[%s10715_s5 + $0x30] sm:$0xf] %vm6129_vm1, %v6125_v10  ;;  %v6223_v46 = vsel %vm6146_vm2, %v6196_v34, 0.0 }
 0x8c4   :  { %v6224_v15 = vadd.f32 %v6223_v46, %v6222_v32  ;;  %v5934_v59 = vpop.f32.mrf.mxu3 }
 0x8c5   :  { %v5955_v51 = vadd.f32 %v5934_v59, %v5800_v52 }
 0x8c7   :  { %v6110_v0 = vadd.f32 %v6089_v5, %v5955_v51 }
 0x8c9   :  { %v6126_v63 = vpack.c.bf16 %v6110_v0, %v6110_v0  ;;  %v6172_v18 = vsel %vm6146_vm2, %v6110_v0, 0.0  ;;  %v6197_v13 = vmul.f32 %v6110_v0, %v6110_v0 }
 0x8ca   :  { %v6173_v14 = vadd.f32 %v6172_v18, %v6171_v4 }
 0x8cb   :  { %6143 = vst.msk [vmem:[%s10715_s5 + $0x34] sm:$0xf] %vm6129_vm1, %v6126_v63  ;;  %v6225_v3 = vsel %vm6146_vm2, %v6197_v13, 0.0 }
 0x8cc   :  { %v6226_v50 = vadd.f32 %v6225_v3, %v6224_v15  ;;  %v5937_v8 = vpop.f32.mrf.mxu3 }
 0x8cd   :  { %v5956_v7 = vadd.f32 %v5937_v8, %v5801_v2 }
 0x8cf   :  { %v6111_v49 = vadd.f32 %v6092_v29, %v5956_v7 }
 0x8d1   :  { %v6127_v6 = vpack.c.bf16 %v6111_v49, %v6111_v49  ;;  %v6174_v53 = vsel %vm6146_vm2, %v6111_v49, 0.0  ;;  %v6198_v19 = vmul.f32 %v6111_v49, %v6111_v49 }
 0x8d2   :  { %v6175_v23 = vadd.f32 %v6174_v53, %v6173_v14 }
 0x8d3   :  { %6144 = vst.msk [vmem:[%s10715_s5 + $0x38] sm:$0xf] %vm6129_vm1, %v6127_v6  ;;  %v6227_v12 = vsel %vm6146_vm2, %v6198_v19, 0.0 }
 0x8d4   :  { %v6228_v41 = vadd.f32 %v6227_v12, %v6226_v50  ;;  %v5939_v48 = vpop.f32.mrf.mxu3 }
 0x8d5   :  { %v5957_v28 = vadd.f32 %v5939_v48, %v5802_v55 }
 0x8d7   :  { %v6112_v60 = vadd.f32 %v6094_v42, %v5957_v28 }
 0x8d9   :  { %v6128_v16 = vpack.c.bf16 %v6112_v60, %v6112_v60  ;;  %v6176_v17 = vsel %vm6146_vm2, %v6112_v60, 0.0  ;;  %v6199_v25 = vmul.f32 %v6112_v60, %v6112_v60 }
 0x8da   :  { %v6177_v24 = vadd.f32 %v6176_v17, %v6175_v23 }
 0x8db   :  { %6145 = vst.msk [vmem:[%s10715_s5 + $0x3c] sm:$0xf] %vm6129_vm1, %v6128_v16  ;;  %v6229_v36 = vsel %vm6146_vm2, %v6199_v25, 0.0 }
 0x8dc   :  { %v6178_v26 = vrot.slane %v6177_v24, 4  ;;  %v6230_v39 = vadd.f32 %v6229_v36, %v6228_v41 }
 0x8de   :  { %v6179_v61 = vadd.f32 %v6178_v26, %v6177_v24  ;;  %v6231_v47 = vrot.slane %v6230_v39, 4 }
 0x8e0   :  { %v6180_v56 = vrot.slane %v6179_v61, 2  ;;  %v6232_v37 = vadd.f32 %v6231_v47, %v6230_v39 }
 0x8e2   :  { %v6181_v62 = vadd.f32 %v6180_v56, %v6179_v61  ;;  %v6233_v31 = vrot.slane %v6232_v37, 2 }
 0x8e4   :  { %v6182_v21 = vrot.slane %v6181_v62, 1  ;;  %v6234_v20 = vadd.f32 %v6233_v31, %v6232_v37 }
 0x8e6   :  { %v6235_v11 = vrot.slane %v6234_v20, 1  ;;  %v6183_v38 = vadd.f32 %v6182_v21, %v6181_v62 }
 0x8e8   :  { %v6236_v44 = vadd.f32 %v6235_v11, %v6234_v20 }
 0x8ea   :  { %v6238_v9 = vsel %vm6237_vm3, %v6183_v38, %v6236_v44 }
 0x8eb   :  { %6240 = vst.msk [vmem:[%s10716_s6] sm:$0x3] %vm6239_vm4, %v6238_v9 }

</bundles_post_ra>
